<compile_context>
chip_gen: v7x
topology: tpu7x:2x2x1
jax: 0.10.0
libtpu: 0.0.40
codegen_flags: <defaults>
</compile_context>

<pallas_src>
import functools

import jax
import jax.numpy as jnp
from jax import lax
from jax.experimental import pallas as pl
from jax.experimental.pallas import tpu as pltpu

_EPS = 0.001
_LANE = 128


def _pad_axis(a, axis, target):
    pad = target - a.shape[axis]
    if pad <= 0:
        return a
    widths = [(0, 0)] * a.ndim
    widths[axis] = (0, pad)
    return jnp.pad(a, widths)


# ----------------------------------------------------------------------------
# In-kernel helpers
# ----------------------------------------------------------------------------
def _conv_taps(read, wd, kh, kw, w_ref, mout):
    """Tap-shifted GEMM accumulation in f32.

    `read(lo, hi)` loads rows [lo, hi) of a flattened row-major (width `wd`)
    bf16 input slab.  The kw (unaligned) column shifts are hoisted and loaded
    once each; the kh row taps are then plain i*wd offsets inside that load.
    The accumulator is seeded with the first dot (no zeros + add)."""
    span = (kh - 1) * wd + mout
    acc = None
    for j in range(kw):
        xj = read(j, j + span)
        for i in range(kh):
            tap = lax.slice_in_dim(xj, i * wd, i * wd + mout, axis=0)
            d = jnp.dot(tap, w_ref[i * kw + j], preferred_element_type=jnp.float32)
            acc = d if acc is None else acc + d
    return acc


def _bn_relu(acc, s_ref, b_ref):
    """Folded inference BatchNorm + ReLU in f32."""
    return jnp.maximum(acc * s_ref[...] + b_ref[...], 0.0)


# ----------------------------------------------------------------------------
# Pallas kernels
# ----------------------------------------------------------------------------
def _head_kernel(x_ref, w1, s1, b1, w2, s2, b2, w3, s3, b3, o_ref, a1, a3,
                 *, wd, mout1, mout2, mout3, wo2):
    """Fused conv1(3x3 s2, via s2d) + conv2(3x3) + conv3(3x3 pad1)."""
    # conv1: the 3x3/s2 conv rewritten as a 2x2/s1 conv over the s2d input.
    y1 = _bn_relu(_conv_taps(lambda lo, hi: x_ref[0, lo:hi, :], wd, 2, 2, w1, mout1),
                  s1, b1)
    a1[0:mout1, :] = y1.astype(a1.dtype)

    # conv2: 3x3 over conv1's VMEM-resident flat output (stored width wd).
    y2 = _bn_relu(_conv_taps(lambda lo, hi: a1[lo:hi, :], wd, 3, 3, w2, mout2),
                  s2, b2)
    # Zero the garbage columns (>= wo2) so the single shifted copy below also
    # realises conv3's 1-pixel zero padding; the zero-initialised scratch
    # supplies the top / bottom pad rows.
    col = lax.broadcasted_iota(jnp.int32, (mout2, 1), 0) % wd
    y2 = jnp.where(col < wo2, y2, 0.0)
    a3[...] = jnp.zeros_like(a3)
    a3[wd + 1:wd + 1 + mout2, :] = y2.astype(a3.dtype)

    # conv3: 3x3 (padding=1) over the padded scratch slab.
    y3 = _bn_relu(_conv_taps(lambda lo, hi: a3[lo:hi, :], wd, 3, 3, w3, mout3),
                  s3, b3)
    o_ref[0, 0:mout3, :] = y3.astype(o_ref.dtype)


def _pool45_kernel(x_ref, w4, s4, b4, w5, s5, b5, o_ref, p4,
                   *, wd, c, mout_p, mout5):
    """Fused maxpool(3x3 s2, via s2d) + conv4(1x1) + conv5(3x3)."""
    # Max over the 9 valid (row-offset, channel-phase) taps of the s2d slab.
    # Valid outputs only ever read valid inputs, so no zero padding is needed.
    pooled = None
    for a in range(2):
        for p in range(2):
            if 2 * a + p > 2:
                continue
            for b in range(2):
                for q in range(2):
                    if 2 * b + q > 2:
                        continue
                    off = a * wd + b
                    co = (2 * p + q) * c
                    v = x_ref[0, off:off + mout_p, co:co + c]
                    pooled = v if pooled is None else jnp.maximum(pooled, v)

    # conv4 (1x1) epilogue: a single GEMM + folded BN + ReLU, kept in VMEM.
    y4 = _bn_relu(jnp.dot(pooled, w4[0], preferred_element_type=jnp.float32),
                  s4, b4)
    p4[0:mout_p, :] = y4.astype(p4.dtype)

    # conv5 (3x3) straight off the VMEM-resident conv4 output.
    y5 = _bn_relu(_conv_taps(lambda lo, hi: p4[lo:hi, :], wd, 3, 3, w5, mout5),
                  s5, b5)
    o_ref[0, 0:mout5, :] = y5.astype(o_ref.dtype)


def _tail_kernel(x_ref, w6, s6, b6, o_ref, *, wd, mout):
    """conv6 (3x3 stride 2) as a 2x2 stride-1 conv over the s2d slab."""
    y = _bn_relu(_conv_taps(lambda lo, hi: x_ref[0, lo:hi, :], wd, 2, 2, w6, mout),
                 s6, b6)
    o_ref[0, 0:mout, :] = y.astype(o_ref.dtype)


# ----------------------------------------------------------------------------
# pallas_call wrappers
# ----------------------------------------------------------------------------
def _stem_head(xs_flat, prepped, wd, ho1, ho2, wo2, ho3, h3s):
    n, m_in, c1 = xs_flat.shape
    w1, s1, b1 = prepped["conv1"]
    w2, s2, b2 = prepped["conv2"]
    w3, s3, b3 = prepped["conv3"]
    cout = w3.shape[-1]
    mout1 = ho1 * wd - 1
    mout2 = ho2 * wd - 2
    mout3 = ho3 * wd - 2
    m_out = h3s * wd

    kernel = functools.partial(_head_kernel, wd=wd, mout1=mout1, mout2=mout2,
                               mout3=mout3, wo2=wo2)
    weights = (w1, s1, b1, w2, s2, b2, w3, s3, b3)
    flops = 2 * n * (mout1 * c1 * w1.shape[0] * w1.shape[-1]
                     + mout2 * w2.shape[1] * w2.shape[0] * w2.shape[-1]
                     + mout3 * w3.shape[1] * w3.shape[0] * w3.shape[-1])
    bytes_acc = (xs_flat.size * xs_flat.dtype.itemsize
                 + sum(a.size * a.dtype.itemsize for a in weights)
                 + n * m_out * cout * 2)

    return pl.pallas_call(
        kernel,
        out_shape=jax.ShapeDtypeStruct((n, m_out, cout), jnp.bfloat16),
        grid=(n,),
        in_specs=[
            pl.BlockSpec((1, m_in, c1), lambda i: (i, 0, 0)),
            pl.BlockSpec(w1.shape, lambda i: (0, 0, 0)),
            pl.BlockSpec(s1.shape, lambda i: (0, 0)),
            pl.BlockSpec(b1.shape, lambda i: (0, 0)),
            pl.BlockSpec(w2.shape, lambda i: (0, 0, 0)),
            pl.BlockSpec(s2.shape, lambda i: (0, 0)),
            pl.BlockSpec(b2.shape, lambda i: (0, 0)),
            pl.BlockSpec(w3.shape, lambda i: (0, 0, 0)),
            pl.BlockSpec(s3.shape, lambda i: (0, 0)),
            pl.BlockSpec(b3.shape, lambda i: (0, 0)),
        ],
        out_specs=pl.BlockSpec((1, m_out, cout), lambda i: (i, 0, 0)),
        scratch_shapes=[
            pltpu.VMEM((ho1 * wd, w1.shape[-1]), jnp.bfloat16),        # conv1 out
            pltpu.VMEM(((ho2 + 2) * wd, w2.shape[-1]), jnp.bfloat16),  # conv3 padded in
        ],
        compiler_params=pltpu.CompilerParams(dimension_semantics=("parallel",)),
        cost_estimate=pl.CostEstimate(flops=int(flops), transcendentals=0,
                                      bytes_accessed=int(bytes_acc)),
    )(xs_flat, *weights)


def _pool_conv45(xs_flat, prepped, wd, hop, ho5):
    n, m_in, c4 = xs_flat.shape
    c = c4 // 4
    w4, s4, b4 = prepped["conv4"]
    w5, s5, b5 = prepped["conv5"]
    cout = w5.shape[-1]
    mout_p = hop * wd - 1
    mout5 = ho5 * wd - 2
    m_out = ho5 * wd

    kernel = functools.partial(_pool45_kernel, wd=wd, c=c,
                               mout_p=mout_p, mout5=mout5)
    weights = (w4, s4, b4, w5, s5, b5)
    flops = 2 * n * (mout_p * w4.shape[1] * w4.shape[-1]
                     + mout5 * w5.shape[1] * w5.shape[0] * w5.shape[-1])
    bytes_acc = (xs_flat.size * xs_flat.dtype.itemsize
                 + sum(a.size * a.dtype.itemsize for a in weights)
                 + n * m_out * cout * 2)

    return pl.pallas_call(
        kernel,
        out_shape=jax.ShapeDtypeStruct((n, m_out, cout), jnp.bfloat16),
        grid=(n,),
        in_specs=[
            pl.BlockSpec((1, m_in, c4), lambda i: (i, 0, 0)),
            pl.BlockSpec(w4.shape, lambda i: (0, 0, 0)),
            pl.BlockSpec(s4.shape, lambda i: (0, 0)),
            pl.BlockSpec(b4.shape, lambda i: (0, 0)),
            pl.BlockSpec(w5.shape, lambda i: (0, 0, 0)),
            pl.BlockSpec(s5.shape, lambda i: (0, 0)),
            pl.BlockSpec(b5.shape, lambda i: (0, 0)),
        ],
        out_specs=pl.BlockSpec((1, m_out, cout), lambda i: (i, 0, 0)),
        scratch_shapes=[pltpu.VMEM((hop * wd, w4.shape[-1]), jnp.bfloat16)],
        compiler_params=pltpu.CompilerParams(dimension_semantics=("parallel",)),
        cost_estimate=pl.CostEstimate(flops=int(flops), transcendentals=0,
                                      bytes_accessed=int(bytes_acc)),
    )(xs_flat, *weights)


def _stem_tail(zs_flat, prepped, wd, ho6):
    n, m_in, c6 = zs_flat.shape
    w6, s6, b6 = prepped["conv6"]
    cout = w6.shape[-1]
    mout = ho6 * wd - 1
    m_out = ho6 * wd

    kernel = functools.partial(_tail_kernel, wd=wd, mout=mout)
    flops = 2 * n * mout * w6.shape[1] * w6.shape[0] * w6.shape[-1]
    bytes_acc = (zs_flat.size * zs_flat.dtype.itemsize
                 + sum(a.size * a.dtype.itemsize for a in (w6, s6, b6))
                 + n * m_out * cout * 2)

    return pl.pallas_call(
        kernel,
        out_shape=jax.ShapeDtypeStruct((n, m_out, cout), jnp.bfloat16),
        grid=(n,),
        in_specs=[
            pl.BlockSpec((1, m_in, c6), lambda i: (i, 0, 0)),
            pl.BlockSpec(w6.shape, lambda i: (0, 0, 0)),
            pl.BlockSpec(s6.shape, lambda i: (0, 0)),
            pl.BlockSpec(b6.shape, lambda i: (0, 0)),
        ],
        out_specs=pl.BlockSpec((1, m_out, cout), lambda i: (i, 0, 0)),
        compiler_params=pltpu.CompilerParams(dimension_semantics=("parallel",)),
        cost_estimate=pl.CostEstimate(flops=int(flops), transcendentals=0,
                                      bytes_accessed=int(bytes_acc)),
    )(zs_flat, w6, s6, b6)


# ----------------------------------------------------------------------------
# Layout helpers (wrapper side)
# ----------------------------------------------------------------------------
def _space_to_depth2(x):
    """(N,H,W,C) -> (N, ceil(H/2), ceil(W/2), 4C); pads odd H/W with zeros.
    Phase order along channels is (p,q) = (0,0),(0,1),(1,0),(1,1)."""
    n, h, w, c = x.shape
    hp, wp = h + (h % 2), w + (w % 2)
    if (hp, wp) != (h, w):
        x = jnp.pad(x, ((0, 0), (0, hp - h), (0, wp - w), (0, 0)))
    phases = [x[:, p::2, q::2, :] for p in range(2) for q in range(2)]
    return jnp.concatenate(phases, axis=-1)


# ----------------------------------------------------------------------------
# Parameter init (deterministic, synthetic) + packing for the kernels
# ----------------------------------------------------------------------------
def _init_conv_block(key, cin, cout, k):
    k1, k2, k3, k4, k5 = jax.random.split(key, 5)
    fan_in = k * k * cin
    w = jax.random.normal(k1, (k, k, cin, cout), jnp.float32) / jnp.sqrt(
        jnp.float32(fan_in))
    gamma = 1.0 + 0.1 * jax.random.normal(k2, (cout,), jnp.float32)
    beta = 0.1 * jax.random.normal(k3, (cout,), jnp.float32)
    run_mean = 0.1 * jax.random.normal(k4, (cout,), jnp.float32)
    run_var = jnp.abs(jax.random.normal(k5, (cout,), jnp.float32)) + 0.5
    scale = gamma / jnp.sqrt(run_var + _EPS)          # folded BN (inference)
    bias = beta - run_mean * scale
    return w, scale, bias


def init_stem_params(key, in_channels):
    ks = jax.random.split(key, 6)
    return {
        "conv1": _init_conv_block(ks[0], in_channels, 32, 3),   # k3 s2
        "conv2": _init_conv_block(ks[1], 32, 32, 3),            # k3
        "conv3": _init_conv_block(ks[2], 32, 64, 3),            # k3 p1
        "conv4": _init_conv_block(ks[3], 64, 80, 1),            # k1
        "conv5": _init_conv_block(ks[4], 80, 192, 3),           # k3
        "conv6": _init_conv_block(ks[5], 192, 256, 3),          # k3 s2
    }


def _s2d_weight(w):
    """(3,3,Cin,Cout) stride-2 weight -> equivalent (2,2,4*Cin,Cout) stride-1
    weight over the space-to-depth input (out-of-range taps -> 0)."""
    kh, kw, cin, cout = w.shape
    out = jnp.zeros((2, 2, 4, cin, cout), w.dtype)
    for a in range(2):
        for b in range(2):
            for p in range(2):
                for q in range(2):
                    i, j = 2 * a + p, 2 * b + q
                    if i < kh and j < kw:
                        out = out.at[a, b, 2 * p + q].set(w[i, j])
    return out.reshape(2, 2, 4 * cin, cout)


def _pack(w, scale, bias, cinp=None, coutp=None):
    """Pad Cin/Cout with zeros, flatten taps, cast GEMM operands to bf16."""
    kh, kw, cin, cout = w.shape
    cinp = cinp or cin
    coutp = coutp or cout
    w = _pad_axis(_pad_axis(w, 2, cinp), 3, coutp)
    w = w.reshape(kh * kw, cinp, coutp).astype(jnp.bfloat16)
    s = _pad_axis(scale.reshape(1, cout), 1, coutp).astype(jnp.float32)
    b = _pad_axis(bias.reshape(1, cout), 1, coutp).astype(jnp.float32)
    return w, s, b


def prepare_stem_params(params):
    w1, s1, b1 = params["conv1"]
    w2, s2, b2 = params["conv2"]
    w3, s3, b3 = params["conv3"]
    w4, s4, b4 = params["conv4"]
    w5, s5, b5 = params["conv5"]
    w6, s6, b6 = params["conv6"]
    return {
        "conv1": _pack(_s2d_weight(w1), s1, b1, coutp=_LANE),    # (4, 4*cin, 128)
        "conv2": _pack(w2, s2, b2, cinp=_LANE, coutp=_LANE),     # (9, 128, 128)
        "conv3": _pack(w3, s3, b3, cinp=_LANE, coutp=_LANE),     # (9, 128, 128)
        "conv4": _pack(w4, s4, b4, cinp=_LANE, coutp=_LANE),     # (1, 128, 128)
        "conv5": _pack(w5, s5, b5, cinp=_LANE),                  # (9, 128, 192)
        "conv6": _pack(_s2d_weight(w6), s6, b6),                 # (4, 768, 256), K=768
    }


# ----------------------------------------------------------------------------
# Stem forward (public API: NCHW in, NCHW out -- matches PyTorch)
# ----------------------------------------------------------------------------
@jax.jit
def stem_forward(x_nchw, prepped):
    x = jnp.transpose(x_nchw, (0, 2, 3, 1)).astype(jnp.bfloat16)   # NCHW -> NHWC
    n = x.shape[0]

    # --- conv1 + conv2 + conv3 (kernel A) ---
    xs = _space_to_depth2(x)                                 # (n, h1, w1, 4*cin)
    _, h1, w1d, c1 = xs.shape
    ho1 = h1 - 1                                             # conv1 output height
    ho2, wo2 = ho1 - 2, (w1d - 1) - 2                        # conv2 valid extent
    ho3, wo3 = ho2, wo2                                      # conv3 (padding=1)
    h3s = ho3 + (ho3 % 2)                                    # even rows for pool s2d
    y3 = _stem_head(xs.reshape(n, h1 * w1d, c1), prepped,
                    w1d, ho1, ho2, wo2, ho3, h3s)            # (n, h3s*w1d, 128)

    # --- maxpool(3, s2) + conv4 + conv5 (kernel B) ---
    ys = _space_to_depth2(y3.reshape(n, h3s, w1d, y3.shape[-1]))
    _, h2p, w2p, c4 = ys.shape
    hop, wop = (ho3 - 3) // 2 + 1, (wo3 - 3) // 2 + 1        # pool valid extent
    ho5, wo5 = hop - 2, wop - 2                              # conv5 valid extent
    y5 = _pool_conv45(ys.reshape(n, h2p * w2p, c4), prepped, w2p, hop, ho5)

    # --- conv6 (3x3 stride 2, via s2d) (kernel C) ---
    zs = _space_to_depth2(y5.reshape(n, ho5, w2p, y5.shape[-1]))
    _, h6, w6d, c6 = zs.shape
    ho6, wo6 = (ho5 - 3) // 2 + 1, (wo5 - 3) // 2 + 1
    y6 = _stem_tail(zs.reshape(n, h6 * w6d, c6), prepped, w6d, ho6)

    out = y6.reshape(n, ho6, w6d, y6.shape[-1])[:, :, :wo6, :]
    return jnp.transpose(out, (0, 3, 1, 2)).astype(jnp.float32)    # NHWC -> NCHW


# ----------------------------------------------------------------------------
# Pure-JAX reference (silent sanity check)
# ----------------------------------------------------------------------------
def _ref_conv_block(x, params, stride, padding):
    w, scale, bias = params
    y = lax.conv_general_dilated(
        x, w, window_strides=(stride, stride),
        padding=[(padding, padding), (padding, padding)],
        dimension_numbers=("NHWC", "HWIO", "NHWC"),
        precision=lax.Precision.HIGHEST,
    )
    return jnp.maximum(y * scale + bias, 0.0)


def stem_reference(x_nchw, params):
    x = jnp.transpose(x_nchw, (0, 2, 3, 1))
    x = _ref_conv_block(x, params["conv1"], 2, 0)
    x = _ref_conv_block(x, params["conv2"], 1, 0)
    x = _ref_conv_block(x, params["conv3"], 1, 1)
    x = lax.reduce_window(x, -jnp.inf, lax.max, (1, 3, 3, 1), (1, 2, 2, 1), "VALID")
    x = _ref_conv_block(x, params["conv4"], 1, 0)
    x = _ref_conv_block(x, params["conv5"], 1, 0)
    x = _ref_conv_block(x, params["conv6"], 2, 0)
    return jnp.transpose(x, (0, 3, 1, 2))


if __name__ == "__main__":
    key = jax.random.PRNGKey(0)
    kx, kp = jax.random.split(key)

    # (2,4,32,32) -> conv1 15 -> conv2 13 -> conv3 13 -> pool 6 -> conv4 6
    #             -> conv5 4 -> conv6 1  => output (2, 256, 1, 1)
    x = jax.random.normal(kx, (2, 4, 32, 32), jnp.float32)
    params = init_stem_params(kp, in_channels=4)
    prepped = prepare_stem_params(params)

    out = jax.block_until_ready(stem_forward(x, prepped))
    assert out.shape == (2, 256, 1, 1), out.shape

    ref = jax.block_until_ready(stem_reference(x, params))
    max_err = float(jnp.max(jnp.abs(out - ref)))
    # bf16 GEMM operands with f32 accumulation across 6 chained layers.
    assert jnp.allclose(out, ref, atol=5e-2, rtol=5e-2), max_err

    print("KERNEL_OK")
</pallas_src>

<mosaic_0001>
module attributes {stable_mosaic.version = 11 : i64} {
  func.func @_head_kernel(%arg0: i32, %arg1: memref<1x256x16xbf16, #tpu.memory_space<vmem>>, %arg2: memref<4x16x128xbf16, #tpu.memory_space<vmem>>, %arg3: memref<1x128xf32, #tpu.memory_space<vmem>>, %arg4: memref<1x128xf32, #tpu.memory_space<vmem>>, %arg5: memref<9x128x128xbf16, #tpu.memory_space<vmem>>, %arg6: memref<1x128xf32, #tpu.memory_space<vmem>>, %arg7: memref<1x128xf32, #tpu.memory_space<vmem>>, %arg8: memref<9x128x128xbf16, #tpu.memory_space<vmem>>, %arg9: memref<1x128xf32, #tpu.memory_space<vmem>>, %arg10: memref<1x128xf32, #tpu.memory_space<vmem>>, %arg11: memref<1x224x128xbf16, #tpu.memory_space<vmem>>, %arg12: memref<240x128xbf16, #tpu.memory_space<vmem>>, %arg13: memref<240x128xbf16, #tpu.memory_space<vmem>>) attributes {dimension_semantics = [#tpu.dimension_semantics<parallel>], iteration_bounds = array<i64: 2>, scalar_prefetch = 0 : i64, scratch_operands = 2 : i64, tpu.core_type = #tpu.core_type<tc>, window_params = [{transform_indices = @transform_0, window_bounds = array<i64: 1, 256, 16>}, {pipeline_mode = #tpu.pipeline_mode<synchronous>, transform_indices = @transform_1, window_bounds = array<i64: 4, 16, 128>}, {pipeline_mode = #tpu.pipeline_mode<synchronous>, transform_indices = @transform_2, window_bounds = array<i64: 1, 128>}, {pipeline_mode = #tpu.pipeline_mode<synchronous>, transform_indices = @transform_3, window_bounds = array<i64: 1, 128>}, {pipeline_mode = #tpu.pipeline_mode<synchronous>, transform_indices = @transform_4, window_bounds = array<i64: 9, 128, 128>}, {pipeline_mode = #tpu.pipeline_mode<synchronous>, transform_indices = @transform_5, window_bounds = array<i64: 1, 128>}, {pipeline_mode = #tpu.pipeline_mode<synchronous>, transform_indices = @transform_6, window_bounds = array<i64: 1, 128>}, {pipeline_mode = #tpu.pipeline_mode<synchronous>, transform_indices = @transform_7, window_bounds = array<i64: 9, 128, 128>}, {pipeline_mode = #tpu.pipeline_mode<synchronous>, transform_indices = @transform_8, window_bounds = array<i64: 1, 128>}, {pipeline_mode = #tpu.pipeline_mode<synchronous>, transform_indices = @transform_9, window_bounds = array<i64: 1, 128>}, {transform_indices = @transform_10, window_bounds = array<i64: 1, 224, 128>}]} {
    %c0 = arith.constant 0 : index
    %c0_0 = arith.constant 0 : index
    %c0_1 = arith.constant 0 : index
    %0 = vector.load %arg1[%c0, %c0_0, %c0_1] : memref<1x256x16xbf16, #tpu.memory_space<vmem>>, vector<1x255x16xbf16>
    %1 = vector.shape_cast %0 : vector<1x255x16xbf16> to vector<255x16xbf16>
    %2 = vector.extract_strided_slice %1 {offsets = [0, 0], sizes = [239, 16], strides = [1, 1]} : vector<255x16xbf16> to vector<239x16xbf16>
    %c0_2 = arith.constant 0 : index
    %c0_3 = arith.constant 0 : index
    %c0_4 = arith.constant 0 : index
    %3 = vector.load %arg2[%c0_2, %c0_3, %c0_4] : memref<4x16x128xbf16, #tpu.memory_space<vmem>>, vector<1x16x128xbf16>
    %4 = vector.shape_cast %3 : vector<1x16x128xbf16> to vector<16x128xbf16>
    %cst = arith.constant dense<0.000000e+00> : vector<239x128xf32>
    %5 = tpu.matmul %2, %4, %cst {dimension_numbers = #tpu.dot_dimension_numbers<[1], [0], [0], [1], [0, 0, 1, 1], [], []>} : vector<239x16xbf16>, vector<16x128xbf16>, vector<239x128xf32> -> vector<239x128xf32>
    %6 = vector.extract_strided_slice %1 {offsets = [16, 0], sizes = [239, 16], strides = [1, 1]} : vector<255x16xbf16> to vector<239x16xbf16>
    %c2 = arith.constant 2 : index
    %c0_5 = arith.constant 0 : index
    %c0_6 = arith.constant 0 : index
    %7 = vector.load %arg2[%c2, %c0_5, %c0_6] : memref<4x16x128xbf16, #tpu.memory_space<vmem>>, vector<1x16x128xbf16>
    %8 = vector.shape_cast %7 : vector<1x16x128xbf16> to vector<16x128xbf16>
    %cst_7 = arith.constant dense<0.000000e+00> : vector<239x128xf32>
    %9 = tpu.matmul %6, %8, %cst_7 {dimension_numbers = #tpu.dot_dimension_numbers<[1], [0], [0], [1], [0, 0, 1, 1], [], []>} : vector<239x16xbf16>, vector<16x128xbf16>, vector<239x128xf32> -> vector<239x128xf32>
    %10 = arith.addf %5, %9 : vector<239x128xf32>
    %c0_8 = arith.constant 0 : index
    %c1 = arith.constant 1 : index
    %c0_9 = arith.constant 0 : index
    %11 = vector.load %arg1[%c0_8, %c1, %c0_9] : memref<1x256x16xbf16, #tpu.memory_space<vmem>>, vector<1x255x16xbf16>
    %12 = vector.shape_cast %11 : vector<1x255x16xbf16> to vector<255x16xbf16>
    %13 = vector.extract_strided_slice %12 {offsets = [0, 0], sizes = [239, 16], strides = [1, 1]} : vector<255x16xbf16> to vector<239x16xbf16>
    %c1_10 = arith.constant 1 : index
    %c0_11 = arith.constant 0 : index
    %c0_12 = arith.constant 0 : index
    %14 = vector.load %arg2[%c1_10, %c0_11, %c0_12] : memref<4x16x128xbf16, #tpu.memory_space<vmem>>, vector<1x16x128xbf16>
    %15 = vector.shape_cast %14 : vector<1x16x128xbf16> to vector<16x128xbf16>
    %cst_13 = arith.constant dense<0.000000e+00> : vector<239x128xf32>
    %16 = tpu.matmul %13, %15, %cst_13 {dimension_numbers = #tpu.dot_dimension_numbers<[1], [0], [0], [1], [0, 0, 1, 1], [], []>} : vector<239x16xbf16>, vector<16x128xbf16>, vector<239x128xf32> -> vector<239x128xf32>
    %17 = arith.addf %10, %16 : vector<239x128xf32>
    %18 = vector.extract_strided_slice %12 {offsets = [16, 0], sizes = [239, 16], strides = [1, 1]} : vector<255x16xbf16> to vector<239x16xbf16>
    %c3 = arith.constant 3 : index
    %c0_14 = arith.constant 0 : index
    %c0_15 = arith.constant 0 : index
    %19 = vector.load %arg2[%c3, %c0_14, %c0_15] : memref<4x16x128xbf16, #tpu.memory_space<vmem>>, vector<1x16x128xbf16>
    %20 = vector.shape_cast %19 : vector<1x16x128xbf16> to vector<16x128xbf16>
    %cst_16 = arith.constant dense<0.000000e+00> : vector<239x128xf32>
    %21 = tpu.matmul %18, %20, %cst_16 {dimension_numbers = #tpu.dot_dimension_numbers<[1], [0], [0], [1], [0, 0, 1, 1], [], []>} : vector<239x16xbf16>, vector<16x128xbf16>, vector<239x128xf32> -> vector<239x128xf32>
    %22 = arith.addf %17, %21 : vector<239x128xf32>
    %c0_17 = arith.constant 0 : index
    %c0_18 = arith.constant 0 : index
    %23 = vector.load %arg3[%c0_17, %c0_18] : memref<1x128xf32, #tpu.memory_space<vmem>>, vector<1x128xf32>
    %24 = vector.broadcast %23 : vector<1x128xf32> to vector<239x128xf32>
    %25 = arith.mulf %22, %24 : vector<239x128xf32>
    %c0_19 = arith.constant 0 : index
    %c0_20 = arith.constant 0 : index
    %26 = vector.load %arg4[%c0_19, %c0_20] : memref<1x128xf32, #tpu.memory_space<vmem>>, vector<1x128xf32>
    %27 = vector.broadcast %26 : vector<1x128xf32> to vector<239x128xf32>
    %28 = arith.addf %25, %27 : vector<239x128xf32>
    %cst_21 = arith.constant 0.000000e+00 : f32
    %29 = vector.broadcast %cst_21 : f32 to vector<239x128xf32>
    %30 = arith.maximumf %28, %29 : vector<239x128xf32>
    %31 = arith.truncf %30 : vector<239x128xf32> to vector<239x128xbf16>
    %c0_22 = arith.constant 0 : index
    %c0_23 = arith.constant 0 : index
    %32 = vector.load %arg12[%c0_22, %c0_23] : memref<240x128xbf16, #tpu.memory_space<vmem>>, vector<239x128xbf16>
    tpu.vector_store %arg12[%c0_22, %c0_23], %31 {strides = array<i32>} : memref<240x128xbf16, #tpu.memory_space<vmem>>, vector<239x128xbf16>,
    %c0_24 = arith.constant 0 : index
    %c0_25 = arith.constant 0 : index
    %33 = vector.load %arg12[%c0_24, %c0_25] : memref<240x128xbf16, #tpu.memory_space<vmem>>, vector<238x128xbf16>
    %34 = vector.extract_strided_slice %33 {offsets = [0, 0], sizes = [206, 128], strides = [1, 1]} : vector<238x128xbf16> to vector<206x128xbf16>
    %c0_26 = arith.constant 0 : index
    %c0_27 = arith.constant 0 : index
    %c0_28 = arith.constant 0 : index
    %35 = vector.load %arg5[%c0_26, %c0_27, %c0_28] : memref<9x128x128xbf16, #tpu.memory_space<vmem>>, vector<1x128x128xbf16>
    %36 = vector.shape_cast %35 : vector<1x128x128xbf16> to vector<128x128xbf16>
    %cst_29 = arith.constant dense<0.000000e+00> : vector<206x128xf32>
    %37 = tpu.matmul %34, %36, %cst_29 {dimension_numbers = #tpu.dot_dimension_numbers<[1], [0], [0], [1], [0, 0, 1, 1], [], []>} : vector<206x128xbf16>, vector<128x128xbf16>, vector<206x128xf32> -> vector<206x128xf32>
    %38 = vector.extract_strided_slice %33 {offsets = [16, 0], sizes = [206, 128], strides = [1, 1]} : vector<238x128xbf16> to vector<206x128xbf16>
    %c3_30 = arith.constant 3 : index
    %c0_31 = arith.constant 0 : index
    %c0_32 = arith.constant 0 : index
    %39 = vector.load %arg5[%c3_30, %c0_31, %c0_32] : memref<9x128x128xbf16, #tpu.memory_space<vmem>>, vector<1x128x128xbf16>
    %40 = vector.shape_cast %39 : vector<1x128x128xbf16> to vector<128x128xbf16>
    %cst_33 = arith.constant dense<0.000000e+00> : vector<206x128xf32>
    %41 = tpu.matmul %38, %40, %cst_33 {dimension_numbers = #tpu.dot_dimension_numbers<[1], [0], [0], [1], [0, 0, 1, 1], [], []>} : vector<206x128xbf16>, vector<128x128xbf16>, vector<206x128xf32> -> vector<206x128xf32>
    %42 = arith.addf %37, %41 : vector<206x128xf32>
    %43 = vector.extract_strided_slice %33 {offsets = [32, 0], sizes = [206, 128], strides = [1, 1]} : vector<238x128xbf16> to vector<206x128xbf16>
    %c6 = arith.constant 6 : index
    %c0_34 = arith.constant 0 : index
    %c0_35 = arith.constant 0 : index
    %44 = vector.load %arg5[%c6, %c0_34, %c0_35] : memref<9x128x128xbf16, #tpu.memory_space<vmem>>, vector<1x128x128xbf16>
    %45 = vector.shape_cast %44 : vector<1x128x128xbf16> to vector<128x128xbf16>
    %cst_36 = arith.constant dense<0.000000e+00> : vector<206x128xf32>
    %46 = tpu.matmul %43, %45, %cst_36 {dimension_numbers = #tpu.dot_dimension_numbers<[1], [0], [0], [1], [0, 0, 1, 1], [], []>} : vector<206x128xbf16>, vector<128x128xbf16>, vector<206x128xf32> -> vector<206x128xf32>
    %47 = arith.addf %42, %46 : vector<206x128xf32>
    %c1_37 = arith.constant 1 : index
    %c0_38 = arith.constant 0 : index
    %48 = vector.load %arg12[%c1_37, %c0_38] : memref<240x128xbf16, #tpu.memory_space<vmem>>, vector<238x128xbf16>
    %49 = vector.extract_strided_slice %48 {offsets = [0, 0], sizes = [206, 128], strides = [1, 1]} : vector<238x128xbf16> to vector<206x128xbf16>
    %c1_39 = arith.constant 1 : index
    %c0_40 = arith.constant 0 : index
    %c0_41 = arith.constant 0 : index
    %50 = vector.load %arg5[%c1_39, %c0_40, %c0_41] : memref<9x128x128xbf16, #tpu.memory_space<vmem>>, vector<1x128x128xbf16>
    %51 = vector.shape_cast %50 : vector<1x128x128xbf16> to vector<128x128xbf16>
    %cst_42 = arith.constant dense<0.000000e+00> : vector<206x128xf32>
    %52 = tpu.matmul %49, %51, %cst_42 {dimension_numbers = #tpu.dot_dimension_numbers<[1], [0], [0], [1], [0, 0, 1, 1], [], []>} : vector<206x128xbf16>, vector<128x128xbf16>, vector<206x128xf32> -> vector<206x128xf32>
    %53 = arith.addf %47, %52 : vector<206x128xf32>
    %54 = vector.extract_strided_slice %48 {offsets = [16, 0], sizes = [206, 128], strides = [1, 1]} : vector<238x128xbf16> to vector<206x128xbf16>
    %c4 = arith.constant 4 : index
    %c0_43 = arith.constant 0 : index
    %c0_44 = arith.constant 0 : index
    %55 = vector.load %arg5[%c4, %c0_43, %c0_44] : memref<9x128x128xbf16, #tpu.memory_space<vmem>>, vector<1x128x128xbf16>
    %56 = vector.shape_cast %55 : vector<1x128x128xbf16> to vector<128x128xbf16>
    %cst_45 = arith.constant dense<0.000000e+00> : vector<206x128xf32>
    %57 = tpu.matmul %54, %56, %cst_45 {dimension_numbers = #tpu.dot_dimension_numbers<[1], [0], [0], [1], [0, 0, 1, 1], [], []>} : vector<206x128xbf16>, vector<128x128xbf16>, vector<206x128xf32> -> vector<206x128xf32>
    %58 = arith.addf %53, %57 : vector<206x128xf32>
    %59 = vector.extract_strided_slice %48 {offsets = [32, 0], sizes = [206, 128], strides = [1, 1]} : vector<238x128xbf16> to vector<206x128xbf16>
    %c7 = arith.constant 7 : index
    %c0_46 = arith.constant 0 : index
    %c0_47 = arith.constant 0 : index
    %60 = vector.load %arg5[%c7, %c0_46, %c0_47] : memref<9x128x128xbf16, #tpu.memory_space<vmem>>, vector<1x128x128xbf16>
    %61 = vector.shape_cast %60 : vector<1x128x128xbf16> to vector<128x128xbf16>
    %cst_48 = arith.constant dense<0.000000e+00> : vector<206x128xf32>
    %62 = tpu.matmul %59, %61, %cst_48 {dimension_numbers = #tpu.dot_dimension_numbers<[1], [0], [0], [1], [0, 0, 1, 1], [], []>} : vector<206x128xbf16>, vector<128x128xbf16>, vector<206x128xf32> -> vector<206x128xf32>
    %63 = arith.addf %58, %62 : vector<206x128xf32>
    %c2_49 = arith.constant 2 : index
    %c0_50 = arith.constant 0 : index
    %64 = vector.load %arg12[%c2_49, %c0_50] : memref<240x128xbf16, #tpu.memory_space<vmem>>, vector<238x128xbf16>
    %65 = vector.extract_strided_slice %64 {offsets = [0, 0], sizes = [206, 128], strides = [1, 1]} : vector<238x128xbf16> to vector<206x128xbf16>
    %c2_51 = arith.constant 2 : index
    %c0_52 = arith.constant 0 : index
    %c0_53 = arith.constant 0 : index
    %66 = vector.load %arg5[%c2_51, %c0_52, %c0_53] : memref<9x128x128xbf16, #tpu.memory_space<vmem>>, vector<1x128x128xbf16>
    %67 = vector.shape_cast %66 : vector<1x128x128xbf16> to vector<128x128xbf16>
    %cst_54 = arith.constant dense<0.000000e+00> : vector<206x128xf32>
    %68 = tpu.matmul %65, %67, %cst_54 {dimension_numbers = #tpu.dot_dimension_numbers<[1], [0], [0], [1], [0, 0, 1, 1], [], []>} : vector<206x128xbf16>, vector<128x128xbf16>, vector<206x128xf32> -> vector<206x128xf32>
    %69 = arith.addf %63, %68 : vector<206x128xf32>
    %70 = vector.extract_strided_slice %64 {offsets = [16, 0], sizes = [206, 128], strides = [1, 1]} : vector<238x128xbf16> to vector<206x128xbf16>
    %c5 = arith.constant 5 : index
    %c0_55 = arith.constant 0 : index
    %c0_56 = arith.constant 0 : index
    %71 = vector.load %arg5[%c5, %c0_55, %c0_56] : memref<9x128x128xbf16, #tpu.memory_space<vmem>>, vector<1x128x128xbf16>
    %72 = vector.shape_cast %71 : vector<1x128x128xbf16> to vector<128x128xbf16>
    %cst_57 = arith.constant dense<0.000000e+00> : vector<206x128xf32>
    %73 = tpu.matmul %70, %72, %cst_57 {dimension_numbers = #tpu.dot_dimension_numbers<[1], [0], [0], [1], [0, 0, 1, 1], [], []>} : vector<206x128xbf16>, vector<128x128xbf16>, vector<206x128xf32> -> vector<206x128xf32>
    %74 = arith.addf %69, %73 : vector<206x128xf32>
    %75 = vector.extract_strided_slice %64 {offsets = [32, 0], sizes = [206, 128], strides = [1, 1]} : vector<238x128xbf16> to vector<206x128xbf16>
    %c8 = arith.constant 8 : index
    %c0_58 = arith.constant 0 : index
    %c0_59 = arith.constant 0 : index
    %76 = vector.load %arg5[%c8, %c0_58, %c0_59] : memref<9x128x128xbf16, #tpu.memory_space<vmem>>, vector<1x128x128xbf16>
    %77 = vector.shape_cast %76 : vector<1x128x128xbf16> to vector<128x128xbf16>
    %cst_60 = arith.constant dense<0.000000e+00> : vector<206x128xf32>
    %78 = tpu.matmul %75, %77, %cst_60 {dimension_numbers = #tpu.dot_dimension_numbers<[1], [0], [0], [1], [0, 0, 1, 1], [], []>} : vector<206x128xbf16>, vector<128x128xbf16>, vector<206x128xf32> -> vector<206x128xf32>
    %79 = arith.addf %74, %78 : vector<206x128xf32>
    %c0_61 = arith.constant 0 : index
    %c0_62 = arith.constant 0 : index
    %80 = vector.load %arg6[%c0_61, %c0_62] : memref<1x128xf32, #tpu.memory_space<vmem>>, vector<1x128xf32>
    %81 = vector.broadcast %80 : vector<1x128xf32> to vector<206x128xf32>
    %82 = arith.mulf %79, %81 : vector<206x128xf32>
    %c0_63 = arith.constant 0 : index
    %c0_64 = arith.constant 0 : index
    %83 = vector.load %arg7[%c0_63, %c0_64] : memref<1x128xf32, #tpu.memory_space<vmem>>, vector<1x128xf32>
    %84 = vector.broadcast %83 : vector<1x128xf32> to vector<206x128xf32>
    %85 = arith.addf %82, %84 : vector<206x128xf32>
    %cst_65 = arith.constant 0.000000e+00 : f32
    %86 = vector.broadcast %cst_65 : f32 to vector<206x128xf32>
    %87 = arith.maximumf %85, %86 : vector<206x128xf32>
    %88 = tpu.iota {dimensions = array<i32: 0>} : vector<206x1xi32>
    %c16_i32 = arith.constant 16 : i32
    %c0_i32 = arith.constant 0 : i32
    %89 = arith.cmpi eq, %c16_i32, %c0_i32 : i32
    %c1_i32 = arith.constant 1 : i32
    %90 = arith.select %89, %c1_i32, %c16_i32 : i32
    %91 = vector.broadcast %90 : i32 to vector<206x1xi32>
    %92 = arith.remsi %88, %91 : vector<206x1xi32>
    %c0_i32_66 = arith.constant 0 : i32
    %93 = vector.broadcast %c0_i32_66 : i32 to vector<206x1xi32>
    %94 = arith.cmpi ne, %92, %93 : vector<206x1xi32>
    %c0_i32_67 = arith.constant 0 : i32
    %95 = vector.broadcast %c0_i32_67 : i32 to vector<206x1xi32>
    %96 = arith.cmpi slt, %92, %95 : vector<206x1xi32>
    %c0_i32_68 = arith.constant 0 : i32
    %97 = arith.cmpi slt, %90, %c0_i32_68 : i32
    %98 = vector.broadcast %97 : i1 to vector<206x1xi1>
    %99 = vector.broadcast %98 : vector<206x1xi1> to vector<206x1xi1>
    %100 = arith.xori %96, %99 : vector<206x1xi1>
    %101 = arith.andi %100, %94 : vector<206x1xi1>
    %102 = vector.broadcast %90 : i32 to vector<206x1xi32>
    %103 = arith.addi %92, %102 : vector<206x1xi32>
    %104 = arith.select %101, %103, %92 : vector<206x1xi1>, vector<206x1xi32>
    %c13_i32 = arith.constant 13 : i32
    %105 = vector.broadcast %c13_i32 : i32 to vector<206x1xi32>
    %106 = arith.cmpi slt, %104, %105 : vector<206x1xi32>
    %cst_69 = arith.constant 0.000000e+00 : f32
    %107 = vector.shape_cast %106 : vector<206x1xi1> to vector<206x1xi1>
    %108 = vector.broadcast %107 : vector<206x1xi1> to vector<206x128xi1>
    %109 = vector.broadcast %cst_69 : f32 to vector<206x128xf32>
    %110 = arith.select %108, %87, %109 : vector<206x128xi1>, vector<206x128xf32>
    %cst_70 = arith.constant 0.000000e+00 : bf16
    %111 = vector.broadcast %cst_70 : bf16 to vector<240x128xbf16>
    %c0_71 = arith.constant 0 : index
    %c0_72 = arith.constant 0 : index
    %112 = vector.load %arg13[%c0_71, %c0_72] : memref<240x128xbf16, #tpu.memory_space<vmem>>, vector<240x128xbf16>
    tpu.vector_store %arg13[%c0_71, %c0_72], %111 {strides = array<i32>} : memref<240x128xbf16, #tpu.memory_space<vmem>>, vector<240x128xbf16>,
    %113 = arith.truncf %110 : vector<206x128xf32> to vector<206x128xbf16>
    %c17 = arith.constant 17 : index
    %c0_73 = arith.constant 0 : index
    %114 = vector.load %arg13[%c17, %c0_73] : memref<240x128xbf16, #tpu.memory_space<vmem>>, vector<206x128xbf16>
    tpu.vector_store %arg13[%c17, %c0_73], %113 {strides = array<i32>} : memref<240x128xbf16, #tpu.memory_space<vmem>>, vector<206x128xbf16>,
    %c0_74 = arith.constant 0 : index
    %c0_75 = arith.constant 0 : index
    %115 = vector.load %arg13[%c0_74, %c0_75] : memref<240x128xbf16, #tpu.memory_space<vmem>>, vector<238x128xbf16>
    %116 = vector.extract_strided_slice %115 {offsets = [0, 0], sizes = [206, 128], strides = [1, 1]} : vector<238x128xbf16> to vector<206x128xbf16>
    %c0_76 = arith.constant 0 : index
    %c0_77 = arith.constant 0 : index
    %c0_78 = arith.constant 0 : index
    %117 = vector.load %arg8[%c0_76, %c0_77, %c0_78] : memref<9x128x128xbf16, #tpu.memory_space<vmem>>, vector<1x128x128xbf16>
    %118 = vector.shape_cast %117 : vector<1x128x128xbf16> to vector<128x128xbf16>
    %cst_79 = arith.constant dense<0.000000e+00> : vector<206x128xf32>
    %119 = tpu.matmul %116, %118, %cst_79 {dimension_numbers = #tpu.dot_dimension_numbers<[1], [0], [0], [1], [0, 0, 1, 1], [], []>} : vector<206x128xbf16>, vector<128x128xbf16>, vector<206x128xf32> -> vector<206x128xf32>
    %120 = vector.extract_strided_slice %115 {offsets = [16, 0], sizes = [206, 128], strides = [1, 1]} : vector<238x128xbf16> to vector<206x128xbf16>
    %c3_80 = arith.constant 3 : index
    %c0_81 = arith.constant 0 : index
    %c0_82 = arith.constant 0 : index
    %121 = vector.load %arg8[%c3_80, %c0_81, %c0_82] : memref<9x128x128xbf16, #tpu.memory_space<vmem>>, vector<1x128x128xbf16>
    %122 = vector.shape_cast %121 : vector<1x128x128xbf16> to vector<128x128xbf16>
    %cst_83 = arith.constant dense<0.000000e+00> : vector<206x128xf32>
    %123 = tpu.matmul %120, %122, %cst_83 {dimension_numbers = #tpu.dot_dimension_numbers<[1], [0], [0], [1], [0, 0, 1, 1], [], []>} : vector<206x128xbf16>, vector<128x128xbf16>, vector<206x128xf32> -> vector<206x128xf32>
    %124 = arith.addf %119, %123 : vector<206x128xf32>
    %125 = vector.extract_strided_slice %115 {offsets = [32, 0], sizes = [206, 128], strides = [1, 1]} : vector<238x128xbf16> to vector<206x128xbf16>
    %c6_84 = arith.constant 6 : index
    %c0_85 = arith.constant 0 : index
    %c0_86 = arith.constant 0 : index
    %126 = vector.load %arg8[%c6_84, %c0_85, %c0_86] : memref<9x128x128xbf16, #tpu.memory_space<vmem>>, vector<1x128x128xbf16>
    %127 = vector.shape_cast %126 : vector<1x128x128xbf16> to vector<128x128xbf16>
    %cst_87 = arith.constant dense<0.000000e+00> : vector<206x128xf32>
    %128 = tpu.matmul %125, %127, %cst_87 {dimension_numbers = #tpu.dot_dimension_numbers<[1], [0], [0], [1], [0, 0, 1, 1], [], []>} : vector<206x128xbf16>, vector<128x128xbf16>, vector<206x128xf32> -> vector<206x128xf32>
    %129 = arith.addf %124, %128 : vector<206x128xf32>
    %c1_88 = arith.constant 1 : index
    %c0_89 = arith.constant 0 : index
    %130 = vector.load %arg13[%c1_88, %c0_89] : memref<240x128xbf16, #tpu.memory_space<vmem>>, vector<238x128xbf16>
    %131 = vector.extract_strided_slice %130 {offsets = [0, 0], sizes = [206, 128], strides = [1, 1]} : vector<238x128xbf16> to vector<206x128xbf16>
    %c1_90 = arith.constant 1 : index
    %c0_91 = arith.constant 0 : index
    %c0_92 = arith.constant 0 : index
    %132 = vector.load %arg8[%c1_90, %c0_91, %c0_92] : memref<9x128x128xbf16, #tpu.memory_space<vmem>>, vector<1x128x128xbf16>
    %133 = vector.shape_cast %132 : vector<1x128x128xbf16> to vector<128x128xbf16>
    %cst_93 = arith.constant dense<0.000000e+00> : vector<206x128xf32>
    %134 = tpu.matmul %131, %133, %cst_93 {dimension_numbers = #tpu.dot_dimension_numbers<[1], [0], [0], [1], [0, 0, 1, 1], [], []>} : vector<206x128xbf16>, vector<128x128xbf16>, vector<206x128xf32> -> vector<206x128xf32>
    %135 = arith.addf %129, %134 : vector<206x128xf32>
    %136 = vector.extract_strided_slice %130 {offsets = [16, 0], sizes = [206, 128], strides = [1, 1]} : vector<238x128xbf16> to vector<206x128xbf16>
    %c4_94 = arith.constant 4 : index
    %c0_95 = arith.constant 0 : index
    %c0_96 = arith.constant 0 : index
    %137 = vector.load %arg8[%c4_94, %c0_95, %c0_96] : memref<9x128x128xbf16, #tpu.memory_space<vmem>>, vector<1x128x128xbf16>
    %138 = vector.shape_cast %137 : vector<1x128x128xbf16> to vector<128x128xbf16>
    %cst_97 = arith.constant dense<0.000000e+00> : vector<206x128xf32>
    %139 = tpu.matmul %136, %138, %cst_97 {dimension_numbers = #tpu.dot_dimension_numbers<[1], [0], [0], [1], [0, 0, 1, 1], [], []>} : vector<206x128xbf16>, vector<128x128xbf16>, vector<206x128xf32> -> vector<206x128xf32>
    %140 = arith.addf %135, %139 : vector<206x128xf32>
    %141 = vector.extract_strided_slice %130 {offsets = [32, 0], sizes = [206, 128], strides = [1, 1]} : vector<238x128xbf16> to vector<206x128xbf16>
    %c7_98 = arith.constant 7 : index
    %c0_99 = arith.constant 0 : index
    %c0_100 = arith.constant 0 : index
    %142 = vector.load %arg8[%c7_98, %c0_99, %c0_100] : memref<9x128x128xbf16, #tpu.memory_space<vmem>>, vector<1x128x128xbf16>
    %143 = vector.shape_cast %142 : vector<1x128x128xbf16> to vector<128x128xbf16>
    %cst_101 = arith.constant dense<0.000000e+00> : vector<206x128xf32>
    %144 = tpu.matmul %141, %143, %cst_101 {dimension_numbers = #tpu.dot_dimension_numbers<[1], [0], [0], [1], [0, 0, 1, 1], [], []>} : vector<206x128xbf16>, vector<128x128xbf16>, vector<206x128xf32> -> vector<206x128xf32>
    %145 = arith.addf %140, %144 : vector<206x128xf32>
    %c2_102 = arith.constant 2 : index
    %c0_103 = arith.constant 0 : index
    %146 = vector.load %arg13[%c2_102, %c0_103] : memref<240x128xbf16, #tpu.memory_space<vmem>>, vector<238x128xbf16>
    %147 = vector.extract_strided_slice %146 {offsets = [0, 0], sizes = [206, 128], strides = [1, 1]} : vector<238x128xbf16> to vector<206x128xbf16>
    %c2_104 = arith.constant 2 : index
    %c0_105 = arith.constant 0 : index
    %c0_106 = arith.constant 0 : index
    %148 = vector.load %arg8[%c2_104, %c0_105, %c0_106] : memref<9x128x128xbf16, #tpu.memory_space<vmem>>, vector<1x128x128xbf16>
    %149 = vector.shape_cast %148 : vector<1x128x128xbf16> to vector<128x128xbf16>
    %cst_107 = arith.constant dense<0.000000e+00> : vector<206x128xf32>
    %150 = tpu.matmul %147, %149, %cst_107 {dimension_numbers = #tpu.dot_dimension_numbers<[1], [0], [0], [1], [0, 0, 1, 1], [], []>} : vector<206x128xbf16>, vector<128x128xbf16>, vector<206x128xf32> -> vector<206x128xf32>
    %151 = arith.addf %145, %150 : vector<206x128xf32>
    %152 = vector.extract_strided_slice %146 {offsets = [16, 0], sizes = [206, 128], strides = [1, 1]} : vector<238x128xbf16> to vector<206x128xbf16>
    %c5_108 = arith.constant 5 : index
    %c0_109 = arith.constant 0 : index
    %c0_110 = arith.constant 0 : index
    %153 = vector.load %arg8[%c5_108, %c0_109, %c0_110] : memref<9x128x128xbf16, #tpu.memory_space<vmem>>, vector<1x128x128xbf16>
    %154 = vector.shape_cast %153 : vector<1x128x128xbf16> to vector<128x128xbf16>
    %cst_111 = arith.constant dense<0.000000e+00> : vector<206x128xf32>
    %155 = tpu.matmul %152, %154, %cst_111 {dimension_numbers = #tpu.dot_dimension_numbers<[1], [0], [0], [1], [0, 0, 1, 1], [], []>} : vector<206x128xbf16>, vector<128x128xbf16>, vector<206x128xf32> -> vector<206x128xf32>
    %156 = arith.addf %151, %155 : vector<206x128xf32>
    %157 = vector.extract_strided_slice %146 {offsets = [32, 0], sizes = [206, 128], strides = [1, 1]} : vector<238x128xbf16> to vector<206x128xbf16>
    %c8_112 = arith.constant 8 : index
    %c0_113 = arith.constant 0 : index
    %c0_114 = arith.constant 0 : index
    %158 = vector.load %arg8[%c8_112, %c0_113, %c0_114] : memref<9x128x128xbf16, #tpu.memory_space<vmem>>, vector<1x128x128xbf16>
    %159 = vector.shape_cast %158 : vector<1x128x128xbf16> to vector<128x128xbf16>
    %cst_115 = arith.constant dense<0.000000e+00> : vector<206x128xf32>
    %160 = tpu.matmul %157, %159, %cst_115 {dimension_numbers = #tpu.dot_dimension_numbers<[1], [0], [0], [1], [0, 0, 1, 1], [], []>} : vector<206x128xbf16>, vector<128x128xbf16>, vector<206x128xf32> -> vector<206x128xf32>
    %161 = arith.addf %156, %160 : vector<206x128xf32>
    %c0_116 = arith.constant 0 : index
    %c0_117 = arith.constant 0 : index
    %162 = vector.load %arg9[%c0_116, %c0_117] : memref<1x128xf32, #tpu.memory_space<vmem>>, vector<1x128xf32>
    %163 = vector.broadcast %162 : vector<1x128xf32> to vector<206x128xf32>
    %164 = arith.mulf %161, %163 : vector<206x128xf32>
    %c0_118 = arith.constant 0 : index
    %c0_119 = arith.constant 0 : index
    %165 = vector.load %arg10[%c0_118, %c0_119] : memref<1x128xf32, #tpu.memory_space<vmem>>, vector<1x128xf32>
    %166 = vector.broadcast %165 : vector<1x128xf32> to vector<206x128xf32>
    %167 = arith.addf %164, %166 : vector<206x128xf32>
    %cst_120 = arith.constant 0.000000e+00 : f32
    %168 = vector.broadcast %cst_120 : f32 to vector<206x128xf32>
    %169 = arith.maximumf %167, %168 : vector<206x128xf32>
    %170 = arith.truncf %169 : vector<206x128xf32> to vector<206x128xbf16>
    %c0_121 = arith.constant 0 : index
    %c0_122 = arith.constant 0 : index
    %c0_123 = arith.constant 0 : index
    %171 = vector.load %arg11[%c0_121, %c0_122, %c0_123] : memref<1x224x128xbf16, #tpu.memory_space<vmem>>, vector<1x206x128xbf16>
    %172 = vector.shape_cast %171 : vector<1x206x128xbf16> to vector<206x128xbf16>
    %173 = vector.shape_cast %170 : vector<206x128xbf16> to vector<1x206x128xbf16>
    tpu.vector_store %arg11[%c0_121, %c0_122, %c0_123], %173 {strides = array<i32>} : memref<1x224x128xbf16, #tpu.memory_space<vmem>>, vector<1x206x128xbf16>,
    return
  }
  func.func @transform_0(%arg0: i32) -> (i32, i32, i32) {
    %c0_i32 = arith.constant 0 : i32
    %c0_i32_0 = arith.constant 0 : i32
    %c0_i32_1 = arith.constant 0 : i32
    return %arg0, %c0_i32, %c0_i32_0 : i32, i32, i32
  }
  func.func @transform_1(%arg0: i32) -> (i32, i32, i32) {
    %c0_i32 = arith.constant 0 : i32
    %c0_i32_0 = arith.constant 0 : i32
    %c0_i32_1 = arith.constant 0 : i32
    %c0_i32_2 = arith.constant 0 : i32
    return %c0_i32, %c0_i32_0, %c0_i32_1 : i32, i32, i32
  }
  func.func @transform_2(%arg0: i32) -> (i32, i32) {
    %c0_i32 = arith.constant 0 : i32
    %c0_i32_0 = arith.constant 0 : i32
    %c0_i32_1 = arith.constant 0 : i32
    return %c0_i32, %c0_i32_0 : i32, i32
  }
  func.func @transform_3(%arg0: i32) -> (i32, i32) {
    %c0_i32 = arith.constant 0 : i32
    %c0_i32_0 = arith.constant 0 : i32
    %c0_i32_1 = arith.constant 0 : i32
    return %c0_i32, %c0_i32_0 : i32, i32
  }
  func.func @transform_4(%arg0: i32) -> (i32, i32, i32) {
    %c0_i32 = arith.constant 0 : i32
    %c0_i32_0 = arith.constant 0 : i32
    %c0_i32_1 = arith.constant 0 : i32
    %c0_i32_2 = arith.constant 0 : i32
    return %c0_i32, %c0_i32_0, %c0_i32_1 : i32, i32, i32
  }
  func.func @transform_5(%arg0: i32) -> (i32, i32) {
    %c0_i32 = arith.constant 0 : i32
    %c0_i32_0 = arith.constant 0 : i32
    %c0_i32_1 = arith.constant 0 : i32
    return %c0_i32, %c0_i32_0 : i32, i32
  }
  func.func @transform_6(%arg0: i32) -> (i32, i32) {
    %c0_i32 = arith.constant 0 : i32
    %c0_i32_0 = arith.constant 0 : i32
    %c0_i32_1 = arith.constant 0 : i32
    return %c0_i32, %c0_i32_0 : i32, i32
  }
  func.func @transform_7(%arg0: i32) -> (i32, i32, i32) {
    %c0_i32 = arith.constant 0 : i32
    %c0_i32_0 = arith.constant 0 : i32
    %c0_i32_1 = arith.constant 0 : i32
    %c0_i32_2 = arith.constant 0 : i32
    return %c0_i32, %c0_i32_0, %c0_i32_1 : i32, i32, i32
  }
  func.func @transform_8(%arg0: i32) -> (i32, i32) {
    %c0_i32 = arith.constant 0 : i32
    %c0_i32_0 = arith.constant 0 : i32
    %c0_i32_1 = arith.constant 0 : i32
    return %c0_i32, %c0_i32_0 : i32, i32
  }
  func.func @transform_9(%arg0: i32) -> (i32, i32) {
    %c0_i32 = arith.constant 0 : i32
    %c0_i32_0 = arith.constant 0 : i32
    %c0_i32_1 = arith.constant 0 : i32
    return %c0_i32, %c0_i32_0 : i32, i32
  }
  func.func @transform_10(%arg0: i32) -> (i32, i32, i32) {
    %c0_i32 = arith.constant 0 : i32
    %c0_i32_0 = arith.constant 0 : i32
    %c0_i32_1 = arith.constant 0 : i32
    return %arg0, %c0_i32, %c0_i32_0 : i32, i32, i32
  }
}

module attributes {stable_mosaic.version = 11 : i64} {
  func.func @_pool45_kernel(%arg0: i32, %arg1: memref<1x56x512xbf16, #tpu.memory_space<vmem>>, %arg2: memref<1x128x128xbf16, #tpu.memory_space<vmem>>, %arg3: memref<1x128xf32, #tpu.memory_space<vmem>>, %arg4: memref<1x128xf32, #tpu.memory_space<vmem>>, %arg5: memref<9x128x192xbf16, #tpu.memory_space<vmem>>, %arg6: memref<1x192xf32, #tpu.memory_space<vmem>>, %arg7: memref<1x192xf32, #tpu.memory_space<vmem>>, %arg8: memref<1x32x192xbf16, #tpu.memory_space<vmem>>, %arg9: memref<48x128xbf16, #tpu.memory_space<vmem>>) attributes {dimension_semantics = [#tpu.dimension_semantics<parallel>], iteration_bounds = array<i64: 2>, scalar_prefetch = 0 : i64, scratch_operands = 1 : i64, tpu.core_type = #tpu.core_type<tc>, window_params = [{transform_indices = @transform_0, window_bounds = array<i64: 1, 56, 512>}, {pipeline_mode = #tpu.pipeline_mode<synchronous>, transform_indices = @transform_1, window_bounds = array<i64: 1, 128, 128>}, {pipeline_mode = #tpu.pipeline_mode<synchronous>, transform_indices = @transform_2, window_bounds = array<i64: 1, 128>}, {pipeline_mode = #tpu.pipeline_mode<synchronous>, transform_indices = @transform_3, window_bounds = array<i64: 1, 128>}, {pipeline_mode = #tpu.pipeline_mode<synchronous>, transform_indices = @transform_4, window_bounds = array<i64: 9, 128, 192>}, {pipeline_mode = #tpu.pipeline_mode<synchronous>, transform_indices = @transform_5, window_bounds = array<i64: 1, 192>}, {pipeline_mode = #tpu.pipeline_mode<synchronous>, transform_indices = @transform_6, window_bounds = array<i64: 1, 192>}, {transform_indices = @transform_7, window_bounds = array<i64: 1, 32, 192>}]} {
    %c0 = arith.constant 0 : index
    %c0_0 = arith.constant 0 : index
    %c0_1 = arith.constant 0 : index
    %0 = vector.load %arg1[%c0, %c0_0, %c0_1] : memref<1x56x512xbf16, #tpu.memory_space<vmem>>, vector<1x47x128xbf16>
    %1 = vector.shape_cast %0 : vector<1x47x128xbf16> to vector<47x128xbf16>
    %c0_2 = arith.constant 0 : index
    %c0_3 = arith.constant 0 : index
    %c128 = arith.constant 128 : index
    %2 = vector.load %arg1[%c0_2, %c0_3, %c128] : memref<1x56x512xbf16, #tpu.memory_space<vmem>>, vector<1x47x128xbf16>
    %3 = vector.shape_cast %2 : vector<1x47x128xbf16> to vector<47x128xbf16>
    %4 = arith.maximumf %1, %3 : vector<47x128xbf16>
    %c0_4 = arith.constant 0 : index
    %c1 = arith.constant 1 : index
    %c0_5 = arith.constant 0 : index
    %5 = vector.load %arg1[%c0_4, %c1, %c0_5] : memref<1x56x512xbf16, #tpu.memory_space<vmem>>, vector<1x47x128xbf16>
    %6 = vector.shape_cast %5 : vector<1x47x128xbf16> to vector<47x128xbf16>
    %7 = arith.maximumf %4, %6 : vector<47x128xbf16>
    %c0_6 = arith.constant 0 : index
    %c0_7 = arith.constant 0 : index
    %c256 = arith.constant 256 : index
    %8 = vector.load %arg1[%c0_6, %c0_7, %c256] : memref<1x56x512xbf16, #tpu.memory_space<vmem>>, vector<1x47x128xbf16>
    %9 = vector.shape_cast %8 : vector<1x47x128xbf16> to vector<47x128xbf16>
    %10 = arith.maximumf %7, %9 : vector<47x128xbf16>
    %c0_8 = arith.constant 0 : index
    %c0_9 = arith.constant 0 : index
    %c384 = arith.constant 384 : index
    %11 = vector.load %arg1[%c0_8, %c0_9, %c384] : memref<1x56x512xbf16, #tpu.memory_space<vmem>>, vector<1x47x128xbf16>
    %12 = vector.shape_cast %11 : vector<1x47x128xbf16> to vector<47x128xbf16>
    %13 = arith.maximumf %10, %12 : vector<47x128xbf16>
    %c0_10 = arith.constant 0 : index
    %c1_11 = arith.constant 1 : index
    %c256_12 = arith.constant 256 : index
    %14 = vector.load %arg1[%c0_10, %c1_11, %c256_12] : memref<1x56x512xbf16, #tpu.memory_space<vmem>>, vector<1x47x128xbf16>
    %15 = vector.shape_cast %14 : vector<1x47x128xbf16> to vector<47x128xbf16>
    %16 = arith.maximumf %13, %15 : vector<47x128xbf16>
    %c0_13 = arith.constant 0 : index
    %c8 = arith.constant 8 : index
    %c0_14 = arith.constant 0 : index
    %17 = vector.load %arg1[%c0_13, %c8, %c0_14] : memref<1x56x512xbf16, #tpu.memory_space<vmem>>, vector<1x47x128xbf16>
    %18 = vector.shape_cast %17 : vector<1x47x128xbf16> to vector<47x128xbf16>
    %19 = arith.maximumf %16, %18 : vector<47x128xbf16>
    %c0_15 = arith.constant 0 : index
    %c8_16 = arith.constant 8 : index
    %c128_17 = arith.constant 128 : index
    %20 = vector.load %arg1[%c0_15, %c8_16, %c128_17] : memref<1x56x512xbf16, #tpu.memory_space<vmem>>, vector<1x47x128xbf16>
    %21 = vector.shape_cast %20 : vector<1x47x128xbf16> to vector<47x128xbf16>
    %22 = arith.maximumf %19, %21 : vector<47x128xbf16>
    %c0_18 = arith.constant 0 : index
    %c9 = arith.constant 9 : index
    %c0_19 = arith.constant 0 : index
    %23 = vector.load %arg1[%c0_18, %c9, %c0_19] : memref<1x56x512xbf16, #tpu.memory_space<vmem>>, vector<1x47x128xbf16>
    %24 = vector.shape_cast %23 : vector<1x47x128xbf16> to vector<47x128xbf16>
    %25 = arith.maximumf %22, %24 : vector<47x128xbf16>
    %c0_20 = arith.constant 0 : index
    %c0_21 = arith.constant 0 : index
    %c0_22 = arith.constant 0 : index
    %26 = vector.load %arg2[%c0_20, %c0_21, %c0_22] : memref<1x128x128xbf16, #tpu.memory_space<vmem>>, vector<1x128x128xbf16>
    %27 = vector.shape_cast %26 : vector<1x128x128xbf16> to vector<128x128xbf16>
    %cst = arith.constant dense<0.000000e+00> : vector<47x128xf32>
    %28 = tpu.matmul %25, %27, %cst {dimension_numbers = #tpu.dot_dimension_numbers<[1], [0], [0], [1], [0, 0, 1, 1], [], []>} : vector<47x128xbf16>, vector<128x128xbf16>, vector<47x128xf32> -> vector<47x128xf32>
    %c0_23 = arith.constant 0 : index
    %c0_24 = arith.constant 0 : index
    %29 = vector.load %arg3[%c0_23, %c0_24] : memref<1x128xf32, #tpu.memory_space<vmem>>, vector<1x128xf32>
    %30 = vector.broadcast %29 : vector<1x128xf32> to vector<47x128xf32>
    %31 = arith.mulf %28, %30 : vector<47x128xf32>
    %c0_25 = arith.constant 0 : index
    %c0_26 = arith.constant 0 : index
    %32 = vector.load %arg4[%c0_25, %c0_26] : memref<1x128xf32, #tpu.memory_space<vmem>>, vector<1x128xf32>
    %33 = vector.broadcast %32 : vector<1x128xf32> to vector<47x128xf32>
    %34 = arith.addf %31, %33 : vector<47x128xf32>
    %cst_27 = arith.constant 0.000000e+00 : f32
    %35 = vector.broadcast %cst_27 : f32 to vector<47x128xf32>
    %36 = arith.maximumf %34, %35 : vector<47x128xf32>
    %37 = arith.truncf %36 : vector<47x128xf32> to vector<47x128xbf16>
    %c0_28 = arith.constant 0 : index
    %c0_29 = arith.constant 0 : index
    %38 = vector.load %arg9[%c0_28, %c0_29] : memref<48x128xbf16, #tpu.memory_space<vmem>>, vector<47x128xbf16>
    tpu.vector_store %arg9[%c0_28, %c0_29], %37 {strides = array<i32>} : memref<48x128xbf16, #tpu.memory_space<vmem>>, vector<47x128xbf16>,
    %c0_30 = arith.constant 0 : index
    %c0_31 = arith.constant 0 : index
    %39 = vector.load %arg9[%c0_30, %c0_31] : memref<48x128xbf16, #tpu.memory_space<vmem>>, vector<46x128xbf16>
    %40 = vector.extract_strided_slice %39 {offsets = [0, 0], sizes = [30, 128], strides = [1, 1]} : vector<46x128xbf16> to vector<30x128xbf16>
    %c0_32 = arith.constant 0 : index
    %c0_33 = arith.constant 0 : index
    %c0_34 = arith.constant 0 : index
    %41 = vector.load %arg5[%c0_32, %c0_33, %c0_34] : memref<9x128x192xbf16, #tpu.memory_space<vmem>>, vector<1x128x192xbf16>
    %42 = vector.shape_cast %41 : vector<1x128x192xbf16> to vector<128x192xbf16>
    %cst_35 = arith.constant dense<0.000000e+00> : vector<30x192xf32>
    %43 = tpu.matmul %40, %42, %cst_35 {dimension_numbers = #tpu.dot_dimension_numbers<[1], [0], [0], [1], [0, 0, 1, 1], [], []>} : vector<30x128xbf16>, vector<128x192xbf16>, vector<30x192xf32> -> vector<30x192xf32>
    %44 = vector.extract_strided_slice %39 {offsets = [8, 0], sizes = [30, 128], strides = [1, 1]} : vector<46x128xbf16> to vector<30x128xbf16>
    %c3 = arith.constant 3 : index
    %c0_36 = arith.constant 0 : index
    %c0_37 = arith.constant 0 : index
    %45 = vector.load %arg5[%c3, %c0_36, %c0_37] : memref<9x128x192xbf16, #tpu.memory_space<vmem>>, vector<1x128x192xbf16>
    %46 = vector.shape_cast %45 : vector<1x128x192xbf16> to vector<128x192xbf16>
    %cst_38 = arith.constant dense<0.000000e+00> : vector<30x192xf32>
    %47 = tpu.matmul %44, %46, %cst_38 {dimension_numbers = #tpu.dot_dimension_numbers<[1], [0], [0], [1], [0, 0, 1, 1], [], []>} : vector<30x128xbf16>, vector<128x192xbf16>, vector<30x192xf32> -> vector<30x192xf32>
    %48 = arith.addf %43, %47 : vector<30x192xf32>
    %49 = vector.extract_strided_slice %39 {offsets = [16, 0], sizes = [30, 128], strides = [1, 1]} : vector<46x128xbf16> to vector<30x128xbf16>
    %c6 = arith.constant 6 : index
    %c0_39 = arith.constant 0 : index
    %c0_40 = arith.constant 0 : index
    %50 = vector.load %arg5[%c6, %c0_39, %c0_40] : memref<9x128x192xbf16, #tpu.memory_space<vmem>>, vector<1x128x192xbf16>
    %51 = vector.shape_cast %50 : vector<1x128x192xbf16> to vector<128x192xbf16>
    %cst_41 = arith.constant dense<0.000000e+00> : vector<30x192xf32>
    %52 = tpu.matmul %49, %51, %cst_41 {dimension_numbers = #tpu.dot_dimension_numbers<[1], [0], [0], [1], [0, 0, 1, 1], [], []>} : vector<30x128xbf16>, vector<128x192xbf16>, vector<30x192xf32> -> vector<30x192xf32>
    %53 = arith.addf %48, %52 : vector<30x192xf32>
    %c1_42 = arith.constant 1 : index
    %c0_43 = arith.constant 0 : index
    %54 = vector.load %arg9[%c1_42, %c0_43] : memref<48x128xbf16, #tpu.memory_space<vmem>>, vector<46x128xbf16>
    %55 = vector.extract_strided_slice %54 {offsets = [0, 0], sizes = [30, 128], strides = [1, 1]} : vector<46x128xbf16> to vector<30x128xbf16>
    %c1_44 = arith.constant 1 : index
    %c0_45 = arith.constant 0 : index
    %c0_46 = arith.constant 0 : index
    %56 = vector.load %arg5[%c1_44, %c0_45, %c0_46] : memref<9x128x192xbf16, #tpu.memory_space<vmem>>, vector<1x128x192xbf16>
    %57 = vector.shape_cast %56 : vector<1x128x192xbf16> to vector<128x192xbf16>
    %cst_47 = arith.constant dense<0.000000e+00> : vector<30x192xf32>
    %58 = tpu.matmul %55, %57, %cst_47 {dimension_numbers = #tpu.dot_dimension_numbers<[1], [0], [0], [1], [0, 0, 1, 1], [], []>} : vector<30x128xbf16>, vector<128x192xbf16>, vector<30x192xf32> -> vector<30x192xf32>
    %59 = arith.addf %53, %58 : vector<30x192xf32>
    %60 = vector.extract_strided_slice %54 {offsets = [8, 0], sizes = [30, 128], strides = [1, 1]} : vector<46x128xbf16> to vector<30x128xbf16>
    %c4 = arith.constant 4 : index
    %c0_48 = arith.constant 0 : index
    %c0_49 = arith.constant 0 : index
    %61 = vector.load %arg5[%c4, %c0_48, %c0_49] : memref<9x128x192xbf16, #tpu.memory_space<vmem>>, vector<1x128x192xbf16>
    %62 = vector.shape_cast %61 : vector<1x128x192xbf16> to vector<128x192xbf16>
    %cst_50 = arith.constant dense<0.000000e+00> : vector<30x192xf32>
    %63 = tpu.matmul %60, %62, %cst_50 {dimension_numbers = #tpu.dot_dimension_numbers<[1], [0], [0], [1], [0, 0, 1, 1], [], []>} : vector<30x128xbf16>, vector<128x192xbf16>, vector<30x192xf32> -> vector<30x192xf32>
    %64 = arith.addf %59, %63 : vector<30x192xf32>
    %65 = vector.extract_strided_slice %54 {offsets = [16, 0], sizes = [30, 128], strides = [1, 1]} : vector<46x128xbf16> to vector<30x128xbf16>
    %c7 = arith.constant 7 : index
    %c0_51 = arith.constant 0 : index
    %c0_52 = arith.constant 0 : index
    %66 = vector.load %arg5[%c7, %c0_51, %c0_52] : memref<9x128x192xbf16, #tpu.memory_space<vmem>>, vector<1x128x192xbf16>
    %67 = vector.shape_cast %66 : vector<1x128x192xbf16> to vector<128x192xbf16>
    %cst_53 = arith.constant dense<0.000000e+00> : vector<30x192xf32>
    %68 = tpu.matmul %65, %67, %cst_53 {dimension_numbers = #tpu.dot_dimension_numbers<[1], [0], [0], [1], [0, 0, 1, 1], [], []>} : vector<30x128xbf16>, vector<128x192xbf16>, vector<30x192xf32> -> vector<30x192xf32>
    %69 = arith.addf %64, %68 : vector<30x192xf32>
    %c2 = arith.constant 2 : index
    %c0_54 = arith.constant 0 : index
    %70 = vector.load %arg9[%c2, %c0_54] : memref<48x128xbf16, #tpu.memory_space<vmem>>, vector<46x128xbf16>
    %71 = vector.extract_strided_slice %70 {offsets = [0, 0], sizes = [30, 128], strides = [1, 1]} : vector<46x128xbf16> to vector<30x128xbf16>
    %c2_55 = arith.constant 2 : index
    %c0_56 = arith.constant 0 : index
    %c0_57 = arith.constant 0 : index
    %72 = vector.load %arg5[%c2_55, %c0_56, %c0_57] : memref<9x128x192xbf16, #tpu.memory_space<vmem>>, vector<1x128x192xbf16>
    %73 = vector.shape_cast %72 : vector<1x128x192xbf16> to vector<128x192xbf16>
    %cst_58 = arith.constant dense<0.000000e+00> : vector<30x192xf32>
    %74 = tpu.matmul %71, %73, %cst_58 {dimension_numbers = #tpu.dot_dimension_numbers<[1], [0], [0], [1], [0, 0, 1, 1], [], []>} : vector<30x128xbf16>, vector<128x192xbf16>, vector<30x192xf32> -> vector<30x192xf32>
    %75 = arith.addf %69, %74 : vector<30x192xf32>
    %76 = vector.extract_strided_slice %70 {offsets = [8, 0], sizes = [30, 128], strides = [1, 1]} : vector<46x128xbf16> to vector<30x128xbf16>
    %c5 = arith.constant 5 : index
    %c0_59 = arith.constant 0 : index
    %c0_60 = arith.constant 0 : index
    %77 = vector.load %arg5[%c5, %c0_59, %c0_60] : memref<9x128x192xbf16, #tpu.memory_space<vmem>>, vector<1x128x192xbf16>
    %78 = vector.shape_cast %77 : vector<1x128x192xbf16> to vector<128x192xbf16>
    %cst_61 = arith.constant dense<0.000000e+00> : vector<30x192xf32>
    %79 = tpu.matmul %76, %78, %cst_61 {dimension_numbers = #tpu.dot_dimension_numbers<[1], [0], [0], [1], [0, 0, 1, 1], [], []>} : vector<30x128xbf16>, vector<128x192xbf16>, vector<30x192xf32> -> vector<30x192xf32>
    %80 = arith.addf %75, %79 : vector<30x192xf32>
    %81 = vector.extract_strided_slice %70 {offsets = [16, 0], sizes = [30, 128], strides = [1, 1]} : vector<46x128xbf16> to vector<30x128xbf16>
    %c8_62 = arith.constant 8 : index
    %c0_63 = arith.constant 0 : index
    %c0_64 = arith.constant 0 : index
    %82 = vector.load %arg5[%c8_62, %c0_63, %c0_64] : memref<9x128x192xbf16, #tpu.memory_space<vmem>>, vector<1x128x192xbf16>
    %83 = vector.shape_cast %82 : vector<1x128x192xbf16> to vector<128x192xbf16>
    %cst_65 = arith.constant dense<0.000000e+00> : vector<30x192xf32>
    %84 = tpu.matmul %81, %83, %cst_65 {dimension_numbers = #tpu.dot_dimension_numbers<[1], [0], [0], [1], [0, 0, 1, 1], [], []>} : vector<30x128xbf16>, vector<128x192xbf16>, vector<30x192xf32> -> vector<30x192xf32>
    %85 = arith.addf %80, %84 : vector<30x192xf32>
    %c0_66 = arith.constant 0 : index
    %c0_67 = arith.constant 0 : index
    %86 = vector.load %arg6[%c0_66, %c0_67] : memref<1x192xf32, #tpu.memory_space<vmem>>, vector<1x192xf32>
    %87 = vector.broadcast %86 : vector<1x192xf32> to vector<30x192xf32>
    %88 = arith.mulf %85, %87 : vector<30x192xf32>
    %c0_68 = arith.constant 0 : index
    %c0_69 = arith.constant 0 : index
    %89 = vector.load %arg7[%c0_68, %c0_69] : memref<1x192xf32, #tpu.memory_space<vmem>>, vector<1x192xf32>
    %90 = vector.broadcast %89 : vector<1x192xf32> to vector<30x192xf32>
    %91 = arith.addf %88, %90 : vector<30x192xf32>
    %cst_70 = arith.constant 0.000000e+00 : f32
    %92 = vector.broadcast %cst_70 : f32 to vector<30x192xf32>
    %93 = arith.maximumf %91, %92 : vector<30x192xf32>
    %94 = arith.truncf %93 : vector<30x192xf32> to vector<30x192xbf16>
    %c0_71 = arith.constant 0 : index
    %c0_72 = arith.constant 0 : index
    %c0_73 = arith.constant 0 : index
    %95 = vector.load %arg8[%c0_71, %c0_72, %c0_73] : memref<1x32x192xbf16, #tpu.memory_space<vmem>>, vector<1x30x192xbf16>
    %96 = vector.shape_cast %95 : vector<1x30x192xbf16> to vector<30x192xbf16>
    %97 = vector.shape_cast %94 : vector<30x192xbf16> to vector<1x30x192xbf16>
    tpu.vector_store %arg8[%c0_71, %c0_72, %c0_73], %97 {strides = array<i32>} : memref<1x32x192xbf16, #tpu.memory_space<vmem>>, vector<1x30x192xbf16>,
    return
  }
  func.func @transform_0(%arg0: i32) -> (i32, i32, i32) {
    %c0_i32 = arith.constant 0 : i32
    %c0_i32_0 = arith.constant 0 : i32
    %c0_i32_1 = arith.constant 0 : i32
    return %arg0, %c0_i32, %c0_i32_0 : i32, i32, i32
  }
  func.func @transform_1(%arg0: i32) -> (i32, i32, i32) {
    %c0_i32 = arith.constant 0 : i32
    %c0_i32_0 = arith.constant 0 : i32
    %c0_i32_1 = arith.constant 0 : i32
    %c0_i32_2 = arith.constant 0 : i32
    return %c0_i32, %c0_i32_0, %c0_i32_1 : i32, i32, i32
  }
  func.func @transform_2(%arg0: i32) -> (i32, i32) {
    %c0_i32 = arith.constant 0 : i32
    %c0_i32_0 = arith.constant 0 : i32
    %c0_i32_1 = arith.constant 0 : i32
    return %c0_i32, %c0_i32_0 : i32, i32
  }
  func.func @transform_3(%arg0: i32) -> (i32, i32) {
    %c0_i32 = arith.constant 0 : i32
    %c0_i32_0 = arith.constant 0 : i32
    %c0_i32_1 = arith.constant 0 : i32
    return %c0_i32, %c0_i32_0 : i32, i32
  }
  func.func @transform_4(%arg0: i32) -> (i32, i32, i32) {
    %c0_i32 = arith.constant 0 : i32
    %c0_i32_0 = arith.constant 0 : i32
    %c0_i32_1 = arith.constant 0 : i32
    %c0_i32_2 = arith.constant 0 : i32
    return %c0_i32, %c0_i32_0, %c0_i32_1 : i32, i32, i32
  }
  func.func @transform_5(%arg0: i32) -> (i32, i32) {
    %c0_i32 = arith.constant 0 : i32
    %c0_i32_0 = arith.constant 0 : i32
    %c0_i32_1 = arith.constant 0 : i32
    return %c0_i32, %c0_i32_0 : i32, i32
  }
  func.func @transform_6(%arg0: i32) -> (i32, i32) {
    %c0_i32 = arith.constant 0 : i32
    %c0_i32_0 = arith.constant 0 : i32
    %c0_i32_1 = arith.constant 0 : i32
    return %c0_i32, %c0_i32_0 : i32, i32
  }
  func.func @transform_7(%arg0: i32) -> (i32, i32, i32) {
    %c0_i32 = arith.constant 0 : i32
    %c0_i32_0 = arith.constant 0 : i32
    %c0_i32_1 = arith.constant 0 : i32
    return %arg0, %c0_i32, %c0_i32_0 : i32, i32, i32
  }
}

module attributes {stable_mosaic.version = 11 : i64} {
  func.func @_tail_kernel(%arg0: i32, %arg1: memref<1x8x768xbf16, #tpu.memory_space<vmem>>, %arg2: memref<4x768x256xbf16, #tpu.memory_space<vmem>>, %arg3: memref<1x256xf32, #tpu.memory_space<vmem>>, %arg4: memref<1x256xf32, #tpu.memory_space<vmem>>, %arg5: memref<1x4x256xbf16, #tpu.memory_space<vmem>>) attributes {dimension_semantics = [#tpu.dimension_semantics<parallel>], iteration_bounds = array<i64: 2>, scalar_prefetch = 0 : i64, scratch_operands = 0 : i64, tpu.core_type = #tpu.core_type<tc>, window_params = [{transform_indices = @transform_0, window_bounds = array<i64: 1, 8, 768>}, {pipeline_mode = #tpu.pipeline_mode<synchronous>, transform_indices = @transform_1, window_bounds = array<i64: 4, 768, 256>}, {pipeline_mode = #tpu.pipeline_mode<synchronous>, transform_indices = @transform_2, window_bounds = array<i64: 1, 256>}, {pipeline_mode = #tpu.pipeline_mode<synchronous>, transform_indices = @transform_3, window_bounds = array<i64: 1, 256>}, {transform_indices = @transform_4, window_bounds = array<i64: 1, 4, 256>}]} {
    %c0 = arith.constant 0 : index
    %c0_0 = arith.constant 0 : index
    %c0_1 = arith.constant 0 : index
    %0 = vector.load %arg1[%c0, %c0_0, %c0_1] : memref<1x8x768xbf16, #tpu.memory_space<vmem>>, vector<1x7x768xbf16>
    %1 = vector.shape_cast %0 : vector<1x7x768xbf16> to vector<7x768xbf16>
    %2 = vector.extract_strided_slice %1 {offsets = [0, 0], sizes = [3, 768], strides = [1, 1]} : vector<7x768xbf16> to vector<3x768xbf16>
    %c0_2 = arith.constant 0 : index
    %c0_3 = arith.constant 0 : index
    %c0_4 = arith.constant 0 : index
    %3 = vector.load %arg2[%c0_2, %c0_3, %c0_4] : memref<4x768x256xbf16, #tpu.memory_space<vmem>>, vector<1x768x256xbf16>
    %4 = vector.shape_cast %3 : vector<1x768x256xbf16> to vector<768x256xbf16>
    %cst = arith.constant dense<0.000000e+00> : vector<3x256xf32>
    %5 = tpu.matmul %2, %4, %cst {dimension_numbers = #tpu.dot_dimension_numbers<[1], [0], [0], [1], [0, 0, 1, 1], [], []>} : vector<3x768xbf16>, vector<768x256xbf16>, vector<3x256xf32> -> vector<3x256xf32>
    %6 = vector.extract_strided_slice %1 {offsets = [4, 0], sizes = [3, 768], strides = [1, 1]} : vector<7x768xbf16> to vector<3x768xbf16>
    %c2 = arith.constant 2 : index
    %c0_5 = arith.constant 0 : index
    %c0_6 = arith.constant 0 : index
    %7 = vector.load %arg2[%c2, %c0_5, %c0_6] : memref<4x768x256xbf16, #tpu.memory_space<vmem>>, vector<1x768x256xbf16>
    %8 = vector.shape_cast %7 : vector<1x768x256xbf16> to vector<768x256xbf16>
    %cst_7 = arith.constant dense<0.000000e+00> : vector<3x256xf32>
    %9 = tpu.matmul %6, %8, %cst_7 {dimension_numbers = #tpu.dot_dimension_numbers<[1], [0], [0], [1], [0, 0, 1, 1], [], []>} : vector<3x768xbf16>, vector<768x256xbf16>, vector<3x256xf32> -> vector<3x256xf32>
    %10 = arith.addf %5, %9 : vector<3x256xf32>
    %c0_8 = arith.constant 0 : index
    %c1 = arith.constant 1 : index
    %c0_9 = arith.constant 0 : index
    %11 = vector.load %arg1[%c0_8, %c1, %c0_9] : memref<1x8x768xbf16, #tpu.memory_space<vmem>>, vector<1x7x768xbf16>
    %12 = vector.shape_cast %11 : vector<1x7x768xbf16> to vector<7x768xbf16>
    %13 = vector.extract_strided_slice %12 {offsets = [0, 0], sizes = [3, 768], strides = [1, 1]} : vector<7x768xbf16> to vector<3x768xbf16>
    %c1_10 = arith.constant 1 : index
    %c0_11 = arith.constant 0 : index
    %c0_12 = arith.constant 0 : index
    %14 = vector.load %arg2[%c1_10, %c0_11, %c0_12] : memref<4x768x256xbf16, #tpu.memory_space<vmem>>, vector<1x768x256xbf16>
    %15 = vector.shape_cast %14 : vector<1x768x256xbf16> to vector<768x256xbf16>
    %cst_13 = arith.constant dense<0.000000e+00> : vector<3x256xf32>
    %16 = tpu.matmul %13, %15, %cst_13 {dimension_numbers = #tpu.dot_dimension_numbers<[1], [0], [0], [1], [0, 0, 1, 1], [], []>} : vector<3x768xbf16>, vector<768x256xbf16>, vector<3x256xf32> -> vector<3x256xf32>
    %17 = arith.addf %10, %16 : vector<3x256xf32>
    %18 = vector.extract_strided_slice %12 {offsets = [4, 0], sizes = [3, 768], strides = [1, 1]} : vector<7x768xbf16> to vector<3x768xbf16>
    %c3 = arith.constant 3 : index
    %c0_14 = arith.constant 0 : index
    %c0_15 = arith.constant 0 : index
    %19 = vector.load %arg2[%c3, %c0_14, %c0_15] : memref<4x768x256xbf16, #tpu.memory_space<vmem>>, vector<1x768x256xbf16>
    %20 = vector.shape_cast %19 : vector<1x768x256xbf16> to vector<768x256xbf16>
    %cst_16 = arith.constant dense<0.000000e+00> : vector<3x256xf32>
    %21 = tpu.matmul %18, %20, %cst_16 {dimension_numbers = #tpu.dot_dimension_numbers<[1], [0], [0], [1], [0, 0, 1, 1], [], []>} : vector<3x768xbf16>, vector<768x256xbf16>, vector<3x256xf32> -> vector<3x256xf32>
    %22 = arith.addf %17, %21 : vector<3x256xf32>
    %c0_17 = arith.constant 0 : index
    %c0_18 = arith.constant 0 : index
    %23 = vector.load %arg3[%c0_17, %c0_18] : memref<1x256xf32, #tpu.memory_space<vmem>>, vector<1x256xf32>
    %24 = vector.broadcast %23 : vector<1x256xf32> to vector<3x256xf32>
    %25 = arith.mulf %22, %24 : vector<3x256xf32>
    %c0_19 = arith.constant 0 : index
    %c0_20 = arith.constant 0 : index
    %26 = vector.load %arg4[%c0_19, %c0_20] : memref<1x256xf32, #tpu.memory_space<vmem>>, vector<1x256xf32>
    %27 = vector.broadcast %26 : vector<1x256xf32> to vector<3x256xf32>
    %28 = arith.addf %25, %27 : vector<3x256xf32>
    %cst_21 = arith.constant 0.000000e+00 : f32
    %29 = vector.broadcast %cst_21 : f32 to vector<3x256xf32>
    %30 = arith.maximumf %28, %29 : vector<3x256xf32>
    %31 = arith.truncf %30 : vector<3x256xf32> to vector<3x256xbf16>
    %c0_22 = arith.constant 0 : index
    %c0_23 = arith.constant 0 : index
    %c0_24 = arith.constant 0 : index
    %32 = vector.load %arg5[%c0_22, %c0_23, %c0_24] : memref<1x4x256xbf16, #tpu.memory_space<vmem>>, vector<1x3x256xbf16>
    %33 = vector.shape_cast %32 : vector<1x3x256xbf16> to vector<3x256xbf16>
    %34 = vector.shape_cast %31 : vector<3x256xbf16> to vector<1x3x256xbf16>
    tpu.vector_store %arg5[%c0_22, %c0_23, %c0_24], %34 {strides = array<i32>} : memref<1x4x256xbf16, #tpu.memory_space<vmem>>, vector<1x3x256xbf16>,
    return
  }
  func.func @transform_0(%arg0: i32) -> (i32, i32, i32) {
    %c0_i32 = arith.constant 0 : i32
    %c0_i32_0 = arith.constant 0 : i32
    %c0_i32_1 = arith.constant 0 : i32
    return %arg0, %c0_i32, %c0_i32_0 : i32, i32, i32
  }
  func.func @transform_1(%arg0: i32) -> (i32, i32, i32) {
    %c0_i32 = arith.constant 0 : i32
    %c0_i32_0 = arith.constant 0 : i32
    %c0_i32_1 = arith.constant 0 : i32
    %c0_i32_2 = arith.constant 0 : i32
    return %c0_i32, %c0_i32_0, %c0_i32_1 : i32, i32, i32
  }
  func.func @transform_2(%arg0: i32) -> (i32, i32) {
    %c0_i32 = arith.constant 0 : i32
    %c0_i32_0 = arith.constant 0 : i32
    %c0_i32_1 = arith.constant 0 : i32
    return %c0_i32, %c0_i32_0 : i32, i32
  }
  func.func @transform_3(%arg0: i32) -> (i32, i32) {
    %c0_i32 = arith.constant 0 : i32
    %c0_i32_0 = arith.constant 0 : i32
    %c0_i32_1 = arith.constant 0 : i32
    return %c0_i32, %c0_i32_0 : i32, i32
  }
  func.func @transform_4(%arg0: i32) -> (i32, i32, i32) {
    %c0_i32 = arith.constant 0 : i32
    %c0_i32_0 = arith.constant 0 : i32
    %c0_i32_1 = arith.constant 0 : i32
    return %arg0, %c0_i32, %c0_i32_0 : i32, i32, i32
  }
}

</mosaic_0001>

<bundles_post_ra>
// kernel: stem_forward.4
= control target key start
LH: loop header
LB: loop body
LE: loop exit
PB: predicated region body
PF: predicated region fallthrough
CT: control target
= control target key end

     0   :  { %s2993_s24 = smov 0   ;;  %s3747_s0 = inlined_call_operand.vmem [shape: bf16[2,56,512], index: 0, kind: input, shape index: {}]   ;;  %s3748_s1 = inlined_call_operand.vmem [shape: bf16[1,128,128], index: 1, kind: input, shape index: {}]   ;;  %s3749_s2 = inlined_call_operand.vmem [shape: f32[1,128], index: 2, kind: input, shape index: {}]   ;;  %s3750_s3 = inlined_call_operand.vmem [shape: f32[1,128], index: 3, kind: input, shape index: {}]   ;;  %s3751_s4 = inlined_call_operand.vmem [shape: bf16[9,128,192], index: 4, kind: input, shape index: {}]   ;;  %s3752_s5 = inlined_call_operand.vmem [shape: f32[1,192], index: 5, kind: input, shape index: {}]   ;;  %s3753_s6 = inlined_call_operand.vmem [shape: f32[1,192], index: 6, kind: input, shape index: {}]   ;;  %s3754_s7 = inlined_call_operand.vmem [shape: bf16[2,32,192], index: 7, kind: output, shape index: {}]  }
   0x1 LB: > { %s2299_s25 = sadd.s32 4294967295, %s2948_s24   ;;  %p2303_p0 = scmp.ge.s32.totalorder %s2948_s24, 1  ;;  %s2948_s24 = sphi %s2993_s24, %s17_s24  }
   0x2   : > { %p237_p1 = scmp.lt.s32.totalorder %s2948_s24, 3 }
   0x4   : > { %p238_p2 = pnand %p2303_p0, %p237_p1 }
   0x5   : > { %v2718_v0 = vld [vmem:[%s3748_s1] sm:$0xff] (!%p238_p2)   ;;  %v2950_v1 = vmov (!%p238_p2), 0.0   ;;  %v2719_v2 = vld [vmem:[%s3748_s1 + $0x8] sm:$0xff] (!%p238_p2)   ;;  %vm2951_vm0 = vmmov (!%p238_p2), 0   ;;  %p269_p3 = scmp.lt.s32.totalorder (!%p238_p2), %s2299_s25, 1  ;;  %v2720_v3 = vld [vmem:[%s3748_s1 + $0x10] sm:$0xff] (!%p238_p2)  }
   0x6   : > { %241 = sbr.rel (%p238_p2) target bundleno = 647 (0x287), region = 48  ;;  %2614 = vmatprep.subr.bf16.mxu0 (!%p238_p2), %v2950_v1  ;;  %2630 = vmatprep.mubr.msk.bf16.mxu0 (!%p238_p2), %vm2951_vm0, %v2950_v1  ;;  %v2721_v4 = vld [vmem:[%s3748_s1 + $0x18] sm:$0xff] (!%p238_p2)   ;;  %vm298_vm1 = vsmask.f32 (!%p238_p2), 3328  ;;  %vm299_vm2 = vsmask.f32 (!%p238_p2), 7440 }
   0x7   : > { %2615 = vmatpush3.bf16.msra.mxu0 (!%p238_p2), %v2718_v0  ;;  %v2722_v25 = vld [vmem:[%s3748_s1 + $0x20] sm:$0xff] (!%p238_p2)   ;;  %vm3071_vm3 = vmor (!%p238_p2), %vm298_vm1, %vm299_vm2  ;;  %v2723_v40 = vld [vmem:[%s3748_s1 + $0x28] sm:$0xff] (!%p238_p2)   ;;  %vm720_vm4 = vcmask (!%p238_p2), 1043456   ;;  %vm675_vm5 = vcmask (!%p238_p2), 1047552   ;;  %vm676_vm6 = vsmask.f32 (!%p238_p2), 7424 }
   0x8   : > { %2616 = vmatprep.subr.bf16.mxu0 (!%p238_p2), %v2950_v1  ;;  %v2729_v35 = vld [vmem:[%s3751_s4 + $0x190] ss:$8 sps:$4 sm:$0xff] (!%p238_p2)   ;;  %vm677_vm7 = vmand (!%p238_p2), %vm675_vm5, %vm676_vm6  ;;  %vm1686_vm8 = vcmask (!%p238_p2), 1046528   ;;  %vm1851_vm9 = vcmask (!%p238_p2), 1042432   ;;  %vm2235_vm10 = vcmask (!%p238_p2), 523268   ;;  %vm2241_vm12 = vcmask (!%p238_p2), 522244  }
   0x9   : > { %vm3724_vm11 = vmor (!%p238_p2), %vm2235_vm10, %vm720_vm4 }
   0xa   : > { %vm2242_vm13 = vmor (!%p238_p2), %vm2241_vm12, %vm1851_vm9 }
   0xb   : > { %2617 = vmatpush3.bf16.msra.mxu0 (!%p238_p2), %v2719_v2  ;;  %v2724_v2 = vld [vmem:[%s3748_s1 + $0x30] sm:$0xff] (!%p238_p2)  }
   0xc   : > { %2618 = vmatprep.subr.bf16.mxu0 (!%p238_p2), %v2950_v1 }
   0xd   : > { %s3760_s25 = smov (!%p269_p3, %s2299_s25), 1 }
   0xe   : > { %s2706_s9 = smul.u32 112, %s3760_s25  ;;  %s2598_s27 = sshll.u32 %s3760_s25, 5 }
   0xf   : > { %2619 = vmatpush3.bf16.msra.mxu0 %v2720_v3  ;;  %s3731_s30 = scalar_lea.vmem %s3754_s7, %s2598_s27 }
  0x10   : > { %s3024_s14 = scalar_lea.vmem %s3747_s0, %s2706_s9  ;;  %2620 = vmatprep.subr.bf16.mxu0 %v2950_v1 }
  0x11   : > { %v280_v5 = vld [vmem:[%s3024_s14] sm:$0xf]  ;;  %v3028_v6 = vld [vmem:[%s3024_s14 + $0x10] sm:$0xf]  ;;  %v286_v9 = vld [vmem:[%s3024_s14 + $0x4] sm:$0xf] }
  0x12   : > { %v3031_v7 = vld [vmem:[%s3024_s14 + $0x20] sm:$0xf]  ;;  %v3034_v8 = vld [vmem:[%s3024_s14 + $0x30] sm:$0xf]  ;;  %v3038_v10 = vld [vmem:[%s3024_s14 + $0x14] sm:$0xf]  ;;  %v292_v12 = vmax.bf16 %v286_v9, %v280_v5 }
  0x13   : > { %v3042_v11 = vld [vmem:[%s3024_s14 + $0x24] sm:$0xf]  ;;  %v302_v13 = vshrl.u32 %v280_v5, 16  ;;  %v305_v14 = vshll.u32 %v280_v5, 16  ;;  %v3045_v15 = vld [vmem:[%s3024_s14 + $0x8] sm:$0xf]  ;;  %v293_v16 = vmax.bf16 %v3038_v10, %v3028_v6  ;;  %2621 = vmatpush3.bf16.msra.mxu0 %v2721_v4 }
  0x14   : > { %v311_v17 = vshll.u32 %v3028_v6, 16  ;;  %v315_v18 = vshrl.u32 %v3028_v6, 16  ;;  %v321_v19 = vshll.u32 %v3031_v7, 16  ;;  %v325_v22 = vshrl.u32 %v3031_v7, 16  ;;  %v3055_v24 = vld [vmem:[%s3024_s14 + $0x18] sm:$0xf]  ;;  %2622 = vmatprep.subr.bf16.mxu0 %v2950_v1 }
  0x15   : > { %v304_v20 = vrot.slane %v302_v13, 4  ;;  %v307_v21 = vrot.slane %v305_v14, 5  ;;  %v331_v23 = vshll.u32 %v3034_v8, 16  ;;  %v294_v26 = vmax.bf16 %v3042_v11, %v3031_v7  ;;  %v3063_v29 = vld [vmem:[%s3024_s14 + $0x28] sm:$0xf] }
  0x16   : > { %v313_v27 = vrot.slane %v311_v17, 5  ;;  %v317_v28 = vrot.slane %v315_v18, 4  ;;  %v397_v30 = vshrl.u32 %v3045_v15, 16  ;;  %v323_v32 = vrot.slane %v321_v19, 5  ;;  %v3084_v49 = vld [vmem:[%s3024_s14 + $0x34] sm:$0xf] }
  0x17   : > { %v308_v31 = vor.u32 %v307_v21, %v304_v20  ;;  %v327_v33 = vrot.slane %v325_v22, 4  ;;  %v3067_v34 = vrot.slane %v331_v23, 5  ;;  %v400_v38 = vshll.u32 %v3045_v15, 16  ;;  %2623 = vmatpush3.bf16.msra.mxu0 %v2722_v25  ;;  %v3094_v58 = vld [vmem:[%s3024_s14 + $0x44] sm:$0xf] }
  0x18   : > { %v318_v36 = vor.u32 %v317_v28, %v313_v27  ;;  %v399_v37 = vrot.slane %v397_v30, 4  ;;  %v406_v39 = vshll.u32 %v3055_v24, 16  ;;  %v410_v43 = vshrl.u32 %v3055_v24, 16  ;;  %2624 = vmatprep.subr.bf16.mxu0 %v2950_v1  ;;  %v384_v61 = vld [vmem:[%s3024_s14 + $0xc] sm:$0xf] }
  0x19   : > { %v309_v41 = vrot.slane %v308_v31, 4  ;;  %v328_v42 = vor.u32 %v327_v33, %v323_v32  ;;  %v416_v44 = vshll.u32 %v3063_v29, 16  ;;  %v402_v46 = vrot.slane %v400_v38, 5  ;;  %v3104_v63 = vld [vmem:[%s3024_s14 + $0x40] sm:$0xf] }
  0x1a   : > { %v319_v45 = vrot.slane %v318_v36, 4  ;;  %v408_v47 = vrot.slane %v406_v39, 5  ;;  %v420_v48 = vshrl.u32 %v3063_v29, 16  ;;  %v412_v52 = vrot.slane %v410_v43, 4  ;;  %v385_v5 = vld [vmem:[%s3024_s14 + $0x1c] sm:$0xf] }
  0x1b   : > { %v314_v50 = vsel %vm3071_vm3, %v309_v41, %v313_v27  ;;  %v329_v51 = vrot.slane %v328_v42, 4  ;;  %v418_v53 = vrot.slane %v416_v44, 5  ;;  %v403_v56 = vor.u32 %v402_v46, %v399_v37  ;;  %2625 = vmatpush3.bf16.msra.mxu0 %v2723_v40  ;;  %v386_v14 = vld [vmem:[%s3024_s14 + $0x2c] sm:$0xf]  ;;  %v3118_v17 = vld [vmem:[%s3024_s14 + $0x50] sm:$0xf] }
  0x1c   : > { %v3091_v54 = vsel %vm3071_vm3, %v319_v45, %v323_v32  ;;  %v366_v55 = vmax.bf16 %v314_v50, %v292_v12  ;;  %v422_v57 = vrot.slane %v420_v48, 4  ;;  %v413_v62 = vor.u32 %v412_v52, %v408_v47  ;;  %2626 = vmatprep.subr.bf16.mxu0 %v2950_v1  ;;  %v3132_v25 = vld [vmem:[%s3024_s14 + $0x48] sm:$0xf] }
  0x1d   : > { %v3099_v59 = vsel %vm3071_vm3, %v329_v51, %v3067_v34  ;;  %v367_v60 = vmax.bf16 %v3091_v54, %v293_v16  ;;  %v295_v0 = vmax.bf16 %v3084_v49, %v3034_v8  ;;  %v404_v9 = vrot.slane %v403_v56, 4 }
  0x1e   : > { %v368_v3 = vmax.bf16 %v3099_v59, %v294_v26  ;;  %v378_v4 = vmax.bf16 %v3045_v15, %v366_v55  ;;  %v423_v12 = vor.u32 %v422_v57, %v418_v53  ;;  %v414_v16 = vrot.slane %v413_v62, 4  ;;  %v2725_v15 = vld [vmem:[%s3748_s1 + $0x38] sm:$0xff]  }
  0x1f   : > { %v379_v13 = vmax.bf16 %v3055_v24, %v367_v60  ;;  %v296_v18 = vmax.bf16 %v3094_v58, %v3104_v63  ;;  %v335_v19 = vshrl.u32 %v3034_v8, 16  ;;  %v409_v22 = vsel %vm3071_vm3, %v404_v9, %v408_v47  ;;  %v375_v24 = vld [vmem:[%s3024_s14 + $0x38] sm:$0xf]  ;;  %2627 = vmatpush3.bf16.msra.mxu0 %v2724_v2  ;;  %v291_v2 = vld [vmem:[%s3024_s14 + $0x54] sm:$0xf] }
  0x20   : > { %v380_v20 = vmax.bf16 %v3063_v29, %v368_v3  ;;  %v390_v21 = vmax.bf16 %v384_v61, %v378_v4  ;;  %v341_v23 = vshll.u32 %v3104_v63, 16  ;;  %v419_v27 = vsel %vm3071_vm3, %v414_v16, %v418_v53  ;;  %v2728_v29 = vld [vmem:[%s3751_s4 + $0x184] ss:$8 sps:$4 sm:$0xff]   ;;  %2628 = vmatprep.subr.bf16.mxu0 %v2950_v1  ;;  %v377_v57 = vld [vmem:[%s3024_s14 + $0x58] sm:$0xf] }
  0x21   : > { %v391_v26 = vmax.bf16 %v385_v5, %v379_v13  ;;  %v337_v28 = vrot.slane %v335_v19, 4  ;;  %v345_v30 = vshrl.u32 %v3104_v63, 16  ;;  %v351_v36 = vshll.u32 %v3118_v17, 16  ;;  %v388_v5 = vld [vmem:[%s3024_s14 + $0x4c] sm:$0xf] }
  0x22   : > { %v392_v31 = vmax.bf16 %v386_v14, %v380_v20  ;;  %v461_v32 = vmax.bf16 %v409_v22, %v390_v21  ;;  %v343_v33 = vrot.slane %v341_v23, 5  ;;  %v424_v40 = vrot.slane %v423_v12, 4  ;;  %v467_v14 = vld [vmem:[%s3024_s14 + $0x60] sm:$0xf] }
  0x23   : > { %v462_v37 = vmax.bf16 %v419_v27, %v391_v26  ;;  %v338_v38 = vor.u32 %v337_v28, %v3067_v34  ;;  %v347_v39 = vrot.slane %v345_v30, 4  ;;  %v353_v42 = vrot.slane %v351_v36, 5  ;;  %2629 = vmatpush3.bf16.msra.mxu0 %v2725_v15 }
  0x24   : > { %v468_v41 = vmax.bf16 %v461_v32, %v3028_v6  ;;  %v426_v43 = vshll.u32 %v375_v24, 16  ;;  %v430_v44 = vshrl.u32 %v375_v24, 16  ;;  %v436_v48 = vshll.u32 %v3132_v25, 16  ;;  %808 = vmatprep.subr.bf16.mxu0 %v2728_v29 }
  0x25   : > { %v469_v45 = vmax.bf16 %v462_v37, %v3031_v7  ;;  %v339_v46 = vrot.slane %v338_v38, 4  ;;  %v348_v47 = vor.u32 %v347_v39, %v343_v33  ;;  %v440_v52 = vshrl.u32 %v3132_v25, 16  ;;  %v387_v7 = vld [vmem:[%s3024_s14 + $0x3c] sm:$0xf] }
  0x26   : > { %v475_v50 = vmax.bf16 %v468_v41, %v3038_v10  ;;  %v428_v34 = vrot.slane %v426_v43, 5  ;;  %v432_v51 = vrot.slane %v430_v44, 4  ;;  %v438_v56 = vrot.slane %v436_v48, 5  ;;  %v389_v44 = vld [vmem:[%s3024_s14 + $0x5c] sm:$0xf] }
  0x27   : > { %v476_v6 = vmax.bf16 %v469_v45, %v3042_v11  ;;  %v344_v53 = vsel %vm3071_vm3, %v339_v46, %v343_v33  ;;  %v349_v55 = vrot.slane %v348_v47, 4  ;;  %v2726_v11 = vld [vmem:[%s3751_s4 + $0x180] ss:$8 sps:$4 sm:$0xff]   ;;  %v442_v9 = vrot.slane %v440_v52, 4  ;;  %v474_v52 = vld [vmem:[%s3024_s14 + $0x64] sm:$0xf] }
  0x28   : > { %v493_v60 = vmax.bf16 %v475_v50, %v3091_v54  ;;  %v369_v61 = vmax.bf16 %v344_v53, %v295_v0  ;;  %v429_v10 = vsel %vm3071_vm3, %v424_v40, %v428_v34  ;;  %v433_v62 = vor.u32 %v432_v51, %v428_v34 }
  0x29   : > { %v494_v3 = vmax.bf16 %v476_v6, %v3099_v59  ;;  %v354_v4 = vsel %vm3071_vm3, %v349_v55, %v353_v42  ;;  %v463_v12 = vmax.bf16 %v429_v10, %v392_v31  ;;  %v443_v19 = vor.u32 %v442_v9, %v438_v56  ;;  %v2734_v10 = vld [vmem:[%s3751_s4 + $0x200] ss:$8 sps:$4 sm:$0xff]   ;;  %v2741_v9 = vld [vmem:[%s3751_s4 + $0x1b0] ss:$8 sps:$4 sm:$0xff]  }
  0x2a   : > { %v370_v13 = vmax.bf16 %v354_v4, %v296_v18  ;;  %v381_v54 = vmax.bf16 %v375_v24, %v369_v61  ;;  %v434_v0 = vrot.slane %v433_v62, 4  ;;  %v355_v20 = vshrl.u32 %v3118_v17, 16  ;;  %v2737_v62 = vld [vmem:[%s3751_s4 + $0x1a4] ss:$8 sps:$4 sm:$0xff]  }
  0x2b   : > { %v2307_v16 = vcombine.low %v493_v60, %v494_v3  ;;  %v470_v15 = vmax.bf16 %v463_v12, %v3034_v8  ;;  %v446_v23 = vshll.u32 %v377_v57, 16  ;;  %v297_v26 = vmax.bf16 %v291_v2, %v3118_v17  ;;  %v2740_v3 = vld [vmem:[%s3751_s4 + $0x210] ss:$8 sps:$4 sm:$0xff]   ;;  %v2746_v12 = vld [vmem:[%s3751_s4 + $0x220] ss:$8 sps:$4 sm:$0xff]  }
  0x2c   : > { %v382_v21 = vmax.bf16 %v3132_v25, %v370_v13  ;;  %v393_v22 = vmax.bf16 %v387_v7, %v381_v54  ;;  %v439_v59 = vsel %vm3071_vm3, %v434_v0, %v438_v56  ;;  %v357_v18 = vrot.slane %v355_v20, 4  ;;  %v2749_v13 = vld [vmem:[%s3751_s4 + $0x1c4] ss:$8 sps:$4 sm:$0xff]   ;;  %v2750_v54 = vld [vmem:[%s3751_s4 + $0x234] ss:$8 sps:$4 sm:$0xff]  }
  0x2d   : > { %2631 = vmatmul.mubr.bf16.vlgmr.msra.gmra.mrb[0].mxu0 %v2307_v16  ;;  %v444_v24 = vrot.slane %v443_v19, 4  ;;  %v450_v27 = vshrl.u32 %v377_v57, 16  ;;  %v477_v30 = vmax.bf16 %v470_v15, %v3084_v49  ;;  %v448_v25 = vrot.slane %v446_v23, 5  ;;  %v2747_v0 = vld [vmem:[%s3751_s4 + $0x1c0] ss:$8 sps:$4 sm:$0xff]  }
  0x2e   : > { %2634 = vmatprep.mubr.msk.bf16.mxu0 %vm2951_vm0, %v2950_v1  ;;  %v394_v28 = vmax.bf16 %v388_v5, %v382_v21  ;;  %v464_v8 = vmax.bf16 %v439_v59, %v393_v22  ;;  %809 = vmatpush1.bf16.msra.mxu0 %v2726_v11  ;;  %v358_v29 = vor.u32 %v357_v18, %v353_v42  ;;  %v482_v32 = vshll.u32 %v467_v14, 16  ;;  %v2735_v11 = vld [vmem:[%s3751_s4 + $0x1a0] ss:$8 sps:$4 sm:$0xff]   ;;  %v2744_v5 = vld [vmem:[%s3751_s4 + $0x224] ss:$8 sps:$4 sm:$0xff]  }
  0x2f   : > { %v452_v31 = vrot.slane %v450_v27, 4  ;;  %v486_v33 = vshrl.u32 %v467_v14, 16  ;;  %v449_v37 = vsel %vm3071_vm3, %v444_v24, %v448_v25  ;;  %v495_v43 = vmax.bf16 %v477_v30, %v344_v53  ;;  %v2755_v16 = vld [vmem:[%s3751_s4 + $0x1d4] ss:$8 sps:$4 sm:$0xff]   ;;  %v2756_v19 = vld [vmem:[%s3751_s4 + $0x244] ss:$8 sps:$4 sm:$0xff]  }
  0x30   : > { %v471_v36 = vmax.bf16 %v464_v8, %v3104_v63  ;;  %v359_v38 = vrot.slane %v358_v29, 4  ;;  %v465_v40 = vmax.bf16 %v449_v37, %v394_v28  ;;  %v484_v45 = vrot.slane %v482_v32, 5  ;;  %v2753_v15 = vld [vmem:[%s3751_s4 + $0x1d0] ss:$8 sps:$4 sm:$0xff]   ;;  %v2758_v20 = vld [vmem:[%s3751_s4 + $0x240] ss:$8 sps:$4 sm:$0xff]  }
  0x31   : > { %v453_v39 = vor.u32 %v452_v31, %v448_v25  ;;  %v488_v46 = vrot.slane %v486_v33, 4  ;;  %v2761_v21 = vld [vmem:[%s3751_s4 + $0x1e4] ss:$8 sps:$4 sm:$0xff]   ;;  %v2762_v22 = vld [vmem:[%s3751_s4 + $0x254] ss:$8 sps:$4 sm:$0xff]   ;;  %v2952_v25 = vmov 0  }
  0x32   : > { %v478_v41 = vmax.bf16 %v471_v36, %v3094_v58  ;;  %v371_v49 = vmax.bf16 %v359_v38, %v297_v26  ;;  %v472_v50 = vmax.bf16 %v465_v40, %v3118_v17  ;;  %v485_v53 = vsel %vm3071_vm3, %v359_v38, %v484_v45  ;;  %v2731_v17 = vld [vmem:[%s3751_s4 + $0x194] ss:$8 sps:$4 sm:$0xff]   ;;  %v2759_v59 = vld [vmem:[%s3751_s4 + $0x1e0] ss:$8 sps:$4 sm:$0xff]   ;;  %v2764_v23 = vld [vmem:[%s3751_s4 + $0x250] ss:$8 sps:$4 sm:$0xff]   ;;  %1475 = vmatprep.mubr.bf16.mxu1 %v2952_v25 }
  0x33   : > { %v454_v48 = vrot.slane %v453_v39, 4  ;;  %v489_v51 = vor.u32 %v488_v46, %v484_v45  ;;  %810 = vmatprep.subr.bf16.mxu0 %v2731_v17  ;;  %v2767_v26 = vld [vmem:[%s3751_s4 + $0x1f4] ss:$8 sps:$4 sm:$0xff]   ;;  %v2768_v18 = vld [vmem:[%s3751_s4 + $0x264] ss:$8 sps:$4 sm:$0xff]  }
  0x34   : > { %v496_v42 = vmax.bf16 %v478_v41, %v354_v4  ;;  %v383_v47 = vmax.bf16 %v377_v57, %v371_v49  ;;  %v479_v58 = vmax.bf16 %v472_v50, %v291_v2  ;;  %811 = vmatpush1.bf16.msra.mxu0 %v2729_v35  ;;  %v2738_v2 = vld [vmem:[%s3751_s4 + $0x214] ss:$8 sps:$4 sm:$0xff]   ;;  %v2765_v24 = vld [vmem:[%s3751_s4 + $0x1f0] ss:$8 sps:$4 sm:$0xff]   ;;  %v2770_v27 = vld [vmem:[%s3751_s4 + $0x260] ss:$8 sps:$4 sm:$0xff]  }
  0x35   : > { %v490_v7 = vrot.slane %v489_v51, 4  ;;  %812 = vmatprep.subr.bf16.mxu0 %v2737_v62  ;;  %v2743_v4 = vld [vmem:[%s3751_s4 + $0x1b4] ss:$8 sps:$4 sm:$0xff]   ;;  %v2773_v28 = vld [vmem:[%s3751_s4 + $0x4] ss:$8 sps:$4 sm:$0xff]  }
  0x36   : > { %v2308_v63 = vcombine.low %v495_v43, %v496_v42  ;;  %v395_v34 = vmax.bf16 %v389_v44, %v383_v47  ;;  %v497_v57 = vmax.bf16 %v485_v53, %v479_v58  ;;  %v2774_v8 = vld [vmem:[%s3751_s4 + $0x274] ss:$8 sps:$4 sm:$0xff]   ;;  %v2776_v30 = vld [vmem:[%s3751_s4 + $0x270] ss:$8 sps:$4 sm:$0xff]   ;;  %v2782_v29 = vld [vmem:[%s3751_s4 + $0x384] ss:$8 sps:$4 sm:$0xff]  }
  0x37   : > { %v2318_v31 = vld [vmem:[%s3749_s2] ss:$0 sm:$0xff] }
  0x38   : > { %2635 = vmatmul.mubr.bf16.gmra.mrb[4].mxu0 %v2308_v63  ;;  %v466_v6 = vmax.bf16 %v454_v48, %v395_v34  ;;  %v2319_v33 = vld [vmem:[%s3750_s3] ss:$0 sm:$0xff] }
  0x39   : > { %2638 = vmatprep.mubr.msk.bf16.mxu0 %vm2951_vm0, %v2950_v1  ;;  %v2732_v1 = vld [vmem:[%s3751_s4 + $0x204] ss:$8 sps:$4 sm:$0xff]   ;;  %813 = vmatpush1.bf16.msra.mxu0 %v2735_v11 }
  0x3a   : > { %v473_v55 = vmax.bf16 %v467_v14, %v466_v6  ;;  %1443 = vmatprep.subr.bf16.mxu1 %v2732_v1  ;;  %814 = vmatprep.subr.bf16.mxu0 %v2743_v4  ;;  %v2752_v14 = vld [vmem:[%s3751_s4 + $0x230] ss:$8 sps:$4 sm:$0xff]  }
  0x3b   : > { %1444 = vmatpush1.bf16.msra.mxu1 %v2734_v10 }
  0x3c   : > { %v480_v56 = vmax.bf16 %v474_v52, %v473_v55  ;;  %1445 = vmatprep.subr.bf16.mxu1 %v2738_v2 }
  0x3d   : > { %815 = vmatpush1.bf16.msra.mxu0 %v2741_v9 }
  0x3e   : > { %v498_v60 = vmax.bf16 %v490_v7, %v480_v56  ;;  %816 = vmatprep.subr.bf16.mxu0 %v2749_v13 }
  0x3f   : > { %1446 = vmatpush1.bf16.msra.mxu1 %v2740_v3  ;;  %v2779_v3 = vld [vmem:[%s3751_s4 + $0x14] ss:$8 sps:$4 sm:$0xff]  }
  0x40   : > { %v2309_v61 = vcombine.low %v497_v57, %v498_v60  ;;  %1447 = vmatprep.subr.bf16.mxu1 %v2744_v5  ;;  %v2771_v57 = vld [vmem:[%s3751_s4] ss:$8 sps:$4 sm:$0xff]  }
  0x41   : > { %817 = vmatpush1.bf16.msra.mxu0 %v2747_v0 }
  0x42   : > { %2639 = vmatmul.mubr.bf16.gmra.mrb[8].mxu0 %v2309_v61  ;;  %818 = vmatprep.subr.bf16.mxu0 %v2755_v16  ;;  %v2780_v16 = vld [vmem:[%s3751_s4 + $0x380] ss:$8 sps:$4 sm:$0xff]  }
  0x43   : > { %1448 = vmatpush1.bf16.msra.mxu1 %v2746_v12  ;;  %840 = vmatprep.mubr.bf16.mxu0 %v2952_v25 }
  0x44   : > { %1449 = vmatprep.subr.bf16.mxu1 %v2750_v54 }
  0x45   : > { %819 = vmatpush1.bf16.msra.mxu0 %v2753_v15 }
  0x46   : > { %820 = vmatprep.subr.bf16.mxu0 %v2761_v21 }
  0x47   : > { %1450 = vmatpush1.bf16.msra.mxu1 %v2752_v14  ;;  %v2777_v14 = vld [vmem:[%s3751_s4 + $0x10] ss:$8 sps:$4 sm:$0xff]  }
  0x48   : > { %1451 = vmatprep.subr.bf16.mxu1 %v2756_v19 }
  0x49   : > { %821 = vmatpush1.bf16.msra.mxu0 %v2759_v59  ;;  %v2788_v59 = vld [vmem:[%s3751_s4 + $0x394] ss:$8 sps:$4 sm:$0xff]  }
  0x4a   : > { %822 = vmatprep.subr.bf16.mxu0 %v2767_v26 }
  0x4b   : > { %1452 = vmatpush1.bf16.msra.mxu1 %v2758_v20 }
  0x4c   : > { %1453 = vmatprep.subr.bf16.mxu1 %v2762_v22  ;;  %v2785_v22 = vld [vmem:[%s3751_s4 + $0x24] ss:$8 sps:$4 sm:$0xff]  }
  0x4d   : > { %823 = vmatpush1.bf16.msra.mxu0 %v2765_v24  ;;  %v2783_v24 = vld [vmem:[%s3751_s4 + $0x20] ss:$8 sps:$4 sm:$0xff]  }
  0x4e   : > { %941 = vmatprep.subr.bf16.mxu0 %v2773_v28 }
  0x4f   : > { %1454 = vmatpush1.bf16.msra.mxu1 %v2764_v23 }
  0x50   : > { %1455 = vmatprep.subr.bf16.mxu1 %v2768_v18  ;;  %v678_v18 = vld [vmem:[#allocation2 + $0x10] sm:$0xff] }
  0x53   : > { %1456 = vmatpush1.bf16.msra.mxu1 %v2770_v27  ;;  %v2786_v27 = vld [vmem:[%s3751_s4 + $0x390] ss:$8 sps:$4 sm:$0xff]  }
  0x54   : > { %1457 = vmatprep.subr.bf16.mxu1 %v2774_v8  ;;  %v2791_v8 = vld [vmem:[%s3751_s4 + $0x34] ss:$8 sps:$4 sm:$0xff]  }
  0x57   : > { %1458 = vmatpush1.bf16.msra.mxu1 %v2776_v30  ;;  %v2794_v30 = vld [vmem:[%s3751_s4 + $0x3a4] ss:$8 sps:$4 sm:$0xff]  }
  0x58   : > { %1606 = vmatprep.subr.bf16.mxu1 %v2782_v29 }
 0x100   : > { %v615_v32 = vpop.f32.mrb[0].mxu0 }
 0x101   : > { %v645_v36 = vmul.f32 %v2318_v31, %v615_v32  ;;  %v2632_v37 = vpop.f32.mrb[1].mxu0  ;;  %v2792_v32 = vld [vmem:[%s3751_s4 + $0x3a0] ss:$8 sps:$4 sm:$0xff]  }
 0x102   : > { %v618_v38 = vpop.f32.mrb[2].mxu0 }
 0x103   : > { %v658_v39 = vadd.f32 %v2319_v33, %v645_v36  ;;  %v646_v40 = vmul.f32 %v2318_v31, %v618_v38  ;;  %v2633_v41 = vpop.f32.mrb[3].mxu0  ;;  %v2797_v38 = vld [vmem:[%s3751_s4 + $0x44] ss:$8 sps:$4 sm:$0xff]  }
 0x105   : > { %v659_v43 = vadd.f32 %v2319_v33, %v646_v40  ;;  %v664_v44 = vmax.f32 %v658_v39, 0.0  ;;  %v2800_v39 = vld [vmem:[%s3751_s4 + $0x3b4] ss:$8 sps:$4 sm:$0xff]  }
 0x107   : > { %v665_v49 = vmax.f32 %v659_v43, 0.0 }
 0x109   : > { %v3289_v45 = vpack.c.bf16 %v665_v49, %v664_v44 }
 0x10b   : > { %673 = vst [vmem:[#allocation2] sm:$0xff] %v3289_v45  ;;  %v623_v46 = vpop.f32.mrb[4].mxu0  ;;  %v1173_v42 = vshll.u32 %v3289_v45, 16  ;;  %v1171_v63 = vshrl.u32 %v3289_v45, 16  ;;  %v721_v60 = vrot.slane %v3289_v45, 4 }
 0x10c   : > { %v647_v47 = vmul.f32 %v2318_v31, %v623_v46  ;;  %v2636_v48 = vpop.f32.mrb[5].mxu0  ;;  %v2795_v46 = vld [vmem:[%s3751_s4 + $0x40] ss:$8 sps:$4 sm:$0xff]  }
 0x10d   : > { %v626_v50 = vpop.f32.mrb[6].mxu0  ;;  %v1175_v34 = vrot.slane %v1173_v42, 1  ;;  %v1345_v61 = vrot.slane %v1171_v63, 4  ;;  %v1346_v62 = vrot.slane %v1173_v42, 5  ;;  %v2798_v42 = vld [vmem:[%s3751_s4 + $0x3b0] ss:$8 sps:$4 sm:$0xff]  }
 0x10e   : > { %v660_v51 = vadd.f32 %v2319_v33, %v647_v47  ;;  %v648_v52 = vmul.f32 %v2318_v31, %v626_v50  ;;  %v2637_v6 = vpop.f32.mrb[7].mxu0  ;;  %v2803_v47 = vld [vmem:[%s3751_s4 + $0x54] ss:$8 sps:$4 sm:$0xff]   ;;  %v2806_v48 = vld [vmem:[%s3751_s4 + $0x3c4] ss:$8 sps:$4 sm:$0xff]  }
 0x10f   : > { %v3294_v58 = vor.u32 %v1175_v34, %v1171_v63  ;;  %v1347_v19 = vor.u32 %v1346_v62, %v1345_v61  ;;  %v2809_v6 = vld [vmem:[%s3751_s4 + $0x64] ss:$8 sps:$4 sm:$0xff]  }
 0x110   : > { %v661_v53 = vadd.f32 %v2319_v33, %v648_v52  ;;  %v666_v55 = vmax.f32 %v660_v51, 0.0  ;;  %v2801_v51 = vld [vmem:[%s3751_s4 + $0x50] ss:$8 sps:$4 sm:$0xff]   ;;  %v2804_v52 = vld [vmem:[%s3751_s4 + $0x3c0] ss:$8 sps:$4 sm:$0xff]  }
 0x111   : > { %v2818_v61 = vld [vmem:[%s3751_s4 + $0x3e4] ss:$8 sps:$4 sm:$0xff]  }
 0x112   : > { %v667_v7 = vmax.f32 %v661_v53, 0.0  ;;  %v2812_v53 = vld [vmem:[%s3751_s4 + $0x3d4] ss:$8 sps:$4 sm:$0xff]   ;;  %v2821_v62 = vld [vmem:[%s3751_s4 + $0x304] ss:$8 sps:$4 sm:$0xff]  }
 0x114   : > { %v3296_v56 = vpack.c.bf16 %v667_v7, %v666_v55  ;;  %v2807_v7 = vld [vmem:[%s3751_s4 + $0x60] ss:$8 sps:$4 sm:$0xff]  }
 0x115   : > { %v631_v17 = vpop.f32.mrb[8].mxu0 }
 0x116   : > { %v722_v1 = vrot.slane %v3296_v56, 4  ;;  %v1178_v35 = vshll.u32 %v3296_v56, 16  ;;  %v1182_v10 = vshrl.u32 %v3296_v56, 16  ;;  %v649_v2 = vmul.f32 %v2318_v31, %v631_v17  ;;  %v2640_v11 = vpop.f32.mrb[9].mxu0  ;;  %v2813_v17 = vld [vmem:[%s3751_s4 + $0x70] ss:$8 sps:$4 sm:$0xff]  }
 0x117   : > { %v634_v4 = vpop.f32.mrb[10].mxu0  ;;  %v3362_v40 = vrot.slane %v3296_v56, 1  ;;  %v2819_v11 = vld [vmem:[%s3751_s4 + $0x300] ss:$8 sps:$4 sm:$0xff]  }
 0x118   : > { %v723_v5 = vsel %vm720_vm4, %v721_v60, %v722_v1  ;;  %v1348_v9 = vrot.slane %v1182_v10, 4  ;;  %v1349_v12 = vrot.slane %v1178_v35, 5  ;;  %v662_v13 = vadd.f32 %v2319_v33, %v649_v2  ;;  %v2641_v0 = vpop.f32.mrb[11].mxu0  ;;  %v2815_v60 = vld [vmem:[%s3751_s4 + $0x74] ss:$8 sps:$4 sm:$0xff]  }
 0x119   : > { %v650_v54 = vmul.f32 %v2318_v31, %v634_v4  ;;  %841 = vmatmul.mubr.bf16.vlgmr.msra.gmra.mrb[12].mxu0 %v723_v5  ;;  %v2789_v31 = vld [vmem:[%s3751_s4 + $0x30] ss:$8 sps:$4 sm:$0xff]   ;;  %v2824_v2 = vld [vmem:[%s3751_s4 + $0x3f4] ss:$8 sps:$4 sm:$0xff]   ;;  %v3437_v4 = vrot.slane %v1178_v35, 1 }
 0x11a   : > { %942 = vmatpush1.bf16.msra.mxu0 %v2771_v57  ;;  %v1350_v15 = vor.u32 %v1349_v12, %v1348_v9  ;;  %850 = vmatprep.mubr.bf16.mxu0 %v2952_v25  ;;  %v668_v20 = vmax.f32 %v662_v13, 0.0  ;;  %v2810_v57 = vld [vmem:[%s3751_s4 + $0x3d0] ss:$8 sps:$4 sm:$0xff]   ;;  %v2827_v5 = vld [vmem:[%s3751_s4 + $0x314] ss:$8 sps:$4 sm:$0xff]  }
 0x11b   : > { %v663_v21 = vadd.f32 %v2319_v33, %v650_v54  ;;  %943 = vmatprep.subr.bf16.mxu0 %v2779_v3  ;;  %v2822_v3 = vld [vmem:[%s3751_s4 + $0x3f0] ss:$8 sps:$4 sm:$0xff]   ;;  %v2830_v9 = vld [vmem:[%s3751_s4 + $0x104] ss:$8 sps:$4 sm:$0xff]   ;;  %v3452_v13 = vor.u32 %v1182_v10, %v3437_v4  ;;  %v2828_v54 = vld [vmem:[%s3751_s4 + $0x100] ss:$8 sps:$4 sm:$0xff]  }
 0x11c   : > { %v1351_v23 = vsel %vm298_vm1, %v1347_v19, %v1350_v15  ;;  %v2825_v35 = vld [vmem:[%s3751_s4 + $0x310] ss:$8 sps:$4 sm:$0xff]   ;;  %v2836_v0 = vld [vmem:[%s3751_s4 + $0x114] ss:$8 sps:$4 sm:$0xff]   ;;  %v2831_v10 = vld [vmem:[%s3751_s4 + $0x320] ss:$8 sps:$4 sm:$0xff]  }
 0x11d   : > { %v669_v26 = vmax.f32 %v663_v21, 0.0  ;;  %1476 = vmatmul.mubr.bf16.vlgmr.msra.gmra.mrb[0].mxu1 %v1351_v23  ;;  %v2839_v19 = vld [vmem:[%s3751_s4 + $0x334] ss:$8 sps:$4 sm:$0xff]   ;;  %v2840_v21 = vld [vmem:[%s3751_s4 + $0x120] ss:$8 sps:$4 sm:$0xff]  }
 0x11e   : > { %944 = vmatpush1.bf16.msra.mxu0 %v2777_v14  ;;  %1607 = vmatpush1.bf16.msra.mxu1 %v2780_v16  ;;  %v2834_v16 = vld [vmem:[%s3751_s4 + $0x110] ss:$8 sps:$4 sm:$0xff]   ;;  %v2848_v23 = vld [vmem:[%s3751_s4 + $0x134] ss:$8 sps:$4 sm:$0xff]  }
 0x11f   : > { %v672_v28 = vpack.c.bf16 %v669_v26, %v668_v20  ;;  %945 = vmatprep.subr.bf16.mxu0 %v2785_v22  ;;  %1608 = vmatprep.subr.bf16.mxu1 %v2788_v59  ;;  %v2837_v20 = vld [vmem:[%s3751_s4 + $0x330] ss:$8 sps:$4 sm:$0xff]   ;;  %v2845_v59 = vld [vmem:[%s3751_s4 + $0x344] ss:$8 sps:$4 sm:$0xff]   ;;  %v2843_v26 = vld [vmem:[%s3751_s4 + $0x340] ss:$8 sps:$4 sm:$0xff]  }
 0x120   : > { %1485 = vmatprep.mubr.bf16.mxu1 %v2952_v25 }
 0x121   : > { %v3343_v29 = vsel %vm677_vm7, %v672_v28, %v678_v18  ;;  %v2846_v18 = vld [vmem:[%s3751_s4 + $0x130] ss:$8 sps:$4 sm:$0xff]  }
 0x122   : > { %680 = vst [vmem:[#allocation2 + $0x10] sm:$0xff] %v3343_v29  ;;  %946 = vmatpush1.bf16.msra.mxu0 %v2783_v24  ;;  %1609 = vmatpush1.bf16.msra.mxu1 %v2786_v27  ;;  %v1353_v33 = vshrl.u32 %v3343_v29, 16  ;;  %v1356_v36 = vshll.u32 %v3343_v29, 16  ;;  %v2017_v37 = vrot.slane %v3343_v29, 1  ;;  %v2851_v24 = vld [vmem:[%s3751_s4 + $0x354] ss:$8 sps:$4 sm:$0xff]  }
 0x123   : > { %947 = vmatprep.subr.bf16.mxu0 %v2791_v8  ;;  %1610 = vmatprep.subr.bf16.mxu1 %v2794_v30  ;;  %v2854_v27 = vld [vmem:[%s3751_s4 + $0x144] ss:$8 sps:$4 sm:$0xff]   ;;  %v2849_v28 = vld [vmem:[%s3751_s4 + $0x350] ss:$8 sps:$4 sm:$0xff]   ;;  %v2852_v8 = vld [vmem:[%s3751_s4 + $0x140] ss:$8 sps:$4 sm:$0xff]  }
 0x124   : > { %v1355_v41 = vrot.slane %v1353_v33, 4  ;;  %v1358_v43 = vrot.slane %v1356_v36, 5  ;;  %v3370_v44 = vsel %vm1686_vm8, %v3362_v40, %v2017_v37  ;;  %v1521_v12 = vrot.slane %v1356_v36, 1  ;;  %v2857_v30 = vld [vmem:[%s3751_s4 + $0x364] ss:$8 sps:$4 sm:$0xff]  }
 0x125   : > { %v2863_v36 = vld [vmem:[%s3751_s4 + $0x374] ss:$8 sps:$4 sm:$0xff]  }
 0x126   : > { %948 = vmatpush1.bf16.msra.mxu0 %v2789_v31  ;;  %1611 = vmatpush1.bf16.msra.mxu1 %v2792_v32  ;;  %v1359_v49 = vor.u32 %v1358_v43, %v1355_v41  ;;  %v1522_v14 = vsel %vm676_vm6, %v3452_v13, %v1521_v12  ;;  %v1523_v22 = vor.u32 %v1521_v12, %v1353_v33  ;;  %v2860_v31 = vld [vmem:[%s3751_s4 + $0x154] ss:$8 sps:$4 sm:$0xff]   ;;  %v2855_v32 = vld [vmem:[%s3751_s4 + $0x360] ss:$8 sps:$4 sm:$0xff]   ;;  %v2858_v33 = vld [vmem:[%s3751_s4 + $0x150] ss:$8 sps:$4 sm:$0xff]  }
 0x127   : > { %949 = vmatprep.subr.bf16.mxu0 %v2797_v38  ;;  %1612 = vmatprep.subr.bf16.mxu1 %v2800_v39  ;;  %v2866_v38 = vld [vmem:[%s3751_s4 + $0x164] ss:$8 sps:$4 sm:$0xff]   ;;  %v2861_v39 = vld [vmem:[%s3751_s4 + $0x370] ss:$8 sps:$4 sm:$0xff]   ;;  %v2864_v41 = vld [vmem:[%s3751_s4 + $0x160] ss:$8 sps:$4 sm:$0xff]  }
 0x128   : > { %v1360_v50 = vsel %vm298_vm1, %v1350_v15, %v1359_v49  ;;  %v2842_v15 = vld [vmem:[%s3751_s4 + $0x124] ss:$8 sps:$4 sm:$0xff]   ;;  %v2872_v49 = vld [vmem:[%s3751_s4 + $0x174] ss:$8 sps:$4 sm:$0xff]  }
 0x129   : > { %v3385_v63 = vld [vmem:[#allocation2 + $0x10] sm:$0x7f]  ;;  %1486 = vmatmul.mubr.bf16.gmra.mrb[4].mxu1 %v1360_v50  ;;  %v2869_v43 = vld [vmem:[%s3751_s4 + $0x84] ss:$8 sps:$4 sm:$0xff]  }
 0x12a   : > { %v724_v34 = vrot.slane %v3385_v63, 4  ;;  %950 = vmatpush1.bf16.msra.mxu0 %v2795_v46  ;;  %1613 = vmatpush1.bf16.msra.mxu1 %v2798_v42  ;;  %v3544_v46 = vld [vmem:[#allocation2] sm:$0xfe] }
 0x12b   : > { %951 = vmatprep.subr.bf16.mxu0 %v2803_v47  ;;  %1614 = vmatprep.subr.bf16.mxu1 %v2806_v48  ;;  %v2867_v42 = vld [vmem:[%s3751_s4 + $0x80] ss:$8 sps:$4 sm:$0xff]   ;;  %v2870_v47 = vld [vmem:[%s3751_s4 + $0x170] ss:$8 sps:$4 sm:$0xff]   ;;  %v2875_v48 = vld [vmem:[%s3751_s4 + $0x94] ss:$8 sps:$4 sm:$0xff]  }
 0x12c   : > { %v725_v55 = vsel %vm720_vm4, %v722_v1, %v724_v34  ;;  %1638 = vmatprep.mubr.bf16.mxu1 %v2952_v25  ;;  %v2816_v1 = vld [vmem:[%s3751_s4 + $0x3e0] ss:$8 sps:$4 sm:$0xff]   ;;  %v2878_v50 = vld [vmem:[%s3751_s4 + $0x284] ss:$8 sps:$4 sm:$0xff]   ;;  %v1687_v34 = vrot.slane %v3544_v46, 1 }
 0x12d   : > { %851 = vmatmul.mubr.bf16.gmra.mrb[16].mxu0 %v725_v55  ;;  %v2905_v12 = vld [vmem:[%s3751_s4 + $0xe4] ss:$8 sps:$4 sm:$0xff]  }
 0x12e   : > { %952 = vmatpush1.bf16.msra.mxu0 %v2801_v51  ;;  %1615 = vmatpush1.bf16.msra.mxu1 %v2804_v52  ;;  %v2873_v51 = vld [vmem:[%s3751_s4 + $0x90] ss:$8 sps:$4 sm:$0xff]   ;;  %v2876_v52 = vld [vmem:[%s3751_s4 + $0x280] ss:$8 sps:$4 sm:$0xff]   ;;  %v1689_v55 = vsel %vm1686_vm8, %v1687_v34, %v3362_v40  ;;  %v2164_v34 = vlaneseq }
 0x12f   : > { %953 = vmatprep.subr.bf16.mxu0 %v2809_v6  ;;  %1616 = vmatprep.subr.bf16.mxu1 %v2812_v53  ;;  %v2881_v6 = vld [vmem:[%s3751_s4 + $0xa4] ss:$8 sps:$4 sm:$0xff]   ;;  %v2884_v53 = vld [vmem:[%s3751_s4 + $0x294] ss:$8 sps:$4 sm:$0xff]  }
 0x130   : > { %973 = vmatprep.mubr.bf16.mxu0 %v2952_v25 }
 0x132   : > { %954 = vmatpush1.bf16.msra.mxu0 %v2807_v7  ;;  %1617 = vmatpush1.bf16.msra.mxu1 %v2810_v57  ;;  %v2879_v7 = vld [vmem:[%s3751_s4 + $0xa0] ss:$8 sps:$4 sm:$0xff]   ;;  %v2882_v57 = vld [vmem:[%s3751_s4 + $0x290] ss:$8 sps:$4 sm:$0xff]  }
 0x133   : > { %955 = vmatprep.subr.bf16.mxu0 %v2815_v60  ;;  %1618 = vmatprep.subr.bf16.mxu1 %v2818_v61  ;;  %v2887_v60 = vld [vmem:[%s3751_s4 + $0xb4] ss:$8 sps:$4 sm:$0xff]   ;;  %v2890_v61 = vld [vmem:[%s3751_s4 + $0x2a4] ss:$8 sps:$4 sm:$0xff]  }
 0x136   : > { %956 = vmatpush1.bf16.msra.mxu0 %v2813_v17  ;;  %1619 = vmatpush1.bf16.msra.mxu1 %v2816_v1  ;;  %v2885_v17 = vld [vmem:[%s3751_s4 + $0xb0] ss:$8 sps:$4 sm:$0xff]   ;;  %v2888_v1 = vld [vmem:[%s3751_s4 + $0x2a0] ss:$8 sps:$4 sm:$0xff]  }
 0x137   : > { %1091 = vmatprep.subr.bf16.mxu0 %v2821_v62  ;;  %1620 = vmatprep.subr.bf16.mxu1 %v2824_v2  ;;  %v2893_v62 = vld [vmem:[%s3751_s4 + $0xc4] ss:$8 sps:$4 sm:$0xff]   ;;  %v2891_v2 = vld [vmem:[%s3751_s4 + $0xc0] ss:$8 sps:$4 sm:$0xff]  }
 0x139   : > { %974 = vmatmul.mubr.bf16.vlgmr.msra.gmra.mrb[12].mxu0 %v3289_v45  ;;  %v2833_v45 = vld [vmem:[%s3751_s4 + $0x324] ss:$8 sps:$4 sm:$0xff]  }
 0x13a   : > { %1092 = vmatpush1.bf16.msra.mxu0 %v2819_v11  ;;  %1621 = vmatpush1.bf16.msra.mxu1 %v2822_v3  ;;  %v2894_v11 = vld [vmem:[%s3751_s4 + $0x2b0] ss:$8 sps:$4 sm:$0xff]   ;;  %v2899_v3 = vld [vmem:[%s3751_s4 + $0xd4] ss:$8 sps:$4 sm:$0xff]  }
 0x13b   : > { %1093 = vmatprep.subr.bf16.mxu0 %v2827_v5  ;;  %1772 = vmatprep.subr.bf16.mxu1 %v2830_v9  ;;  %v2897_v5 = vld [vmem:[%s3751_s4 + $0xd0] ss:$8 sps:$4 sm:$0xff]   ;;  %v2900_v9 = vld [vmem:[%s3751_s4 + $0x2c0] ss:$8 sps:$4 sm:$0xff]  }
 0x13c   : > { %983 = vmatprep.mubr.bf16.mxu0 %v2952_v25 }
 0x13d   : > { %1639 = vmatmul.mubr.bf16.vlgmr.msra.gmra.mrb[0].mxu1 %v1522_v14  ;;  %v2914_v14 = vld [vmem:[%s3751_s4 + $0x2e4] ss:$8 sps:$4 sm:$0xff]  }
 0x13e   : > { %1094 = vmatpush1.bf16.msra.mxu0 %v2825_v35  ;;  %1773 = vmatpush1.bf16.msra.mxu1 %v2828_v54  ;;  %v2908_v35 = vld [vmem:[%s3751_s4 + $0x2d4] ss:$8 sps:$4 sm:$0xff]   ;;  %v2903_v54 = vld [vmem:[%s3751_s4 + $0xe0] ss:$8 sps:$4 sm:$0xff]  }
 0x13f   : > { %1095 = vmatprep.subr.bf16.mxu0 %v2833_v45  ;;  %1774 = vmatprep.subr.bf16.mxu1 %v2836_v0  ;;  %v2906_v45 = vld [vmem:[%s3751_s4 + $0x2d0] ss:$8 sps:$4 sm:$0xff]   ;;  %v2911_v0 = vld [vmem:[%s3751_s4 + $0xf4] ss:$8 sps:$4 sm:$0xff]  }
 0x140   : > { %1648 = vmatprep.mubr.bf16.mxu1 %v2952_v25 }
 0x141   : > { %984 = vmatmul.mubr.bf16.gmra.mrb[16].mxu0 %v3296_v56 }
 0x142   : > { %1096 = vmatpush1.bf16.msra.mxu0 %v2831_v10  ;;  %1775 = vmatpush1.bf16.msra.mxu1 %v2834_v16  ;;  %v2909_v10 = vld [vmem:[%s3751_s4 + $0xf0] ss:$8 sps:$4 sm:$0xff]   ;;  %v2912_v16 = vld [vmem:[%s3751_s4 + $0x2e0] ss:$8 sps:$4 sm:$0xff]  }
 0x143   : > { %1097 = vmatprep.subr.bf16.mxu0 %v2839_v19  ;;  %1776 = vmatprep.subr.bf16.mxu1 %v2842_v15  ;;  %v2917_v19 = vld [vmem:[%s3751_s4 + $0x2f4] ss:$8 sps:$4 sm:$0xff]   ;;  %v2915_v15 = vld [vmem:[%s3751_s4 + $0x2f0] ss:$8 sps:$4 sm:$0xff]  }
 0x144   : > { %1123 = vmatprep.mubr.bf16.mxu0 %v2952_v25 }
 0x145   : > { %1649 = vmatmul.mubr.bf16.gmra.mrb[4].mxu1 %v1523_v22  ;;  %v1852_v22 = vrot.slane %v3544_v46, 5 }
 0x146   : > { %1098 = vmatpush1.bf16.msra.mxu0 %v2837_v20  ;;  %1777 = vmatpush1.bf16.msra.mxu1 %v2840_v21  ;;  %v2920_v20 = vld [vmem:[%s3751_s4 + $0x404] ss:$8 sps:$4 sm:$0xff]   ;;  %v1181_v21 = vsel %vm676_vm6, %v3294_v58, %v3437_v4 }
 0x147   : > { %1099 = vmatprep.subr.bf16.mxu0 %v2845_v59  ;;  %1778 = vmatprep.subr.bf16.mxu1 %v2848_v23  ;;  %v1853_v59 = vrot.slane %v3296_v56, 5  ;;  %v2918_v23 = vld [vmem:[%s3751_s4 + $0x400] ss:$8 sps:$4 sm:$0xff]   ;;  %v2926_v4 = vld [vmem:[%s3751_s4 + $0x424] ss:$8 sps:$4 sm:$0xff]  }
 0x148   : > { %1804 = vmatprep.mubr.bf16.mxu1 %v2952_v25 }
 0x149   : > { %v1854_v58 = vsel %vm1851_vm9, %v1852_v22, %v1853_v59 }
 0x14a   : > { %1100 = vmatpush1.bf16.msra.mxu0 %v2843_v26  ;;  %1779 = vmatpush1.bf16.msra.mxu1 %v2846_v18  ;;  %v2923_v26 = vld [vmem:[%s3751_s4 + $0x414] ss:$8 sps:$4 sm:$0xff]   ;;  %v1855_v18 = vrot.slane %v3343_v29, 5 }
 0x14b   : > { %1101 = vmatprep.subr.bf16.mxu0 %v2851_v24  ;;  %1780 = vmatprep.subr.bf16.mxu1 %v2854_v27  ;;  %v2924_v24 = vld [vmem:[%s3751_s4 + $0x420] ss:$8 sps:$4 sm:$0xff]   ;;  %v2929_v27 = vld [vmem:[%s3751_s4 + $0x434] ss:$8 sps:$4 sm:$0xff]  }
 0x14e   : > { %1102 = vmatpush1.bf16.msra.mxu0 %v2849_v28  ;;  %1781 = vmatpush1.bf16.msra.mxu1 %v2852_v8  ;;  %v1856_v28 = vsel %vm1851_vm9, %v1853_v59, %v1855_v18  ;;  %v2927_v8 = vld [vmem:[%s3751_s4 + $0x430] ss:$8 sps:$4 sm:$0xff]  }
 0x14f   : > { %1103 = vmatprep.subr.bf16.mxu0 %v2857_v30  ;;  %1782 = vmatprep.subr.bf16.mxu1 %v2860_v31  ;;  %v2930_v30 = vld [vmem:[%s3751_s4 + $0x440] ss:$8 sps:$4 sm:$0xff]   ;;  %v2935_v31 = vld [vmem:[%s3751_s4 + $0x454] ss:$8 sps:$4 sm:$0xff]  }
 0x152   : > { %1104 = vmatpush1.bf16.msra.mxu0 %v2855_v32  ;;  %1783 = vmatpush1.bf16.msra.mxu1 %v2858_v33  ;;  %v2933_v32 = vld [vmem:[%s3751_s4 + $0x450] ss:$8 sps:$4 sm:$0xff]   ;;  %v2938_v33 = vld [vmem:[%s3751_s4 + $0x464] ss:$8 sps:$4 sm:$0xff]  }
 0x153   : > { %1105 = vmatprep.subr.bf16.mxu0 %v2863_v36  ;;  %1784 = vmatprep.subr.bf16.mxu1 %v2866_v38  ;;  %v2936_v36 = vld [vmem:[%s3751_s4 + $0x460] ss:$8 sps:$4 sm:$0xff]   ;;  %v2941_v38 = vld [vmem:[%s3751_s4 + $0x474] ss:$8 sps:$4 sm:$0xff]  }
 0x156   : > { %1106 = vmatpush1.bf16.msra.mxu0 %v2861_v39  ;;  %1785 = vmatpush1.bf16.msra.mxu1 %v2864_v41  ;;  %v2939_v39 = vld [vmem:[%s3751_s4 + $0x470] ss:$8 sps:$4 sm:$0xff]  }
 0x157   : > { %1267 = vmatprep.subr.bf16.mxu0 %v2869_v43  ;;  %1786 = vmatprep.subr.bf16.mxu1 %v2872_v49 }
 0x159   : > { %1124 = vmatmul.mubr.bf16.vlgmr.msra.gmra.mrb[12].mxu0 %v3296_v56  ;;  %v2921_v56 = vld [vmem:[%s3751_s4 + $0x410] ss:$8 sps:$4 sm:$0xff]  }
 0x15a   : > { %1268 = vmatpush1.bf16.msra.mxu0 %v2867_v42  ;;  %1787 = vmatpush1.bf16.msra.mxu1 %v2870_v47 }
 0x15b   : > { %1269 = vmatprep.subr.bf16.mxu0 %v2875_v48  ;;  %1939 = vmatprep.subr.bf16.mxu1 %v2878_v50 }
 0x15c   : > { %1133 = vmatprep.mubr.bf16.mxu0 %v2952_v25 }
 0x15d   : > { %1805 = vmatmul.mubr.bf16.vlgmr.msra.gmra.mrb[0].mxu1 %v1689_v55 }
 0x15e   : > { %1270 = vmatpush1.bf16.msra.mxu0 %v2873_v51  ;;  %1940 = vmatpush1.bf16.msra.mxu1 %v2876_v52  ;;  %v2165_v51 = vshrl.u32 %v2164_v34, 7 }
 0x15f   : > { %1271 = vmatprep.subr.bf16.mxu0 %v2881_v6  ;;  %1941 = vmatprep.subr.bf16.mxu1 %v2884_v53 }
 0x160   : > { %1814 = vmatprep.mubr.bf16.mxu1 %v2952_v25  ;;  %v2166_v52 = vsub.s32 0, %v2165_v51  ;;  %v2170_v6 = vsub.s32 1, %v2165_v51 }
 0x161   : > { %1134 = vmatmul.mubr.bf16.gmra.mrb[16].mxu0 %v3385_v63  ;;  %v2896_v63 = vld [vmem:[%s3751_s4 + $0x2b4] ss:$8 sps:$4 sm:$0xff]  }
 0x162   : > { %1272 = vmatpush1.bf16.msra.mxu0 %v2879_v7  ;;  %1942 = vmatpush1.bf16.msra.mxu1 %v2882_v57 }
 0x163   : > { %1273 = vmatprep.subr.bf16.mxu0 %v2887_v60  ;;  %1943 = vmatprep.subr.bf16.mxu1 %v2890_v61 }
 0x164   : > { %1299 = vmatprep.mubr.bf16.mxu0 %v2952_v25 }
 0x165   : > { %1815 = vmatmul.mubr.bf16.gmra.mrb[4].mxu1 %v3362_v40  ;;  %v2902_v40 = vld [vmem:[%s3751_s4 + $0x2c4] ss:$8 sps:$4 sm:$0xff]  }
 0x166   : > { %1274 = vmatpush1.bf16.msra.mxu0 %v2885_v17  ;;  %1944 = vmatpush1.bf16.msra.mxu1 %v2888_v1 }
 0x167   : > { %1275 = vmatprep.subr.bf16.mxu0 %v2893_v62  ;;  %1945 = vmatprep.subr.bf16.mxu1 %v2896_v63 }
 0x168   : > { %1971 = vmatprep.mubr.bf16.mxu1 %v2952_v25 }
 0x16a   : > { %1276 = vmatpush1.bf16.msra.mxu0 %v2891_v2  ;;  %1946 = vmatpush1.bf16.msra.mxu1 %v2894_v11 }
 0x16b   : > { %1277 = vmatprep.subr.bf16.mxu0 %v2899_v3  ;;  %1947 = vmatprep.subr.bf16.mxu1 %v2902_v40 }
 0x16e   : > { %1278 = vmatpush1.bf16.msra.mxu0 %v2897_v5  ;;  %1948 = vmatpush1.bf16.msra.mxu1 %v2900_v9 }
 0x16f   : > { %1279 = vmatprep.subr.bf16.mxu0 %v2905_v12  ;;  %1949 = vmatprep.subr.bf16.mxu1 %v2908_v35 }
 0x172   : > { %1280 = vmatpush1.bf16.msra.mxu0 %v2903_v54  ;;  %1950 = vmatpush1.bf16.msra.mxu1 %v2906_v45 }
 0x173   : > { %1281 = vmatprep.subr.bf16.mxu0 %v2911_v0  ;;  %1951 = vmatprep.subr.bf16.mxu1 %v2914_v14 }
 0x176   : > { %1282 = vmatpush1.bf16.msra.mxu0 %v2909_v10  ;;  %1952 = vmatpush1.bf16.msra.mxu1 %v2912_v16 }
 0x177   : > { %1953 = vmatprep.subr.bf16.mxu1 %v2917_v19 }
 0x179   : > { %1300 = vmatmul.mubr.bf16.vlgmr.msra.gmra.mrb[12].mxu0 %v1181_v21 }
 0x17a   : > { %1954 = vmatpush1.bf16.msra.mxu1 %v2915_v15  ;;  %1309 = vmatprep.mubr.bf16.mxu0 %v2952_v25 }
 0x17b   : > { %2101 = vmatprep.subr.bf16.mxu1 %v2920_v20 }
 0x17d   : > { %1972 = vmatmul.mubr.bf16.vlgmr.msra.gmra.mrb[0].mxu1 %v1854_v58 }
 0x17e   : > { %2102 = vmatpush1.bf16.msra.mxu1 %v2918_v23  ;;  %1981 = vmatprep.mubr.bf16.mxu1 %v2952_v25 }
 0x17f   : > { %2103 = vmatprep.subr.bf16.mxu1 %v2923_v26 }
 0x181   : > { %1310 = vmatmul.mubr.bf16.gmra.mrb[16].mxu0 %v3452_v13  ;;  %v2932_v13 = vld [vmem:[%s3751_s4 + $0x444] ss:$8 sps:$4 sm:$0xff]  }
 0x182   : > { %2104 = vmatpush1.bf16.msra.mxu1 %v2921_v56 }
 0x183   : > { %2105 = vmatprep.subr.bf16.mxu1 %v2926_v4 }
 0x185   : > { %1982 = vmatmul.mubr.bf16.gmra.mrb[4].mxu1 %v1856_v28 }
 0x186   : > { %2106 = vmatpush1.bf16.msra.mxu1 %v2924_v24  ;;  %2133 = vmatprep.mubr.bf16.mxu1 %v2952_v25 }
 0x187   : > { %2107 = vmatprep.subr.bf16.mxu1 %v2929_v27 }
 0x18a   : > { %2108 = vmatpush1.bf16.msra.mxu1 %v2927_v8 }
 0x18b   : > { %2109 = vmatprep.subr.bf16.mxu1 %v2932_v13 }
 0x18e   : > { %2110 = vmatpush1.bf16.msra.mxu1 %v2930_v30 }
 0x18f   : > { %2111 = vmatprep.subr.bf16.mxu1 %v2935_v31 }
 0x192   : > { %2112 = vmatpush1.bf16.msra.mxu1 %v2933_v32 }
 0x193   : > { %2113 = vmatprep.subr.bf16.mxu1 %v2938_v33 }
 0x196   : > { %2114 = vmatpush1.bf16.msra.mxu1 %v2936_v36 }
 0x197   : > { %2115 = vmatprep.subr.bf16.mxu1 %v2941_v38 }
 0x19a   : > { %2116 = vmatpush1.bf16.msra.mxu1 %v2939_v39 }
 0x19d   : > { %2134 = vmatmul.mubr.bf16.vlgmr.msra.gmra.mrb[0].mxu1 %v3370_v44  ;;  %v2162_v44 = vld [vmem:[%s3752_s5] sm:$0x3] }
 0x19e   : > { %2143 = vmatprep.mubr.bf16.mxu1 %v2952_v25  ;;  %v2182_v25 = vld [vmem:[%s3753_s6] sm:$0x3]  ;;  %v2167_v29 = vrot.slane %v2162_v44, %v2166_v52  ;;  %v2171_v53 = vrot.slane %v2162_v44, %v2170_v6 }
 0x19f   : > { %v2187_v7 = vrot.slane %v2182_v25, %v2166_v52  ;;  %v2191_v61 = vrot.slane %v2182_v25, %v2170_v6 }
 0x1a5   : > { %2144 = vmatmul.mubr.bf16.gmra.mrb[4].mxu1 %v2017_v37 }
 0x24c   : > { %v1301_v41 = vpop.f32.mrb[12].mxu0 }
 0x24d   : > { %v1303_v43 = vpop.f32.mrb[13].mxu0 }
 0x24e   : > { %v1305_v49 = vpop.f32.mrb[14].mxu0 }
 0x24f   : > { %v1307_v46 = vpop.f32.mrb[15].mxu0 }
 0x254   : > { %v1311_v42 = vpop.f32.mrb[16].mxu0 }
 0x255   : > { %v1313_v47 = vpop.f32.mrb[17].mxu0 }
 0x256   : > { %v1315_v48 = vpop.f32.mrb[18].mxu0 }
 0x257   : > { %v1317_v50 = vpop.f32.mrb[19].mxu0 }
 0x270   : > { %v2135_v37 = vpop.f32.mrb[0].mxu1 }
 0x271   : > { %v2642_v55 = vadd.f32 %v2135_v37, %v1301_v41  ;;  %v2137_v57 = vpop.f32.mrb[1].mxu1 }
 0x272   : > { %v2643_v60 = vadd.f32 %v2137_v57, %v1303_v43  ;;  %v2139_v17 = vpop.f32.mrb[2].mxu1 }
 0x273   : > { %v2174_v1 = vmul.f32 %v2642_v55, %v2167_v29  ;;  %v2644_v62 = vadd.f32 %v2139_v17, %v1305_v49  ;;  %v2141_v63 = vpop.f32.mrb[3].mxu1 }
 0x274   : > { %v2175_v2 = vmul.f32 %v2643_v60, %v2171_v53  ;;  %v2645_v11 = vadd.f32 %v2141_v63, %v1307_v46 }
 0x275   : > { %v2194_v3 = vadd.f32 %v2187_v7, %v2174_v1  ;;  %v2176_v40 = vmul.f32 %v2644_v62, %v2167_v29 }
 0x276   : > { %v2195_v5 = vadd.f32 %v2191_v61, %v2175_v2  ;;  %v2177_v9 = vmul.f32 %v2645_v11, %v2171_v53 }
 0x277   : > { %v2202_v12 = vmax.f32 %v2194_v3, 0.0  ;;  %v2196_v35 = vadd.f32 %v2187_v7, %v2176_v40 }
 0x278   : > { %v2203_v54 = vmax.f32 %v2195_v5, 0.0  ;;  %v2197_v45 = vadd.f32 %v2191_v61, %v2177_v9  ;;  %v2145_v0 = vpop.f32.mrb[4].mxu1 }
 0x279   : > { %v2204_v10 = vmax.f32 %v2196_v35, 0.0  ;;  %v2646_v16 = vadd.f32 %v2145_v0, %v1311_v42  ;;  %v2147_v19 = vpop.f32.mrb[5].mxu1 }
 0x27a   : > { %v2599_v15 = vpack.c.bf16 %v2203_v54, %v2202_v12  ;;  %v2205_v20 = vmax.f32 %v2197_v45, 0.0  ;;  %v2647_v21 = vadd.f32 %v2147_v19, %v1313_v47  ;;  %v2149_v22 = vpop.f32.mrb[6].mxu1 }
 0x27b   : > { %v2178_v59 = vmul.f32 %v2646_v16, %v2167_v29  ;;  %v2648_v23 = vadd.f32 %v2149_v22, %v1315_v48  ;;  %v2151_v26 = vpop.f32.mrb[7].mxu1 }
 0x27c   : > { %2237 = vst.msk [vmem:[%s3731_s30] sm:$0xff] %vm3724_vm11, %v2599_v15  ;;  %v2600_v58 = vpack.c.bf16 %v2205_v20, %v2204_v10  ;;  %v2179_v56 = vmul.f32 %v2647_v21, %v2171_v53  ;;  %v2649_v4 = vadd.f32 %v2151_v26, %v1317_v50 }
 0x27d   : > { %v2198_v18 = vadd.f32 %v2187_v7, %v2178_v59  ;;  %v2180_v24 = vmul.f32 %v2648_v23, %v2167_v29 }
 0x27e   : > { %2238 = vst.msk [vmem:[%s3731_s30 + $0x8] sm:$0xff] %vm3724_vm11, %v2600_v58  ;;  %v2199_v27 = vadd.f32 %v2191_v61, %v2179_v56  ;;  %v2181_v28 = vmul.f32 %v2649_v4, %v2171_v53 }
 0x27f   : > { %v2206_v8 = vmax.f32 %v2198_v18, 0.0  ;;  %v2200_v13 = vadd.f32 %v2187_v7, %v2180_v24 }
 0x280   : > { %v2207_v30 = vmax.f32 %v2199_v27, 0.0  ;;  %v2201_v31 = vadd.f32 %v2191_v61, %v2181_v28 }
 0x281   : > { %v2208_v32 = vmax.f32 %v2200_v13, 0.0 }
 0x282   : > { %v2601_v33 = vpack.c.bf16 %v2207_v30, %v2206_v8  ;;  %v2209_v36 = vmax.f32 %v2201_v31, 0.0 }
 0x284   : > { %2239 = vst.msk [vmem:[%s3731_s30 + $0x10] sm:$0xff] %vm3724_vm11, %v2601_v33  ;;  %v2602_v38 = vpack.c.bf16 %v2209_v36, %v2208_v32 }
 0x286   : > { %2243 = vst.msk [vmem:[%s3731_s30 + $0x18] sm:$0x77] %vm2242_vm13, %v2602_v38 }
 0x287 PF: > { %s17_s24 = sadd.s32 1, %s2948_s24  }
 0x288   : > { %p14_p4 = scmp.ge.s32.totalorder %s17_s24, 4  }
 0x28a   :  { %16 = sbr.rel (!%p14_p4) target bundleno = 1 (0x1), region = 86 }

// kernel: stem_forward.5
= control target key start
LH: loop header
LB: loop body
LE: loop exit
PB: predicated region body
PF: predicated region fallthrough
CT: control target
= control target key end

     0   :  { %s4575_s15 = smov 0   ;;  %s5859_s0 = inlined_call_operand.vmem [shape: bf16[2,8,768], index: 0, kind: input, shape index: {}]   ;;  %s5860_s1 = inlined_call_operand.vmem [shape: bf16[4,768,256], index: 1, kind: input, shape index: {}]   ;;  %s5861_s2 = inlined_call_operand.vmem [shape: f32[1,256], index: 2, kind: input, shape index: {}]   ;;  %s5862_s3 = inlined_call_operand.vmem [shape: f32[1,256], index: 3, kind: input, shape index: {}]   ;;  %s5863_s4 = inlined_call_operand.vmem [shape: bf16[2,4,256], index: 4, kind: output, shape index: {}]  }
   0x1 LB: > { %s3217_s16 = sadd.s32 4294967295, %s4547_s15   ;;  %p3221_p0 = scmp.ge.s32.totalorder %s4547_s15, 1  ;;  %s4547_s15 = sphi %s4575_s15, %s14_s15  }
   0x2   : > { %p162_p1 = scmp.lt.s32.totalorder %s4547_s15, 3 }
   0x4   : > { %p163_p2 = pnand %p3221_p0, %p162_p1 }
   0x5   : > { %v3959_v0 = vld [vmem:[%s5860_s1 + $0x604] ss:$8 sps:$4 sm:$0xff] (!%p163_p2)   ;;  %v3963_v2 = vld [vmem:[%s5860_s1 + $0x600] ss:$8 sps:$4 sm:$0xff] (!%p163_p2)   ;;  %v3965_v4 = vld [vmem:[%s5860_s1 + $0x614] ss:$8 sps:$4 sm:$0xff] (!%p163_p2)  }
   0x6   : > { %166 = sbr.rel (%p163_p2) target bundleno = 618 (0x26a), region = 36  ;;  %v3961_v1 = vld [vmem:[%s5860_s1 + $0x304] ss:$8 sps:$4 sm:$0xff] (!%p163_p2)   ;;  %901 = vmatprep.subr.bf16.mxu1 (!%p163_p2), %v3959_v0  ;;  %v3964_v3 = vld [vmem:[%s5860_s1 + $0x300] ss:$8 sps:$4 sm:$0xff] (!%p163_p2)   ;;  %p188_p3 = scmp.lt.s32.totalorder (!%p163_p2), %s3217_s16, 1 }
   0x7   : > { %2258 = vmatprep.subr.bf16.mxu0 (!%p163_p2), %v3961_v1  ;;  %902 = vmatpush1.bf16.msra.mxu1 (!%p163_p2), %v3963_v2  ;;  %v3967_v5 = vld [vmem:[%s5860_s1 + $0x314] ss:$8 sps:$4 sm:$0xff] (!%p163_p2)   ;;  %v3969_v6 = vld [vmem:[%s5860_s1 + $0x610] ss:$8 sps:$4 sm:$0xff] (!%p163_p2)   ;;  %v3971_v8 = vld [vmem:[%s5860_s1 + $0x624] ss:$8 sps:$4 sm:$0xff] (!%p163_p2)  }
   0x8   : > { %2259 = vmatpush1.bf16.msra.mxu0 (!%p163_p2), %v3964_v3  ;;  %903 = vmatprep.subr.bf16.mxu1 (!%p163_p2), %v3965_v4  ;;  %v3970_v7 = vld [vmem:[%s5860_s1 + $0x310] ss:$8 sps:$4 sm:$0xff] (!%p163_p2)   ;;  %v3973_v9 = vld [vmem:[%s5860_s1 + $0x324] ss:$8 sps:$4 sm:$0xff] (!%p163_p2)   ;;  %v3975_v10 = vld [vmem:[%s5860_s1 + $0x620] ss:$8 sps:$4 sm:$0xff] (!%p163_p2)  }
   0x9   : > { %2260 = vmatprep.subr.bf16.mxu0 (!%p163_p2), %v3967_v5  ;;  %v3976_v11 = vld [vmem:[%s5860_s1 + $0x320] ss:$8 sps:$4 sm:$0xff] (!%p163_p2)   ;;  %v3977_v12 = vld [vmem:[%s5860_s1 + $0x634] ss:$8 sps:$4 sm:$0xff] (!%p163_p2)   ;;  %v3981_v14 = vld [vmem:[%s5860_s1 + $0x630] ss:$8 sps:$4 sm:$0xff] (!%p163_p2)  }
   0xa   : > { %v3979_v13 = vld [vmem:[%s5860_s1 + $0x334] ss:$8 sps:$4 sm:$0xff] (!%p163_p2)   ;;  %v3982_v15 = vld [vmem:[%s5860_s1 + $0x330] ss:$8 sps:$4 sm:$0xff] (!%p163_p2)   ;;  %v3983_v16 = vld [vmem:[%s5860_s1 + $0x644] ss:$8 sps:$4 sm:$0xff] (!%p163_p2)  }
   0xb   : > { %904 = vmatpush1.bf16.msra.mxu1 (!%p163_p2), %v3969_v6  ;;  %v3985_v17 = vld [vmem:[%s5860_s1 + $0x344] ss:$8 sps:$4 sm:$0xff] (!%p163_p2)   ;;  %v3987_v18 = vld [vmem:[%s5860_s1 + $0x640] ss:$8 sps:$4 sm:$0xff] (!%p163_p2)   ;;  %v3989_v20 = vld [vmem:[%s5860_s1 + $0x654] ss:$8 sps:$4 sm:$0xff] (!%p163_p2)  }
   0xc   : > { %2261 = vmatpush1.bf16.msra.mxu0 (!%p163_p2), %v3970_v7  ;;  %905 = vmatprep.subr.bf16.mxu1 (!%p163_p2), %v3971_v8  ;;  %v3988_v19 = vld [vmem:[%s5860_s1 + $0x340] ss:$8 sps:$4 sm:$0xff] (!%p163_p2)   ;;  %v3991_v21 = vld [vmem:[%s5860_s1 + $0x354] ss:$8 sps:$4 sm:$0xff] (!%p163_p2)   ;;  %v3993_v22 = vld [vmem:[%s5860_s1 + $0x650] ss:$8 sps:$4 sm:$0xff] (!%p163_p2)  }
   0xd   : > { %2262 = vmatprep.subr.bf16.mxu0 %v3973_v9  ;;  %v3994_v23 = vld [vmem:[%s5860_s1 + $0x350] ss:$8 sps:$4 sm:$0xff]   ;;  %v3995_v24 = vld [vmem:[%s5860_s1 + $0x664] ss:$8 sps:$4 sm:$0xff]   ;;  %v3999_v26 = vld [vmem:[%s5860_s1 + $0x660] ss:$8 sps:$4 sm:$0xff]  }
   0xe   : > { %v3997_v25 = vld [vmem:[%s5860_s1 + $0x364] ss:$8 sps:$4 sm:$0xff]   ;;  %v4000_v27 = vld [vmem:[%s5860_s1 + $0x360] ss:$8 sps:$4 sm:$0xff]   ;;  %v4001_v28 = vld [vmem:[%s5860_s1 + $0x674] ss:$8 sps:$4 sm:$0xff]  }
   0xf   : > { %906 = vmatpush1.bf16.msra.mxu1 %v3975_v10  ;;  %v4003_v29 = vld [vmem:[%s5860_s1 + $0x374] ss:$8 sps:$4 sm:$0xff]   ;;  %v4005_v30 = vld [vmem:[%s5860_s1 + $0x670] ss:$8 sps:$4 sm:$0xff]   ;;  %v4007_v32 = vld [vmem:[%s5860_s1 + $0x684] ss:$8 sps:$4 sm:$0xff]  }
  0x10   : > { %2263 = vmatpush1.bf16.msra.mxu0 %v3976_v11  ;;  %907 = vmatprep.subr.bf16.mxu1 %v3977_v12  ;;  %v4006_v31 = vld [vmem:[%s5860_s1 + $0x370] ss:$8 sps:$4 sm:$0xff]   ;;  %v4009_v33 = vld [vmem:[%s5860_s1 + $0x384] ss:$8 sps:$4 sm:$0xff]   ;;  %v4011_v34 = vld [vmem:[%s5860_s1 + $0x680] ss:$8 sps:$4 sm:$0xff]  }
  0x11   : > { %2264 = vmatprep.subr.bf16.mxu0 %v3979_v13  ;;  %v4012_v35 = vld [vmem:[%s5860_s1 + $0x380] ss:$8 sps:$4 sm:$0xff]   ;;  %s5865_s16 = smov (!%p188_p3, %s3217_s16), 1  ;;  %v4013_v36 = vld [vmem:[%s5860_s1 + $0x694] ss:$8 sps:$4 sm:$0xff]   ;;  %vm3152_vm0 = vcmask 1041408  }
  0x12   : > { %v4015_v37 = vld [vmem:[%s5860_s1 + $0x394] ss:$8 sps:$4 sm:$0xff]   ;;  %v4017_v38 = vld [vmem:[%s5860_s1 + $0x690] ss:$8 sps:$4 sm:$0xff]   ;;  %s3949_s23 = smul.u32 24, %s5865_s16  ;;  %s3906_s6 = sshll.u32 %s5865_s16, 2 }
  0x13   : > { %908 = vmatpush1.bf16.msra.mxu1 %v3981_v14  ;;  %v4018_v39 = vld [vmem:[%s5860_s1 + $0x390] ss:$8 sps:$4 sm:$0xff]   ;;  %v4019_v40 = vld [vmem:[%s5860_s1 + $0x6a4] ss:$8 sps:$4 sm:$0xff]   ;;  %v4023_v42 = vld [vmem:[%s5860_s1 + $0x6a0] ss:$8 sps:$4 sm:$0xff]   ;;  %s197_s9 = scalar_lea.vmem %s5863_s4, %s3906_s6 }
  0x14   : > { %2265 = vmatpush1.bf16.msra.mxu0 %v3982_v15  ;;  %909 = vmatprep.subr.bf16.mxu1 %v3983_v16  ;;  %v4021_v41 = vld [vmem:[%s5860_s1 + $0x3a4] ss:$8 sps:$4 sm:$0xff]   ;;  %v4024_v43 = vld [vmem:[%s5860_s1 + $0x3a0] ss:$8 sps:$4 sm:$0xff]   ;;  %s4725_s10 = scalar_lea.vmem %s5859_s0, %s3949_s23  ;;  %v4025_v44 = vld [vmem:[%s5860_s1 + $0x6b4] ss:$8 sps:$4 sm:$0xff]  }
  0x15   : > { %2266 = vmatprep.subr.bf16.mxu0 %v3985_v17  ;;  %v4027_v45 = vld [vmem:[%s5860_s1 + $0x3b4] ss:$8 sps:$4 sm:$0xff]   ;;  %v4029_v46 = vld [vmem:[%s5860_s1 + $0x6b0] ss:$8 sps:$4 sm:$0xff]   ;;  %v198_v47 = vld [vmem:[%s4725_s10] sm:$0xff]  ;;  %vm3155_vm2 = vcmask 1043458  }
  0x16   : > { %v4030_v48 = vld [vmem:[%s5860_s1 + $0x3b0] ss:$8 sps:$4 sm:$0xff]   ;;  %v4740_v49 = vcombine.high %v198_v47, %v198_v47  ;;  %v4031_v50 = vld [vmem:[%s5860_s1 + $0x6c4] ss:$8 sps:$4 sm:$0xff]   ;;  %v4035_v55 = vld [vmem:[%s5860_s1 + $0x6c0] ss:$8 sps:$4 sm:$0xff]   ;;  %v4773_v63 = vcombine.low %v198_v47, %v198_v47 }
  0x17   : > { %910 = vmatpush1.bf16.msra.mxu1 %v3987_v18  ;;  %v4033_v51 = vld [vmem:[%s5860_s1 + $0x3c4] ss:$8 sps:$4 sm:$0xff]   ;;  %v4036_v56 = vld [vmem:[%s5860_s1 + $0x3c0] ss:$8 sps:$4 sm:$0xff]   ;;  %v4037_v58 = vld [vmem:[%s5860_s1 + $0x6d4] ss:$8 sps:$4 sm:$0xff]  }
  0x18   : > { %2267 = vmatpush1.bf16.msra.mxu0 %v3988_v19  ;;  %911 = vmatprep.subr.bf16.mxu1 %v3989_v20  ;;  %v410_v52 = vrot.slane %v4740_v49, 2  ;;  %v1738_v53 = vshrl.u32 %v4740_v49, 16  ;;  %v1740_v54 = vshll.u32 %v4740_v49, 16  ;;  %v4039_v59 = vld [vmem:[%s5860_s1 + $0x3d4] ss:$8 sps:$4 sm:$0xff]   ;;  %v1733_v4 = vshll.u32 %v4773_v63, 16 }
  0x19   : > { %2268 = vmatprep.subr.bf16.mxu0 %v3991_v21  ;;  %v4041_v61 = vld [vmem:[%s5860_s1 + $0x6d0] ss:$8 sps:$4 sm:$0xff]   ;;  %v4043_v0 = vld [vmem:[%s5860_s1 + $0x6e4] ss:$8 sps:$4 sm:$0xff]   ;;  %v4047_v2 = vld [vmem:[%s5860_s1 + $0x6e0] ss:$8 sps:$4 sm:$0xff]  }
  0x1a   : > { %933 = vmatprep.mubr.bf16.mxu1 %v410_v52  ;;  %v1742_v57 = vrot.slane %v1740_v54, 1  ;;  %v4042_v62 = vld [vmem:[%s5860_s1 + $0x3d0] ss:$8 sps:$4 sm:$0xff]   ;;  %v4045_v1 = vld [vmem:[%s5860_s1 + $0x3e4] ss:$8 sps:$4 sm:$0xff]   ;;  %v1731_v9 = vshrl.u32 %v4773_v63, 16 }
  0x1b   : > { %912 = vmatpush1.bf16.msra.mxu1 %v3993_v22  ;;  %v4048_v3 = vld [vmem:[%s5860_s1 + $0x3e0] ss:$8 sps:$4 sm:$0xff]   ;;  %v4049_v5 = vld [vmem:[%s5860_s1 + $0x6f4] ss:$8 sps:$4 sm:$0xff]   ;;  %v4053_v7 = vld [vmem:[%s5860_s1 + $0x6f0] ss:$8 sps:$4 sm:$0xff]  }
  0x1c   : > { %2269 = vmatpush1.bf16.msra.mxu0 %v3994_v23  ;;  %913 = vmatprep.subr.bf16.mxu1 %v3995_v24  ;;  %v1743_v60 = vor.u32 %v1742_v57, %v1738_v53  ;;  %v4051_v6 = vld [vmem:[%s5860_s1 + $0x3f4] ss:$8 sps:$4 sm:$0xff]   ;;  %v4054_v8 = vld [vmem:[%s5860_s1 + $0x3f0] ss:$8 sps:$4 sm:$0xff]   ;;  %v1735_v10 = vrot.slane %v1733_v4, 1  ;;  %v409_v15 = vrot.slane %v4773_v63, 2 }
  0x1d   : > { %2270 = vmatprep.subr.bf16.mxu0 %v3997_v25  ;;  %v4059_v11 = vld [vmem:[%s5860_s1 + $0x704] ss:$8 sps:$4 sm:$0xff]   ;;  %v4057_v13 = vld [vmem:[%s5860_s1 + $0x700] ss:$8 sps:$4 sm:$0xff]   ;;  %v4065_v17 = vld [vmem:[%s5860_s1 + $0x714] ss:$8 sps:$4 sm:$0xff]  }
  0x1e   : > { %2290 = vmatprep.mubr.bf16.mxu0 %v1743_v60  ;;  %v4062_v12 = vld [vmem:[%s5860_s1 + $0x404] ss:$8 sps:$4 sm:$0xff]   ;;  %v4060_v14 = vld [vmem:[%s5860_s1 + $0x400] ss:$8 sps:$4 sm:$0xff]   ;;  %v1736_v16 = vor.u32 %v1735_v10, %v1731_v9  ;;  %v4068_v18 = vld [vmem:[%s5860_s1 + $0x414] ss:$8 sps:$4 sm:$0xff]  }
  0x1f   : > { %914 = vmatpush1.bf16.msra.mxu1 %v3999_v26  ;;  %v4063_v19 = vld [vmem:[%s5860_s1 + $0x710] ss:$8 sps:$4 sm:$0xff]   ;;  %v4071_v21 = vld [vmem:[%s5860_s1 + $0x724] ss:$8 sps:$4 sm:$0xff]   ;;  %v4069_v23 = vld [vmem:[%s5860_s1 + $0x720] ss:$8 sps:$4 sm:$0xff]  }
  0x20   : > { %2271 = vmatpush1.bf16.msra.mxu0 %v4000_v27  ;;  %915 = vmatprep.subr.bf16.mxu1 %v4001_v28  ;;  %v4066_v20 = vld [vmem:[%s5860_s1 + $0x410] ss:$8 sps:$4 sm:$0xff]   ;;  %v4074_v22 = vld [vmem:[%s5860_s1 + $0x424] ss:$8 sps:$4 sm:$0xff]   ;;  %v4072_v24 = vld [vmem:[%s5860_s1 + $0x420] ss:$8 sps:$4 sm:$0xff]  }
  0x21   : > { %2272 = vmatprep.subr.bf16.mxu0 %v4003_v29  ;;  %v4077_v25 = vld [vmem:[%s5860_s1 + $0x734] ss:$8 sps:$4 sm:$0xff]   ;;  %v4075_v27 = vld [vmem:[%s5860_s1 + $0x730] ss:$8 sps:$4 sm:$0xff]   ;;  %v4083_v29 = vld [vmem:[%s5860_s1 + $0x744] ss:$8 sps:$4 sm:$0xff]  }
  0x22   : > { %v4080_v26 = vld [vmem:[%s5860_s1 + $0x434] ss:$8 sps:$4 sm:$0xff]   ;;  %v4078_v28 = vld [vmem:[%s5860_s1 + $0x430] ss:$8 sps:$4 sm:$0xff]   ;;  %v4107_v52 = vld [vmem:[%s5860_s1 + $0x784] ss:$8 sps:$4 sm:$0xff]  }
  0x23   : > { %916 = vmatpush1.bf16.msra.mxu1 %v4005_v30  ;;  %v4086_v30 = vld [vmem:[%s5860_s1 + $0x444] ss:$8 sps:$4 sm:$0xff]   ;;  %v4105_v57 = vld [vmem:[%s5860_s1 + $0x780] ss:$8 sps:$4 sm:$0xff]   ;;  %v4116_v60 = vld [vmem:[%s5860_s1 + $0x494] ss:$8 sps:$4 sm:$0xff]  }
  0x24   : > { %2273 = vmatpush1.bf16.msra.mxu0 %v4006_v31  ;;  %917 = vmatprep.subr.bf16.mxu1 %v4007_v32  ;;  %v4081_v31 = vld [vmem:[%s5860_s1 + $0x740] ss:$8 sps:$4 sm:$0xff]   ;;  %v4131_v10 = vld [vmem:[%s5860_s1 + $0x7c4] ss:$8 sps:$4 sm:$0xff]   ;;  %vm3153_vm1 = vsmask.f32 1280 }
  0x25   : > { %2274 = vmatprep.subr.bf16.mxu0 %v4009_v33  ;;  %v4084_v32 = vld [vmem:[%s5860_s1 + $0x440] ss:$8 sps:$4 sm:$0xff]   ;;  %v4089_v33 = vld [vmem:[%s5860_s1 + $0x754] ss:$8 sps:$4 sm:$0xff]   ;;  %vm3156_vm3 = vsmask.f32 3328  ;;  %vm3154_vm4 = vmand %vm3152_vm0, %vm3153_vm1 }
  0x26   : > { %vm3157_vm5 = vmand %vm3155_vm2, %vm3156_vm3 }
  0x27   : > { %918 = vmatpush1.bf16.msra.mxu1 %v4011_v34  ;;  %v4092_v34 = vld [vmem:[%s5860_s1 + $0x454] ss:$8 sps:$4 sm:$0xff]   ;;  %vm3158_vm6 = vmor %vm3157_vm5, %vm3154_vm4 }
  0x28   : > { %2275 = vmatpush1.bf16.msra.mxu0 %v4012_v35  ;;  %919 = vmatprep.subr.bf16.mxu1 %v4013_v36  ;;  %v4087_v35 = vld [vmem:[%s5860_s1 + $0x750] ss:$8 sps:$4 sm:$0xff]  }
  0x29   : > { %2276 = vmatprep.subr.bf16.mxu0 %v4015_v37  ;;  %v4090_v36 = vld [vmem:[%s5860_s1 + $0x450] ss:$8 sps:$4 sm:$0xff]   ;;  %v4095_v37 = vld [vmem:[%s5860_s1 + $0x764] ss:$8 sps:$4 sm:$0xff]  }
  0x2b   : > { %920 = vmatpush1.bf16.msra.mxu1 %v4017_v38  ;;  %v4098_v38 = vld [vmem:[%s5860_s1 + $0x464] ss:$8 sps:$4 sm:$0xff]  }
  0x2c   : > { %2277 = vmatpush1.bf16.msra.mxu0 %v4018_v39  ;;  %921 = vmatprep.subr.bf16.mxu1 %v4019_v40  ;;  %v4093_v39 = vld [vmem:[%s5860_s1 + $0x760] ss:$8 sps:$4 sm:$0xff]  }
  0x2d   : > { %2278 = vmatprep.subr.bf16.mxu0 %v4021_v41  ;;  %v4888_v40 = vld [vmem:[%s4725_s10 + $0x8] sm:$0xff] }
  0x2e   : > { %v4096_v41 = vld [vmem:[%s5860_s1 + $0x460] ss:$8 sps:$4 sm:$0xff]  }
  0x2f   : > { %922 = vmatpush1.bf16.msra.mxu1 %v4023_v42  ;;  %v4895_v42 = vcombine.high %v4888_v40, %v4888_v40 }
  0x30   : > { %2279 = vmatpush1.bf16.msra.mxu0 %v4024_v43  ;;  %923 = vmatprep.subr.bf16.mxu1 %v4025_v44  ;;  %v4101_v43 = vld [vmem:[%s5860_s1 + $0x774] ss:$8 sps:$4 sm:$0xff]  }
  0x31   : > { %2280 = vmatprep.subr.bf16.mxu0 %v4027_v45  ;;  %v4104_v44 = vld [vmem:[%s5860_s1 + $0x474] ss:$8 sps:$4 sm:$0xff]   ;;  %v412_v45 = vrot.slane %v4895_v42, 2  ;;  %v1754_v47 = vshll.u32 %v4895_v42, 16 }
  0x33   : > { %924 = vmatpush1.bf16.msra.mxu1 %v4029_v46  ;;  %v1752_v46 = vshrl.u32 %v4895_v42, 16 }
  0x34   : > { %2281 = vmatpush1.bf16.msra.mxu0 %v4030_v48  ;;  %925 = vmatprep.subr.bf16.mxu1 %v4031_v50  ;;  %v4099_v48 = vld [vmem:[%s5860_s1 + $0x770] ss:$8 sps:$4 sm:$0xff]   ;;  %v1756_v50 = vrot.slane %v1754_v47, 1 }
  0x35   : > { %2282 = vmatprep.subr.bf16.mxu0 %v4033_v51  ;;  %v4102_v51 = vld [vmem:[%s5860_s1 + $0x470] ss:$8 sps:$4 sm:$0xff]  }
  0x37   : > { %926 = vmatpush1.bf16.msra.mxu1 %v4035_v55  ;;  %v4110_v55 = vld [vmem:[%s5860_s1 + $0x484] ss:$8 sps:$4 sm:$0xff]  }
  0x38   : > { %2283 = vmatpush1.bf16.msra.mxu0 %v4036_v56  ;;  %927 = vmatprep.subr.bf16.mxu1 %v4037_v58  ;;  %v1757_v56 = vor.u32 %v1756_v50, %v1752_v46  ;;  %v4108_v58 = vld [vmem:[%s5860_s1 + $0x480] ss:$8 sps:$4 sm:$0xff]  }
  0x39   : > { %2284 = vmatprep.subr.bf16.mxu0 %v4039_v59  ;;  %v4113_v59 = vld [vmem:[%s5860_s1 + $0x794] ss:$8 sps:$4 sm:$0xff]  }
  0x3b   : > { %928 = vmatpush1.bf16.msra.mxu1 %v4041_v61  ;;  %v4111_v61 = vld [vmem:[%s5860_s1 + $0x790] ss:$8 sps:$4 sm:$0xff]  }
  0x3c   : > { %2285 = vmatpush1.bf16.msra.mxu0 %v4042_v62  ;;  %929 = vmatprep.subr.bf16.mxu1 %v4043_v0  ;;  %v4114_v62 = vld [vmem:[%s5860_s1 + $0x490] ss:$8 sps:$4 sm:$0xff]   ;;  %v4119_v0 = vld [vmem:[%s5860_s1 + $0x7a4] ss:$8 sps:$4 sm:$0xff]  }
  0x3d   : > { %2286 = vmatprep.subr.bf16.mxu0 %v4045_v1  ;;  %v4122_v1 = vld [vmem:[%s5860_s1 + $0x4a4] ss:$8 sps:$4 sm:$0xff]  }
  0x3f   : > { %930 = vmatpush1.bf16.msra.mxu1 %v4047_v2  ;;  %v4117_v2 = vld [vmem:[%s5860_s1 + $0x7a0] ss:$8 sps:$4 sm:$0xff]  }
  0x40   : > { %2287 = vmatpush1.bf16.msra.mxu0 %v4048_v3  ;;  %931 = vmatprep.subr.bf16.mxu1 %v4049_v5  ;;  %v4120_v3 = vld [vmem:[%s5860_s1 + $0x4a0] ss:$8 sps:$4 sm:$0xff]   ;;  %v4125_v5 = vld [vmem:[%s5860_s1 + $0x7b4] ss:$8 sps:$4 sm:$0xff]  }
  0x41   : > { %2288 = vmatprep.subr.bf16.mxu0 %v4051_v6  ;;  %v4128_v6 = vld [vmem:[%s5860_s1 + $0x4b4] ss:$8 sps:$4 sm:$0xff]  }
  0x43   : > { %932 = vmatpush1.bf16.msra.mxu1 %v4053_v7  ;;  %v4123_v7 = vld [vmem:[%s5860_s1 + $0x7b0] ss:$8 sps:$4 sm:$0xff]  }
  0x44   : > { %2289 = vmatpush1.bf16.msra.mxu0 %v4054_v8  ;;  %942 = vmatprep.subr.bf16.mxu1 %v4059_v11  ;;  %v4126_v8 = vld [vmem:[%s5860_s1 + $0x4b0] ss:$8 sps:$4 sm:$0xff]   ;;  %v4134_v11 = vld [vmem:[%s5860_s1 + $0x4c4] ss:$8 sps:$4 sm:$0xff]  }
  0x45   : > { %2299 = vmatprep.subr.bf16.mxu0 %v4062_v12  ;;  %v4129_v12 = vld [vmem:[%s5860_s1 + $0x7c0] ss:$8 sps:$4 sm:$0xff]  }
  0x46   : > { %934 = vmatmul.mubr.bf16.vlgmr.msra.gmra.mrb[0].mxu1 %v409_v15  ;;  %v4140_v15 = vld [vmem:[%s5860_s1 + $0x4d4] ss:$8 sps:$4 sm:$0xff]  }
  0x47   : > { %2291 = vmatmul.mubr.bf16.vlgmr.msra.gmra.mrb[0].mxu0 %v1736_v16  ;;  %943 = vmatpush1.bf16.msra.mxu1 %v4057_v13  ;;  %v4132_v13 = vld [vmem:[%s5860_s1 + $0x4c0] ss:$8 sps:$4 sm:$0xff]   ;;  %v4135_v16 = vld [vmem:[%s5860_s1 + $0x7d0] ss:$8 sps:$4 sm:$0xff]  }
  0x48   : > { %2300 = vmatpush1.bf16.msra.mxu0 %v4060_v14  ;;  %944 = vmatprep.subr.bf16.mxu1 %v4065_v17  ;;  %v4137_v14 = vld [vmem:[%s5860_s1 + $0x7d4] ss:$8 sps:$4 sm:$0xff]   ;;  %v4987_v17 = vcombine.low %v4888_v40, %v4888_v40  ;;  %v4164_v40 = vld [vmem:[%s5860_s1 + $0x510] ss:$8 sps:$4 sm:$0xff]  }
  0x49   : > { %2301 = vmatprep.subr.bf16.mxu0 %v4068_v18  ;;  %974 = vmatprep.mubr.bf16.mxu1 %v412_v45  ;;  %v4138_v18 = vld [vmem:[%s5860_s1 + $0x4d0] ss:$8 sps:$4 sm:$0xff]  }
  0x4a   : > { %2331 = vmatprep.mubr.bf16.mxu0 %v1757_v56  ;;  %v4175_v56 = vld [vmem:[%s5860_s1 + $0x834] ss:$8 sps:$4 sm:$0xff]  }
  0x4b   : > { %945 = vmatpush1.bf16.msra.mxu1 %v4063_v19  ;;  %v4143_v19 = vld [vmem:[%s5860_s1 + $0x7e4] ss:$8 sps:$4 sm:$0xff]  }
  0x4c   : > { %2302 = vmatpush1.bf16.msra.mxu0 %v4066_v20  ;;  %946 = vmatprep.subr.bf16.mxu1 %v4071_v21  ;;  %v4146_v20 = vld [vmem:[%s5860_s1 + $0x4e4] ss:$8 sps:$4 sm:$0xff]   ;;  %v4141_v21 = vld [vmem:[%s5860_s1 + $0x7e0] ss:$8 sps:$4 sm:$0xff]  }
  0x4d   : > { %2303 = vmatprep.subr.bf16.mxu0 %v4074_v22  ;;  %v1747_v22 = vshll.u32 %v4987_v17, 16 }
  0x4f   : > { %947 = vmatpush1.bf16.msra.mxu1 %v4069_v23  ;;  %v4144_v23 = vld [vmem:[%s5860_s1 + $0x4e0] ss:$8 sps:$4 sm:$0xff]  }
  0x50   : > { %2304 = vmatpush1.bf16.msra.mxu0 %v4072_v24  ;;  %948 = vmatprep.subr.bf16.mxu1 %v4077_v25  ;;  %v4149_v24 = vld [vmem:[%s5860_s1 + $0x7f4] ss:$8 sps:$4 sm:$0xff]  }
  0x51   : > { %2305 = vmatprep.subr.bf16.mxu0 %v4080_v26  ;;  %v4152_v25 = vld [vmem:[%s5860_s1 + $0x4f4] ss:$8 sps:$4 sm:$0xff]   ;;  %v4147_v26 = vld [vmem:[%s5860_s1 + $0x7f0] ss:$8 sps:$4 sm:$0xff]  }
  0x53   : > { %949 = vmatpush1.bf16.msra.mxu1 %v4075_v27  ;;  %v1745_v27 = vshrl.u32 %v4987_v17, 16 }
  0x54   : > { %2306 = vmatpush1.bf16.msra.mxu0 %v4078_v28  ;;  %950 = vmatprep.subr.bf16.mxu1 %v4083_v29  ;;  %v1749_v28 = vrot.slane %v1747_v22, 1  ;;  %v4150_v29 = vld [vmem:[%s5860_s1 + $0x4f0] ss:$8 sps:$4 sm:$0xff]  }
  0x55   : > { %2307 = vmatprep.subr.bf16.mxu0 %v4086_v30  ;;  %v4157_v30 = vld [vmem:[%s5860_s1 + $0x804] ss:$8 sps:$4 sm:$0xff]  }
  0x57   : > { %951 = vmatpush1.bf16.msra.mxu1 %v4081_v31  ;;  %v4160_v31 = vld [vmem:[%s5860_s1 + $0x504] ss:$8 sps:$4 sm:$0xff]  }
  0x58   : > { %2308 = vmatpush1.bf16.msra.mxu0 %v4084_v32  ;;  %952 = vmatprep.subr.bf16.mxu1 %v4089_v33  ;;  %v4155_v32 = vld [vmem:[%s5860_s1 + $0x800] ss:$8 sps:$4 sm:$0xff]   ;;  %v411_v33 = vrot.slane %v4987_v17, 2 }
  0x59   : > { %2309 = vmatprep.subr.bf16.mxu0 %v4092_v34  ;;  %v1750_v34 = vor.u32 %v1749_v28, %v1745_v27  ;;  %v4220_v28 = vld [vmem:[%s5860_s1 + $0x5a4] ss:$8 sps:$4 sm:$0xff]  }
  0x5b   : > { %953 = vmatpush1.bf16.msra.mxu1 %v4087_v35  ;;  %v4158_v35 = vld [vmem:[%s5860_s1 + $0x500] ss:$8 sps:$4 sm:$0xff]  }
  0x5c   : > { %2310 = vmatpush1.bf16.msra.mxu0 %v4090_v36  ;;  %954 = vmatprep.subr.bf16.mxu1 %v4095_v37  ;;  %v4163_v36 = vld [vmem:[%s5860_s1 + $0x814] ss:$8 sps:$4 sm:$0xff]  }
  0x5d   : > { %2311 = vmatprep.subr.bf16.mxu0 %v4098_v38  ;;  %v4166_v37 = vld [vmem:[%s5860_s1 + $0x514] ss:$8 sps:$4 sm:$0xff]  }
  0x5e   : > { %v5042_v38 = vld [vmem:[%s4725_s10 + $0x10] sm:$0xff] }
  0x5f   : > { %955 = vmatpush1.bf16.msra.mxu1 %v4093_v39  ;;  %v4161_v39 = vld [vmem:[%s5860_s1 + $0x810] ss:$8 sps:$4 sm:$0xff]  }
  0x60   : > { %2312 = vmatpush1.bf16.msra.mxu0 %v4096_v41  ;;  %956 = vmatprep.subr.bf16.mxu1 %v4101_v43  ;;  %v5052_v41 = vcombine.high %v5042_v38, %v5042_v38  ;;  %v4169_v43 = vld [vmem:[%s5860_s1 + $0x824] ss:$8 sps:$4 sm:$0xff]  }
  0x61   : > { %2313 = vmatprep.subr.bf16.mxu0 %v4104_v44  ;;  %v4172_v44 = vld [vmem:[%s5860_s1 + $0x524] ss:$8 sps:$4 sm:$0xff]  }
  0x62   : > { %v414_v45 = vrot.slane %v5052_v41, 2  ;;  %v1768_v50 = vshll.u32 %v5052_v41, 16 }
  0x63   : > { %957 = vmatpush1.bf16.msra.mxu1 %v4099_v48  ;;  %v1766_v48 = vshrl.u32 %v5052_v41, 16 }
  0x64   : > { %2314 = vmatpush1.bf16.msra.mxu0 %v4102_v51  ;;  %958 = vmatprep.subr.bf16.mxu1 %v4107_v52  ;;  %v1770_v51 = vrot.slane %v1768_v50, 1  ;;  %v4167_v52 = vld [vmem:[%s5860_s1 + $0x820] ss:$8 sps:$4 sm:$0xff]  }
  0x65   : > { %2315 = vmatprep.subr.bf16.mxu0 %v4110_v55  ;;  %v4170_v55 = vld [vmem:[%s5860_s1 + $0x520] ss:$8 sps:$4 sm:$0xff]  }
  0x67   : > { %959 = vmatpush1.bf16.msra.mxu1 %v4105_v57  ;;  %v4178_v57 = vld [vmem:[%s5860_s1 + $0x534] ss:$8 sps:$4 sm:$0xff]  }
  0x68   : > { %2316 = vmatpush1.bf16.msra.mxu0 %v4108_v58  ;;  %960 = vmatprep.subr.bf16.mxu1 %v4113_v59  ;;  %v1771_v58 = vor.u32 %v1770_v51, %v1766_v48  ;;  %v4173_v59 = vld [vmem:[%s5860_s1 + $0x830] ss:$8 sps:$4 sm:$0xff]  }
  0x69   : > { %2317 = vmatprep.subr.bf16.mxu0 %v4116_v60  ;;  %v4176_v60 = vld [vmem:[%s5860_s1 + $0x530] ss:$8 sps:$4 sm:$0xff]  }
  0x6a   : > { %v4236_v51 = vld [vmem:[%s5860_s1 + $0x5d0] ss:$8 sps:$4 sm:$0xff]  }
  0x6b   : > { %961 = vmatpush1.bf16.msra.mxu1 %v4111_v61  ;;  %v4181_v61 = vld [vmem:[%s5860_s1 + $0x844] ss:$8 sps:$4 sm:$0xff]  }
  0x6c   : > { %2318 = vmatpush1.bf16.msra.mxu0 %v4114_v62  ;;  %962 = vmatprep.subr.bf16.mxu1 %v4119_v0  ;;  %v4184_v62 = vld [vmem:[%s5860_s1 + $0x544] ss:$8 sps:$4 sm:$0xff]   ;;  %v4179_v0 = vld [vmem:[%s5860_s1 + $0x840] ss:$8 sps:$4 sm:$0xff]  }
  0x6d   : > { %2319 = vmatprep.subr.bf16.mxu0 %v4122_v1  ;;  %v4182_v1 = vld [vmem:[%s5860_s1 + $0x540] ss:$8 sps:$4 sm:$0xff]  }
  0x6f   : > { %963 = vmatpush1.bf16.msra.mxu1 %v4117_v2  ;;  %v4187_v2 = vld [vmem:[%s5860_s1 + $0x854] ss:$8 sps:$4 sm:$0xff]  }
  0x70   : > { %2320 = vmatpush1.bf16.msra.mxu0 %v4120_v3  ;;  %964 = vmatprep.subr.bf16.mxu1 %v4125_v5  ;;  %v4190_v3 = vld [vmem:[%s5860_s1 + $0x554] ss:$8 sps:$4 sm:$0xff]   ;;  %v4185_v5 = vld [vmem:[%s5860_s1 + $0x850] ss:$8 sps:$4 sm:$0xff]  }
  0x71   : > { %2321 = vmatprep.subr.bf16.mxu0 %v4128_v6  ;;  %v4188_v6 = vld [vmem:[%s5860_s1 + $0x550] ss:$8 sps:$4 sm:$0xff]  }
  0x73   : > { %965 = vmatpush1.bf16.msra.mxu1 %v4123_v7  ;;  %v4193_v7 = vld [vmem:[%s5860_s1 + $0x864] ss:$8 sps:$4 sm:$0xff]  }
  0x74   : > { %2322 = vmatpush1.bf16.msra.mxu0 %v4126_v8  ;;  %966 = vmatprep.subr.bf16.mxu1 %v4131_v10  ;;  %v4196_v8 = vld [vmem:[%s5860_s1 + $0x564] ss:$8 sps:$4 sm:$0xff]   ;;  %v4191_v10 = vld [vmem:[%s5860_s1 + $0x860] ss:$8 sps:$4 sm:$0xff]  }
  0x75   : > { %2323 = vmatprep.subr.bf16.mxu0 %v4134_v11  ;;  %v4194_v11 = vld [vmem:[%s5860_s1 + $0x560] ss:$8 sps:$4 sm:$0xff]  }
  0x77   : > { %967 = vmatpush1.bf16.msra.mxu1 %v4129_v12  ;;  %v4199_v12 = vld [vmem:[%s5860_s1 + $0x874] ss:$8 sps:$4 sm:$0xff]  }
  0x78   : > { %2324 = vmatpush1.bf16.msra.mxu0 %v4132_v13  ;;  %968 = vmatprep.subr.bf16.mxu1 %v4137_v14  ;;  %v4202_v13 = vld [vmem:[%s5860_s1 + $0x574] ss:$8 sps:$4 sm:$0xff]   ;;  %v4197_v14 = vld [vmem:[%s5860_s1 + $0x870] ss:$8 sps:$4 sm:$0xff]  }
  0x79   : > { %2325 = vmatprep.subr.bf16.mxu0 %v4140_v15  ;;  %v4200_v15 = vld [vmem:[%s5860_s1 + $0x570] ss:$8 sps:$4 sm:$0xff]  }
  0x7b   : > { %969 = vmatpush1.bf16.msra.mxu1 %v4135_v16  ;;  %v4205_v16 = vld [vmem:[%s5860_s1 + $0x884] ss:$8 sps:$4 sm:$0xff]  }
  0x7c   : > { %2326 = vmatpush1.bf16.msra.mxu0 %v4138_v18  ;;  %970 = vmatprep.subr.bf16.mxu1 %v4143_v19  ;;  %v4208_v18 = vld [vmem:[%s5860_s1 + $0x584] ss:$8 sps:$4 sm:$0xff]   ;;  %v4203_v19 = vld [vmem:[%s5860_s1 + $0x880] ss:$8 sps:$4 sm:$0xff]  }
  0x7d   : > { %2327 = vmatprep.subr.bf16.mxu0 %v4146_v20  ;;  %v4206_v20 = vld [vmem:[%s5860_s1 + $0x580] ss:$8 sps:$4 sm:$0xff]  }
  0x7f   : > { %971 = vmatpush1.bf16.msra.mxu1 %v4141_v21  ;;  %v4211_v21 = vld [vmem:[%s5860_s1 + $0x894] ss:$8 sps:$4 sm:$0xff]  }
  0x80   : > { %2328 = vmatpush1.bf16.msra.mxu0 %v4144_v23  ;;  %972 = vmatprep.subr.bf16.mxu1 %v4149_v24  ;;  %v4214_v23 = vld [vmem:[%s5860_s1 + $0x594] ss:$8 sps:$4 sm:$0xff]   ;;  %v4209_v24 = vld [vmem:[%s5860_s1 + $0x890] ss:$8 sps:$4 sm:$0xff]  }
  0x81   : > { %2329 = vmatprep.subr.bf16.mxu0 %v4152_v25  ;;  %v4212_v25 = vld [vmem:[%s5860_s1 + $0x590] ss:$8 sps:$4 sm:$0xff]  }
  0x83   : > { %973 = vmatpush1.bf16.msra.mxu1 %v4147_v26  ;;  %v4217_v26 = vld [vmem:[%s5860_s1 + $0x8a4] ss:$8 sps:$4 sm:$0xff]  }
  0x84   : > { %2330 = vmatpush1.bf16.msra.mxu0 %v4150_v29  ;;  %983 = vmatprep.subr.bf16.mxu1 %v4157_v30  ;;  %v4215_v29 = vld [vmem:[%s5860_s1 + $0x8a0] ss:$8 sps:$4 sm:$0xff]  }
  0x85   : > { %2340 = vmatprep.subr.bf16.mxu0 %v4160_v31  ;;  %v4218_v30 = vld [vmem:[%s5860_s1 + $0x5a0] ss:$8 sps:$4 sm:$0xff]   ;;  %v4223_v31 = vld [vmem:[%s5860_s1 + $0x8b4] ss:$8 sps:$4 sm:$0xff]  }
  0x86   : > { %975 = vmatmul.mubr.bf16.vlgmr.msra.gmra.mrb[0].mxu1 %v411_v33  ;;  %v4221_v33 = vld [vmem:[%s5860_s1 + $0x8b0] ss:$8 sps:$4 sm:$0xff]  }
  0x87   : > { %2332 = vmatmul.mubr.bf16.vlgmr.msra.gmra.mrb[0].mxu0 %v1750_v34  ;;  %984 = vmatpush1.bf16.msra.mxu1 %v4155_v32  ;;  %v4226_v32 = vld [vmem:[%s5860_s1 + $0x5b4] ss:$8 sps:$4 sm:$0xff]   ;;  %v4224_v34 = vld [vmem:[%s5860_s1 + $0x5b0] ss:$8 sps:$4 sm:$0xff]  }
  0x88   : > { %2341 = vmatpush1.bf16.msra.mxu0 %v4158_v35  ;;  %985 = vmatprep.subr.bf16.mxu1 %v4163_v36  ;;  %v4229_v35 = vld [vmem:[%s5860_s1 + $0x8c4] ss:$8 sps:$4 sm:$0xff]  }
  0x89   : > { %2342 = vmatprep.subr.bf16.mxu0 %v4166_v37  ;;  %1015 = vmatprep.mubr.bf16.mxu1 %v414_v45  ;;  %v4232_v36 = vld [vmem:[%s5860_s1 + $0x5c4] ss:$8 sps:$4 sm:$0xff]   ;;  %v4227_v37 = vld [vmem:[%s5860_s1 + $0x8c0] ss:$8 sps:$4 sm:$0xff]   ;;  %v4233_v45 = vld [vmem:[%s5860_s1 + $0x8d0] ss:$8 sps:$4 sm:$0xff]  }
  0x8a   : > { %2372 = vmatprep.mubr.bf16.mxu0 %v1771_v58  ;;  %v4247_v58 = vld [vmem:[%s5860_s1 + $0x8f4] ss:$8 sps:$4 sm:$0xff]  }
  0x8b   : > { %986 = vmatpush1.bf16.msra.mxu1 %v4161_v39  ;;  %v4230_v39 = vld [vmem:[%s5860_s1 + $0x5c0] ss:$8 sps:$4 sm:$0xff]  }
  0x8c   : > { %2343 = vmatpush1.bf16.msra.mxu0 %v4164_v40  ;;  %987 = vmatprep.subr.bf16.mxu1 %v4169_v43  ;;  %v4235_v40 = vld [vmem:[%s5860_s1 + $0x8d4] ss:$8 sps:$4 sm:$0xff]  }
  0x8d   : > { %2344 = vmatprep.subr.bf16.mxu0 %v4172_v44  ;;  %v4238_v43 = vld [vmem:[%s5860_s1 + $0x5d4] ss:$8 sps:$4 sm:$0xff]   ;;  %v5201_v44 = vcombine.low %v5042_v38, %v5042_v38  ;;  %v4244_v38 = vld [vmem:[%s5860_s1 + $0x5e4] ss:$8 sps:$4 sm:$0xff]  }
  0x8f   : > { %988 = vmatpush1.bf16.msra.mxu1 %v4167_v52  ;;  %v4241_v52 = vld [vmem:[%s5860_s1 + $0x8e4] ss:$8 sps:$4 sm:$0xff]  }
  0x90   : > { %2345 = vmatpush1.bf16.msra.mxu0 %v4170_v55  ;;  %989 = vmatprep.subr.bf16.mxu1 %v4175_v56  ;;  %v1761_v55 = vshll.u32 %v5201_v44, 16  ;;  %v4239_v56 = vld [vmem:[%s5860_s1 + $0x8e0] ss:$8 sps:$4 sm:$0xff]  }
  0x91   : > { %2346 = vmatprep.subr.bf16.mxu0 %v4178_v57  ;;  %v4242_v57 = vld [vmem:[%s5860_s1 + $0x5e0] ss:$8 sps:$4 sm:$0xff]  }
  0x93   : > { %990 = vmatpush1.bf16.msra.mxu1 %v4173_v59  ;;  %v4250_v59 = vld [vmem:[%s5860_s1 + $0x5f4] ss:$8 sps:$4 sm:$0xff]  }
  0x94   : > { %2347 = vmatpush1.bf16.msra.mxu0 %v4176_v60  ;;  %991 = vmatprep.subr.bf16.mxu1 %v4181_v61  ;;  %v1759_v60 = vshrl.u32 %v5201_v44, 16  ;;  %v1763_v61 = vrot.slane %v1761_v55, 1 }
  0x95   : > { %2348 = vmatprep.subr.bf16.mxu0 %v4184_v62  ;;  %v4245_v62 = vld [vmem:[%s5860_s1 + $0x8f0] ss:$8 sps:$4 sm:$0xff]  }
  0x97   : > { %992 = vmatpush1.bf16.msra.mxu1 %v4179_v0  ;;  %v4248_v0 = vld [vmem:[%s5860_s1 + $0x5f0] ss:$8 sps:$4 sm:$0xff]  }
  0x98   : > { %2349 = vmatpush1.bf16.msra.mxu0 %v4182_v1  ;;  %993 = vmatprep.subr.bf16.mxu1 %v4187_v2  ;;  %v4255_v1 = vld [vmem:[%s5860_s1 + $0x4] ss:$8 sps:$4 sm:$0xff]  }
  0x99   : > { %2350 = vmatprep.subr.bf16.mxu0 %v4190_v3  ;;  %v4258_v2 = vld [vmem:[%s5860_s1 + $0x904] ss:$8 sps:$4 sm:$0xff]   ;;  %v2483_v3 = vrot.slane %v1738_v53, 2  ;;  %v4261_v53 = vld [vmem:[%s5860_s1 + $0x14] ss:$8 sps:$4 sm:$0xff]  }
  0x9b   : > { %994 = vmatpush1.bf16.msra.mxu1 %v4185_v5  ;;  %v2484_v5 = vrot.slane %v1740_v54, 3  ;;  %v4264_v54 = vld [vmem:[%s5860_s1 + $0x914] ss:$8 sps:$4 sm:$0xff]  }
  0x9c   : > { %2351 = vmatpush1.bf16.msra.mxu0 %v4188_v6  ;;  %995 = vmatprep.subr.bf16.mxu1 %v4193_v7  ;;  %v413_v6 = vrot.slane %v5201_v44, 2  ;;  %v1764_v7 = vor.u32 %v1763_v61, %v1759_v60  ;;  %v4318_v61 = vld [vmem:[%s5860_s1 + $0x9a4] ss:$8 sps:$4 sm:$0xff]  }
  0x9d   : > { %2352 = vmatprep.subr.bf16.mxu0 %v4196_v8  ;;  %v4253_v8 = vld [vmem:[%s5860_s1] ss:$8 sps:$4 sm:$0xff]  }
  0x9f   : > { %996 = vmatpush1.bf16.msra.mxu1 %v4191_v10  ;;  %v4256_v10 = vld [vmem:[%s5860_s1 + $0x900] ss:$8 sps:$4 sm:$0xff]  }
  0xa0   : > { %2353 = vmatpush1.bf16.msra.mxu0 %v4194_v11  ;;  %997 = vmatprep.subr.bf16.mxu1 %v4199_v12  ;;  %v2485_v11 = vor.u32 %v2484_v5, %v2483_v3  ;;  %v4259_v12 = vld [vmem:[%s5860_s1 + $0x10] ss:$8 sps:$4 sm:$0xff]  }
  0xa1   : > { %2354 = vmatprep.subr.bf16.mxu0 %v4202_v13  ;;  %v4262_v13 = vld [vmem:[%s5860_s1 + $0x910] ss:$8 sps:$4 sm:$0xff]  }
  0xa2   : > { %v4319_v3 = vld [vmem:[%s5860_s1 + $0xb0] ss:$8 sps:$4 sm:$0xff]  }
  0xa3   : > { %998 = vmatpush1.bf16.msra.mxu1 %v4197_v14  ;;  %v4267_v14 = vld [vmem:[%s5860_s1 + $0x24] ss:$8 sps:$4 sm:$0xff]   ;;  %v4322_v5 = vld [vmem:[%s5860_s1 + $0x9b0] ss:$8 sps:$4 sm:$0xff]  }
  0xa4   : > { %2355 = vmatpush1.bf16.msra.mxu0 %v4200_v15  ;;  %999 = vmatprep.subr.bf16.mxu1 %v4205_v16  ;;  %v4270_v15 = vld [vmem:[%s5860_s1 + $0x924] ss:$8 sps:$4 sm:$0xff]   ;;  %v4265_v16 = vld [vmem:[%s5860_s1 + $0x20] ss:$8 sps:$4 sm:$0xff]  }
  0xa5   : > { %2356 = vmatprep.subr.bf16.mxu0 %v4208_v18  ;;  %v4268_v18 = vld [vmem:[%s5860_s1 + $0x920] ss:$8 sps:$4 sm:$0xff]  }
  0xa7   : > { %1000 = vmatpush1.bf16.msra.mxu1 %v4203_v19  ;;  %v4273_v19 = vld [vmem:[%s5860_s1 + $0x34] ss:$8 sps:$4 sm:$0xff]  }
  0xa8   : > { %2357 = vmatpush1.bf16.msra.mxu0 %v4206_v20  ;;  %1001 = vmatprep.subr.bf16.mxu1 %v4211_v21  ;;  %v4271_v20 = vld [vmem:[%s5860_s1 + $0x30] ss:$8 sps:$4 sm:$0xff]  }
  0xa9   : > { %2358 = vmatprep.subr.bf16.mxu0 %v4214_v23  ;;  %v4274_v21 = vld [vmem:[%s5860_s1 + $0x930] ss:$8 sps:$4 sm:$0xff]   ;;  %v4279_v23 = vld [vmem:[%s5860_s1 + $0x44] ss:$8 sps:$4 sm:$0xff]  }
  0xab   : > { %1002 = vmatpush1.bf16.msra.mxu1 %v4209_v24  ;;  %v4282_v24 = vld [vmem:[%s5860_s1 + $0x944] ss:$8 sps:$4 sm:$0xff]  }
  0xac   : > { %2359 = vmatpush1.bf16.msra.mxu0 %v4212_v25  ;;  %1003 = vmatprep.subr.bf16.mxu1 %v4217_v26  ;;  %v4277_v25 = vld [vmem:[%s5860_s1 + $0x40] ss:$8 sps:$4 sm:$0xff]  }
  0xad   : > { %2360 = vmatprep.subr.bf16.mxu0 %v4220_v28  ;;  %v4280_v26 = vld [vmem:[%s5860_s1 + $0x940] ss:$8 sps:$4 sm:$0xff]   ;;  %v4285_v28 = vld [vmem:[%s5860_s1 + $0x54] ss:$8 sps:$4 sm:$0xff]  }
  0xaf   : > { %1004 = vmatpush1.bf16.msra.mxu1 %v4215_v29  ;;  %v4288_v29 = vld [vmem:[%s5860_s1 + $0x954] ss:$8 sps:$4 sm:$0xff]  }
  0xb0   : > { %2361 = vmatpush1.bf16.msra.mxu0 %v4218_v30  ;;  %1005 = vmatprep.subr.bf16.mxu1 %v4223_v31  ;;  %v4283_v30 = vld [vmem:[%s5860_s1 + $0x50] ss:$8 sps:$4 sm:$0xff]  }
  0xb1   : > { %2362 = vmatprep.subr.bf16.mxu0 %v4226_v32  ;;  %v4286_v31 = vld [vmem:[%s5860_s1 + $0x950] ss:$8 sps:$4 sm:$0xff]   ;;  %v4291_v32 = vld [vmem:[%s5860_s1 + $0x64] ss:$8 sps:$4 sm:$0xff]  }
  0xb3   : > { %1006 = vmatpush1.bf16.msra.mxu1 %v4221_v33  ;;  %v4294_v33 = vld [vmem:[%s5860_s1 + $0x964] ss:$8 sps:$4 sm:$0xff]  }
  0xb4   : > { %2363 = vmatpush1.bf16.msra.mxu0 %v4224_v34  ;;  %1007 = vmatprep.subr.bf16.mxu1 %v4229_v35  ;;  %v4289_v34 = vld [vmem:[%s5860_s1 + $0x60] ss:$8 sps:$4 sm:$0xff]  }
  0xb5   : > { %2364 = vmatprep.subr.bf16.mxu0 %v4232_v36  ;;  %v4292_v35 = vld [vmem:[%s5860_s1 + $0x960] ss:$8 sps:$4 sm:$0xff]   ;;  %v4297_v36 = vld [vmem:[%s5860_s1 + $0x74] ss:$8 sps:$4 sm:$0xff]  }
  0xb7   : > { %1008 = vmatpush1.bf16.msra.mxu1 %v4227_v37  ;;  %v4300_v37 = vld [vmem:[%s5860_s1 + $0x974] ss:$8 sps:$4 sm:$0xff]  }
  0xb8   : > { %2365 = vmatpush1.bf16.msra.mxu0 %v4230_v39  ;;  %1009 = vmatprep.subr.bf16.mxu1 %v4235_v40  ;;  %v4295_v39 = vld [vmem:[%s5860_s1 + $0x70] ss:$8 sps:$4 sm:$0xff]  }
  0xb9   : > { %2366 = vmatprep.subr.bf16.mxu0 %v4238_v43  ;;  %v4298_v40 = vld [vmem:[%s5860_s1 + $0x970] ss:$8 sps:$4 sm:$0xff]   ;;  %v4303_v43 = vld [vmem:[%s5860_s1 + $0x84] ss:$8 sps:$4 sm:$0xff]  }
  0xbb   : > { %1010 = vmatpush1.bf16.msra.mxu1 %v4233_v45  ;;  %v4306_v45 = vld [vmem:[%s5860_s1 + $0x984] ss:$8 sps:$4 sm:$0xff]  }
  0xbc   : > { %2367 = vmatpush1.bf16.msra.mxu0 %v4236_v51  ;;  %1011 = vmatprep.subr.bf16.mxu1 %v4241_v52  ;;  %v4301_v51 = vld [vmem:[%s5860_s1 + $0x80] ss:$8 sps:$4 sm:$0xff]  }
  0xbd   : > { %2368 = vmatprep.subr.bf16.mxu0 %v4244_v38  ;;  %v4304_v52 = vld [vmem:[%s5860_s1 + $0x980] ss:$8 sps:$4 sm:$0xff]   ;;  %v4309_v38 = vld [vmem:[%s5860_s1 + $0x94] ss:$8 sps:$4 sm:$0xff]  }
  0xbf   : > { %1012 = vmatpush1.bf16.msra.mxu1 %v4239_v56  ;;  %v4312_v56 = vld [vmem:[%s5860_s1 + $0x994] ss:$8 sps:$4 sm:$0xff]  }
  0xc0   : > { %2369 = vmatpush1.bf16.msra.mxu0 %v4242_v57  ;;  %1013 = vmatprep.subr.bf16.mxu1 %v4247_v58  ;;  %v4307_v57 = vld [vmem:[%s5860_s1 + $0x90] ss:$8 sps:$4 sm:$0xff]  }
  0xc1   : > { %2370 = vmatprep.subr.bf16.mxu0 %v4250_v59  ;;  %v4310_v58 = vld [vmem:[%s5860_s1 + $0x990] ss:$8 sps:$4 sm:$0xff]   ;;  %v4315_v59 = vld [vmem:[%s5860_s1 + $0xa4] ss:$8 sps:$4 sm:$0xff]  }
  0xc3   : > { %1014 = vmatpush1.bf16.msra.mxu1 %v4245_v62  ;;  %v4313_v62 = vld [vmem:[%s5860_s1 + $0xa0] ss:$8 sps:$4 sm:$0xff]  }
  0xc4   : > { %2371 = vmatpush1.bf16.msra.mxu0 %v4248_v0  ;;  %1510 = vmatprep.subr.bf16.mxu1 %v4255_v1  ;;  %v4316_v0 = vld [vmem:[%s5860_s1 + $0x9a0] ss:$8 sps:$4 sm:$0xff]   ;;  %v4321_v1 = vld [vmem:[%s5860_s1 + $0xb4] ss:$8 sps:$4 sm:$0xff]  }
  0xc5   : > { %2984 = vmatprep.subr.bf16.mxu0 %v4258_v2  ;;  %v4324_v2 = vld [vmem:[%s5860_s1 + $0x9b4] ss:$8 sps:$4 sm:$0xff]  }
  0xc6   : > { %1016 = vmatmul.mubr.bf16.vlgmr.msra.gmra.mrb[0].mxu1 %v413_v6  ;;  %v4327_v6 = vld [vmem:[%s5860_s1 + $0xc4] ss:$8 sps:$4 sm:$0xff]  }
  0xc7   : > { %2373 = vmatmul.mubr.bf16.vlgmr.msra.gmra.mrb[0].mxu0 %v1764_v7  ;;  %1511 = vmatpush1.bf16.msra.mxu1 %v4253_v8  ;;  %v4330_v7 = vld [vmem:[%s5860_s1 + $0x9c4] ss:$8 sps:$4 sm:$0xff]   ;;  %v4325_v8 = vld [vmem:[%s5860_s1 + $0xc0] ss:$8 sps:$4 sm:$0xff]  }
  0xc8   : > { %2985 = vmatpush1.bf16.msra.mxu0 %v4256_v10  ;;  %1512 = vmatprep.subr.bf16.mxu1 %v4261_v53  ;;  %v4328_v10 = vld [vmem:[%s5860_s1 + $0x9c0] ss:$8 sps:$4 sm:$0xff]   ;;  %v4333_v53 = vld [vmem:[%s5860_s1 + $0xd4] ss:$8 sps:$4 sm:$0xff]  }
  0xc9   : > { %2986 = vmatprep.subr.bf16.mxu0 %v4264_v54  ;;  %1542 = vmatprep.mubr.bf16.mxu1 %v4740_v49  ;;  %v4276_v49 = vld [vmem:[%s5860_s1 + $0x934] ss:$8 sps:$4 sm:$0xff]  }
  0xca   : > { %3016 = vmatprep.mubr.bf16.mxu0 %v2485_v11  ;;  %v4336_v54 = vld [vmem:[%s5860_s1 + $0x9d4] ss:$8 sps:$4 sm:$0xff]   ;;  %v4331_v11 = vld [vmem:[%s5860_s1 + $0xd0] ss:$8 sps:$4 sm:$0xff]  }
  0xcb   : > { %1513 = vmatpush1.bf16.msra.mxu1 %v4259_v12  ;;  %v4334_v12 = vld [vmem:[%s5860_s1 + $0x9d0] ss:$8 sps:$4 sm:$0xff]  }
  0xcc   : > { %2987 = vmatpush1.bf16.msra.mxu0 %v4262_v13  ;;  %1514 = vmatprep.subr.bf16.mxu1 %v4267_v14  ;;  %v4339_v13 = vld [vmem:[%s5860_s1 + $0xe4] ss:$8 sps:$4 sm:$0xff]  }
  0xcd   : > { %2988 = vmatprep.subr.bf16.mxu0 %v4270_v15  ;;  %v4342_v14 = vld [vmem:[%s5860_s1 + $0x9e4] ss:$8 sps:$4 sm:$0xff]   ;;  %v4337_v15 = vld [vmem:[%s5860_s1 + $0xe0] ss:$8 sps:$4 sm:$0xff]  }
  0xcf   : > { %1515 = vmatpush1.bf16.msra.mxu1 %v4265_v16  ;;  %v4340_v16 = vld [vmem:[%s5860_s1 + $0x9e0] ss:$8 sps:$4 sm:$0xff]  }
  0xd0   : > { %2989 = vmatpush1.bf16.msra.mxu0 %v4268_v18  ;;  %1516 = vmatprep.subr.bf16.mxu1 %v4273_v19  ;;  %v4345_v18 = vld [vmem:[%s5860_s1 + $0xf4] ss:$8 sps:$4 sm:$0xff]  }
  0xd1   : > { %2990 = vmatprep.subr.bf16.mxu0 %v4276_v49  ;;  %v4348_v19 = vld [vmem:[%s5860_s1 + $0x9f4] ss:$8 sps:$4 sm:$0xff]   ;;  %v2480_v49 = vrot.slane %v1731_v9, 2  ;;  %v2489_v9 = vrot.slane %v1752_v46, 2 }
  0xd2   : > { %v4357_v46 = vld [vmem:[%s5860_s1 + $0x114] ss:$8 sps:$4 sm:$0xff]  }
  0xd3   : > { %1517 = vmatpush1.bf16.msra.mxu1 %v4271_v20  ;;  %v2481_v20 = vrot.slane %v1733_v4, 3  ;;  %v4354_v4 = vld [vmem:[%s5860_s1 + $0xa04] ss:$8 sps:$4 sm:$0xff]  }
  0xd4   : > { %2991 = vmatpush1.bf16.msra.mxu0 %v4274_v21  ;;  %1518 = vmatprep.subr.bf16.mxu1 %v4279_v23  ;;  %v4343_v21 = vld [vmem:[%s5860_s1 + $0xf0] ss:$8 sps:$4 sm:$0xff]  }
  0xd5   : > { %2992 = vmatprep.subr.bf16.mxu0 %v4282_v24  ;;  %v4346_v23 = vld [vmem:[%s5860_s1 + $0x9f0] ss:$8 sps:$4 sm:$0xff]   ;;  %v4351_v24 = vld [vmem:[%s5860_s1 + $0x104] ss:$8 sps:$4 sm:$0xff]  }
  0xd7   : > { %1519 = vmatpush1.bf16.msra.mxu1 %v4277_v25  ;;  %v2490_v25 = vrot.slane %v1754_v47, 3  ;;  %v4360_v47 = vld [vmem:[%s5860_s1 + $0xa14] ss:$8 sps:$4 sm:$0xff]  }
  0xd8   : > { %2993 = vmatpush1.bf16.msra.mxu0 %v4280_v26  ;;  %1520 = vmatprep.subr.bf16.mxu1 %v4285_v28  ;;  %v2482_v26 = vor.u32 %v2481_v20, %v2480_v49  ;;  %v4349_v28 = vld [vmem:[%s5860_s1 + $0x100] ss:$8 sps:$4 sm:$0xff]   ;;  %v4418_v49 = vld [vmem:[%s5860_s1 + $0xab0] ss:$8 sps:$4 sm:$0xff]   ;;  %v4423_v20 = vld [vmem:[%s5860_s1 + $0x1c4] ss:$8 sps:$4 sm:$0xff]  }
  0xd9   : > { %2994 = vmatprep.subr.bf16.mxu0 %v4288_v29  ;;  %v4352_v29 = vld [vmem:[%s5860_s1 + $0xa00] ss:$8 sps:$4 sm:$0xff]  }
  0xdb   : > { %1521 = vmatpush1.bf16.msra.mxu1 %v4283_v30  ;;  %v2491_v30 = vor.u32 %v2490_v25, %v2489_v9  ;;  %v4432_v9 = vld [vmem:[%s5860_s1 + $0xad4] ss:$8 sps:$4 sm:$0xff]   ;;  %v4427_v25 = vld [vmem:[%s5860_s1 + $0x1d0] ss:$8 sps:$4 sm:$0xff]  }
  0xdc   : > { %2995 = vmatpush1.bf16.msra.mxu0 %v4286_v31  ;;  %1522 = vmatprep.subr.bf16.mxu1 %v4291_v32  ;;  %v4355_v31 = vld [vmem:[%s5860_s1 + $0x110] ss:$8 sps:$4 sm:$0xff]  }
  0xdd   : > { %2996 = vmatprep.subr.bf16.mxu0 %v4294_v33  ;;  %v4358_v32 = vld [vmem:[%s5860_s1 + $0xa10] ss:$8 sps:$4 sm:$0xff]   ;;  %v4363_v33 = vld [vmem:[%s5860_s1 + $0x124] ss:$8 sps:$4 sm:$0xff]  }
  0xdf   : > { %1523 = vmatpush1.bf16.msra.mxu1 %v4289_v34  ;;  %v4361_v34 = vld [vmem:[%s5860_s1 + $0x120] ss:$8 sps:$4 sm:$0xff]  }
  0xe0   : > { %2997 = vmatpush1.bf16.msra.mxu0 %v4292_v35  ;;  %1524 = vmatprep.subr.bf16.mxu1 %v4297_v36  ;;  %v4364_v35 = vld [vmem:[%s5860_s1 + $0xa20] ss:$8 sps:$4 sm:$0xff]   ;;  %v4369_v36 = vld [vmem:[%s5860_s1 + $0x134] ss:$8 sps:$4 sm:$0xff]  }
  0xe1   : > { %2998 = vmatprep.subr.bf16.mxu0 %v4300_v37  ;;  %v4367_v37 = vld [vmem:[%s5860_s1 + $0x130] ss:$8 sps:$4 sm:$0xff]  }
  0xe3   : > { %1525 = vmatpush1.bf16.msra.mxu1 %v4295_v39  ;;  %v4370_v39 = vld [vmem:[%s5860_s1 + $0xa30] ss:$8 sps:$4 sm:$0xff]  }
  0xe4   : > { %2999 = vmatpush1.bf16.msra.mxu0 %v4298_v40  ;;  %1526 = vmatprep.subr.bf16.mxu1 %v4303_v43  ;;  %v4375_v40 = vld [vmem:[%s5860_s1 + $0x144] ss:$8 sps:$4 sm:$0xff]  }
  0xe5   : > { %3000 = vmatprep.subr.bf16.mxu0 %v4306_v45  ;;  %v4378_v43 = vld [vmem:[%s5860_s1 + $0xa44] ss:$8 sps:$4 sm:$0xff]   ;;  %v4373_v45 = vld [vmem:[%s5860_s1 + $0x140] ss:$8 sps:$4 sm:$0xff]  }
  0xe7   : > { %1527 = vmatpush1.bf16.msra.mxu1 %v4301_v51  ;;  %v4376_v51 = vld [vmem:[%s5860_s1 + $0xa40] ss:$8 sps:$4 sm:$0xff]  }
  0xe8   : > { %3001 = vmatpush1.bf16.msra.mxu0 %v4304_v52  ;;  %1528 = vmatprep.subr.bf16.mxu1 %v4309_v38  ;;  %v4381_v52 = vld [vmem:[%s5860_s1 + $0x154] ss:$8 sps:$4 sm:$0xff]  }
  0xe9   : > { %3002 = vmatprep.subr.bf16.mxu0 %v4312_v56  ;;  %v4384_v38 = vld [vmem:[%s5860_s1 + $0xa54] ss:$8 sps:$4 sm:$0xff]   ;;  %v4379_v56 = vld [vmem:[%s5860_s1 + $0x150] ss:$8 sps:$4 sm:$0xff]  }
  0xeb   : > { %1529 = vmatpush1.bf16.msra.mxu1 %v4307_v57  ;;  %v4382_v57 = vld [vmem:[%s5860_s1 + $0xa50] ss:$8 sps:$4 sm:$0xff]  }
  0xec   : > { %3003 = vmatpush1.bf16.msra.mxu0 %v4310_v58  ;;  %1530 = vmatprep.subr.bf16.mxu1 %v4315_v59  ;;  %v4387_v58 = vld [vmem:[%s5860_s1 + $0x164] ss:$8 sps:$4 sm:$0xff]  }
  0xed   : > { %3004 = vmatprep.subr.bf16.mxu0 %v4318_v61  ;;  %v4390_v59 = vld [vmem:[%s5860_s1 + $0xa64] ss:$8 sps:$4 sm:$0xff]   ;;  %v4385_v61 = vld [vmem:[%s5860_s1 + $0x160] ss:$8 sps:$4 sm:$0xff]  }
  0xef   : > { %1531 = vmatpush1.bf16.msra.mxu1 %v4313_v62  ;;  %v4388_v62 = vld [vmem:[%s5860_s1 + $0xa60] ss:$8 sps:$4 sm:$0xff]  }
  0xf0   : > { %3005 = vmatpush1.bf16.msra.mxu0 %v4316_v0  ;;  %1532 = vmatprep.subr.bf16.mxu1 %v4321_v1  ;;  %v4393_v0 = vld [vmem:[%s5860_s1 + $0x174] ss:$8 sps:$4 sm:$0xff]  }
  0xf1   : > { %3006 = vmatprep.subr.bf16.mxu0 %v4324_v2  ;;  %v4396_v1 = vld [vmem:[%s5860_s1 + $0xa74] ss:$8 sps:$4 sm:$0xff]   ;;  %v4391_v2 = vld [vmem:[%s5860_s1 + $0x170] ss:$8 sps:$4 sm:$0xff]  }
  0xf3   : > { %1533 = vmatpush1.bf16.msra.mxu1 %v4319_v3  ;;  %v4394_v3 = vld [vmem:[%s5860_s1 + $0xa70] ss:$8 sps:$4 sm:$0xff]  }
  0xf4   : > { %3007 = vmatpush1.bf16.msra.mxu0 %v4322_v5  ;;  %1534 = vmatprep.subr.bf16.mxu1 %v4327_v6  ;;  %v4399_v5 = vld [vmem:[%s5860_s1 + $0x184] ss:$8 sps:$4 sm:$0xff]  }
  0xf5   : > { %3008 = vmatprep.subr.bf16.mxu0 %v4330_v7  ;;  %v4402_v6 = vld [vmem:[%s5860_s1 + $0xa84] ss:$8 sps:$4 sm:$0xff]   ;;  %v4397_v7 = vld [vmem:[%s5860_s1 + $0x180] ss:$8 sps:$4 sm:$0xff]  }
  0xf7   : > { %1535 = vmatpush1.bf16.msra.mxu1 %v4325_v8  ;;  %v4400_v8 = vld [vmem:[%s5860_s1 + $0xa80] ss:$8 sps:$4 sm:$0xff]  }
  0xf8   : > { %3009 = vmatpush1.bf16.msra.mxu0 %v4328_v10  ;;  %1536 = vmatprep.subr.bf16.mxu1 %v4333_v53  ;;  %v4405_v10 = vld [vmem:[%s5860_s1 + $0x194] ss:$8 sps:$4 sm:$0xff]  }
  0xf9   : > { %3010 = vmatprep.subr.bf16.mxu0 %v4336_v54  ;;  %v4408_v53 = vld [vmem:[%s5860_s1 + $0xa94] ss:$8 sps:$4 sm:$0xff]   ;;  %v4403_v54 = vld [vmem:[%s5860_s1 + $0x190] ss:$8 sps:$4 sm:$0xff]  }
  0xfb   : > { %1537 = vmatpush1.bf16.msra.mxu1 %v4331_v11  ;;  %v4406_v11 = vld [vmem:[%s5860_s1 + $0xa90] ss:$8 sps:$4 sm:$0xff]  }
  0xfc   : > { %3011 = vmatpush1.bf16.msra.mxu0 %v4334_v12  ;;  %1538 = vmatprep.subr.bf16.mxu1 %v4339_v13  ;;  %v4411_v12 = vld [vmem:[%s5860_s1 + $0x1a4] ss:$8 sps:$4 sm:$0xff]  }
  0xfd   : > { %3012 = vmatprep.subr.bf16.mxu0 %v4342_v14  ;;  %v4414_v13 = vld [vmem:[%s5860_s1 + $0xaa4] ss:$8 sps:$4 sm:$0xff]   ;;  %v4409_v14 = vld [vmem:[%s5860_s1 + $0x1a0] ss:$8 sps:$4 sm:$0xff]  }
  0xff   : > { %1539 = vmatpush1.bf16.msra.mxu1 %v4337_v15  ;;  %v4412_v15 = vld [vmem:[%s5860_s1 + $0xaa0] ss:$8 sps:$4 sm:$0xff]  }
 0x100   : > { %3013 = vmatpush1.bf16.msra.mxu0 %v4340_v16  ;;  %1540 = vmatprep.subr.bf16.mxu1 %v4345_v18  ;;  %v4417_v16 = vld [vmem:[%s5860_s1 + $0x1b4] ss:$8 sps:$4 sm:$0xff]  }
 0x101   : > { %3014 = vmatprep.subr.bf16.mxu0 %v4348_v19  ;;  %v4420_v18 = vld [vmem:[%s5860_s1 + $0xab4] ss:$8 sps:$4 sm:$0xff]   ;;  %v4415_v19 = vld [vmem:[%s5860_s1 + $0x1b0] ss:$8 sps:$4 sm:$0xff]  }
 0x103   : > { %1541 = vmatpush1.bf16.msra.mxu1 %v4343_v21  ;;  %v4426_v21 = vld [vmem:[%s5860_s1 + $0xac4] ss:$8 sps:$4 sm:$0xff]  }
 0x104   : > { %3015 = vmatpush1.bf16.msra.mxu0 %v4346_v23  ;;  %1551 = vmatprep.subr.bf16.mxu1 %v4351_v24  ;;  %v4421_v23 = vld [vmem:[%s5860_s1 + $0x1c0] ss:$8 sps:$4 sm:$0xff]  }
 0x105   : > { %3025 = vmatprep.subr.bf16.mxu0 %v4354_v4  ;;  %v4424_v24 = vld [vmem:[%s5860_s1 + $0xac0] ss:$8 sps:$4 sm:$0xff]   ;;  %v4429_v4 = vld [vmem:[%s5860_s1 + $0x1d4] ss:$8 sps:$4 sm:$0xff]  }
 0x106   : > { %1543 = vmatmul.mubr.bf16.vlgmr.msra.gmra.mrb[0].mxu1 %v4773_v63  ;;  %v4366_v63 = vld [vmem:[%s5860_s1 + $0xa24] ss:$8 sps:$4 sm:$0xff]  }
 0x107   : > { %3017 = vmatmul.mubr.bf16.vlgmr.msra.gmra.mrb[0].mxu0 %v2482_v26  ;;  %1552 = vmatpush1.bf16.msra.mxu1 %v4349_v28  ;;  %v4430_v26 = vld [vmem:[%s5860_s1 + $0xad0] ss:$8 sps:$4 sm:$0xff]   ;;  %v4435_v28 = vld [vmem:[%s5860_s1 + $0x1e4] ss:$8 sps:$4 sm:$0xff]  }
 0x108   : > { %3026 = vmatpush1.bf16.msra.mxu0 %v4352_v29  ;;  %1553 = vmatprep.subr.bf16.mxu1 %v4357_v46  ;;  %v4438_v29 = vld [vmem:[%s5860_s1 + $0xae4] ss:$8 sps:$4 sm:$0xff]   ;;  %v4433_v46 = vld [vmem:[%s5860_s1 + $0x1e0] ss:$8 sps:$4 sm:$0xff]  }
 0x109   : > { %3027 = vmatprep.subr.bf16.mxu0 %v4360_v47  ;;  %1583 = vmatprep.mubr.bf16.mxu1 %v4895_v42  ;;  %v4372_v42 = vld [vmem:[%s5860_s1 + $0xa34] ss:$8 sps:$4 sm:$0xff]   ;;  %v4436_v47 = vld [vmem:[%s5860_s1 + $0xae0] ss:$8 sps:$4 sm:$0xff]  }
 0x10a   : > { %3057 = vmatprep.mubr.bf16.mxu0 %v2491_v30  ;;  %v4441_v30 = vld [vmem:[%s5860_s1 + $0x1f4] ss:$8 sps:$4 sm:$0xff]  }
 0x10b   : > { %1554 = vmatpush1.bf16.msra.mxu1 %v4355_v31  ;;  %v4444_v31 = vld [vmem:[%s5860_s1 + $0xaf4] ss:$8 sps:$4 sm:$0xff]  }
 0x10c   : > { %3028 = vmatpush1.bf16.msra.mxu0 %v4358_v32  ;;  %1555 = vmatprep.subr.bf16.mxu1 %v4363_v33  ;;  %v2486_v32 = vrot.slane %v1745_v27, 2  ;;  %v2487_v33 = vrot.slane %v1747_v22, 3  ;;  %v4450_v22 = vld [vmem:[%s5860_s1 + $0xb04] ss:$8 sps:$4 sm:$0xff]   ;;  %v2495_v27 = vrot.slane %v1766_v48, 2 }
 0x10d   : > { %3029 = vmatprep.subr.bf16.mxu0 %v4366_v63  ;;  %v4439_v63 = vld [vmem:[%s5860_s1 + $0x1f0] ss:$8 sps:$4 sm:$0xff]   ;;  %v4453_v48 = vld [vmem:[%s5860_s1 + $0x214] ss:$8 sps:$4 sm:$0xff]  }
 0x10f   : > { %1556 = vmatpush1.bf16.msra.mxu1 %v4361_v34  ;;  %v4442_v34 = vld [vmem:[%s5860_s1 + $0xaf0] ss:$8 sps:$4 sm:$0xff]  }
 0x110   : > { %3030 = vmatpush1.bf16.msra.mxu0 %v4364_v35  ;;  %1557 = vmatprep.subr.bf16.mxu1 %v4369_v36  ;;  %v4447_v35 = vld [vmem:[%s5860_s1 + $0x204] ss:$8 sps:$4 sm:$0xff]   ;;  %v2496_v36 = vrot.slane %v1768_v50, 3  ;;  %v4456_v50 = vld [vmem:[%s5860_s1 + $0xb14] ss:$8 sps:$4 sm:$0xff]  }
 0x111   : > { %3031 = vmatprep.subr.bf16.mxu0 %v4372_v42  ;;  %v2488_v42 = vor.u32 %v2487_v33, %v2486_v32  ;;  %v4528_v32 = vld [vmem:[%s5860_s1 + $0xbd4] ss:$8 sps:$4 sm:$0xff]   ;;  %v4523_v33 = vld [vmem:[%s5860_s1 + $0x2d0] ss:$8 sps:$4 sm:$0xff]  }
 0x113   : > { %1558 = vmatpush1.bf16.msra.mxu1 %v4367_v37  ;;  %v4445_v37 = vld [vmem:[%s5860_s1 + $0x200] ss:$8 sps:$4 sm:$0xff]  }
 0x114   : > { %3032 = vmatpush1.bf16.msra.mxu0 %v4370_v39  ;;  %1559 = vmatprep.subr.bf16.mxu1 %v4375_v40  ;;  %v4448_v39 = vld [vmem:[%s5860_s1 + $0xb00] ss:$8 sps:$4 sm:$0xff]   ;;  %v2497_v40 = vor.u32 %v2496_v36, %v2495_v27  ;;  %v4537_v36 = vld [vmem:[%s5860_s1 + $0x2f4] ss:$8 sps:$4 sm:$0xff]  }
 0x115   : > { %3033 = vmatprep.subr.bf16.mxu0 %v4378_v43  ;;  %v4451_v43 = vld [vmem:[%s5860_s1 + $0x210] ss:$8 sps:$4 sm:$0xff]   ;;  %v4532_v27 = vld [vmem:[%s5860_s1 + $0xbe0] ss:$8 sps:$4 sm:$0xff]  }
 0x117   : > { %1560 = vmatpush1.bf16.msra.mxu1 %v4373_v45  ;;  %v4454_v45 = vld [vmem:[%s5860_s1 + $0xb10] ss:$8 sps:$4 sm:$0xff]  }
 0x118   : > { %3034 = vmatpush1.bf16.msra.mxu0 %v4376_v51  ;;  %1561 = vmatprep.subr.bf16.mxu1 %v4381_v52  ;;  %v4459_v51 = vld [vmem:[%s5860_s1 + $0x224] ss:$8 sps:$4 sm:$0xff]   ;;  %v4457_v52 = vld [vmem:[%s5860_s1 + $0x220] ss:$8 sps:$4 sm:$0xff]  }
 0x119   : > { %3035 = vmatprep.subr.bf16.mxu0 %v4384_v38  ;;  %v4460_v38 = vld [vmem:[%s5860_s1 + $0xb20] ss:$8 sps:$4 sm:$0xff]  }
 0x11b   : > { %1562 = vmatpush1.bf16.msra.mxu1 %v4379_v56  ;;  %v4465_v56 = vld [vmem:[%s5860_s1 + $0x234] ss:$8 sps:$4 sm:$0xff]  }
 0x11c   : > { %3036 = vmatpush1.bf16.msra.mxu0 %v4382_v57  ;;  %1563 = vmatprep.subr.bf16.mxu1 %v4387_v58  ;;  %v4463_v57 = vld [vmem:[%s5860_s1 + $0x230] ss:$8 sps:$4 sm:$0xff]  }
 0x11d   : > { %3037 = vmatprep.subr.bf16.mxu0 %v4390_v59  ;;  %v4466_v58 = vld [vmem:[%s5860_s1 + $0xb30] ss:$8 sps:$4 sm:$0xff]   ;;  %v4471_v59 = vld [vmem:[%s5860_s1 + $0x244] ss:$8 sps:$4 sm:$0xff]  }
 0x11f   : > { %1564 = vmatpush1.bf16.msra.mxu1 %v4385_v61  ;;  %v4474_v61 = vld [vmem:[%s5860_s1 + $0xb44] ss:$8 sps:$4 sm:$0xff]  }
 0x120   : > { %3038 = vmatpush1.bf16.msra.mxu0 %v4388_v62  ;;  %1565 = vmatprep.subr.bf16.mxu1 %v4393_v0  ;;  %v4469_v62 = vld [vmem:[%s5860_s1 + $0x240] ss:$8 sps:$4 sm:$0xff]  }
 0x121   : > { %3039 = vmatprep.subr.bf16.mxu0 %v4396_v1  ;;  %v4472_v0 = vld [vmem:[%s5860_s1 + $0xb40] ss:$8 sps:$4 sm:$0xff]   ;;  %v4477_v1 = vld [vmem:[%s5860_s1 + $0x254] ss:$8 sps:$4 sm:$0xff]  }
 0x123   : > { %1566 = vmatpush1.bf16.msra.mxu1 %v4391_v2  ;;  %v4480_v2 = vld [vmem:[%s5860_s1 + $0xb54] ss:$8 sps:$4 sm:$0xff]  }
 0x124   : > { %3040 = vmatpush1.bf16.msra.mxu0 %v4394_v3  ;;  %1567 = vmatprep.subr.bf16.mxu1 %v4399_v5  ;;  %v4475_v3 = vld [vmem:[%s5860_s1 + $0x250] ss:$8 sps:$4 sm:$0xff]  }
 0x125   : > { %3041 = vmatprep.subr.bf16.mxu0 %v4402_v6  ;;  %v4478_v5 = vld [vmem:[%s5860_s1 + $0xb50] ss:$8 sps:$4 sm:$0xff]   ;;  %v4483_v6 = vld [vmem:[%s5860_s1 + $0x264] ss:$8 sps:$4 sm:$0xff]  }
 0x127   : > { %1568 = vmatpush1.bf16.msra.mxu1 %v4397_v7  ;;  %v4486_v7 = vld [vmem:[%s5860_s1 + $0xb64] ss:$8 sps:$4 sm:$0xff]  }
 0x128   : > { %3042 = vmatpush1.bf16.msra.mxu0 %v4400_v8  ;;  %1569 = vmatprep.subr.bf16.mxu1 %v4405_v10  ;;  %v4481_v8 = vld [vmem:[%s5860_s1 + $0x260] ss:$8 sps:$4 sm:$0xff]  }
 0x129   : > { %3043 = vmatprep.subr.bf16.mxu0 %v4408_v53  ;;  %v4484_v10 = vld [vmem:[%s5860_s1 + $0xb60] ss:$8 sps:$4 sm:$0xff]   ;;  %v4489_v53 = vld [vmem:[%s5860_s1 + $0x274] ss:$8 sps:$4 sm:$0xff]  }
 0x12b   : > { %1570 = vmatpush1.bf16.msra.mxu1 %v4403_v54  ;;  %v4492_v54 = vld [vmem:[%s5860_s1 + $0xb74] ss:$8 sps:$4 sm:$0xff]  }
 0x12c   : > { %3044 = vmatpush1.bf16.msra.mxu0 %v4406_v11  ;;  %1571 = vmatprep.subr.bf16.mxu1 %v4411_v12  ;;  %v4487_v11 = vld [vmem:[%s5860_s1 + $0x270] ss:$8 sps:$4 sm:$0xff]  }
 0x12d   : > { %3045 = vmatprep.subr.bf16.mxu0 %v4414_v13  ;;  %v4490_v12 = vld [vmem:[%s5860_s1 + $0xb70] ss:$8 sps:$4 sm:$0xff]   ;;  %v4495_v13 = vld [vmem:[%s5860_s1 + $0x284] ss:$8 sps:$4 sm:$0xff]  }
 0x12f   : > { %1572 = vmatpush1.bf16.msra.mxu1 %v4409_v14  ;;  %v4498_v14 = vld [vmem:[%s5860_s1 + $0xb84] ss:$8 sps:$4 sm:$0xff]  }
 0x130   : > { %3046 = vmatpush1.bf16.msra.mxu0 %v4412_v15  ;;  %1573 = vmatprep.subr.bf16.mxu1 %v4417_v16  ;;  %v4493_v15 = vld [vmem:[%s5860_s1 + $0x280] ss:$8 sps:$4 sm:$0xff]  }
 0x131   : > { %3047 = vmatprep.subr.bf16.mxu0 %v4420_v18  ;;  %v4496_v16 = vld [vmem:[%s5860_s1 + $0xb80] ss:$8 sps:$4 sm:$0xff]   ;;  %v4501_v18 = vld [vmem:[%s5860_s1 + $0x294] ss:$8 sps:$4 sm:$0xff]  }
 0x133   : > { %1574 = vmatpush1.bf16.msra.mxu1 %v4415_v19  ;;  %v4504_v19 = vld [vmem:[%s5860_s1 + $0xb94] ss:$8 sps:$4 sm:$0xff]  }
 0x134   : > { %3048 = vmatpush1.bf16.msra.mxu0 %v4418_v49  ;;  %1575 = vmatprep.subr.bf16.mxu1 %v4423_v20  ;;  %v4499_v49 = vld [vmem:[%s5860_s1 + $0x290] ss:$8 sps:$4 sm:$0xff]  }
 0x135   : > { %3049 = vmatprep.subr.bf16.mxu0 %v4426_v21  ;;  %v4502_v20 = vld [vmem:[%s5860_s1 + $0xb90] ss:$8 sps:$4 sm:$0xff]   ;;  %v4507_v21 = vld [vmem:[%s5860_s1 + $0x2a4] ss:$8 sps:$4 sm:$0xff]  }
 0x137   : > { %1576 = vmatpush1.bf16.msra.mxu1 %v4421_v23  ;;  %v4510_v23 = vld [vmem:[%s5860_s1 + $0xba4] ss:$8 sps:$4 sm:$0xff]  }
 0x138   : > { %3050 = vmatpush1.bf16.msra.mxu0 %v4424_v24  ;;  %1577 = vmatprep.subr.bf16.mxu1 %v4429_v4  ;;  %v4505_v24 = vld [vmem:[%s5860_s1 + $0x2a0] ss:$8 sps:$4 sm:$0xff]  }
 0x139   : > { %3051 = vmatprep.subr.bf16.mxu0 %v4432_v9  ;;  %v4508_v4 = vld [vmem:[%s5860_s1 + $0xba0] ss:$8 sps:$4 sm:$0xff]   ;;  %v4513_v9 = vld [vmem:[%s5860_s1 + $0x2b4] ss:$8 sps:$4 sm:$0xff]  }
 0x13b   : > { %1578 = vmatpush1.bf16.msra.mxu1 %v4427_v25  ;;  %v4516_v25 = vld [vmem:[%s5860_s1 + $0xbb4] ss:$8 sps:$4 sm:$0xff]  }
 0x13c   : > { %3052 = vmatpush1.bf16.msra.mxu0 %v4430_v26  ;;  %1579 = vmatprep.subr.bf16.mxu1 %v4435_v28  ;;  %v4511_v26 = vld [vmem:[%s5860_s1 + $0x2b0] ss:$8 sps:$4 sm:$0xff]  }
 0x13d   : > { %3053 = vmatprep.subr.bf16.mxu0 %v4438_v29  ;;  %v4514_v28 = vld [vmem:[%s5860_s1 + $0xbb0] ss:$8 sps:$4 sm:$0xff]   ;;  %v4519_v29 = vld [vmem:[%s5860_s1 + $0x2c4] ss:$8 sps:$4 sm:$0xff]  }
 0x13f   : > { %1580 = vmatpush1.bf16.msra.mxu1 %v4433_v46  ;;  %v4522_v46 = vld [vmem:[%s5860_s1 + $0xbc4] ss:$8 sps:$4 sm:$0xff]  }
 0x140   : > { %3054 = vmatpush1.bf16.msra.mxu0 %v4436_v47  ;;  %1581 = vmatprep.subr.bf16.mxu1 %v4441_v30  ;;  %v4517_v47 = vld [vmem:[%s5860_s1 + $0x2c0] ss:$8 sps:$4 sm:$0xff]  }
 0x141   : > { %3055 = vmatprep.subr.bf16.mxu0 %v4444_v31  ;;  %v4520_v30 = vld [vmem:[%s5860_s1 + $0xbc0] ss:$8 sps:$4 sm:$0xff]   ;;  %v4525_v31 = vld [vmem:[%s5860_s1 + $0x2d4] ss:$8 sps:$4 sm:$0xff]  }
 0x143   : > { %1582 = vmatpush1.bf16.msra.mxu1 %v4439_v63  ;;  %v4526_v63 = vld [vmem:[%s5860_s1 + $0xbd0] ss:$8 sps:$4 sm:$0xff]  }
 0x144   : > { %3056 = vmatpush1.bf16.msra.mxu0 %v4442_v34  ;;  %1592 = vmatprep.subr.bf16.mxu1 %v4447_v35  ;;  %v4531_v34 = vld [vmem:[%s5860_s1 + $0x2e4] ss:$8 sps:$4 sm:$0xff]  }
 0x145   : > { %3066 = vmatprep.subr.bf16.mxu0 %v4450_v22  ;;  %v4534_v35 = vld [vmem:[%s5860_s1 + $0xbe4] ss:$8 sps:$4 sm:$0xff]   ;;  %v4529_v22 = vld [vmem:[%s5860_s1 + $0x2e0] ss:$8 sps:$4 sm:$0xff]  }
 0x146   : > { %1584 = vmatmul.mubr.bf16.vlgmr.msra.gmra.mrb[0].mxu1 %v4987_v17  ;;  %v4462_v17 = vld [vmem:[%s5860_s1 + $0xb24] ss:$8 sps:$4 sm:$0xff]  }
 0x147   : > { %3058 = vmatmul.mubr.bf16.vlgmr.msra.gmra.mrb[0].mxu0 %v2488_v42  ;;  %1593 = vmatpush1.bf16.msra.mxu1 %v4445_v37  ;;  %v4540_v42 = vld [vmem:[%s5860_s1 + $0xbf4] ss:$8 sps:$4 sm:$0xff]   ;;  %v2492_v37 = vrot.slane %v1759_v60, 2  ;;  %v3111_v60 = vlaneseq }
 0x148   : > { %3067 = vmatpush1.bf16.msra.mxu0 %v4448_v39  ;;  %1594 = vmatprep.subr.bf16.mxu1 %v4453_v48  ;;  %v2493_v39 = vrot.slane %v1761_v55, 3  ;;  %v4535_v48 = vld [vmem:[%s5860_s1 + $0x2f0] ss:$8 sps:$4 sm:$0xff]  }
 0x149   : > { %3068 = vmatprep.subr.bf16.mxu0 %v4456_v50  ;;  %1624 = vmatprep.mubr.bf16.mxu1 %v5052_v41  ;;  %v4468_v41 = vld [vmem:[%s5860_s1 + $0xb34] ss:$8 sps:$4 sm:$0xff]   ;;  %v4538_v50 = vld [vmem:[%s5860_s1 + $0xbf0] ss:$8 sps:$4 sm:$0xff]   ;;  %v3112_v55 = vshrl.u32 %v3111_v60, 7 }
 0x14a   : > { %3098 = vmatprep.mubr.bf16.mxu0 %v2497_v40  ;;  %v2494_v40 = vor.u32 %v2493_v39, %v2492_v37 }
 0x14b   : > { %1595 = vmatpush1.bf16.msra.mxu1 %v4451_v43  ;;  %v3113_v43 = vsub.s32 0, %v3112_v55 }
 0x14c   : > { %3069 = vmatpush1.bf16.msra.mxu0 %v4454_v45  ;;  %1596 = vmatprep.subr.bf16.mxu1 %v4459_v51  ;;  %v3109_v45 = vld [vmem:[%s5861_s2] sm:$0x3]  ;;  %v3117_v51 = vsub.s32 1, %v3112_v55 }
 0x14d   : > { %3070 = vmatprep.subr.bf16.mxu0 %v4462_v17  ;;  %v3123_v17 = vld [vmem:[%s5862_s3] sm:$0x3] }
 0x14f   : > { %1597 = vmatpush1.bf16.msra.mxu1 %v4457_v52  ;;  %v3114_v52 = vrot.slane %v3109_v45, %v3113_v43 }
 0x150   : > { %3071 = vmatpush1.bf16.msra.mxu0 %v4460_v38  ;;  %1598 = vmatprep.subr.bf16.mxu1 %v4465_v56 }
 0x151   : > { %3072 = vmatprep.subr.bf16.mxu0 %v4468_v41  ;;  %v3118_v41 = vrot.slane %v3109_v45, %v3117_v51 }
 0x153   : > { %1599 = vmatpush1.bf16.msra.mxu1 %v4463_v57  ;;  %v4549_v57 = vmov 1983009808  }
 0x154   : > { %3073 = vmatpush1.bf16.msra.mxu0 %v4466_v58  ;;  %1600 = vmatprep.subr.bf16.mxu1 %v4471_v59  ;;  %v3145_v58 = vunpack.c.l.s4 %v4549_v57  ;;  %v3128_v59 = vrot.slane %v3123_v17, %v3113_v43 }
 0x155   : > { %3074 = vmatprep.subr.bf16.mxu0 %v4474_v61 }
 0x157   : > { %1601 = vmatpush1.bf16.msra.mxu1 %v4469_v62 }
 0x158   : > { %3075 = vmatpush1.bf16.msra.mxu0 %v4472_v0  ;;  %1602 = vmatprep.subr.bf16.mxu1 %v4477_v1  ;;  %v3132_v1 = vrot.slane %v3123_v17, %v3117_v51 }
 0x159   : > { %3076 = vmatprep.subr.bf16.mxu0 %v4480_v2 }
 0x15b   : > { %1603 = vmatpush1.bf16.msra.mxu1 %v4475_v3 }
 0x15c   : > { %3077 = vmatpush1.bf16.msra.mxu0 %v4478_v5  ;;  %1604 = vmatprep.subr.bf16.mxu1 %v4483_v6 }
 0x15d   : > { %3078 = vmatprep.subr.bf16.mxu0 %v4486_v7 }
 0x15f   : > { %1605 = vmatpush1.bf16.msra.mxu1 %v4481_v8 }
 0x160   : > { %3079 = vmatpush1.bf16.msra.mxu0 %v4484_v10  ;;  %1606 = vmatprep.subr.bf16.mxu1 %v4489_v53  ;;  %v3146_v10 = vunpack.c.0.s8 %v3145_v58 }
 0x161   : > { %3080 = vmatprep.subr.bf16.mxu0 %v4492_v54 }
 0x163   : > { %1607 = vmatpush1.bf16.msra.mxu1 %v4487_v11 }
 0x164   : > { %3081 = vmatpush1.bf16.msra.mxu0 %v4490_v12  ;;  %1608 = vmatprep.subr.bf16.mxu1 %v4495_v13  ;;  %v3149_v13 = vsub.s32 %v3146_v10, %v3112_v55 }
 0x165   : > { %3082 = vmatprep.subr.bf16.mxu0 %v4498_v14 }
 0x167   : > { %1609 = vmatpush1.bf16.msra.mxu1 %v4493_v15  ;;  %v3159_v15 = vld [vmem:[%s197_s9] sm:$0xf] }
 0x168   : > { %3083 = vmatpush1.bf16.msra.mxu0 %v4496_v16  ;;  %1610 = vmatprep.subr.bf16.mxu1 %v4501_v18 }
 0x169   : > { %3084 = vmatprep.subr.bf16.mxu0 %v4504_v19 }
 0x16b   : > { %1611 = vmatpush1.bf16.msra.mxu1 %v4499_v49 }
 0x16c   : > { %3085 = vmatpush1.bf16.msra.mxu0 %v4502_v20  ;;  %1612 = vmatprep.subr.bf16.mxu1 %v4507_v21 }
 0x16d   : > { %3086 = vmatprep.subr.bf16.mxu0 %v4510_v23 }
 0x16f   : > { %1613 = vmatpush1.bf16.msra.mxu1 %v4505_v24 }
 0x170   : > { %3087 = vmatpush1.bf16.msra.mxu0 %v4508_v4  ;;  %1614 = vmatprep.subr.bf16.mxu1 %v4513_v9 }
 0x171   : > { %3088 = vmatprep.subr.bf16.mxu0 %v4516_v25 }
 0x173   : > { %1615 = vmatpush1.bf16.msra.mxu1 %v4511_v26 }
 0x174   : > { %3089 = vmatpush1.bf16.msra.mxu0 %v4514_v28  ;;  %1616 = vmatprep.subr.bf16.mxu1 %v4519_v29 }
 0x175   : > { %3090 = vmatprep.subr.bf16.mxu0 %v4522_v46 }
 0x177   : > { %1617 = vmatpush1.bf16.msra.mxu1 %v4517_v47 }
 0x178   : > { %3091 = vmatpush1.bf16.msra.mxu0 %v4520_v30  ;;  %1618 = vmatprep.subr.bf16.mxu1 %v4525_v31 }
 0x179   : > { %3092 = vmatprep.subr.bf16.mxu0 %v4528_v32 }
 0x17b   : > { %1619 = vmatpush1.bf16.msra.mxu1 %v4523_v33 }
 0x17c   : > { %3093 = vmatpush1.bf16.msra.mxu0 %v4526_v63  ;;  %1620 = vmatprep.subr.bf16.mxu1 %v4531_v34 }
 0x17d   : > { %3094 = vmatprep.subr.bf16.mxu0 %v4534_v35 }
 0x17f   : > { %1621 = vmatpush1.bf16.msra.mxu1 %v4529_v22 }
 0x180   : > { %3095 = vmatpush1.bf16.msra.mxu0 %v4532_v27  ;;  %1622 = vmatprep.subr.bf16.mxu1 %v4537_v36 }
 0x181   : > { %3096 = vmatprep.subr.bf16.mxu0 %v4540_v42 }
 0x183   : > { %1623 = vmatpush1.bf16.msra.mxu1 %v4535_v48 }
 0x184   : > { %3097 = vmatpush1.bf16.msra.mxu0 %v4538_v50 }
 0x186   : > { %1625 = vmatmul.mubr.bf16.vlgmr.msra.gmra.mrb[0].mxu1 %v5201_v44 }
 0x187   : > { %3099 = vmatmul.mubr.bf16.vlgmr.msra.gmra.mrb[0].mxu0 %v2494_v40 }
 0x259   : > { %v1626_v38 = vpop.f32.mrb[0].mxu1 }
 0x25a   : > { %v3100_v56 = vpop.f32.mrb[0].mxu0  ;;  %v1628_v61 = vpop.f32.mrb[1].mxu1 }
 0x25b   : > { %v3907_v44 = vadd.f32 %v3100_v56, %v1626_v38  ;;  %v3102_v62 = vpop.f32.mrb[1].mxu0  ;;  %v1630_v2 = vpop.f32.mrb[2].mxu1 }
 0x25c   : > { %v3908_v0 = vadd.f32 %v3102_v62, %v1628_v61  ;;  %v3104_v3 = vpop.f32.mrb[2].mxu0  ;;  %v1631_v6 = vpop.f32.mrb[3].mxu1 }
 0x25d   : > { %v3121_v5 = vmul.f32 %v3907_v44, %v3114_v52  ;;  %v3105_v7 = vpop.f32.mrb[3].mxu0 }
 0x25e   : > { %v3122_v8 = vmul.f32 %v3908_v0, %v3118_v41 }
 0x25f   : > { %v3135_v53 = vadd.f32 %v3128_v59, %v3121_v5 }
 0x260   : > { %v3136_v54 = vadd.f32 %v3132_v1, %v3122_v8 }
 0x261   : > { %v3137_v11 = vmax.f32 %v3135_v53, 0.0 }
 0x262   : > { %v3138_v12 = vmax.f32 %v3136_v54, 0.0 }
 0x264   : > { %v3903_v14 = vpack.c.bf16 %v3138_v12, %v3137_v11 }
 0x266   : > { %v3150_v16 = vrot.slane %v3903_v14, %v3149_v13 }
 0x268   : > { %v3160_v18 = vsel %vm3158_vm6, %v3150_v16, %v3159_v15 }
 0x269   : > { %3161 = vst [vmem:[%s197_s9] sm:$0xf] %v3160_v18 }
 0x26a PF: > { %s14_s15 = sadd.s32 1, %s4547_s15  }
 0x26b   : > { %p11_p4 = scmp.ge.s32.totalorder %s14_s15, 4  }
 0x26d   :  { %13 = sbr.rel (!%p11_p4) target bundleno = 1 (0x1), region = 69 }

// kernel: stem_forward.3
= control target key start
LH: loop header
LB: loop body
LE: loop exit
PB: predicated region body
PF: predicated region fallthrough
CT: control target
= control target key end

     0   :  { %15 = vsyncpa [#allocation5], 0  ;;  %s13040_s0 = inlined_call_operand.vmem [shape: bf16[2,256,16], index: 0, kind: input, shape index: {}]   ;;  %s13041_s1 = inlined_call_operand.hbm [shape: bf16[4,16,128], index: 1, kind: input, shape index: {}]   ;;  %s13042_s2 = inlined_call_operand.hbm [shape: f32[1,128], index: 2, kind: input, shape index: {}]   ;;  %s13043_s3 = inlined_call_operand.hbm [shape: f32[1,128], index: 3, kind: input, shape index: {}]   ;;  %s13044_s4 = inlined_call_operand.hbm [shape: bf16[9,128,128], index: 4, kind: input, shape index: {}]   ;;  %s13045_s5 = inlined_call_operand.hbm [shape: f32[1,128], index: 5, kind: input, shape index: {}]   ;;  %s13046_s6 = inlined_call_operand.hbm [shape: f32[1,128], index: 6, kind: input, shape index: {}]   ;;  %s13047_s7 = inlined_call_operand.hbm [shape: bf16[9,128,128], index: 7, kind: input, shape index: {}]   ;;  %s13048_s8 = inlined_call_operand.hbm [shape: f32[1,128], index: 8, kind: input, shape index: {}]   ;;  %s13049_s9 = inlined_call_operand.hbm [shape: f32[1,128], index: 9, kind: input, shape index: {}]   ;;  %s13050_s10 = inlined_call_operand.vmem [shape: bf16[2,224,128], index: 10, kind: output, shape index: {}]  }
   0x1   :  { %16 = vsyncpa [#allocation7], 0 }
   0x2   :  { %17 = vsyncpa [#allocation10], 0 }
   0x3   :  { %18 = vsyncpa [#allocation13], 0 }
   0x4   :  { %19 = vsyncpa [#allocation16], 0  ;;  %s11049_s13 = smov 0  }
   0x5 LB: > { %s10980_s14 = smov [#allocation6]   ;;  %s11055_s16 = sadd.s32 4294967295, %s10978_s13   ;;  %s10978_s13 = sphi %s11049_s13, %s25_s13  }
   0x6   : > { %s297_s15 = sshll.u32 %s10980_s14, 4  ;;  %p7142_p0 = scmp.ge.s32.totalorder %s10978_s13, 1  ;;  %s11060_s15 = int_to_ptr.vmem [resolvable:$true] %s297_s15 }
   0x7   : > { %p271_p1 = scmp.lt.s32.totalorder %s10978_s13, 3  ;;  %p13051_p2 = scmp.eq.s32.totalorder %s11055_s16, 0 }
   0x8   : > { %s10981_s18 = smov [#allocation9]   ;;  %s10982_s21 = smov [#allocation12]  }
   0x9   : > { %p11062_p3 = pnand %p7142_p0, %p271_p1  ;;  %s318_s19 = sshll.u32 %s10981_s18, 4  ;;  %s11068_s19 = int_to_ptr.vmem [resolvable:$true] %s318_s19 }
   0xa   : > { %s343_s22 = sshll.u32 %s10982_s21, 4  ;;  %s10983_s23 = smov [#allocation15]   ;;  %s11076_s22 = int_to_ptr.vmem [resolvable:$true] %s343_s22 }
   0xb   : > { %s13053_s17 = scalar_select %p11062_p3, 1, 0 }
   0xc   : > { %p10455_p4 = pneg %p11062_p3  ;;  %s11078_s24 = sshll.u32 %s10983_s23, 4  ;;  %s368_s24 = int_to_ptr.vmem [resolvable:$true] %s11078_s24 }
   0xd   : > { %s10700_s27 = scalar_lea.hbm %s13042_s2, 16 }
   0xe   : > { %p11072_p5 = pnand %p13051_p2, %p10455_p4  ;;  %p10701_p6 = scmp.ne.s32.totalorder %s13042_s2, %s10700_s27 }
   0xf   : > { %p10707_p10 = scmp.lt.u32.totalorder %s10700_s27, %s13042_s2 }
  0x10   : > { %p11088_p7 = pneg %p11072_p5 }
  0x12   : > { %p10703_p8 = pnand %p11088_p7, %p10701_p6 }
  0x14   : > { %p10704_p9 = pneg %p10703_p8 }
  0x16   : > { %p10709_p11 = pnand %p10707_p10, %p10704_p9 }
  0x18   : > { %10712 = shalt.err (!%p10709_p11)
}
  0x19   : > { %s10713_s14 = scalar_lea.vmem %s11060_s15, 16  ;;  %s10720_s18 = scalar_lea.vmem %s11060_s15, 32 }
  0x1a   : > { %p10714_p12 = scmp.ne.s32.totalorder %s11060_s15, %s10713_s14  ;;  %p10721_p1 = scmp.lt.s32.totalorder %s11060_s15, %s11060_s15 }
  0x1b   : > { %p10722_p4 = scmp.lt.s32.totalorder %s10720_s18, %s10713_s14 }
  0x1c   : > { %p10716_p13 = pnand %p10714_p12, %p11088_p7 }
  0x1d   : > { %p10723_p6 = por %p10722_p4, %p10721_p1 }
  0x1e   : > { %p10717_p0 = pneg %p10716_p13 }
  0x20   : > { %p10724_p8 = pnand %p10723_p6, %p10717_p0 }
  0x22   : > { %10727 = shalt.err (!%p10724_p8)
}
  0x23   : > { %10461 = dma.hbm_to_vmem [thread:$0]  (!%p11072_p5), %s13042_s2, 16, %s11060_s15, [#allocation7]  }
  0x24   : > { %s10728_s27 = scalar_lea.hbm %s13044_s4, 9216 }
  0x25   : > { %p10729_p9 = scmp.ne.s32.totalorder %s13044_s4, %s10728_s27  ;;  %p10735_p12 = scmp.lt.u32.totalorder %s10728_s27, %s13044_s4 }
  0x27   : > { %p10731_p10 = pnand %p10729_p9, %p11088_p7 }
  0x29   : > { %p10732_p11 = pneg %p10731_p10 }
  0x2b   : > { %p10737_p13 = pnand %p10735_p12, %p10732_p11 }
  0x2d   : > { %10740 = shalt.err (!%p10737_p13)
}
  0x2e   : > { %s10741_s15 = scalar_lea.vmem %s11068_s19, 9216  ;;  %p10749_p6 = scmp.lt.s32.totalorder %s11068_s19, %s11068_s19 }
  0x2f   : > { %p10742_p0 = scmp.ne.s32.totalorder %s11068_s19, %s10741_s15  ;;  %p10750_p8 = scmp.lt.s32.totalorder %s10741_s15, %s10741_s15 }
  0x31   : > { %p10744_p1 = pnand %p10742_p0, %p11088_p7  ;;  %p10751_p9 = por %p10750_p8, %p10749_p6 }
  0x33   : > { %p10745_p4 = pneg %p10744_p1 }
  0x35   : > { %p10752_p10 = pnand %p10751_p9, %p10745_p4 }
  0x37   : > { %10755 = shalt.err (!%p10752_p10)
}
  0x38   : > { %s10984_s14 = smov 64   ;;  %s10985_s18 = smov 4  }
  0x39   : > { %10467 = dma.hbm_to_vmem [thread:$0]  (!%p11072_p5), %s13044_s4, 9216, %s11068_s19, [#allocation10], %s10984_s14, %s10984_s14, %s10985_s18  }
  0x3a   : > { %s10756_s27 = scalar_lea.hbm %s13046_s6, 16 }
  0x3b   : > { %p10757_p11 = scmp.ne.s32.totalorder %s13046_s6, %s10756_s27  ;;  %p10763_p0 = scmp.lt.u32.totalorder %s10756_s27, %s13046_s6 }
  0x3d   : > { %p10759_p12 = pnand %p10757_p11, %p11088_p7 }
  0x3f   : > { %p10760_p13 = pneg %p10759_p12 }
  0x41   : > { %p10765_p1 = pnand %p10763_p0, %p10760_p13 }
  0x43   : > { %10768 = shalt.err (!%p10765_p1)
}
  0x44   : > { %s10769_s19 = scalar_lea.vmem %s11076_s22, 16  ;;  %s10776_s15 = scalar_lea.vmem %s11076_s22, 32 }
  0x45   : > { %p10770_p4 = scmp.ne.s32.totalorder %s11076_s22, %s10769_s19  ;;  %p10777_p9 = scmp.lt.s32.totalorder %s11076_s22, %s11076_s22 }
  0x46   : > { %p10778_p10 = scmp.lt.s32.totalorder %s10776_s15, %s10769_s19 }
  0x47   : > { %p10772_p6 = pnand %p10770_p4, %p11088_p7 }
  0x48   : > { %p10779_p11 = por %p10778_p10, %p10777_p9 }
  0x49   : > { %p10773_p8 = pneg %p10772_p6 }
  0x4b   : > { %p10780_p12 = pnand %p10779_p11, %p10773_p8 }
  0x4d   : > { %10783 = shalt.err (!%p10780_p12)
}
  0x4e   : > { %10473 = dma.hbm_to_vmem [thread:$0]  (!%p11072_p5), %s13046_s6, 16, %s11076_s22, [#allocation13]  }
  0x4f   : > { %s10784_s27 = scalar_lea.hbm %s13048_s8, 16 }
  0x50   : > { %p10785_p13 = scmp.ne.s32.totalorder %s13048_s8, %s10784_s27  ;;  %p10791_p4 = scmp.lt.u32.totalorder %s10784_s27, %s13048_s8 }
  0x52   : > { %p10787_p0 = pnand %p10785_p13, %p11088_p7 }
  0x54   : > { %p10788_p1 = pneg %p10787_p0 }
  0x56   : > { %p10793_p6 = pnand %p10791_p4, %p10788_p1 }
  0x58   : > { %10796 = shalt.err (!%p10793_p6)
}
  0x59   : > { %s10797_s19 = scalar_lea.vmem %s368_s24, 16  ;;  %s10804_s22 = scalar_lea.vmem %s368_s24, 32 }
  0x5a   : > { %p10798_p8 = scmp.ne.s32.totalorder %s368_s24, %s10797_s19  ;;  %p10805_p11 = scmp.lt.s32.totalorder %s368_s24, %s368_s24 }
  0x5b   : > { %p10806_p12 = scmp.lt.s32.totalorder %s10804_s22, %s10797_s19 }
  0x5c   : > { %p10800_p9 = pnand %p10798_p8, %p11088_p7 }
  0x5d   : > { %p10807_p2 = por %p10806_p12, %p10805_p11 }
  0x5e   : > { %p10801_p10 = pneg %p10800_p9 }
  0x60   : > { %p10808_p3 = pnand %p10807_p2, %p10801_p10 }
  0x62   : > { %10811 = shalt.err (!%p10808_p3)
}
  0x63   : > { %10479 = dma.hbm_to_vmem [thread:$0]  (!%p11072_p5), %s13048_s8, 16, %s368_s24, [#allocation16]  }
  0x64   : > { %s10986_s23 = smov [#allocation4]   ;;  %s10987_s26 = smov [#allocation8]  }
  0x65   : > { %s283_s25 = sshll.u32 %s10986_s23, 4  ;;  %s308_s27 = sshll.u32 %s10987_s26, 4  ;;  %s284_s25 = int_to_ptr.vmem [resolvable:$true] %s283_s25  ;;  %s309_s27 = int_to_ptr.vmem [resolvable:$true] %s308_s27 }
  0x66   : > { %s10812_s11 = scalar_lea.hbm %s13041_s1, 512 }
  0x67   : > { %p10813_p2 = scmp.ne.s32.totalorder %s13041_s1, %s10812_s11  ;;  %p10819_p0 = scmp.lt.u32.totalorder %s10812_s11, %s13041_s1 }
  0x69   : > { %p10815_p3 = pnand %p10813_p2, %p11088_p7 }
  0x6b   : > { %p10816_p13 = pneg %p10815_p3 }
  0x6d   : > { %p10821_p1 = pnand %p10819_p0, %p10816_p13 }
  0x6f   : > { %10824 = shalt.err (!%p10821_p1)
}
  0x70   : > { %s10825_s24 = scalar_lea.vmem %s284_s25, 512  ;;  %p10833_p9 = scmp.lt.s32.totalorder %s284_s25, %s284_s25 }
  0x71   : > { %p10826_p4 = scmp.ne.s32.totalorder %s284_s25, %s10825_s24  ;;  %p10834_p10 = scmp.lt.s32.totalorder %s10825_s24, %s10825_s24 }
  0x73   : > { %p10828_p6 = pnand %p10826_p4, %p11088_p7  ;;  %p10835_p11 = por %p10834_p10, %p10833_p9 }
  0x75   : > { %p10829_p8 = pneg %p10828_p6 }
  0x77   : > { %p10836_p12 = pnand %p10835_p11, %p10829_p8 }
  0x79   : > { %10839 = shalt.err (!%p10836_p12)
}
  0x7a   : > { %10458 = dma.hbm_to_vmem [thread:$0]  (!%p11072_p5), %s13041_s1, 512, %s284_s25, [#allocation5], %s10984_s14, %s10984_s14, %s10985_s18  }
  0x7b   : > { %s10840_s29 = scalar_lea.hbm %s13043_s3, 16 }
  0x7c   : > { %p10841_p2 = scmp.ne.s32.totalorder %s13043_s3, %s10840_s29  ;;  %p10847_p0 = scmp.lt.u32.totalorder %s10840_s29, %s13043_s3 }
  0x7e   : > { %p10843_p3 = pnand %p10841_p2, %p11088_p7 }
  0x80   : > { %p10844_p13 = pneg %p10843_p3 }
  0x82   : > { %p10849_p1 = pnand %p10847_p0, %p10844_p13 }
  0x84   : > { %10852 = shalt.err (!%p10849_p1)
}
  0x85   : > { %s10853_s15 = scalar_lea.vmem %s309_s27, 16  ;;  %s10860_s25 = scalar_lea.vmem %s309_s27, 32 }
  0x86   : > { %p10854_p4 = scmp.ne.s32.totalorder %s309_s27, %s10853_s15  ;;  %p10861_p9 = scmp.lt.s32.totalorder %s309_s27, %s309_s27 }
  0x87   : > { %p10862_p10 = scmp.lt.s32.totalorder %s10860_s25, %s10853_s15 }
  0x88   : > { %p10856_p6 = pnand %p10854_p4, %p11088_p7 }
  0x89   : > { %p10863_p11 = por %p10862_p10, %p10861_p9 }
  0x8a   : > { %p10857_p8 = pneg %p10856_p6 }
  0x8c   : > { %p10864_p12 = pnand %p10863_p11, %p10857_p8 }
  0x8e   : > { %10867 = shalt.err (!%p10864_p12)
}
  0x8f   : > { %10464 = dma.hbm_to_vmem [thread:$0]  (!%p11072_p5), %s13043_s3, 16, %s309_s27, [#allocation7]  }
  0x90   : > { %s10988_s23 = smov [#allocation11]   ;;  %s10989_s28 = smov [#allocation14]  }
  0x91   : > { %s332_s26 = sshll.u32 %s10988_s23, 4  ;;  %s353_s29 = sshll.u32 %s10989_s28, 4  ;;  %s333_s26 = int_to_ptr.vmem [resolvable:$true] %s332_s26  ;;  %s354_s29 = int_to_ptr.vmem [resolvable:$true] %s353_s29 }
  0x92   : > { %s10868_s19 = scalar_lea.hbm %s13045_s5, 16 }
  0x93   : > { %p10869_p2 = scmp.ne.s32.totalorder %s13045_s5, %s10868_s19  ;;  %p10875_p0 = scmp.lt.u32.totalorder %s10868_s19, %s13045_s5 }
  0x95   : > { %p10871_p3 = pnand %p10869_p2, %p11088_p7 }
  0x97   : > { %p10872_p13 = pneg %p10871_p3 }
  0x99   : > { %p10877_p1 = pnand %p10875_p0, %p10872_p13 }
  0x9b   : > { %10880 = shalt.err (!%p10877_p1)
}
  0x9c   : > { %s10881_s27 = scalar_lea.vmem %s333_s26, 16  ;;  %s10888_s21 = scalar_lea.vmem %s333_s26, 32 }
  0x9d   : > { %p10882_p4 = scmp.ne.s32.totalorder %s333_s26, %s10881_s27  ;;  %p10889_p9 = scmp.lt.s32.totalorder %s333_s26, %s333_s26 }
  0x9e   : > { %p10890_p10 = scmp.lt.s32.totalorder %s10888_s21, %s10881_s27 }
  0x9f   : > { %p10884_p6 = pnand %p10882_p4, %p11088_p7 }
  0xa0   : > { %p10891_p11 = por %p10890_p10, %p10889_p9 }
  0xa1   : > { %p10885_p8 = pneg %p10884_p6 }
  0xa3   : > { %p10892_p12 = pnand %p10891_p11, %p10885_p8 }
  0xa5   : > { %10895 = shalt.err (!%p10892_p12)
}
  0xa6   : > { %10470 = dma.hbm_to_vmem [thread:$0]  (!%p11072_p5), %s13045_s5, 16, %s333_s26, [#allocation10]  }
  0xa7   : > { %s10896_s19 = scalar_lea.hbm %s13047_s7, 9216 }
  0xa8   : > { %p10897_p2 = scmp.ne.s32.totalorder %s13047_s7, %s10896_s19  ;;  %p10903_p0 = scmp.lt.u32.totalorder %s10896_s19, %s13047_s7 }
  0xaa   : > { %p10899_p3 = pnand %p10897_p2, %p11088_p7 }
  0xac   : > { %p10900_p13 = pneg %p10899_p3 }
  0xae   : > { %p10905_p1 = pnand %p10903_p0, %p10900_p13 }
  0xb0   : > { %10908 = shalt.err (!%p10905_p1)
}
  0xb1   : > { %s10909_s27 = scalar_lea.vmem %s354_s29, 9216  ;;  %p10917_p9 = scmp.lt.s32.totalorder %s354_s29, %s354_s29 }
  0xb2   : > { %p10910_p4 = scmp.ne.s32.totalorder %s354_s29, %s10909_s27  ;;  %p10918_p10 = scmp.lt.s32.totalorder %s10909_s27, %s10909_s27 }
  0xb4   : > { %p10912_p6 = pnand %p10910_p4, %p11088_p7  ;;  %p10919_p11 = por %p10918_p10, %p10917_p9 }
  0xb6   : > { %p10913_p8 = pneg %p10912_p6 }
  0xb8   : > { %p10920_p12 = pnand %p10919_p11, %p10913_p8 }
  0xba   : > { %10923 = shalt.err (!%p10920_p12)
}
  0xbb   : > { %10476 = dma.hbm_to_vmem [thread:$0]  (!%p11072_p5), %s13047_s7, 9216, %s354_s29, [#allocation13], %s10984_s14, %s10984_s14, %s10985_s18  }
  0xbc   : > { %s10990_s23 = smov [#allocation17]   ;;  %s10924_s19 = scalar_lea.hbm %s13049_s9, 16 }
  0xbd   : > { %s378_s28 = sshll.u32 %s10990_s23, 4  ;;  %p10925_p2 = scmp.ne.s32.totalorder %s13049_s9, %s10924_s19  ;;  %s379_s28 = int_to_ptr.vmem [resolvable:$true] %s378_s28 }
  0xbe   : > { %p10931_p0 = scmp.lt.u32.totalorder %s10924_s19, %s13049_s9 }
  0xbf   : > { %p10927_p3 = pnand %p10925_p2, %p11088_p7 }
  0xc1   : > { %p10928_p13 = pneg %p10927_p3 }
  0xc3   : > { %p10933_p1 = pnand %p10931_p0, %p10928_p13 }
  0xc5   : > { %10936 = shalt.err (!%p10933_p1)
}
  0xc6   : > { %s10937_s14 = scalar_lea.vmem %s379_s28, 16  ;;  %s10944_s18 = scalar_lea.vmem %s379_s28, 32 }
  0xc7   : > { %p10938_p4 = scmp.ne.s32.totalorder %s379_s28, %s10937_s14  ;;  %p10945_p9 = scmp.lt.s32.totalorder %s379_s28, %s379_s28 }
  0xc8   : > { %p10946_p10 = scmp.lt.s32.totalorder %s10944_s18, %s10937_s14 }
  0xc9   : > { %p10940_p6 = pnand %p10938_p4, %p11088_p7 }
  0xca   : > { %p10947_p11 = por %p10946_p10, %p10945_p9 }
  0xcb   : > { %p10941_p8 = pneg %p10940_p6 }
  0xcd   : > { %p10948_p12 = pnand %p10947_p11, %p10941_p8 }
  0xcf   : > { %10951 = shalt.err (!%p10948_p12)
}
  0xd0   : > { %10482 = dma.hbm_to_vmem [thread:$0]  (!%p11072_p5), %s13049_s9, 16, %s379_s28, [#allocation16]  }
  0xd1   : > { %p13056_p2 = scmp.ne.s32.totalorder %s13053_s17, 0 }
  0xd2   : > { %p13057_p3 = scmp.eq.s32.totalorder (!%p13056_p2), %s11055_s16, 0 }
  0xd3   : > { %399 = sbr.rel (%p13056_p2) target bundleno = 2811 (0xafb), region = 60 }
  0xda   : > { %10957 = dma.done.wait (%p13057_p3), [#allocation5], 512   ;;  %p13058_p7 = pmov %p13057_p3 }
  0xdb   : > { %p13059_p13 = pmov %p13057_p3 }
  0xdc   : > { %10959 = vsyncadd (%p13058_p7), [#allocation5], 4294966784 }
  0xdd   : > { %10961 = dma.done.wait (%p13059_p13), [#allocation7], 32   ;;  %p13060_p0 = pmov %p13057_p3 }
  0xdf   : > { %10963 = vsyncadd (%p13060_p0), [#allocation7], 4294967264  ;;  %p13061_p1 = pmov %p13060_p0 }
  0xe0   : > { %p13062_p5 = pmov %p13060_p0 }
  0xe1   : > { %10965 = dma.done.wait (%p13061_p1), [#allocation10], 9232  }
  0xe2   : > { %10967 = vsyncadd (%p13062_p5), [#allocation10], 4294958064  ;;  %p13063_p4 = pmov %p13060_p0 }
  0xe3   : > { %p13064_p6 = pmov %p13060_p0 }
  0xe4   : > { %10969 = dma.done.wait (%p13063_p4), [#allocation13], 9232  }
  0xe5   : > { %10971 = vsyncadd (%p13064_p6), [#allocation13], 4294958064  ;;  %p13065_p8 = pmov %p13060_p0 }
  0xe6   : > { %p13066_p9 = pmov %p13060_p0 }
  0xe7   : > { %10973 = dma.done.wait (%p13065_p8), [#allocation16], 32  }
  0xe8   : > { %10975 = vsyncadd (%p13066_p9), [#allocation16], 4294967264  ;;  %p469_p10 = scmp.lt.s32.totalorder %s11055_s16, 1  ;;  %v10991_v0 = vmov 0.0   ;;  %vm10992_vm0 = vmmov 0   ;;  %v10523_v1 = vld [vmem:[#allocation4 + $0x10] sm:$0xff]  }
  0xe9   : > { %7964 = vmatprep.subr.bf16.mxu1 %v10991_v0  ;;  %7966 = vmatprep.mubr.msk.bf16.mxu1 %vm10992_vm0, %v10991_v0  ;;  %vm598_vm1 = vcmask 130048   ;;  %v10525_v3 = vld [vmem:[#allocation4 + $0x8] sm:$0xff]   ;;  %v10526_v4 = vld [vmem:[#allocation4] sm:$0xff]   ;;  %vm967_vm2 = vsmask.f32 7424  ;;  %v10528_v18 = vld [vmem:[#allocation4 + $0x18] sm:$0xff]  }
  0xea   : > { %8088 = vmatprep.subr.bf16.mxu0 %v10991_v0  ;;  %s13070_s16 = smov (!%p469_p10, %s11055_s16), 1  ;;  %8090 = vmatprep.mubr.msk.bf16.mxu0 %vm10992_vm0, %v10991_v0  ;;  %vm1644_vm3 = vcmask 1047552   ;;  %vm3147_vm5 = vcmask 1046528   ;;  %vm4543_vm7 = vsmask.f32 7938 }
  0xeb   : > { %s7424_s17 = sshll.u32 %s13070_s16, 7  ;;  %7965 = vmatpush3.bf16.msra.mxu1 %v10523_v1  ;;  %8089 = vmatpush3.bf16.msra.mxu0 %v10525_v3  ;;  %vm11851_vm4 = vmand %vm1644_vm3, %vm967_vm2  ;;  %vm4426_vm11 = vsmask.f32 256  ;;  %s10418_s21 = smul.u32 112, %s13070_s16 }
  0xec   : > { %s11311_s26 = scalar_lea.vmem %s13040_s0, %s7424_s17  ;;  %8026 = vmatprep.subr.bf16.mxu1 %v10991_v0  ;;  %8150 = vmatprep.subr.bf16.mxu0 %v10991_v0  ;;  %vm4544_vm9 = vmand %vm1644_vm3, %vm4543_vm7 }
  0xed   : > { %v11314_v2 = vld [vmem:[%s11311_s26 + $0x8] sm:$0xff]   ;;  %v11319_v6 = vld [vmem:[%s11311_s26] sm:$0xff]   ;;  %v11329_v10 = vld [vmem:[%s11311_s26 + $0x10] sm:$0xff]   ;;  %s12973_s11 = scalar_lea.vmem %s13050_s10, %s10418_s21 }
  0xee   : > { %v974_v5 = vshll.u32 %v11314_v2, 16  ;;  %7967 = vmatmul.mubr.msk.bf16.vlgmr.msra.gmra.mrb[0].mxu1 %vm598_vm1, %v11314_v2  ;;  %v968_v7 = vshrl.u32 %v11319_v6, 16  ;;  %v970_v8 = vshll.u32 %v11319_v6, 16  ;;  %v11333_v12 = vld [vmem:[%s11311_s26 + $0x18] sm:$0xff]   ;;  %v978_v13 = vshrl.u32 %v11314_v2, 16  ;;  %v11338_v15 = vld [vmem:[%s11311_s26 + $0x20] sm:$0xff]  }
  0xef   : > { %8027 = vmatpush3.bf16.msra.mxu1 %v10526_v4  ;;  %7970 = vmatprep.mubr.msk.bf16.mxu1 %vm10992_vm0, %v10991_v0  ;;  %v981_v14 = vshll.u32 %v11329_v10, 16  ;;  %v11341_v16 = vld [vmem:[%s11311_s26 + $0x28] sm:$0xff]   ;;  %v988_v19 = vshll.u32 %v11333_v12, 16  ;;  %v985_v20 = vshrl.u32 %v11329_v10, 16  ;;  %v992_v21 = vshrl.u32 %v11333_v12, 16  ;;  %v11350_v25 = vld [vmem:[%s11311_s26 + $0x30] sm:$0xff]  }
  0xf0   : > { %v976_v9 = vrot.slane %v974_v5, 1  ;;  %8212 = vmatprep.subr.bf16.mxu1 %v10991_v0  ;;  %v972_v11 = vrot.slane %v970_v8, 1  ;;  %v995_v23 = vshll.u32 %v11338_v15, 16  ;;  %v1002_v24 = vshll.u32 %v11341_v16, 16  ;;  %v11353_v26 = vld [vmem:[%s11311_s26 + $0x38] sm:$0xff]   ;;  %v11364_v33 = vld [vmem:[%s11311_s26 + $0x40] sm:$0xff]  }
  0xf1   : > { %v983_v27 = vrot.slane %v981_v14, 1  ;;  %v999_v28 = vshrl.u32 %v11338_v15, 16  ;;  %v990_v30 = vrot.slane %v988_v19, 1  ;;  %v1006_v31 = vshrl.u32 %v11341_v16, 16  ;;  %v11370_v35 = vld [vmem:[%s11311_s26 + $0x48] sm:$0xff]   ;;  %v11375_v39 = vld [vmem:[%s11311_s26 + $0x50] sm:$0xff]  }
  0xf2   : > { %v973_v17 = vor.u32 %v972_v11, %v968_v7  ;;  %v980_v29 = vor.u32 %v978_v13, %v976_v9  ;;  %v1009_v32 = vshll.u32 %v11350_v25, 16  ;;  %v1016_v34 = vshll.u32 %v11353_v26, 16  ;;  %v11381_v43 = vld [vmem:[%s11311_s26 + $0x58] sm:$0xff]   ;;  %v11387_v46 = vld [vmem:[%s11311_s26 + $0x60] sm:$0xff]   ;;  %v11394_v52 = vld [vmem:[%s11311_s26 + $0x68] sm:$0xff]  }
  0xf3   : > { %v997_v36 = vrot.slane %v995_v23, 1  ;;  %v1004_v37 = vrot.slane %v1002_v24, 1  ;;  %v1013_v38 = vshrl.u32 %v11350_v25, 16  ;;  %v1020_v40 = vshrl.u32 %v11353_v26, 16  ;;  %v11408_v59 = vld [vmem:[%s11311_s26 + $0x70] sm:$0xff]  }
  0xf4   : > { %v977_v22 = vsel %vm967_vm2, %v973_v17, %v976_v9  ;;  %v1023_v41 = vshll.u32 %v11364_v33, 16  ;;  %v1030_v42 = vshll.u32 %v11370_v35, 16  ;;  %v11384_v44 = vsel %vm967_vm2, %v980_v29, %v983_v27 }
  0xf5   : > { %8091 = vmatmul.mubr.msk.bf16.vlgmr.msra.gmra.mrb[0].mxu0 %vm598_vm1, %v977_v22  ;;  %v1011_v45 = vrot.slane %v1009_v32, 1  ;;  %v1018_v47 = vrot.slane %v1016_v34, 1  ;;  %v1027_v48 = vshrl.u32 %v11364_v33, 16  ;;  %v1034_v49 = vshrl.u32 %v11370_v35, 16  ;;  %v11524_v32 = vld [vmem:[%s11311_s26 + $0x78] sm:$0xff]  }
  0xf6   : > { %7971 = vmatmul.mubr.msk.bf16.gmra.mrb[4].mxu1 %vm598_vm1, %v11329_v10  ;;  %8151 = vmatpush3.bf16.msra.mxu0 %v10528_v18  ;;  %v1037_v50 = vshll.u32 %v11375_v39, 16  ;;  %v1044_v51 = vshll.u32 %v11381_v43, 16  ;;  %v1025_v53 = vrot.slane %v1023_v41, 1  ;;  %v1032_v54 = vrot.slane %v1030_v42, 1 }
  0xf7   : > { %8094 = vmatprep.mubr.msk.bf16.mxu0 %vm10992_vm0, %v10991_v0  ;;  %7974 = vmatprep.mubr.msk.bf16.mxu1 %vm10992_vm0, %v10991_v0  ;;  %v1041_v55 = vshrl.u32 %v11375_v39, 16  ;;  %v1051_v56 = vshll.u32 %v11387_v46, 16  ;;  %v987_v57 = vor.u32 %v985_v20, %v983_v27  ;;  %v1058_v58 = vshll.u32 %v11394_v52, 16 }
  0xf8   : > { %8824 = vmatprep.subr.bf16.mxu0 %v10991_v0  ;;  %v1039_v60 = vrot.slane %v1037_v50, 1  ;;  %v1048_v61 = vshrl.u32 %v11381_v43, 16  ;;  %v1046_v62 = vrot.slane %v1044_v51, 1  ;;  %v1055_v1 = vshrl.u32 %v11387_v46, 16  ;;  %v10544_v50 = vld [vmem:[#allocation9 + $0xc8] sm:$0xff]   ;;  %v10545_v51 = vld [vmem:[#allocation9 + $0xd0] sm:$0xff]  }
  0xf9   : > { %v11411_v63 = vrot.slane %v1051_v56, 1  ;;  %v11414_v3 = vrot.slane %v1058_v58, 1  ;;  %v11417_v4 = vsel %vm967_vm2, %v987_v57, %v990_v30  ;;  %v1065_v5 = vshll.u32 %v11408_v59, 16 }
  0xfa   : > { %v1069_v7 = vshrl.u32 %v11408_v59, 16  ;;  %v994_v8 = vor.u32 %v992_v21, %v990_v30  ;;  %v1001_v11 = vor.u32 %v999_v28, %v997_v36  ;;  %v1008_v14 = vor.u32 %v1006_v31, %v1004_v37 }
  0xfb   : > { %v1015_v18 = vor.u32 %v1013_v38, %v1011_v45  ;;  %v1022_v20 = vor.u32 %v1020_v40, %v1018_v47  ;;  %v1029_v22 = vor.u32 %v1027_v48, %v1025_v53  ;;  %v1036_v24 = vor.u32 %v1034_v49, %v1032_v54  ;;  %v10543_v49 = vld [vmem:[#allocation9 + $0xc0] sm:$0xff]  }
  0xfc   : > { %v11430_v9 = vsel %vm967_vm2, %v994_v8, %v997_v36  ;;  %v11441_v13 = vsel %vm967_vm2, %v1001_v11, %v1004_v37  ;;  %v11452_v17 = vsel %vm967_vm2, %v1008_v14, %v1011_v45  ;;  %v1043_v28 = vor.u32 %v1041_v55, %v1039_v60  ;;  %v11705_v55 = vld [vmem:[#allocation8] ss:$0 sm:$0xff] }
  0xfd   : > { %8095 = vmatmul.mubr.msk.bf16.gmra.mrb[4].mxu0 %vm598_vm1, %v11384_v44  ;;  %v11463_v19 = vsel %vm967_vm2, %v1015_v18, %v1018_v47  ;;  %v11474_v21 = vsel %vm967_vm2, %v1022_v20, %v1025_v53  ;;  %v11485_v23 = vsel %vm967_vm2, %v1029_v22, %v1032_v54  ;;  %v11498_v27 = vsel %vm967_vm2, %v1036_v24, %v1039_v60  ;;  %v10547_v53 = vld [vmem:[#allocation9 + $0xe0] sm:$0xff]  }
  0xfe   : > { %7975 = vmatmul.mubr.msk.bf16.gmra.mrb[8].mxu1 %vm598_vm1, %v11333_v12  ;;  %8098 = vmatprep.mubr.msk.bf16.mxu0 %vm10992_vm0, %v10991_v0  ;;  %v11509_v29 = vsel %vm967_vm2, %v1043_v28, %v1046_v62  ;;  %v1050_v30 = vor.u32 %v1048_v61, %v1046_v62  ;;  %v1057_v34 = vor.u32 %v1055_v1, %v11411_v63  ;;  %v1067_v36 = vrot.slane %v1065_v5, 1 }
  0xff   : > { %7978 = vmatprep.mubr.msk.bf16.mxu1 %vm10992_vm0, %v10991_v0  ;;  %v1309_v37 = vshll.u32 %v11524_v32, 16  ;;  %v1062_v38 = vshrl.u32 %v11394_v52, 16 }
 0x100   : > { %v11521_v31 = vsel %vm967_vm2, %v1050_v30, %v11411_v63  ;;  %v1071_v40 = vor.u32 %v1069_v7, %v1067_v36  ;;  %v11545_v42 = vsel %vm967_vm2, %v1057_v34, %v11414_v3 }
 0x101   : > { %v11541_v41 = vrot.slane %v1309_v37, 1  ;;  %v1064_v47 = vor.u32 %v1062_v38, %v11414_v3  ;;  %v10551_v38 = vld [vmem:[#allocation9] sm:$0xff]  }
 0x103   : > { %v11549_v45 = vsel %vm967_vm2, %v1071_v40, %v11541_v41  ;;  %v11561_v48 = vsel %vm967_vm2, %v1064_v47, %v1067_v36 }
 0x105   : > { %8099 = vmatmul.mubr.msk.bf16.gmra.mrb[8].mxu0 %vm598_vm1, %v11417_v4 }
 0x106   : > { %7979 = vmatmul.mubr.msk.bf16.gmra.mrb[12].mxu1 %vm598_vm1, %v11338_v15  ;;  %8102 = vmatprep.mubr.msk.bf16.mxu0 %vm10992_vm0, %v10991_v0 }
 0x107   : > { %7982 = vmatprep.mubr.msk.bf16.mxu1 %vm10992_vm0, %v10991_v0 }
 0x10d   : > { %8103 = vmatmul.mubr.msk.bf16.gmra.mrb[12].mxu0 %vm598_vm1, %v11430_v9 }
 0x10e   : > { %7983 = vmatmul.mubr.msk.bf16.gmra.mrb[16].mxu1 %vm598_vm1, %v11341_v16  ;;  %8106 = vmatprep.mubr.msk.bf16.mxu0 %vm10992_vm0, %v10991_v0 }
 0x10f   : > { %7986 = vmatprep.mubr.msk.bf16.mxu1 %vm10992_vm0, %v10991_v0 }
 0x115   : > { %8107 = vmatmul.mubr.msk.bf16.gmra.mrb[16].mxu0 %vm598_vm1, %v11441_v13 }
 0x116   : > { %7987 = vmatmul.mubr.msk.bf16.gmra.mrb[20].mxu1 %vm598_vm1, %v11350_v25  ;;  %8110 = vmatprep.mubr.msk.bf16.mxu0 %vm10992_vm0, %v10991_v0 }
 0x117   : > { %7990 = vmatprep.mubr.msk.bf16.mxu1 %vm10992_vm0, %v10991_v0 }
 0x11d   : > { %8111 = vmatmul.mubr.msk.bf16.gmra.mrb[20].mxu0 %vm598_vm1, %v11452_v17 }
 0x11e   : > { %7991 = vmatmul.mubr.msk.bf16.gmra.mrb[24].mxu1 %vm598_vm1, %v11353_v26  ;;  %8114 = vmatprep.mubr.msk.bf16.mxu0 %vm10992_vm0, %v10991_v0 }
 0x11f   : > { %7994 = vmatprep.mubr.msk.bf16.mxu1 %vm10992_vm0, %v10991_v0 }
 0x125   : > { %8115 = vmatmul.mubr.msk.bf16.gmra.mrb[24].mxu0 %vm598_vm1, %v11463_v19 }
 0x126   : > { %7995 = vmatmul.mubr.msk.bf16.gmra.mrb[28].mxu1 %vm598_vm1, %v11364_v33  ;;  %8118 = vmatprep.mubr.msk.bf16.mxu0 %vm10992_vm0, %v10991_v0 }
 0x127   : > { %7998 = vmatprep.mubr.msk.bf16.mxu1 %vm10992_vm0, %v10991_v0 }
 0x12d   : > { %8119 = vmatmul.mubr.msk.bf16.gmra.mrb[28].mxu0 %vm598_vm1, %v11474_v21 }
 0x12e   : > { %7999 = vmatmul.mubr.msk.bf16.gmra.mrb[32].mxu1 %vm598_vm1, %v11370_v35  ;;  %8122 = vmatprep.mubr.msk.bf16.mxu0 %vm10992_vm0, %v10991_v0 }
 0x12f   : > { %8002 = vmatprep.mubr.msk.bf16.mxu1 %vm10992_vm0, %v10991_v0 }
 0x135   : > { %8123 = vmatmul.mubr.msk.bf16.gmra.mrb[32].mxu0 %vm598_vm1, %v11485_v23 }
 0x136   : > { %8003 = vmatmul.mubr.msk.bf16.gmra.mrb[36].mxu1 %vm598_vm1, %v11375_v39  ;;  %8126 = vmatprep.mubr.msk.bf16.mxu0 %vm10992_vm0, %v10991_v0 }
 0x137   : > { %8006 = vmatprep.mubr.msk.bf16.mxu1 %vm10992_vm0, %v10991_v0 }
 0x13d   : > { %8127 = vmatmul.mubr.msk.bf16.gmra.mrb[36].mxu0 %vm598_vm1, %v11498_v27 }
 0x13e   : > { %8007 = vmatmul.mubr.msk.bf16.gmra.mrb[40].mxu1 %vm598_vm1, %v11381_v43  ;;  %8130 = vmatprep.mubr.msk.bf16.mxu0 %vm10992_vm0, %v10991_v0 }
 0x13f   : > { %8010 = vmatprep.mubr.msk.bf16.mxu1 %vm10992_vm0, %v10991_v0 }
 0x145   : > { %8131 = vmatmul.mubr.msk.bf16.gmra.mrb[40].mxu0 %vm598_vm1, %v11509_v29 }
 0x146   : > { %8011 = vmatmul.mubr.msk.bf16.gmra.mrb[44].mxu1 %vm598_vm1, %v11387_v46  ;;  %8134 = vmatprep.mubr.msk.bf16.mxu0 %vm10992_vm0, %v10991_v0 }
 0x147   : > { %8014 = vmatprep.mubr.msk.bf16.mxu1 %vm10992_vm0, %v10991_v0 }
 0x14d   : > { %8135 = vmatmul.mubr.msk.bf16.gmra.mrb[44].mxu0 %vm598_vm1, %v11521_v31 }
 0x14e   : > { %8015 = vmatmul.mubr.msk.bf16.gmra.mrb[48].mxu1 %vm598_vm1, %v11394_v52  ;;  %8138 = vmatprep.mubr.msk.bf16.mxu0 %vm10992_vm0, %v10991_v0 }
 0x14f   : > { %8018 = vmatprep.mubr.msk.bf16.mxu1 %vm10992_vm0, %v10991_v0 }
 0x155   : > { %8139 = vmatmul.mubr.msk.bf16.gmra.mrb[48].mxu0 %vm598_vm1, %v11545_v42 }
 0x156   : > { %8019 = vmatmul.mubr.msk.bf16.gmra.mrb[52].mxu1 %vm598_vm1, %v11408_v59  ;;  %8142 = vmatprep.mubr.msk.bf16.mxu0 %vm10992_vm0, %v10991_v0 }
 0x157   : > { %8022 = vmatprep.mubr.msk.bf16.mxu1 %vm10992_vm0, %v10991_v0 }
 0x15d   : > { %8143 = vmatmul.mubr.msk.bf16.gmra.mrb[52].mxu0 %vm598_vm1, %v11561_v48 }
 0x15e   : > { %8023 = vmatmul.mubr.msk.bf16.gmra.mrb[56].mxu1 %vm598_vm1, %v11524_v32  ;;  %8146 = vmatprep.mubr.msk.bf16.mxu0 %vm10992_vm0, %v10991_v0 }
 0x15f   : > { %8028 = vmatprep.mubr.msk.bf16.mxu1 %vm10992_vm0, %v10991_v0 }
 0x165   : > { %8147 = vmatmul.mubr.msk.bf16.gmra.mrb[56].mxu0 %vm598_vm1, %v1071_v40 }
 0x166   : > { %8029 = vmatmul.mubr.msk.bf16.vlgmr.msra.gmra.mrb[0].mxu1 %vm598_vm1, %v11319_v6  ;;  %8152 = vmatprep.mubr.msk.bf16.mxu0 %vm10992_vm0, %v10991_v0  ;;  %v10546_v6 = vld [vmem:[#allocation9 + $0xd8] sm:$0xff]  }
 0x167   : > { %8032 = vmatprep.mubr.msk.bf16.mxu1 %vm10992_vm0, %v10991_v0  ;;  %8213 = vmatpush3.bf16.msra.mxu1 %v10543_v49 }
 0x168   : > { %8214 = vmatprep.subr.bf16.mxu1 %v10991_v0 }
 0x16b   : > { %8215 = vmatpush3.bf16.msra.mxu1 %v10544_v50  ;;  %v10552_v50 = vld [vmem:[#allocation9 + $0x8] sm:$0xff]  }
 0x16c   : > { %8216 = vmatprep.subr.bf16.mxu1 %v10991_v0 }
 0x16d   : > { %8153 = vmatmul.mubr.msk.bf16.vlgmr.msra.gmra.mrb[0].mxu0 %vm598_vm1, %v11384_v44 }
 0x16e   : > { %8033 = vmatmul.mubr.msk.bf16.gmra.mrb[4].mxu1 %vm598_vm1, %v11314_v2  ;;  %8156 = vmatprep.mubr.msk.bf16.mxu0 %vm10992_vm0, %v10991_v0  ;;  %v10548_v2 = vld [vmem:[#allocation9 + $0xe8] sm:$0xff]  }
 0x16f   : > { %8036 = vmatprep.mubr.msk.bf16.mxu1 %vm10992_vm0, %v10991_v0  ;;  %8217 = vmatpush3.bf16.msra.mxu1 %v10545_v51 }
 0x170   : > { %8218 = vmatprep.subr.bf16.mxu1 %v10991_v0 }
 0x173   : > { %8219 = vmatpush3.bf16.msra.mxu1 %v10546_v6 }
 0x174   : > { %8220 = vmatprep.subr.bf16.mxu1 %v10991_v0 }
 0x175   : > { %8157 = vmatmul.mubr.msk.bf16.gmra.mrb[4].mxu0 %vm598_vm1, %v11417_v4 }
 0x176   : > { %8037 = vmatmul.mubr.msk.bf16.gmra.mrb[8].mxu1 %vm598_vm1, %v11329_v10  ;;  %8160 = vmatprep.mubr.msk.bf16.mxu0 %vm10992_vm0, %v10991_v0  ;;  %v10549_v10 = vld [vmem:[#allocation9 + $0xf0] sm:$0xff]  }
 0x177   : > { %8040 = vmatprep.mubr.msk.bf16.mxu1 %vm10992_vm0, %v10991_v0  ;;  %8221 = vmatpush3.bf16.msra.mxu1 %v10547_v53 }
 0x178   : > { %8222 = vmatprep.subr.bf16.mxu1 %v10991_v0 }
 0x17b   : > { %8223 = vmatpush3.bf16.msra.mxu1 %v10548_v2 }
 0x17c   : > { %8224 = vmatprep.subr.bf16.mxu1 %v10991_v0 }
 0x17d   : > { %8161 = vmatmul.mubr.msk.bf16.gmra.mrb[8].mxu0 %vm598_vm1, %v11430_v9 }
 0x17e   : > { %8041 = vmatmul.mubr.msk.bf16.gmra.mrb[12].mxu1 %vm598_vm1, %v11333_v12  ;;  %8164 = vmatprep.mubr.msk.bf16.mxu0 %vm10992_vm0, %v10991_v0  ;;  %v10550_v12 = vld [vmem:[#allocation9 + $0xf8] sm:$0xff]  }
 0x17f   : > { %8044 = vmatprep.mubr.msk.bf16.mxu1 %vm10992_vm0, %v10991_v0  ;;  %8225 = vmatpush3.bf16.msra.mxu1 %v10549_v10 }
 0x180   : > { %8226 = vmatprep.subr.bf16.mxu1 %v10991_v0 }
 0x183   : > { %8227 = vmatpush3.bf16.msra.mxu1 %v10550_v12 }
 0x184   : > { %8280 = vmatprep.subr.bf16.mxu1 %v10991_v0 }
 0x185   : > { %8165 = vmatmul.mubr.msk.bf16.gmra.mrb[12].mxu0 %vm598_vm1, %v11441_v13 }
 0x186   : > { %8045 = vmatmul.mubr.msk.bf16.gmra.mrb[16].mxu1 %vm598_vm1, %v11338_v15  ;;  %8168 = vmatprep.mubr.msk.bf16.mxu0 %vm10992_vm0, %v10991_v0  ;;  %v1313_v15 = vshrl.u32 %v11524_v32, 16 }
 0x187   : > { %8048 = vmatprep.mubr.msk.bf16.mxu1 %vm10992_vm0, %v10991_v0 }
 0x18d   : > { %8169 = vmatmul.mubr.msk.bf16.gmra.mrb[16].mxu0 %vm598_vm1, %v11452_v17 }
 0x18e   : > { %8049 = vmatmul.mubr.msk.bf16.gmra.mrb[20].mxu1 %vm598_vm1, %v11341_v16  ;;  %8172 = vmatprep.mubr.msk.bf16.mxu0 %vm10992_vm0, %v10991_v0  ;;  %v1315_v16 = vor.u32 %v1313_v15, %v11541_v41 }
 0x18f   : > { %8052 = vmatprep.mubr.msk.bf16.mxu1 %vm10992_vm0, %v10991_v0 }
 0x195   : > { %8173 = vmatmul.mubr.msk.bf16.gmra.mrb[20].mxu0 %vm598_vm1, %v11463_v19 }
 0x196   : > { %8053 = vmatmul.mubr.msk.bf16.gmra.mrb[24].mxu1 %vm598_vm1, %v11350_v25  ;;  %8176 = vmatprep.mubr.msk.bf16.mxu0 %vm10992_vm0, %v10991_v0 }
 0x197   : > { %8056 = vmatprep.mubr.msk.bf16.mxu1 %vm10992_vm0, %v10991_v0 }
 0x19d   : > { %8177 = vmatmul.mubr.msk.bf16.gmra.mrb[24].mxu0 %vm598_vm1, %v11474_v21 }
 0x19e   : > { %8057 = vmatmul.mubr.msk.bf16.gmra.mrb[28].mxu1 %vm598_vm1, %v11353_v26  ;;  %8180 = vmatprep.mubr.msk.bf16.mxu0 %vm10992_vm0, %v10991_v0 }
 0x19f   : > { %8060 = vmatprep.mubr.msk.bf16.mxu1 %vm10992_vm0, %v10991_v0 }
 0x1a5   : > { %8181 = vmatmul.mubr.msk.bf16.gmra.mrb[28].mxu0 %vm598_vm1, %v11485_v23 }
 0x1a6   : > { %8061 = vmatmul.mubr.msk.bf16.gmra.mrb[32].mxu1 %vm598_vm1, %v11364_v33  ;;  %8184 = vmatprep.mubr.msk.bf16.mxu0 %vm10992_vm0, %v10991_v0 }
 0x1a7   : > { %8064 = vmatprep.mubr.msk.bf16.mxu1 %vm10992_vm0, %v10991_v0 }
 0x1ad   : > { %8185 = vmatmul.mubr.msk.bf16.gmra.mrb[32].mxu0 %vm598_vm1, %v11498_v27 }
 0x1ae   : > { %8065 = vmatmul.mubr.msk.bf16.gmra.mrb[36].mxu1 %vm598_vm1, %v11370_v35  ;;  %8188 = vmatprep.mubr.msk.bf16.mxu0 %vm10992_vm0, %v10991_v0 }
 0x1af   : > { %8068 = vmatprep.mubr.msk.bf16.mxu1 %vm10992_vm0, %v10991_v0 }
 0x1b5   : > { %8189 = vmatmul.mubr.msk.bf16.gmra.mrb[36].mxu0 %vm598_vm1, %v11509_v29 }
 0x1b6   : > { %8069 = vmatmul.mubr.msk.bf16.gmra.mrb[40].mxu1 %vm598_vm1, %v11375_v39  ;;  %8192 = vmatprep.mubr.msk.bf16.mxu0 %vm10992_vm0, %v10991_v0 }
 0x1b7   : > { %8072 = vmatprep.mubr.msk.bf16.mxu1 %vm10992_vm0, %v10991_v0 }
 0x1bd   : > { %8193 = vmatmul.mubr.msk.bf16.gmra.mrb[40].mxu0 %vm598_vm1, %v11521_v31 }
 0x1be   : > { %8073 = vmatmul.mubr.msk.bf16.gmra.mrb[44].mxu1 %vm598_vm1, %v11381_v43  ;;  %8196 = vmatprep.mubr.msk.bf16.mxu0 %vm10992_vm0, %v10991_v0  ;;  %v11703_v43 = vld [vmem:[#allocation6] ss:$0 sm:$0xff] }
 0x1bf   : > { %8076 = vmatprep.mubr.msk.bf16.mxu1 %vm10992_vm0, %v10991_v0 }
 0x1c5   : > { %8197 = vmatmul.mubr.msk.bf16.gmra.mrb[44].mxu0 %vm598_vm1, %v11545_v42 }
 0x1c6   : > { %8077 = vmatmul.mubr.msk.bf16.gmra.mrb[48].mxu1 %vm598_vm1, %v11387_v46  ;;  %8200 = vmatprep.mubr.msk.bf16.mxu0 %vm10992_vm0, %v10991_v0 }
 0x1c7   : > { %8080 = vmatprep.mubr.msk.bf16.mxu1 %vm10992_vm0, %v10991_v0 }
 0x1cd   : > { %8201 = vmatmul.mubr.msk.bf16.gmra.mrb[48].mxu0 %vm598_vm1, %v11561_v48 }
 0x1ce   : > { %8081 = vmatmul.mubr.msk.bf16.gmra.mrb[52].mxu1 %vm598_vm1, %v11394_v52  ;;  %8204 = vmatprep.mubr.msk.bf16.mxu0 %vm10992_vm0, %v10991_v0 }
 0x1cf   : > { %8084 = vmatprep.mubr.msk.bf16.mxu1 %vm10992_vm0, %v10991_v0 }
 0x1d5   : > { %8205 = vmatmul.mubr.msk.bf16.gmra.mrb[52].mxu0 %vm598_vm1, %v11549_v45 }
 0x1d6   : > { %8085 = vmatmul.mubr.msk.bf16.gmra.mrb[56].mxu1 %vm598_vm1, %v11408_v59  ;;  %8208 = vmatprep.mubr.msk.bf16.mxu0 %vm10992_vm0, %v10991_v0 }
 0x1d7   : > { %8228 = vmatprep.mubr.msk.bf16.mxu1 %vm10992_vm0, %v10991_v0 }
 0x1dd   : > { %8209 = vmatmul.mubr.msk.bf16.gmra.mrb[56].mxu0 %vm598_vm1, %v1315_v16 }
 0x1de   : > { %8840 = vmatprep.mubr.msk.bf16.mxu0 %vm10992_vm0, %v10991_v0 }
 0x239   : > { %v845_v25 = vpop.f32.mrb[0].mxu1 }
 0x23a   : > { %v8030_v26 = vpop.f32.mrb[1].mxu1 }
 0x23b   : > { %v848_v33 = vpop.f32.mrb[2].mxu1 }
 0x23c   : > { %v8031_v35 = vpop.f32.mrb[3].mxu1 }
 0x240   : > { %v1362_v39 = vpop.f32.mrb[0].mxu0 }
 0x241   : > { %v853_v44 = vpop.f32.mrb[4].mxu1  ;;  %v9436_v46 = vadd.f32 %v1362_v39, %v845_v25  ;;  %v8154_v52 = vpop.f32.mrb[1].mxu0 }
 0x242   : > { %v8034_v54 = vpop.f32.mrb[5].mxu1  ;;  %v1365_v56 = vpop.f32.mrb[2].mxu0 }
 0x243   : > { %v856_v57 = vpop.f32.mrb[6].mxu1  ;;  %v1518_v58 = vmul.f32 %v9436_v46, %v11703_v43  ;;  %v9437_v59 = vadd.f32 %v1365_v56, %v848_v33  ;;  %v8155_v60 = vpop.f32.mrb[3].mxu0  ;;  %v10553_v33 = vld [vmem:[#allocation9 + $0x10] sm:$0xff]  }
 0x244   : > { %v8035_v61 = vpop.f32.mrb[7].mxu1 }
 0x245   : > { %v1555_v62 = vadd.f32 %v11705_v55, %v1518_v58  ;;  %v1519_v63 = vmul.f32 %v9437_v59, %v11703_v43 }
 0x247   : > { %v1556_v1 = vadd.f32 %v11705_v55, %v1519_v63  ;;  %v1585_v5 = vmax.f32 %v1555_v62, 0.0 }
 0x248   : > { %v1370_v3 = vpop.f32.mrb[4].mxu0 }
 0x249   : > { %v861_v4 = vpop.f32.mrb[8].mxu1  ;;  %v1586_v7 = vmax.f32 %v1556_v1, 0.0  ;;  %v9438_v8 = vadd.f32 %v1370_v3, %v853_v44  ;;  %v8158_v9 = vpop.f32.mrb[5].mxu0 }
 0x24a   : > { %v8038_v11 = vpop.f32.mrb[9].mxu1  ;;  %v1373_v13 = vpop.f32.mrb[6].mxu0 }
 0x24b   : > { %v864_v14 = vpop.f32.mrb[10].mxu1  ;;  %v11711_v17 = vpack.c.bf16 %v1586_v7, %v1585_v5  ;;  %v1520_v18 = vmul.f32 %v9438_v8, %v11703_v43  ;;  %v9439_v19 = vadd.f32 %v1373_v13, %v856_v57  ;;  %v8159_v20 = vpop.f32.mrb[7].mxu0  ;;  %v10554_v57 = vld [vmem:[#allocation9 + $0x18] sm:$0xff]   ;;  %v10555_v7 = vld [vmem:[#allocation9 + $0x20] sm:$0xff]  }
 0x24c   : > { %v8039_v21 = vpop.f32.mrb[11].mxu1  ;;  %v10556_v20 = vld [vmem:[#allocation9 + $0x28] sm:$0xff]  }
 0x24d   : > { %1630 = vst [vmem:[#allocation2] sm:$0xff] %v11711_v17  ;;  %v1557_v22 = vadd.f32 %v11705_v55, %v1520_v18  ;;  %v1521_v23 = vmul.f32 %v9439_v19, %v11703_v43 }
 0x24f   : > { %v1558_v24 = vadd.f32 %v11705_v55, %v1521_v23  ;;  %v1587_v29 = vmax.f32 %v1557_v22, 0.0 }
 0x250   : > { %v1378_v27 = vpop.f32.mrb[8].mxu0 }
 0x251   : > { %v869_v28 = vpop.f32.mrb[12].mxu1  ;;  %v1588_v30 = vmax.f32 %v1558_v24, 0.0  ;;  %v9440_v31 = vadd.f32 %v1378_v27, %v861_v4  ;;  %v8162_v32 = vpop.f32.mrb[9].mxu0 }
 0x252   : > { %v8042_v34 = vpop.f32.mrb[13].mxu1  ;;  %v1381_v36 = vpop.f32.mrb[10].mxu0 }
 0x253   : > { %v872_v37 = vpop.f32.mrb[14].mxu1  ;;  %v11718_v40 = vpack.c.bf16 %v1588_v30, %v1587_v29  ;;  %v1522_v41 = vmul.f32 %v9440_v31, %v11703_v43  ;;  %v9441_v42 = vadd.f32 %v1381_v36, %v864_v14  ;;  %v8163_v45 = vpop.f32.mrb[11].mxu0  ;;  %v10557_v34 = vld [vmem:[#allocation9 + $0x30] sm:$0xff]  }
 0x254   : > { %v8043_v47 = vpop.f32.mrb[15].mxu1 }
 0x255   : > { %1631 = vst [vmem:[#allocation2 + $0x8] sm:$0xff] %v11718_v40  ;;  %v1559_v48 = vadd.f32 %v11705_v55, %v1522_v41  ;;  %v1523_v49 = vmul.f32 %v9441_v42, %v11703_v43  ;;  %8229 = vmatmul.mubr.bf16.vlgmr.msra.gmra.mrb[60].mxu1 %v11718_v40 }
 0x256   : > { %8281 = vmatpush3.bf16.msra.mxu1 %v10551_v38  ;;  %8232 = vmatprep.mubr.msk.bf16.mxu1 %vm10992_vm0, %v10991_v0 }
 0x257   : > { %v1560_v51 = vadd.f32 %v11705_v55, %v1523_v49  ;;  %8282 = vmatprep.subr.bf16.mxu1 %v10991_v0  ;;  %v1589_v2 = vmax.f32 %v1559_v48, 0.0  ;;  %v10558_v48 = vld [vmem:[#allocation9 + $0x38] sm:$0xff]  }
 0x258   : > { %v1386_v6 = vpop.f32.mrb[12].mxu0 }
 0x259   : > { %v877_v53 = vpop.f32.mrb[16].mxu1  ;;  %v1590_v10 = vmax.f32 %v1560_v51, 0.0  ;;  %v9442_v12 = vadd.f32 %v1386_v6, %v869_v28  ;;  %v8166_v15 = vpop.f32.mrb[13].mxu0 }
 0x25a   : > { %v8046_v16 = vpop.f32.mrb[17].mxu1  ;;  %v1389_v25 = vpop.f32.mrb[14].mxu0  ;;  %8283 = vmatpush3.bf16.msra.mxu1 %v10552_v50 }
 0x25b   : > { %v880_v26 = vpop.f32.mrb[18].mxu1  ;;  %v11729_v35 = vpack.c.bf16 %v1590_v10, %v1589_v2  ;;  %v1524_v39 = vmul.f32 %v9442_v12, %v11703_v43  ;;  %v9443_v44 = vadd.f32 %v1389_v25, %v872_v37  ;;  %v8167_v46 = vpop.f32.mrb[15].mxu0  ;;  %8284 = vmatprep.subr.bf16.mxu1 %v10991_v0 }
 0x25c   : > { %v8047_v52 = vpop.f32.mrb[19].mxu1 }
 0x25d   : > { %1632 = vst [vmem:[#allocation2 + $0x10] sm:$0xff] %v11729_v35  ;;  %v1561_v54 = vadd.f32 %v11705_v55, %v1524_v39  ;;  %v1525_v56 = vmul.f32 %v9443_v44, %v11703_v43  ;;  %8233 = vmatmul.mubr.bf16.gmra.mrb[64].mxu1 %v11729_v35 }
 0x25e   : > { %8236 = vmatprep.mubr.msk.bf16.mxu1 %vm10992_vm0, %v10991_v0  ;;  %8285 = vmatpush3.bf16.msra.mxu1 %v10553_v33 }
 0x25f   : > { %v1562_v58 = vadd.f32 %v11705_v55, %v1525_v56  ;;  %8286 = vmatprep.subr.bf16.mxu1 %v10991_v0  ;;  %v1591_v61 = vmax.f32 %v1561_v54, 0.0 }
 0x260   : > { %v1394_v59 = vpop.f32.mrb[16].mxu0 }
 0x261   : > { %v885_v60 = vpop.f32.mrb[20].mxu1  ;;  %v1592_v62 = vmax.f32 %v1562_v58, 0.0  ;;  %v9444_v63 = vadd.f32 %v1394_v59, %v877_v53  ;;  %v8170_v1 = vpop.f32.mrb[17].mxu0 }
 0x262   : > { %v8050_v3 = vpop.f32.mrb[21].mxu1  ;;  %v1397_v4 = vpop.f32.mrb[18].mxu0  ;;  %8287 = vmatpush3.bf16.msra.mxu1 %v10554_v57 }
 0x263   : > { %v888_v5 = vpop.f32.mrb[22].mxu1  ;;  %v11741_v8 = vpack.c.bf16 %v1592_v62, %v1591_v61  ;;  %v1526_v9 = vmul.f32 %v9444_v63, %v11703_v43  ;;  %v9445_v11 = vadd.f32 %v1397_v4, %v880_v26  ;;  %v8171_v13 = vpop.f32.mrb[19].mxu0  ;;  %8288 = vmatprep.subr.bf16.mxu1 %v10991_v0 }
 0x264   : > { %v8051_v14 = vpop.f32.mrb[23].mxu1 }
 0x265   : > { %1633 = vst [vmem:[#allocation2 + $0x18] sm:$0xff] %v11741_v8  ;;  %v1563_v18 = vadd.f32 %v11705_v55, %v1526_v9  ;;  %v1527_v19 = vmul.f32 %v9445_v11, %v11703_v43  ;;  %8237 = vmatmul.mubr.bf16.gmra.mrb[68].mxu1 %v11741_v8 }
 0x266   : > { %8240 = vmatprep.mubr.msk.bf16.mxu1 %vm10992_vm0, %v10991_v0  ;;  %8289 = vmatpush3.bf16.msra.mxu1 %v10555_v7 }
 0x267   : > { %v1564_v21 = vadd.f32 %v11705_v55, %v1527_v19  ;;  %8290 = vmatprep.subr.bf16.mxu1 %v10991_v0  ;;  %v1593_v24 = vmax.f32 %v1563_v18, 0.0 }
 0x268   : > { %v1402_v22 = vpop.f32.mrb[20].mxu0 }
 0x269   : > { %v893_v23 = vpop.f32.mrb[24].mxu1  ;;  %v1594_v27 = vmax.f32 %v1564_v21, 0.0  ;;  %v9446_v28 = vadd.f32 %v1402_v22, %v885_v60  ;;  %v8174_v29 = vpop.f32.mrb[21].mxu0 }
 0x26a   : > { %v8054_v30 = vpop.f32.mrb[25].mxu1  ;;  %v1405_v31 = vpop.f32.mrb[22].mxu0  ;;  %8291 = vmatpush3.bf16.msra.mxu1 %v10556_v20 }
 0x26b   : > { %v896_v32 = vpop.f32.mrb[26].mxu1  ;;  %v11753_v36 = vpack.c.bf16 %v1594_v27, %v1593_v24  ;;  %v1528_v37 = vmul.f32 %v9446_v28, %v11703_v43  ;;  %v9447_v38 = vadd.f32 %v1405_v31, %v888_v5  ;;  %v8175_v41 = vpop.f32.mrb[23].mxu0  ;;  %8292 = vmatprep.subr.bf16.mxu1 %v10991_v0 }
 0x26c   : > { %v8055_v42 = vpop.f32.mrb[27].mxu1 }
 0x26d   : > { %1634 = vst [vmem:[#allocation2 + $0x20] sm:$0xff] %v11753_v36  ;;  %v1565_v45 = vadd.f32 %v11705_v55, %v1528_v37  ;;  %v1529_v47 = vmul.f32 %v9447_v38, %v11703_v43  ;;  %8241 = vmatmul.mubr.bf16.gmra.mrb[72].mxu1 %v11753_v36 }
 0x26e   : > { %8244 = vmatprep.mubr.msk.bf16.mxu1 %vm10992_vm0, %v10991_v0  ;;  %8293 = vmatpush3.bf16.msra.mxu1 %v10557_v34 }
 0x26f   : > { %v1566_v49 = vadd.f32 %v11705_v55, %v1529_v47  ;;  %8294 = vmatprep.subr.bf16.mxu1 %v10991_v0  ;;  %v1595_v6 = vmax.f32 %v1565_v45, 0.0 }
 0x270   : > { %v1410_v50 = vpop.f32.mrb[24].mxu0 }
 0x271   : > { %v901_v51 = vpop.f32.mrb[28].mxu1  ;;  %v1596_v53 = vmax.f32 %v1566_v49, 0.0  ;;  %v9448_v2 = vadd.f32 %v1410_v50, %v893_v23  ;;  %v8178_v10 = vpop.f32.mrb[25].mxu0 }
 0x272   : > { %v8058_v12 = vpop.f32.mrb[29].mxu1  ;;  %v1413_v15 = vpop.f32.mrb[26].mxu0  ;;  %8295 = vmatpush3.bf16.msra.mxu1 %v10558_v48 }
 0x273   : > { %v904_v16 = vpop.f32.mrb[30].mxu1  ;;  %v11765_v25 = vpack.c.bf16 %v1596_v53, %v1595_v6  ;;  %v1530_v26 = vmul.f32 %v9448_v2, %v11703_v43  ;;  %v9449_v33 = vadd.f32 %v1413_v15, %v896_v32  ;;  %v8179_v39 = vpop.f32.mrb[27].mxu0  ;;  %8348 = vmatprep.subr.bf16.mxu1 %v10991_v0 }
 0x274   : > { %v8059_v44 = vpop.f32.mrb[31].mxu1 }
 0x275   : > { %1635 = vst [vmem:[#allocation2 + $0x28] sm:$0xff] %v11765_v25  ;;  %v1567_v46 = vadd.f32 %v11705_v55, %v1530_v26  ;;  %v1531_v52 = vmul.f32 %v9449_v33, %v11703_v43  ;;  %8245 = vmatmul.mubr.bf16.gmra.mrb[76].mxu1 %v11765_v25 }
 0x276   : > { %8248 = vmatprep.mubr.msk.bf16.mxu1 %vm10992_vm0, %v10991_v0 }
 0x277   : > { %v1568_v54 = vadd.f32 %v11705_v55, %v1531_v52  ;;  %v1597_v58 = vmax.f32 %v1567_v46, 0.0 }
 0x278   : > { %v1418_v56 = vpop.f32.mrb[28].mxu0 }
 0x279   : > { %v909_v57 = vpop.f32.mrb[32].mxu1  ;;  %v1598_v59 = vmax.f32 %v1568_v54, 0.0  ;;  %v9450_v60 = vadd.f32 %v1418_v56, %v901_v51  ;;  %v8182_v61 = vpop.f32.mrb[29].mxu0 }
 0x27a   : > { %v8062_v62 = vpop.f32.mrb[33].mxu1  ;;  %v1421_v63 = vpop.f32.mrb[30].mxu0 }
 0x27b   : > { %v912_v1 = vpop.f32.mrb[34].mxu1  ;;  %v11776_v3 = vpack.c.bf16 %v1598_v59, %v1597_v58  ;;  %v1532_v4 = vmul.f32 %v9450_v60, %v11703_v43  ;;  %v9451_v5 = vadd.f32 %v1421_v63, %v904_v16  ;;  %v8183_v7 = vpop.f32.mrb[31].mxu0 }
 0x27c   : > { %v8063_v9 = vpop.f32.mrb[35].mxu1 }
 0x27d   : > { %1636 = vst [vmem:[#allocation2 + $0x30] sm:$0xff] %v11776_v3  ;;  %v1569_v11 = vadd.f32 %v11705_v55, %v1532_v4  ;;  %v1533_v13 = vmul.f32 %v9451_v5, %v11703_v43  ;;  %8249 = vmatmul.mubr.bf16.gmra.mrb[80].mxu1 %v11776_v3 }
 0x27e   : > { %8252 = vmatprep.mubr.msk.bf16.mxu1 %vm10992_vm0, %v10991_v0 }
 0x27f   : > { %v1570_v14 = vadd.f32 %v11705_v55, %v1533_v13  ;;  %v1599_v20 = vmax.f32 %v1569_v11, 0.0 }
 0x280   : > { %v1426_v18 = vpop.f32.mrb[32].mxu0 }
 0x281   : > { %v917_v19 = vpop.f32.mrb[36].mxu1  ;;  %v1600_v21 = vmax.f32 %v1570_v14, 0.0  ;;  %v9452_v22 = vadd.f32 %v1426_v18, %v909_v57  ;;  %v8186_v23 = vpop.f32.mrb[33].mxu0 }
 0x282   : > { %v8066_v24 = vpop.f32.mrb[37].mxu1  ;;  %v1429_v27 = vpop.f32.mrb[34].mxu0 }
 0x283   : > { %v920_v28 = vpop.f32.mrb[38].mxu1  ;;  %v11786_v29 = vpack.c.bf16 %v1600_v21, %v1599_v20  ;;  %v1534_v30 = vmul.f32 %v9452_v22, %v11703_v43  ;;  %v9453_v31 = vadd.f32 %v1429_v27, %v912_v1  ;;  %v8187_v32 = vpop.f32.mrb[35].mxu0 }
 0x284   : > { %v8067_v34 = vpop.f32.mrb[39].mxu1 }
 0x285   : > { %v1571_v37 = vadd.f32 %v11705_v55, %v1534_v30  ;;  %v1535_v38 = vmul.f32 %v9453_v31, %v11703_v43  ;;  %8253 = vmatmul.mubr.bf16.gmra.mrb[84].mxu1 %v11786_v29 }
 0x286   : > { %8256 = vmatprep.mubr.msk.bf16.mxu1 %vm10992_vm0, %v10991_v0 }
 0x287   : > { %v1572_v41 = vadd.f32 %v11705_v55, %v1535_v38  ;;  %v1601_v47 = vmax.f32 %v1571_v37, 0.0 }
 0x288   : > { %v1434_v42 = vpop.f32.mrb[36].mxu0 }
 0x289   : > { %v925_v45 = vpop.f32.mrb[40].mxu1  ;;  %v1602_v48 = vmax.f32 %v1572_v41, 0.0  ;;  %v9454_v49 = vadd.f32 %v1434_v42, %v917_v19  ;;  %v8190_v50 = vpop.f32.mrb[37].mxu0 }
 0x28a   : > { %v8070_v51 = vpop.f32.mrb[41].mxu1  ;;  %v1437_v6 = vpop.f32.mrb[38].mxu0 }
 0x28b   : > { %v928_v53 = vpop.f32.mrb[42].mxu1  ;;  %v11795_v2 = vpack.c.bf16 %v1602_v48, %v1601_v47  ;;  %v1536_v10 = vmul.f32 %v9454_v49, %v11703_v43  ;;  %v9455_v12 = vadd.f32 %v1437_v6, %v920_v28  ;;  %v8191_v15 = vpop.f32.mrb[39].mxu0 }
 0x28c   : > { %v8071_v16 = vpop.f32.mrb[43].mxu1 }
 0x28d   : > { %v1573_v26 = vadd.f32 %v11705_v55, %v1536_v10  ;;  %v1537_v33 = vmul.f32 %v9455_v12, %v11703_v43  ;;  %8257 = vmatmul.mubr.bf16.gmra.mrb[88].mxu1 %v11795_v2 }
 0x28e   : > { %8260 = vmatprep.mubr.msk.bf16.mxu1 %vm10992_vm0, %v10991_v0 }
 0x28f   : > { %v1574_v39 = vadd.f32 %v11705_v55, %v1537_v33  ;;  %v1603_v52 = vmax.f32 %v1573_v26, 0.0 }
 0x290   : > { %v1442_v44 = vpop.f32.mrb[40].mxu0 }
 0x291   : > { %v933_v46 = vpop.f32.mrb[44].mxu1  ;;  %v1604_v54 = vmax.f32 %v1574_v39, 0.0  ;;  %v9456_v56 = vadd.f32 %v1442_v44, %v925_v45  ;;  %v8194_v57 = vpop.f32.mrb[41].mxu0 }
 0x292   : > { %v8074_v58 = vpop.f32.mrb[45].mxu1  ;;  %v1445_v59 = vpop.f32.mrb[42].mxu0 }
 0x293   : > { %v936_v60 = vpop.f32.mrb[46].mxu1  ;;  %v11804_v61 = vpack.c.bf16 %v1604_v54, %v1603_v52  ;;  %v1538_v62 = vmul.f32 %v9456_v56, %v11703_v43  ;;  %v9457_v63 = vadd.f32 %v1445_v59, %v928_v53  ;;  %v8195_v1 = vpop.f32.mrb[43].mxu0 }
 0x294   : > { %v8075_v4 = vpop.f32.mrb[47].mxu1 }
 0x295   : > { %v1575_v5 = vadd.f32 %v11705_v55, %v1538_v62  ;;  %v1539_v7 = vmul.f32 %v9457_v63, %v11703_v43  ;;  %8261 = vmatmul.mubr.bf16.gmra.mrb[92].mxu1 %v11804_v61 }
 0x296   : > { %8264 = vmatprep.mubr.msk.bf16.mxu1 %vm10992_vm0, %v10991_v0 }
 0x297   : > { %v1576_v9 = vadd.f32 %v11705_v55, %v1539_v7  ;;  %v1605_v14 = vmax.f32 %v1575_v5, 0.0 }
 0x298   : > { %v1450_v11 = vpop.f32.mrb[44].mxu0 }
 0x299   : > { %v941_v13 = vpop.f32.mrb[48].mxu1  ;;  %v1606_v18 = vmax.f32 %v1576_v9, 0.0  ;;  %v9458_v19 = vadd.f32 %v1450_v11, %v933_v46  ;;  %v8198_v20 = vpop.f32.mrb[45].mxu0 }
 0x29a   : > { %v8078_v21 = vpop.f32.mrb[49].mxu1  ;;  %v1453_v22 = vpop.f32.mrb[46].mxu0 }
 0x29b   : > { %v944_v23 = vpop.f32.mrb[50].mxu1  ;;  %v11813_v24 = vpack.c.bf16 %v1606_v18, %v1605_v14  ;;  %v1540_v27 = vmul.f32 %v9458_v19, %v11703_v43  ;;  %v9459_v28 = vadd.f32 %v1453_v22, %v936_v60  ;;  %v8199_v30 = vpop.f32.mrb[47].mxu0 }
 0x29c   : > { %v8079_v31 = vpop.f32.mrb[51].mxu1 }
 0x29d   : > { %v1577_v32 = vadd.f32 %v11705_v55, %v1540_v27  ;;  %v1541_v34 = vmul.f32 %v9459_v28, %v11703_v43  ;;  %8265 = vmatmul.mubr.bf16.gmra.mrb[96].mxu1 %v11813_v24 }
 0x29e   : > { %8268 = vmatprep.mubr.msk.bf16.mxu1 %vm10992_vm0, %v10991_v0 }
 0x29f   : > { %v1578_v37 = vadd.f32 %v11705_v55, %v1541_v34  ;;  %v1607_v42 = vmax.f32 %v1577_v32, 0.0 }
 0x2a0   : > { %v1458_v38 = vpop.f32.mrb[48].mxu0 }
 0x2a1   : > { %v949_v41 = vpop.f32.mrb[52].mxu1  ;;  %v1608_v45 = vmax.f32 %v1578_v37, 0.0  ;;  %v9460_v47 = vadd.f32 %v1458_v38, %v941_v13  ;;  %v8202_v48 = vpop.f32.mrb[49].mxu0  ;;  %v1646_v38 = vld [vmem:[#allocation2 + $0x70] sm:$0xff] }
 0x2a2   : > { %v8082_v49 = vpop.f32.mrb[53].mxu1  ;;  %v1461_v50 = vpop.f32.mrb[50].mxu0  ;;  %v10563_v48 = vld [vmem:[#allocation9 + $0x1a0] sm:$0xff]  }
 0x2a3   : > { %v952_v51 = vpop.f32.mrb[54].mxu1  ;;  %v11822_v6 = vpack.c.bf16 %v1608_v45, %v1607_v42  ;;  %v1542_v53 = vmul.f32 %v9460_v47, %v11703_v43  ;;  %v9461_v10 = vadd.f32 %v1461_v50, %v944_v23  ;;  %v8203_v12 = vpop.f32.mrb[51].mxu0  ;;  %v10561_v45 = vld [vmem:[#allocation9 + $0x190] sm:$0xff]   ;;  %v10562_v47 = vld [vmem:[#allocation9 + $0x198] sm:$0xff]   ;;  %v10564_v49 = vld [vmem:[#allocation9 + $0x1a8] sm:$0xff]  }
 0x2a4   : > { %v8083_v15 = vpop.f32.mrb[55].mxu1  ;;  %v10565_v50 = vld [vmem:[#allocation9 + $0x1b0] sm:$0xff]   ;;  %v10634_v37 = vld [vmem:[#allocation14 + $0x198] sm:$0xff]  }
 0x2a5   : > { %v1579_v16 = vadd.f32 %v11705_v55, %v1542_v53  ;;  %v1543_v26 = vmul.f32 %v9461_v10, %v11703_v43  ;;  %8269 = vmatmul.mubr.bf16.gmra.mrb[100].mxu1 %v11822_v6  ;;  %v10567_v53 = vld [vmem:[#allocation9 + $0x40] sm:$0xff]   ;;  %v10568_v10 = vld [vmem:[#allocation9 + $0x48] sm:$0xff]   ;;  %v10569_v12 = vld [vmem:[#allocation9 + $0x50] sm:$0xff]  }
 0x2a6   : > { %8272 = vmatprep.mubr.msk.bf16.mxu1 %vm10992_vm0, %v10991_v0  ;;  %v10570_v15 = vld [vmem:[#allocation9 + $0x58] sm:$0xff]  }
 0x2a7   : > { %v1580_v33 = vadd.f32 %v11705_v55, %v1543_v26  ;;  %v1609_v46 = vmax.f32 %v1579_v16, 0.0  ;;  %v10571_v16 = vld [vmem:[#allocation9 + $0x60] sm:$0xff]   ;;  %v10572_v26 = vld [vmem:[#allocation9 + $0x68] sm:$0xff]  }
 0x2a8   : > { %v1466_v39 = vpop.f32.mrb[52].mxu0 }
 0x2a9   : > { %v957_v44 = vpop.f32.mrb[56].mxu1  ;;  %v1610_v52 = vmax.f32 %v1580_v33, 0.0  ;;  %v9462_v54 = vadd.f32 %v1466_v39, %v949_v41  ;;  %v8206_v56 = vpop.f32.mrb[53].mxu0  ;;  %v10559_v41 = vld [vmem:[#allocation9 + $0x180] sm:$0xff]   ;;  %v10573_v33 = vld [vmem:[#allocation9 + $0x70] sm:$0xff]   ;;  %v10574_v39 = vld [vmem:[#allocation9 + $0x78] sm:$0xff]  }
 0x2aa   : > { %v8086_v57 = vpop.f32.mrb[57].mxu1  ;;  %v1469_v58 = vpop.f32.mrb[54].mxu0  ;;  %v2314_v56 = vshrl.u32 %v11711_v17, 16 }
 0x2ab   : > { %v960_v59 = vpop.f32.mrb[58].mxu1  ;;  %v11831_v60 = vpack.c.bf16 %v1610_v52, %v1609_v46  ;;  %v1544_v62 = vmul.f32 %v9462_v54, %v11703_v43  ;;  %v9463_v63 = vadd.f32 %v1469_v58, %v952_v51  ;;  %v8207_v1 = vpop.f32.mrb[55].mxu0  ;;  %v10566_v51 = vld [vmem:[#allocation9 + $0x1b8] sm:$0xff]   ;;  %v2321_v52 = vshll.u32 %v11718_v40, 16 }
 0x2ac   : > { %v8087_v4 = vpop.f32.mrb[59].mxu1  ;;  %v10576_v1 = vld [vmem:[#allocation9 + $0x108] sm:$0xff]  }
 0x2ad   : > { %v1581_v5 = vadd.f32 %v11705_v55, %v1544_v62  ;;  %v1545_v7 = vmul.f32 %v9463_v63, %v11703_v43  ;;  %8273 = vmatmul.mubr.bf16.gmra.mrb[104].mxu1 %v11831_v60  ;;  %v2323_v57 = vrot.slane %v2321_v52, 1  ;;  %v2329_v63 = vshll.u32 %v11729_v35, 16 }
 0x2ae   : > { %8276 = vmatprep.mubr.msk.bf16.mxu1 %vm10992_vm0, %v10991_v0  ;;  %v2325_v4 = vshrl.u32 %v11718_v40, 16  ;;  %v2393_v52 = vshll.u32 %v11813_v24, 16 }
 0x2af   : > { %v1582_v9 = vadd.f32 %v11705_v55, %v1545_v7  ;;  %v1611_v13 = vmax.f32 %v1581_v5, 0.0  ;;  %v2331_v5 = vrot.slane %v2329_v63, 1 }
 0x2b0   : > { %v1474_v11 = vpop.f32.mrb[56].mxu0  ;;  %v2327_v7 = vor.u32 %v2325_v4, %v2323_v57 }
 0x2b1   : > { %v1612_v14 = vmax.f32 %v1582_v9, 0.0  ;;  %v9464_v18 = vadd.f32 %v1474_v11, %v957_v44  ;;  %v8210_v19 = vpop.f32.mrb[57].mxu0  ;;  %v2316_v44 = vshll.u32 %v11711_v17, 16  ;;  %v2337_v11 = vshll.u32 %v11741_v8, 16 }
 0x2b2   : > { %v1477_v20 = vpop.f32.mrb[58].mxu0  ;;  %v11964_v9 = vsel %vm967_vm2, %v2327_v7, %v2331_v5  ;;  %v10579_v19 = vld [vmem:[#allocation9 + $0x120] sm:$0xff]   ;;  %v2405_v7 = vshrl.u32 %v11822_v6, 16 }
 0x2b3   : > { %v11840_v21 = vpack.c.bf16 %v1612_v14, %v1611_v13  ;;  %v1546_v22 = vmul.f32 %v9464_v18, %v11703_v43  ;;  %v9465_v23 = vadd.f32 %v1477_v20, %v960_v59  ;;  %v8211_v27 = vpop.f32.mrb[59].mxu0  ;;  %v2318_v54 = vrot.slane %v2316_v44, 1  ;;  %v10575_v59 = vld [vmem:[#allocation9 + $0x100] sm:$0xff]   ;;  %v10578_v13 = vld [vmem:[#allocation9 + $0x118] sm:$0xff]  }
 0x2b4   : > { %v2339_v14 = vrot.slane %v2337_v11, 1 }
 0x2b5   : > { %v1583_v28 = vadd.f32 %v11705_v55, %v1546_v22  ;;  %v1547_v30 = vmul.f32 %v9465_v23, %v11703_v43  ;;  %8277 = vmatmul.mubr.bf16.gmra.mrb[108].mxu1 %v11840_v21  ;;  %v2319_v58 = vor.u32 %v2318_v54, %v2314_v56  ;;  %v2345_v22 = vshll.u32 %v11753_v36, 16  ;;  %v10580_v23 = vld [vmem:[#allocation9 + $0x128] sm:$0xff]  }
 0x2b6   : > { %8296 = vmatprep.mubr.msk.bf16.mxu1 %vm10992_vm0, %v10991_v0  ;;  %v2389_v54 = vshrl.u32 %v11804_v61, 16  ;;  %v2395_v56 = vrot.slane %v2393_v52, 1  ;;  %v10602_v52 = vld [vmem:[#allocation9 + $0x158] sm:$0xff]  }
 0x2b7   : > { %v1584_v31 = vadd.f32 %v11705_v55, %v1547_v30  ;;  %v1613_v32 = vmax.f32 %v1583_v28, 0.0  ;;  %v10560_v55 = vld [vmem:[#allocation9 + $0x188] sm:$0xff]   ;;  %v2324_v62 = vsel %vm967_vm2, %v2319_v58, %v2323_v57  ;;  %v2347_v27 = vrot.slane %v2345_v22, 1  ;;  %v10581_v30 = vld [vmem:[#allocation9 + $0x130] sm:$0xff]  }
 0x2b8   : > { %v10585_v22 = vld [vmem:[#allocation9 + $0x1d0] sm:$0xff]  }
 0x2b9   : > { %v1614_v34 = vmax.f32 %v1584_v31, 0.0 }
 0x2bb   : > { %v1629_v42 = vpack.c.bf16 %v1614_v34, %v1613_v32  ;;  %v2353_v32 = vshll.u32 %v11765_v25, 16  ;;  %v10582_v34 = vld [vmem:[#allocation9 + $0x138] sm:$0xff]  }
 0x2bd   : > { %v11857_v43 = vsel %vm11851_vm4, %v1629_v42, %v1646_v38  ;;  %8297 = vmatmul.mubr.bf16.vlgmr.msra.gmra.mrb[60].mxu1 %v11711_v17  ;;  %v10577_v17 = vld [vmem:[#allocation9 + $0x110] sm:$0xff]   ;;  %v2355_v38 = vrot.slane %v2353_v32, 1 }
 0x2be   : > { %1648 = vst [vmem:[#allocation2 + $0x70] sm:$0xff] %v11857_v43  ;;  %8349 = vmatpush3.bf16.msra.mxu1 %v10559_v41  ;;  %8300 = vmatprep.mubr.msk.bf16.mxu1 %vm10992_vm0, %v10991_v0 }
 0x2bf   : > { %8350 = vmatprep.subr.bf16.mxu1 %v10991_v0 }
 0x2c2   : > { %8351 = vmatpush3.bf16.msra.mxu1 %v10560_v55  ;;  %v2361_v55 = vshll.u32 %v11776_v3, 16 }
 0x2c3   : > { %8352 = vmatprep.subr.bf16.mxu1 %v10991_v0 }
 0x2c5   : > { %8301 = vmatmul.mubr.bf16.gmra.mrb[64].mxu1 %v11718_v40  ;;  %v1663_v46 = vld [vmem:[#allocation2 + $0x70] sm:$0x7f]  ;;  %v2333_v40 = vshrl.u32 %v11729_v35, 16 }
 0x2c6   : > { %8304 = vmatprep.mubr.msk.bf16.mxu1 %vm10992_vm0, %v10991_v0  ;;  %8353 = vmatpush3.bf16.msra.mxu1 %v10561_v45  ;;  %v2357_v45 = vshrl.u32 %v11765_v25, 16 }
 0x2c7   : > { %8354 = vmatprep.subr.bf16.mxu1 %v10991_v0  ;;  %v2335_v18 = vor.u32 %v2333_v40, %v2331_v5  ;;  %v2409_v5 = vshll.u32 %v11831_v60, 16  ;;  %v2413_v40 = vshrl.u32 %v11831_v60, 16 }
 0x2c9   : > { %v11974_v20 = vsel %vm967_vm2, %v2335_v18, %v2339_v14  ;;  %v10583_v18 = vld [vmem:[#allocation9 + $0x1c0] sm:$0xff]  }
 0x2ca   : > { %8355 = vmatpush3.bf16.msra.mxu1 %v10562_v47  ;;  %v2363_v47 = vrot.slane %v2361_v55, 1  ;;  %v10592_v55 = vld [vmem:[#allocation9 + $0x88] sm:$0xff]  }
 0x2cb   : > { %8356 = vmatprep.subr.bf16.mxu1 %v10991_v0 }
 0x2cd   : > { %8305 = vmatmul.mubr.bf16.gmra.mrb[68].mxu1 %v11729_v35 }
 0x2ce   : > { %8308 = vmatprep.mubr.msk.bf16.mxu1 %vm10992_vm0, %v10991_v0  ;;  %8357 = vmatpush3.bf16.msra.mxu1 %v10563_v48  ;;  %v2359_v48 = vor.u32 %v2357_v45, %v2355_v38  ;;  %v10593_v45 = vld [vmem:[#allocation9 + $0x90] sm:$0xff]  }
 0x2cf   : > { %8358 = vmatprep.subr.bf16.mxu1 %v10991_v0 }
 0x2d2   : > { %8359 = vmatpush3.bf16.msra.mxu1 %v10564_v49  ;;  %v2369_v49 = vshll.u32 %v11786_v29, 16 }
 0x2d3   : > { %8360 = vmatprep.subr.bf16.mxu1 %v10991_v0 }
 0x2d5   : > { %8309 = vmatmul.mubr.bf16.gmra.mrb[72].mxu1 %v11741_v8 }
 0x2d6   : > { %8312 = vmatprep.mubr.msk.bf16.mxu1 %vm10992_vm0, %v10991_v0  ;;  %8361 = vmatpush3.bf16.msra.mxu1 %v10565_v50  ;;  %v2365_v50 = vshrl.u32 %v11776_v3, 16 }
 0x2d7   : > { %8362 = vmatprep.subr.bf16.mxu1 %v10991_v0 }
 0x2da   : > { %8363 = vmatpush3.bf16.msra.mxu1 %v10566_v51  ;;  %v2371_v51 = vrot.slane %v2369_v49, 1  ;;  %v10598_v49 = vld [vmem:[#allocation9 + $0xb8] sm:$0xff]  }
 0x2db   : > { %8416 = vmatprep.subr.bf16.mxu1 %v10991_v0 }
 0x2dd   : > { %8313 = vmatmul.mubr.bf16.gmra.mrb[76].mxu1 %v11753_v36 }
 0x2de   : > { %8316 = vmatprep.mubr.msk.bf16.mxu1 %vm10992_vm0, %v10991_v0 }
 0x2e5   : > { %8317 = vmatmul.mubr.bf16.gmra.mrb[80].mxu1 %v11765_v25 }
 0x2e6   : > { %8320 = vmatprep.mubr.msk.bf16.mxu1 %vm10992_vm0, %v10991_v0 }
 0x2ed   : > { %8321 = vmatmul.mubr.bf16.gmra.mrb[84].mxu1 %v11776_v3 }
 0x2ee   : > { %8324 = vmatprep.mubr.msk.bf16.mxu1 %vm10992_vm0, %v10991_v0 }
 0x2f5   : > { %8325 = vmatmul.mubr.bf16.gmra.mrb[88].mxu1 %v11786_v29 }
 0x2f6   : > { %8328 = vmatprep.mubr.msk.bf16.mxu1 %vm10992_vm0, %v10991_v0 }
 0x2fd   : > { %8329 = vmatmul.mubr.bf16.gmra.mrb[92].mxu1 %v11795_v2 }
 0x2fe   : > { %8332 = vmatprep.mubr.msk.bf16.mxu1 %vm10992_vm0, %v10991_v0 }
 0x305   : > { %8333 = vmatmul.mubr.bf16.gmra.mrb[96].mxu1 %v11804_v61 }
 0x306   : > { %8336 = vmatprep.mubr.msk.bf16.mxu1 %vm10992_vm0, %v10991_v0 }
 0x30d   : > { %8337 = vmatmul.mubr.bf16.gmra.mrb[100].mxu1 %v11813_v24 }
 0x30e   : > { %8340 = vmatprep.mubr.msk.bf16.mxu1 %vm10992_vm0, %v10991_v0 }
 0x315   : > { %8341 = vmatmul.mubr.bf16.gmra.mrb[104].mxu1 %v11822_v6 }
 0x316   : > { %8344 = vmatprep.mubr.msk.bf16.mxu1 %vm10992_vm0, %v10991_v0 }
 0x31d   : > { %8345 = vmatmul.mubr.bf16.gmra.mrb[108].mxu1 %v11831_v60 }
 0x31e   : > { %8364 = vmatprep.mubr.msk.bf16.mxu1 %vm10992_vm0, %v10991_v0 }
 0x325   : > { %8365 = vmatmul.mubr.bf16.vlgmr.msra.gmra.mrb[60].mxu1 %v11729_v35  ;;  %v2341_v35 = vshrl.u32 %v11741_v8, 16 }
 0x326   : > { %8417 = vmatpush3.bf16.msra.mxu1 %v10567_v53  ;;  %8368 = vmatprep.mubr.msk.bf16.mxu1 %vm10992_vm0, %v10991_v0  ;;  %v2367_v53 = vor.u32 %v2365_v50, %v2363_v47 }
 0x327   : > { %8418 = vmatprep.subr.bf16.mxu1 %v10991_v0  ;;  %v2343_v28 = vor.u32 %v2341_v35, %v2339_v14  ;;  %v10588_v35 = vld [vmem:[#allocation9 + $0x1e8] sm:$0xff]  }
 0x329   : > { %v11984_v31 = vsel %vm967_vm2, %v2343_v28, %v2347_v27  ;;  %v10590_v28 = vld [vmem:[#allocation9 + $0x1f8] sm:$0xff]  }
 0x32a   : > { %8419 = vmatpush3.bf16.msra.mxu1 %v10568_v10  ;;  %v12010_v10 = vsel %vm967_vm2, %v2367_v53, %v2371_v51 }
 0x32b   : > { %8420 = vmatprep.subr.bf16.mxu1 %v10991_v0 }
 0x32d   : > { %8369 = vmatmul.mubr.bf16.gmra.mrb[64].mxu1 %v11741_v8  ;;  %v2349_v8 = vshrl.u32 %v11753_v36, 16 }
 0x32e   : > { %8372 = vmatprep.mubr.msk.bf16.mxu1 %vm10992_vm0, %v10991_v0  ;;  %8421 = vmatpush3.bf16.msra.mxu1 %v10569_v12  ;;  %v2373_v12 = vshrl.u32 %v11786_v29, 16 }
 0x32f   : > { %8422 = vmatprep.subr.bf16.mxu1 %v10991_v0  ;;  %v2351_v41 = vor.u32 %v2349_v8, %v2347_v27  ;;  %v10589_v27 = vld [vmem:[#allocation9 + $0x1f0] sm:$0xff]   ;;  %v2662_v8 = vshrl.u32 %v11840_v21, 16 }
 0x331   : > { %v11994_v42 = vsel %vm967_vm2, %v2351_v41, %v2355_v38  ;;  %v10591_v41 = vld [vmem:[#allocation9 + $0x80] sm:$0xff]  }
 0x332   : > { %8423 = vmatpush3.bf16.msra.mxu1 %v10570_v15 }
 0x333   : > { %8424 = vmatprep.subr.bf16.mxu1 %v10991_v0 }
 0x335   : > { %8373 = vmatmul.mubr.bf16.gmra.mrb[68].mxu1 %v11753_v36  ;;  %v12002_v36 = vsel %vm967_vm2, %v2359_v48, %v2363_v47  ;;  %v10594_v47 = vld [vmem:[#allocation9 + $0x98] sm:$0xff]   ;;  %v10596_v48 = vld [vmem:[#allocation9 + $0xa8] sm:$0xff]  }
 0x336   : > { %8376 = vmatprep.mubr.msk.bf16.mxu1 %vm10992_vm0, %v10991_v0  ;;  %8425 = vmatpush3.bf16.msra.mxu1 %v10571_v16  ;;  %v2375_v16 = vor.u32 %v2373_v12, %v2371_v51  ;;  %v2900_v51 = vshrl.u32 %v11857_v43, 16  ;;  %v10687_v12 = vld [vmem:[#allocation2 + $0x8] sm:$0xff] }
 0x337   : > { %8426 = vmatprep.subr.bf16.mxu1 %v10991_v0 }
 0x33a   : > { %8427 = vmatpush3.bf16.msra.mxu1 %v10572_v26 }
 0x33b   : > { %8428 = vmatprep.subr.bf16.mxu1 %v10991_v0 }
 0x33d   : > { %8377 = vmatmul.mubr.bf16.gmra.mrb[72].mxu1 %v11765_v25  ;;  %v2377_v25 = vshll.u32 %v11795_v2, 16 }
 0x33e   : > { %8380 = vmatprep.mubr.msk.bf16.mxu1 %vm10992_vm0, %v10991_v0  ;;  %8429 = vmatpush3.bf16.msra.mxu1 %v10573_v33  ;;  %v2381_v33 = vshrl.u32 %v11795_v2, 16 }
 0x33f   : > { %8430 = vmatprep.subr.bf16.mxu1 %v10991_v0  ;;  %v2379_v15 = vrot.slane %v2377_v25, 1 }
 0x341   : > { %v12018_v26 = vsel %vm967_vm2, %v2375_v16, %v2379_v15  ;;  %v2383_v44 = vor.u32 %v2381_v33, %v2379_v15  ;;  %v3149_v15 = vrot.slane %v10687_v12, 1  ;;  %v10599_v16 = vld [vmem:[#allocation9 + $0x140] sm:$0xff]  }
 0x342   : > { %8431 = vmatpush3.bf16.msra.mxu1 %v10574_v39  ;;  %v10688_v33 = vld [vmem:[#allocation2 + $0x10] sm:$0xff] }
 0x343   : > { %8484 = vmatprep.subr.bf16.mxu1 %v10991_v0 }
 0x345   : > { %8381 = vmatmul.mubr.bf16.gmra.mrb[76].mxu1 %v11776_v3  ;;  %v2385_v3 = vshll.u32 %v11804_v61, 16 }
 0x346   : > { %8384 = vmatprep.mubr.msk.bf16.mxu1 %vm10992_vm0, %v10991_v0 }
 0x347   : > { %v2387_v39 = vrot.slane %v2385_v3, 1  ;;  %v10600_v3 = vld [vmem:[#allocation9 + $0x148] sm:$0xff]  }
 0x349   : > { %v2391_v57 = vor.u32 %v2389_v54, %v2387_v39  ;;  %v10689_v54 = vld [vmem:[#allocation2 + $0x18] sm:$0xff] }
 0x34b   : > { %v12034_v58 = vsel %vm967_vm2, %v2391_v57, %v2395_v56  ;;  %v10603_v57 = vld [vmem:[#allocation9 + $0x160] sm:$0xff]  }
 0x34d   : > { %8385 = vmatmul.mubr.bf16.gmra.mrb[80].mxu1 %v11786_v29 }
 0x34e   : > { %8388 = vmatprep.mubr.msk.bf16.mxu1 %vm10992_vm0, %v10991_v0 }
 0x355   : > { %8389 = vmatmul.mubr.bf16.gmra.mrb[84].mxu1 %v11795_v2 }
 0x356   : > { %8392 = vmatprep.mubr.msk.bf16.mxu1 %vm10992_vm0, %v10991_v0 }
 0x35d   : > { %8393 = vmatmul.mubr.bf16.gmra.mrb[88].mxu1 %v11804_v61 }
 0x35e   : > { %8396 = vmatprep.mubr.msk.bf16.mxu1 %vm10992_vm0, %v10991_v0 }
 0x365   : > { %8397 = vmatmul.mubr.bf16.gmra.mrb[92].mxu1 %v11813_v24 }
 0x366   : > { %8400 = vmatprep.mubr.msk.bf16.mxu1 %vm10992_vm0, %v10991_v0 }
 0x36d   : > { %8401 = vmatmul.mubr.bf16.gmra.mrb[96].mxu1 %v11822_v6 }
 0x36e   : > { %8404 = vmatprep.mubr.msk.bf16.mxu1 %vm10992_vm0, %v10991_v0 }
 0x375   : > { %8405 = vmatmul.mubr.bf16.gmra.mrb[100].mxu1 %v11831_v60 }
 0x376   : > { %8408 = vmatprep.mubr.msk.bf16.mxu1 %vm10992_vm0, %v10991_v0 }
 0x37d   : > { %8409 = vmatmul.mubr.bf16.gmra.mrb[104].mxu1 %v11840_v21 }
 0x37e   : > { %8412 = vmatprep.mubr.msk.bf16.mxu1 %vm10992_vm0, %v10991_v0 }
 0x385   : > { %8413 = vmatmul.mubr.bf16.gmra.mrb[108].mxu1 %v1663_v46  ;;  %v12026_v46 = vsel %vm967_vm2, %v2383_v44, %v2387_v39  ;;  %v3151_v39 = vrot.slane %v10688_v33, 1  ;;  %v10601_v44 = vld [vmem:[#allocation9 + $0x150] sm:$0xff]  }
 0x386   : > { %8432 = vmatprep.mubr.msk.bf16.mxu1 %vm10992_vm0, %v10991_v0 }
 0x38d   : > { %8433 = vmatmul.mubr.bf16.vlgmr.msra.gmra.mrb[60].mxu1 %v2324_v62  ;;  %v2397_v62 = vshrl.u32 %v11813_v24, 16 }
 0x38e   : > { %8485 = vmatpush3.bf16.msra.mxu1 %v10575_v59  ;;  %8436 = vmatprep.mubr.msk.bf16.mxu1 %vm10992_vm0, %v10991_v0  ;;  %v2401_v59 = vshll.u32 %v11822_v6, 16 }
 0x38f   : > { %8486 = vmatprep.subr.bf16.mxu1 %v10991_v0 }
 0x390   : > { %v2403_v63 = vrot.slane %v2401_v59, 1  ;;  %v10604_v59 = vld [vmem:[#allocation9 + $0x168] sm:$0xff]  }
 0x392   : > { %8487 = vmatpush3.bf16.msra.mxu1 %v10576_v1  ;;  %v2399_v1 = vor.u32 %v2397_v62, %v2395_v56  ;;  %v2407_v11 = vor.u32 %v2405_v7, %v2403_v63  ;;  %v3153_v56 = vrot.slane %v10689_v54, 1  ;;  %v10690_v62 = vld [vmem:[#allocation2 + $0x20] sm:$0xff]  ;;  %v10691_v7 = vld [vmem:[#allocation2 + $0x28] sm:$0xff] }
 0x393   : > { %8488 = vmatprep.subr.bf16.mxu1 %v10991_v0 }
 0x394   : > { %v12042_v4 = vsel %vm967_vm2, %v2399_v1, %v2403_v63  ;;  %v3155_v63 = vrot.slane %v10690_v62, 1  ;;  %v10605_v1 = vld [vmem:[#allocation9 + $0x170] sm:$0xff]  }
 0x395   : > { %8437 = vmatmul.mubr.bf16.gmra.mrb[64].mxu1 %v11964_v9 }
 0x396   : > { %8440 = vmatprep.mubr.msk.bf16.mxu1 %vm10992_vm0, %v10991_v0  ;;  %8489 = vmatpush3.bf16.msra.mxu1 %v10577_v17  ;;  %v2411_v17 = vrot.slane %v2409_v5, 1  ;;  %v10606_v5 = vld [vmem:[#allocation9 + $0x178] sm:$0xff]  }
 0x397   : > { %8490 = vmatprep.subr.bf16.mxu1 %v10991_v0 }
 0x398   : > { %v2415_v14 = vor.u32 %v2413_v40, %v2411_v17 }
 0x39a   : > { %8491 = vmatpush3.bf16.msra.mxu1 %v10578_v13  ;;  %v12050_v13 = vsel %vm967_vm2, %v2407_v11, %v2411_v17  ;;  %v3157_v17 = vrot.slane %v10691_v7, 1 }
 0x39b   : > { %8492 = vmatprep.subr.bf16.mxu1 %v10991_v0 }
 0x39c   : > { %v12183_v11 = vsel %vm3147_vm5, %v3155_v63, %v3157_v17 }
 0x39d   : > { %8441 = vmatmul.mubr.bf16.gmra.mrb[68].mxu1 %v11974_v20 }
 0x39e   : > { %8444 = vmatprep.mubr.msk.bf16.mxu1 %vm10992_vm0, %v10991_v0  ;;  %8493 = vmatpush3.bf16.msra.mxu1 %v10579_v19  ;;  %v10584_v19 = vld [vmem:[#allocation9 + $0x1c8] sm:$0xff]  }
 0x39f   : > { %8494 = vmatprep.subr.bf16.mxu1 %v10991_v0 }
 0x3a2   : > { %8495 = vmatpush3.bf16.msra.mxu1 %v10580_v23  ;;  %v10586_v23 = vld [vmem:[#allocation9 + $0x1d8] sm:$0xff]  }
 0x3a3   : > { %8496 = vmatprep.subr.bf16.mxu1 %v10991_v0 }
 0x3a5   : > { %8445 = vmatmul.mubr.bf16.gmra.mrb[72].mxu1 %v11984_v31 }
 0x3a6   : > { %8448 = vmatprep.mubr.msk.bf16.mxu1 %vm10992_vm0, %v10991_v0  ;;  %8497 = vmatpush3.bf16.msra.mxu1 %v10581_v30  ;;  %v2658_v30 = vshll.u32 %v11840_v21, 16 }
 0x3a7   : > { %8498 = vmatprep.subr.bf16.mxu1 %v10991_v0 }
 0x3a8   : > { %v2660_v32 = vrot.slane %v2658_v30, 1  ;;  %v10609_v30 = vld [vmem:[#allocation9 + $0x210] sm:$0xff]  }
 0x3aa   : > { %8499 = vmatpush3.bf16.msra.mxu1 %v10582_v34  ;;  %v2661_v34 = vsel %vm967_vm2, %v2415_v14, %v2660_v32  ;;  %v2664_v38 = vor.u32 %v2662_v8, %v2660_v32  ;;  %v10610_v32 = vld [vmem:[#allocation9 + $0x218] sm:$0xff]   ;;  %v10612_v8 = vld [vmem:[#allocation9 + $0x228] sm:$0xff]  }
 0x3ab   : > { %8552 = vmatprep.subr.bf16.mxu1 %v10991_v0 }
 0x3ad   : > { %8449 = vmatmul.mubr.bf16.gmra.mrb[76].mxu1 %v11994_v42 }
 0x3ae   : > { %8452 = vmatprep.mubr.msk.bf16.mxu1 %vm10992_vm0, %v10991_v0 }
 0x3b5   : > { %8453 = vmatmul.mubr.bf16.gmra.mrb[80].mxu1 %v12002_v36 }
 0x3b6   : > { %8456 = vmatprep.mubr.msk.bf16.mxu1 %vm10992_vm0, %v10991_v0 }
 0x3bd   : > { %8457 = vmatmul.mubr.bf16.gmra.mrb[84].mxu1 %v12010_v10 }
 0x3be   : > { %8460 = vmatprep.mubr.msk.bf16.mxu1 %vm10992_vm0, %v10991_v0 }
 0x3c5   : > { %8461 = vmatmul.mubr.bf16.gmra.mrb[88].mxu1 %v12018_v26 }
 0x3c6   : > { %8464 = vmatprep.mubr.msk.bf16.mxu1 %vm10992_vm0, %v10991_v0 }
 0x3cd   : > { %8465 = vmatmul.mubr.bf16.gmra.mrb[92].mxu1 %v12026_v46 }
 0x3ce   : > { %8468 = vmatprep.mubr.msk.bf16.mxu1 %vm10992_vm0, %v10991_v0 }
 0x3d5   : > { %8469 = vmatmul.mubr.bf16.gmra.mrb[96].mxu1 %v12034_v58 }
 0x3d6   : > { %8472 = vmatprep.mubr.msk.bf16.mxu1 %vm10992_vm0, %v10991_v0 }
 0x3dd   : > { %8473 = vmatmul.mubr.bf16.gmra.mrb[100].mxu1 %v12042_v4 }
 0x3de   : > { %8476 = vmatprep.mubr.msk.bf16.mxu1 %vm10992_vm0, %v10991_v0 }
 0x3e5   : > { %8477 = vmatmul.mubr.bf16.gmra.mrb[104].mxu1 %v12050_v13 }
 0x3e6   : > { %8480 = vmatprep.mubr.msk.bf16.mxu1 %vm10992_vm0, %v10991_v0 }
 0x3ed   : > { %8481 = vmatmul.mubr.bf16.gmra.mrb[108].mxu1 %v2415_v14 }
 0x3ee   : > { %8500 = vmatprep.mubr.msk.bf16.mxu1 %vm10992_vm0, %v10991_v0 }
 0x3f5   : > { %8501 = vmatmul.mubr.bf16.vlgmr.msra.gmra.mrb[60].mxu1 %v11964_v9  ;;  %v10587_v9 = vld [vmem:[#allocation9 + $0x1e0] sm:$0xff]  }
 0x3f6   : > { %8553 = vmatpush3.bf16.msra.mxu1 %v10583_v18  ;;  %8504 = vmatprep.mubr.msk.bf16.mxu1 %vm10992_vm0, %v10991_v0  ;;  %v3161_v18 = vrot.slane %v11786_v29, 1  ;;  %v3165_v29 = vrot.slane %v11804_v61, 1  ;;  %v3169_v61 = vrot.slane %v11822_v6, 1  ;;  %v10607_v6 = vld [vmem:[#allocation9 + $0x200] sm:$0xff]  }
 0x3f7   : > { %8554 = vmatprep.subr.bf16.mxu1 %v10991_v0 }
 0x3fa   : > { %8555 = vmatpush3.bf16.msra.mxu1 %v10584_v19 }
 0x3fb   : > { %8556 = vmatprep.subr.bf16.mxu1 %v10991_v0 }
 0x3fd   : > { %8505 = vmatmul.mubr.bf16.gmra.mrb[64].mxu1 %v11974_v20 }
 0x3fe   : > { %8508 = vmatprep.mubr.msk.bf16.mxu1 %vm10992_vm0, %v10991_v0  ;;  %8557 = vmatpush3.bf16.msra.mxu1 %v10585_v22  ;;  %v3163_v22 = vrot.slane %v11795_v2, 1  ;;  %v3167_v2 = vrot.slane %v11813_v24, 1  ;;  %v12230_v24 = vrot.slane %v11831_v60, 1  ;;  %v10608_v60 = vld [vmem:[#allocation9 + $0x208] sm:$0xff]  }
 0x3ff   : > { %8558 = vmatprep.subr.bf16.mxu1 %v10991_v0 }
 0x402   : > { %8559 = vmatpush3.bf16.msra.mxu1 %v10586_v23  ;;  %v12203_v23 = vsel %vm3147_vm5, %v3161_v18, %v3163_v22 }
 0x403   : > { %8560 = vmatprep.subr.bf16.mxu1 %v10991_v0 }
 0x405   : > { %8509 = vmatmul.mubr.bf16.gmra.mrb[68].mxu1 %v11984_v31 }
 0x406   : > { %8512 = vmatprep.mubr.msk.bf16.mxu1 %vm10992_vm0, %v10991_v0  ;;  %8561 = vmatpush3.bf16.msra.mxu1 %v10587_v9  ;;  %v12210_v9 = vsel %vm3147_vm5, %v3163_v22, %v3165_v29 }
 0x407   : > { %8562 = vmatprep.subr.bf16.mxu1 %v10991_v0 }
 0x40a   : > { %8563 = vmatpush3.bf16.msra.mxu1 %v10588_v35  ;;  %v12217_v35 = vsel %vm3147_vm5, %v3165_v29, %v3167_v2 }
 0x40b   : > { %8564 = vmatprep.subr.bf16.mxu1 %v10991_v0 }
 0x40d   : > { %8513 = vmatmul.mubr.bf16.gmra.mrb[72].mxu1 %v11994_v42 }
 0x40e   : > { %8516 = vmatprep.mubr.msk.bf16.mxu1 %vm10992_vm0, %v10991_v0  ;;  %8565 = vmatpush3.bf16.msra.mxu1 %v10589_v27  ;;  %v12224_v27 = vsel %vm3147_vm5, %v3167_v2, %v3169_v61 }
 0x40f   : > { %8566 = vmatprep.subr.bf16.mxu1 %v10991_v0 }
 0x412   : > { %8567 = vmatpush3.bf16.msra.mxu1 %v10590_v28  ;;  %v12234_v28 = vsel %vm3147_vm5, %v3169_v61, %v12230_v24 }
 0x413   : > { %8620 = vmatprep.subr.bf16.mxu1 %v10991_v0 }
 0x415   : > { %8517 = vmatmul.mubr.bf16.gmra.mrb[76].mxu1 %v12002_v36 }
 0x416   : > { %8520 = vmatprep.mubr.msk.bf16.mxu1 %vm10992_vm0, %v10991_v0 }
 0x41d   : > { %8521 = vmatmul.mubr.bf16.gmra.mrb[80].mxu1 %v12010_v10 }
 0x41e   : > { %8524 = vmatprep.mubr.msk.bf16.mxu1 %vm10992_vm0, %v10991_v0 }
 0x425   : > { %8525 = vmatmul.mubr.bf16.gmra.mrb[84].mxu1 %v12018_v26 }
 0x426   : > { %8528 = vmatprep.mubr.msk.bf16.mxu1 %vm10992_vm0, %v10991_v0 }
 0x42d   : > { %8529 = vmatmul.mubr.bf16.gmra.mrb[88].mxu1 %v12026_v46 }
 0x42e   : > { %8532 = vmatprep.mubr.msk.bf16.mxu1 %vm10992_vm0, %v10991_v0 }
 0x435   : > { %8533 = vmatmul.mubr.bf16.gmra.mrb[92].mxu1 %v12034_v58 }
 0x436   : > { %8536 = vmatprep.mubr.msk.bf16.mxu1 %vm10992_vm0, %v10991_v0 }
 0x43d   : > { %8537 = vmatmul.mubr.bf16.gmra.mrb[96].mxu1 %v12042_v4 }
 0x43e   : > { %8540 = vmatprep.mubr.msk.bf16.mxu1 %vm10992_vm0, %v10991_v0 }
 0x445   : > { %8541 = vmatmul.mubr.bf16.gmra.mrb[100].mxu1 %v12050_v13 }
 0x446   : > { %8544 = vmatprep.mubr.msk.bf16.mxu1 %vm10992_vm0, %v10991_v0 }
 0x44d   : > { %8545 = vmatmul.mubr.bf16.gmra.mrb[104].mxu1 %v2661_v34 }
 0x44e   : > { %8548 = vmatprep.mubr.msk.bf16.mxu1 %vm10992_vm0, %v10991_v0 }
 0x455   : > { %8549 = vmatmul.mubr.bf16.gmra.mrb[108].mxu1 %v2664_v38 }
 0x456   : > { %8568 = vmatprep.mubr.msk.bf16.mxu1 %vm10992_vm0, %v10991_v0 }
 0x45d   : > { %8569 = vmatmul.mubr.bf16.vlgmr.msra.gmra.mrb[60].mxu1 %v11974_v20  ;;  %v10595_v20 = vld [vmem:[#allocation9 + $0xa0] sm:$0xff]  }
 0x45e   : > { %8621 = vmatpush3.bf16.msra.mxu1 %v10591_v41  ;;  %8572 = vmatprep.mubr.msk.bf16.mxu1 %vm10992_vm0, %v10991_v0  ;;  %v10614_v41 = vld [vmem:[#allocation9 + $0x238] sm:$0xff]  }
 0x45f   : > { %8622 = vmatprep.subr.bf16.mxu1 %v10991_v0 }
 0x462   : > { %8623 = vmatpush3.bf16.msra.mxu1 %v10592_v55  ;;  %v10615_v55 = vld [vmem:[#allocation14 + $0xc0] sm:$0xff]  }
 0x463   : > { %8624 = vmatprep.subr.bf16.mxu1 %v10991_v0  ;;  %8825 = vmatpush3.bf16.msra.mxu0 %v10615_v55 }
 0x464   : > { %8826 = vmatprep.subr.bf16.mxu0 %v10991_v0 }
 0x465   : > { %8573 = vmatmul.mubr.bf16.gmra.mrb[64].mxu1 %v11984_v31  ;;  %v10597_v31 = vld [vmem:[#allocation9 + $0xb0] sm:$0xff]  }
 0x466   : > { %8576 = vmatprep.mubr.msk.bf16.mxu1 %vm10992_vm0, %v10991_v0  ;;  %8625 = vmatpush3.bf16.msra.mxu1 %v10593_v45  ;;  %v10616_v45 = vld [vmem:[#allocation14 + $0xc8] sm:$0xff]  }
 0x467   : > { %8626 = vmatprep.subr.bf16.mxu1 %v10991_v0  ;;  %8827 = vmatpush3.bf16.msra.mxu0 %v10616_v45 }
 0x468   : > { %8828 = vmatprep.subr.bf16.mxu0 %v10991_v0 }
 0x46a   : > { %8627 = vmatpush3.bf16.msra.mxu1 %v10594_v47  ;;  %v10617_v47 = vld [vmem:[#allocation14 + $0xd0] sm:$0xff]  }
 0x46b   : > { %8628 = vmatprep.subr.bf16.mxu1 %v10991_v0  ;;  %8829 = vmatpush3.bf16.msra.mxu0 %v10617_v47 }
 0x46c   : > { %8830 = vmatprep.subr.bf16.mxu0 %v10991_v0 }
 0x46d   : > { %8577 = vmatmul.mubr.bf16.gmra.mrb[68].mxu1 %v11994_v42  ;;  %v2896_v42 = vshll.u32 %v11857_v43, 16 }
 0x46e   : > { %8580 = vmatprep.mubr.msk.bf16.mxu1 %vm10992_vm0, %v10991_v0  ;;  %8629 = vmatpush3.bf16.msra.mxu1 %v10595_v20  ;;  %v10618_v20 = vld [vmem:[#allocation14 + $0xd8] sm:$0xff]  }
 0x46f   : > { %8630 = vmatprep.subr.bf16.mxu1 %v10991_v0  ;;  %8831 = vmatpush3.bf16.msra.mxu0 %v10618_v20 }
 0x470   : > { %8832 = vmatprep.subr.bf16.mxu0 %v10991_v0 }
 0x472   : > { %8631 = vmatpush3.bf16.msra.mxu1 %v10596_v48  ;;  %v3415_v48 = vrot.slane %v11840_v21, 1  ;;  %v3648_v21 = vrot.slane %v11857_v43, 1  ;;  %v12337_v43 = vld [vmem:[#allocation11] ss:$0 sm:$0xff] }
 0x473   : > { %8632 = vmatprep.subr.bf16.mxu1 %v10991_v0 }
 0x475   : > { %8581 = vmatmul.mubr.bf16.gmra.mrb[72].mxu1 %v12002_v36  ;;  %v2898_v36 = vrot.slane %v2896_v42, 1  ;;  %v10620_v42 = vld [vmem:[#allocation14 + $0xe8] sm:$0xff]  }
 0x476   : > { %8584 = vmatprep.mubr.msk.bf16.mxu1 %vm10992_vm0, %v10991_v0  ;;  %8633 = vmatpush3.bf16.msra.mxu1 %v10597_v31  ;;  %v10619_v31 = vld [vmem:[#allocation14 + $0xe0] sm:$0xff]  }
 0x477   : > { %8634 = vmatprep.subr.bf16.mxu1 %v10991_v0  ;;  %v2899_v50 = vsel %vm967_vm2, %v2664_v38, %v2898_v36  ;;  %v2902_v53 = vor.u32 %v2900_v51, %v2898_v36  ;;  %v10613_v38 = vld [vmem:[#allocation9 + $0x230] sm:$0xff]   ;;  %8833 = vmatpush3.bf16.msra.mxu0 %v10619_v31  ;;  %v10993_v51 = vmov 0  }
 0x478   : > { %8834 = vmatprep.subr.bf16.mxu0 %v10991_v0  ;;  %v10621_v36 = vld [vmem:[#allocation14 + $0xf0] sm:$0xff]   ;;  %4398 = vst [vmem:[#allocation3] sm:$0xff] %v10993_v51  ;;  %4412 = vst [vmem:[#allocation3 + $0x70] sm:$0xff] %v10993_v51 }
 0x47a   : > { %8635 = vmatpush3.bf16.msra.mxu1 %v10598_v49  ;;  %v3416_v49 = vsel %vm3147_vm5, %v12230_v24, %v3415_v48 }
 0x47b   : > { %8688 = vmatprep.subr.bf16.mxu1 %v10991_v0  ;;  %8835 = vmatpush3.bf16.msra.mxu0 %v10620_v42 }
 0x47c   : > { %8836 = vmatprep.subr.bf16.mxu0 %v10991_v0 }
 0x47d   : > { %8585 = vmatmul.mubr.bf16.gmra.mrb[76].mxu1 %v12010_v10  ;;  %v3116_v10 = vld [vmem:[#allocation2] sm:$0xfe] }
 0x47e   : > { %8588 = vmatprep.mubr.msk.bf16.mxu1 %vm10992_vm0, %v10991_v0  ;;  %v3148_v25 = vrot.slane %v3116_v10, 1  ;;  %v3955_v10 = vlaneseq }
 0x47f   : > { %8837 = vmatpush3.bf16.msra.mxu0 %v10621_v36  ;;  %v10625_v36 = vld [vmem:[#allocation14 + $0x10] sm:$0xff]  }
 0x480   : > { %8838 = vmatprep.subr.bf16.mxu0 %v10991_v0 }
 0x485   : > { %8589 = vmatmul.mubr.bf16.gmra.mrb[80].mxu1 %v12018_v26  ;;  %v3150_v26 = vsel %vm3147_vm5, %v3148_v25, %v3149_v15  ;;  %v12335_v25 = vshrl.u32 %v3955_v10, 7 }
 0x486   : > { %8592 = vmatprep.mubr.msk.bf16.mxu1 %vm10992_vm0, %v10991_v0 }
 0x487   : > { %v3957_v12 = vadd.s32 8, %v12335_v25  ;;  %v3961_v22 = vadd.s32 40, %v12335_v25  ;;  %v3963_v20 = vadd.s32 56, %v12335_v25 }
 0x48d   : > { %8593 = vmatmul.mubr.bf16.gmra.mrb[84].mxu1 %v12026_v46  ;;  %v12159_v46 = vsel %vm3147_vm5, %v3149_v15, %v3151_v39 }
 0x48e   : > { %8596 = vmatprep.mubr.msk.bf16.mxu1 %vm10992_vm0, %v10991_v0 }
 0x495   : > { %8597 = vmatmul.mubr.bf16.gmra.mrb[88].mxu1 %v12034_v58  ;;  %v12167_v58 = vsel %vm3147_vm5, %v3151_v39, %v3153_v56  ;;  %v3993_v39 = vand.u32 15, %v3957_v12 }
 0x496   : > { %8600 = vmatprep.mubr.msk.bf16.mxu1 %vm10992_vm0, %v10991_v0 }
 0x497   : > { %vm4295_vm6 = vcmp.lt.s32.totalorder %v3993_v39, 13 }
 0x49d   : > { %8601 = vmatmul.mubr.bf16.gmra.mrb[92].mxu1 %v12042_v4  ;;  %v12175_v4 = vsel %vm3147_vm5, %v3153_v56, %v3155_v63  ;;  %v3959_v56 = vadd.s32 24, %v12335_v25 }
 0x49e   : > { %8604 = vmatprep.mubr.msk.bf16.mxu1 %vm10992_vm0, %v10991_v0 }
 0x49f   : > { %v4007_v7 = vand.u32 15, %v3959_v56 }
 0x4a1   : > { %vm4297_vm8 = vcmp.lt.s32.totalorder %v4007_v7, 13 }
 0x4a5   : > { %8605 = vmatmul.mubr.bf16.gmra.mrb[96].mxu1 %v12050_v13  ;;  %v10692_v13 = vld [vmem:[#allocation2 + $0x30] sm:$0xff] }
 0x4a6   : > { %8608 = vmatprep.mubr.msk.bf16.mxu1 %vm10992_vm0, %v10991_v0  ;;  %v3159_v40 = vrot.slane %v10692_v13, 1 }
 0x4a8   : > { %v12189_v14 = vsel %vm3147_vm5, %v3157_v17, %v3159_v40  ;;  %v12196_v19 = vsel %vm3147_vm5, %v3159_v40, %v3161_v18 }
 0x4ad   : > { %8609 = vmatmul.mubr.bf16.gmra.mrb[100].mxu1 %v2661_v34  ;;  %v10611_v34 = vld [vmem:[#allocation9 + $0x220] sm:$0xff]  }
 0x4ae   : > { %8612 = vmatprep.mubr.msk.bf16.mxu1 %vm10992_vm0, %v10991_v0 }
 0x4b5   : > { %8613 = vmatmul.mubr.bf16.gmra.mrb[104].mxu1 %v2899_v50  ;;  %v3649_v50 = vsel %vm3147_vm5, %v3415_v48, %v3648_v21 }
 0x4b6   : > { %8616 = vmatprep.mubr.msk.bf16.mxu1 %vm10992_vm0, %v10991_v0 }
 0x4bd   : > { %8617 = vmatmul.mubr.bf16.gmra.mrb[108].mxu1 %v2902_v53  ;;  %v10622_v53 = vld [vmem:[#allocation14 + $0xf8] sm:$0xff]  }
 0x4be   : > { %8636 = vmatprep.mubr.msk.bf16.mxu1 %vm10992_vm0, %v10991_v0  ;;  %8839 = vmatpush3.bf16.msra.mxu0 %v10622_v53 }
 0x4bf   : > { %8892 = vmatprep.subr.bf16.mxu0 %v10991_v0 }
 0x4c5   : > { %8637 = vmatmul.mubr.bf16.vlgmr.msra.gmra.mrb[60].mxu1 %v3150_v26  ;;  %v12341_v26 = vld [vmem:[#allocation12] ss:$0 sm:$0xff] }
 0x4c6   : > { %8689 = vmatpush3.bf16.msra.mxu1 %v10599_v16  ;;  %8640 = vmatprep.mubr.msk.bf16.mxu1 %vm10992_vm0, %v10991_v0 }
 0x4c7   : > { %8690 = vmatprep.subr.bf16.mxu1 %v10991_v0 }
 0x4ca   : > { %8691 = vmatpush3.bf16.msra.mxu1 %v10600_v3 }
 0x4cb   : > { %8692 = vmatprep.subr.bf16.mxu1 %v10991_v0 }
 0x4cd   : > { %8641 = vmatmul.mubr.bf16.gmra.mrb[64].mxu1 %v12159_v46 }
 0x4ce   : > { %8644 = vmatprep.mubr.msk.bf16.mxu1 %vm10992_vm0, %v10991_v0  ;;  %8693 = vmatpush3.bf16.msra.mxu1 %v10601_v44 }
 0x4cf   : > { %8694 = vmatprep.subr.bf16.mxu1 %v10991_v0 }
 0x4d2   : > { %8695 = vmatpush3.bf16.msra.mxu1 %v10602_v52 }
 0x4d3   : > { %8696 = vmatprep.subr.bf16.mxu1 %v10991_v0 }
 0x4d5   : > { %8645 = vmatmul.mubr.bf16.gmra.mrb[68].mxu1 %v12167_v58 }
 0x4d6   : > { %8648 = vmatprep.mubr.msk.bf16.mxu1 %vm10992_vm0, %v10991_v0  ;;  %8697 = vmatpush3.bf16.msra.mxu1 %v10603_v57 }
 0x4d7   : > { %8698 = vmatprep.subr.bf16.mxu1 %v10991_v0 }
 0x4da   : > { %8699 = vmatpush3.bf16.msra.mxu1 %v10604_v59 }
 0x4db   : > { %8700 = vmatprep.subr.bf16.mxu1 %v10991_v0 }
 0x4dd   : > { %8649 = vmatmul.mubr.bf16.gmra.mrb[72].mxu1 %v12175_v4 }
 0x4de   : > { %8652 = vmatprep.mubr.msk.bf16.mxu1 %vm10992_vm0, %v10991_v0  ;;  %8701 = vmatpush3.bf16.msra.mxu1 %v10605_v1 }
 0x4df   : > { %8702 = vmatprep.subr.bf16.mxu1 %v10991_v0 }
 0x4e2   : > { %8703 = vmatpush3.bf16.msra.mxu1 %v10606_v5 }
 0x4e3   : > { %8756 = vmatprep.subr.bf16.mxu1 %v10991_v0 }
 0x4e5   : > { %8653 = vmatmul.mubr.bf16.gmra.mrb[76].mxu1 %v12183_v11 }
 0x4e6   : > { %8656 = vmatprep.mubr.msk.bf16.mxu1 %vm10992_vm0, %v10991_v0 }
 0x4ed   : > { %8657 = vmatmul.mubr.bf16.gmra.mrb[80].mxu1 %v12189_v14 }
 0x4ee   : > { %8660 = vmatprep.mubr.msk.bf16.mxu1 %vm10992_vm0, %v10991_v0 }
 0x4f5   : > { %8661 = vmatmul.mubr.bf16.gmra.mrb[84].mxu1 %v12196_v19 }
 0x4f6   : > { %8664 = vmatprep.mubr.msk.bf16.mxu1 %vm10992_vm0, %v10991_v0 }
 0x4fd   : > { %8665 = vmatmul.mubr.bf16.gmra.mrb[88].mxu1 %v12203_v23 }
 0x4fe   : > { %8668 = vmatprep.mubr.msk.bf16.mxu1 %vm10992_vm0, %v10991_v0 }
 0x505   : > { %8669 = vmatmul.mubr.bf16.gmra.mrb[92].mxu1 %v12210_v9 }
 0x506   : > { %8672 = vmatprep.mubr.msk.bf16.mxu1 %vm10992_vm0, %v10991_v0 }
 0x50d   : > { %8673 = vmatmul.mubr.bf16.gmra.mrb[96].mxu1 %v12217_v35 }
 0x50e   : > { %8676 = vmatprep.mubr.msk.bf16.mxu1 %vm10992_vm0, %v10991_v0 }
 0x515   : > { %8677 = vmatmul.mubr.bf16.gmra.mrb[100].mxu1 %v12224_v27 }
 0x516   : > { %8680 = vmatprep.mubr.msk.bf16.mxu1 %vm10992_vm0, %v10991_v0 }
 0x51d   : > { %8681 = vmatmul.mubr.bf16.gmra.mrb[104].mxu1 %v12234_v28 }
 0x51e   : > { %8684 = vmatprep.mubr.msk.bf16.mxu1 %vm10992_vm0, %v10991_v0 }
 0x525   : > { %8685 = vmatmul.mubr.bf16.gmra.mrb[108].mxu1 %v12230_v24 }
 0x526   : > { %8704 = vmatprep.mubr.msk.bf16.mxu1 %vm10992_vm0, %v10991_v0 }
 0x52d   : > { %8705 = vmatmul.mubr.bf16.vlgmr.msra.gmra.mrb[60].mxu1 %v12159_v46 }
 0x52e   : > { %8757 = vmatpush3.bf16.msra.mxu1 %v10607_v6  ;;  %8708 = vmatprep.mubr.msk.bf16.mxu1 %vm10992_vm0, %v10991_v0 }
 0x52f   : > { %8758 = vmatprep.subr.bf16.mxu1 %v10991_v0 }
 0x532   : > { %8759 = vmatpush3.bf16.msra.mxu1 %v10608_v60 }
 0x533   : > { %8760 = vmatprep.subr.bf16.mxu1 %v10991_v0 }
 0x535   : > { %8709 = vmatmul.mubr.bf16.gmra.mrb[64].mxu1 %v12167_v58 }
 0x536   : > { %8712 = vmatprep.mubr.msk.bf16.mxu1 %vm10992_vm0, %v10991_v0  ;;  %8761 = vmatpush3.bf16.msra.mxu1 %v10609_v30  ;;  %v4021_v30 = vand.u32 15, %v3961_v22 }
 0x537   : > { %8762 = vmatprep.subr.bf16.mxu1 %v10991_v0 }
 0x538   : > { %vm4299_vm10 = vcmp.lt.s32.totalorder %v4021_v30, 13 }
 0x53a   : > { %8763 = vmatpush3.bf16.msra.mxu1 %v10610_v32 }
 0x53b   : > { %8764 = vmatprep.subr.bf16.mxu1 %v10991_v0 }
 0x53d   : > { %8713 = vmatmul.mubr.bf16.gmra.mrb[68].mxu1 %v12175_v4 }
 0x53e   : > { %8716 = vmatprep.mubr.msk.bf16.mxu1 %vm10992_vm0, %v10991_v0  ;;  %8765 = vmatpush3.bf16.msra.mxu1 %v10611_v34 }
 0x53f   : > { %8766 = vmatprep.subr.bf16.mxu1 %v10991_v0 }
 0x542   : > { %8767 = vmatpush3.bf16.msra.mxu1 %v10612_v8 }
 0x543   : > { %8768 = vmatprep.subr.bf16.mxu1 %v10991_v0 }
 0x545   : > { %8717 = vmatmul.mubr.bf16.gmra.mrb[72].mxu1 %v12183_v11 }
 0x546   : > { %8720 = vmatprep.mubr.msk.bf16.mxu1 %vm10992_vm0, %v10991_v0  ;;  %8769 = vmatpush3.bf16.msra.mxu1 %v10613_v38 }
 0x547   : > { %8770 = vmatprep.subr.bf16.mxu1 %v10991_v0 }
 0x54a   : > { %8771 = vmatpush3.bf16.msra.mxu1 %v10614_v41  ;;  %v10624_v41 = vld [vmem:[#allocation14 + $0x8] sm:$0xff]  }
 0x54d   : > { %8721 = vmatmul.mubr.bf16.gmra.mrb[76].mxu1 %v12189_v14 }
 0x54e   : > { %8724 = vmatprep.mubr.msk.bf16.mxu1 %vm10992_vm0, %v10991_v0 }
 0x555   : > { %8725 = vmatmul.mubr.bf16.gmra.mrb[80].mxu1 %v12196_v19 }
 0x556   : > { %8728 = vmatprep.mubr.msk.bf16.mxu1 %vm10992_vm0, %v10991_v0 }
 0x55d   : > { %8729 = vmatmul.mubr.bf16.gmra.mrb[84].mxu1 %v12203_v23 }
 0x55e   : > { %8732 = vmatprep.mubr.msk.bf16.mxu1 %vm10992_vm0, %v10991_v0 }
 0x565   : > { %8733 = vmatmul.mubr.bf16.gmra.mrb[88].mxu1 %v12210_v9 }
 0x566   : > { %8736 = vmatprep.mubr.msk.bf16.mxu1 %vm10992_vm0, %v10991_v0 }
 0x56d   : > { %8737 = vmatmul.mubr.bf16.gmra.mrb[92].mxu1 %v12217_v35 }
 0x56e   : > { %8740 = vmatprep.mubr.msk.bf16.mxu1 %vm10992_vm0, %v10991_v0 }
 0x575   : > { %8741 = vmatmul.mubr.bf16.gmra.mrb[96].mxu1 %v12224_v27 }
 0x576   : > { %8744 = vmatprep.mubr.msk.bf16.mxu1 %vm10992_vm0, %v10991_v0 }
 0x57d   : > { %8745 = vmatmul.mubr.bf16.gmra.mrb[100].mxu1 %v12234_v28 }
 0x57e   : > { %8748 = vmatprep.mubr.msk.bf16.mxu1 %vm10992_vm0, %v10991_v0 }
 0x585   : > { %8749 = vmatmul.mubr.bf16.gmra.mrb[104].mxu1 %v3416_v49 }
 0x586   : > { %8752 = vmatprep.mubr.msk.bf16.mxu1 %vm10992_vm0, %v10991_v0 }
 0x58d   : > { %8753 = vmatmul.mubr.bf16.gmra.mrb[108].mxu1 %v3415_v48 }
 0x58e   : > { %8772 = vmatprep.mubr.msk.bf16.mxu1 %vm10992_vm0, %v10991_v0 }
 0x595   : > { %8773 = vmatmul.mubr.bf16.vlgmr.msra.gmra.mrb[60].mxu1 %v12167_v58 }
 0x596   : > { %8776 = vmatprep.mubr.msk.bf16.mxu1 %vm10992_vm0, %v10991_v0 }
 0x59d   : > { %8777 = vmatmul.mubr.bf16.gmra.mrb[64].mxu1 %v12175_v4 }
 0x59e   : > { %8780 = vmatprep.mubr.msk.bf16.mxu1 %vm10992_vm0, %v10991_v0 }
 0x5a5   : > { %8781 = vmatmul.mubr.bf16.gmra.mrb[68].mxu1 %v12183_v11 }
 0x5a6   : > { %8784 = vmatprep.mubr.msk.bf16.mxu1 %vm10992_vm0, %v10991_v0 }
 0x5ad   : > { %8785 = vmatmul.mubr.bf16.gmra.mrb[72].mxu1 %v12189_v14 }
 0x5ae   : > { %8788 = vmatprep.mubr.msk.bf16.mxu1 %vm10992_vm0, %v10991_v0 }
 0x5b5   : > { %8789 = vmatmul.mubr.bf16.gmra.mrb[76].mxu1 %v12196_v19 }
 0x5b6   : > { %8792 = vmatprep.mubr.msk.bf16.mxu1 %vm10992_vm0, %v10991_v0 }
 0x5bd   : > { %8793 = vmatmul.mubr.bf16.gmra.mrb[80].mxu1 %v12203_v23 }
 0x5be   : > { %8796 = vmatprep.mubr.msk.bf16.mxu1 %vm10992_vm0, %v10991_v0 }
 0x5c5   : > { %8797 = vmatmul.mubr.bf16.gmra.mrb[84].mxu1 %v12210_v9 }
 0x5c6   : > { %8800 = vmatprep.mubr.msk.bf16.mxu1 %vm10992_vm0, %v10991_v0 }
 0x5cd   : > { %8801 = vmatmul.mubr.bf16.gmra.mrb[88].mxu1 %v12217_v35  ;;  %v10623_v35 = vld [vmem:[#allocation14] sm:$0xff]  }
 0x5ce   : > { %8804 = vmatprep.mubr.msk.bf16.mxu1 %vm10992_vm0, %v10991_v0 }
 0x5d5   : > { %8805 = vmatmul.mubr.bf16.gmra.mrb[92].mxu1 %v12224_v27 }
 0x5d6   : > { %8808 = vmatprep.mubr.msk.bf16.mxu1 %vm10992_vm0, %v10991_v0 }
 0x5dd   : > { %8809 = vmatmul.mubr.bf16.gmra.mrb[96].mxu1 %v12234_v28 }
 0x5de   : > { %8812 = vmatprep.mubr.msk.bf16.mxu1 %vm10992_vm0, %v10991_v0 }
 0x5e5   : > { %8813 = vmatmul.mubr.bf16.gmra.mrb[100].mxu1 %v3416_v49 }
 0x5e6   : > { %8816 = vmatprep.mubr.msk.bf16.mxu1 %vm10992_vm0, %v10991_v0 }
 0x5ed   : > { %8817 = vmatmul.mubr.bf16.gmra.mrb[104].mxu1 %v3649_v50 }
 0x5ee   : > { %8820 = vmatprep.mubr.msk.bf16.mxu1 %vm10992_vm0, %v10991_v0 }
 0x5f5   : > { %8821 = vmatmul.mubr.bf16.gmra.mrb[108].mxu1 %v3648_v21 }
 0x668   : > { %v3734_v15 = vpop.f32.mrb[60].mxu1 }
 0x669   : > { %v3870_v16 = vmul.f32 %v12337_v43, %v3734_v15  ;;  %v8774_v3 = vpop.f32.mrb[61].mxu1 }
 0x66a   : > { %v3737_v33 = vpop.f32.mrb[62].mxu1 }
 0x66b   : > { %v3871_v44 = vmul.f32 %v12337_v43, %v3737_v33  ;;  %v8775_v46 = vpop.f32.mrb[63].mxu1  ;;  %v3903_v52 = vadd.f32 %v12341_v26, %v3870_v16  ;;  %v4035_v16 = vand.u32 15, %v3963_v20 }
 0x66c   : > { %v10626_v46 = vld [vmem:[#allocation14 + $0x18] sm:$0xff]  }
 0x66d   : > { %v3904_v54 = vadd.f32 %v12341_v26, %v3871_v44  ;;  %v3929_v58 = vmax.f32 %v3903_v52, 0.0  ;;  %vm4301_vm12 = vcmp.lt.s32.totalorder %v4035_v16, 13 }
 0x66f   : > { %v3930_v57 = vmax.f32 %v3904_v54, 0.0 }
 0x670   : > { %v3742_v59 = vpop.f32.mrb[64].mxu1 }
 0x671   : > { %v4373_v62 = vsel %vm4295_vm6, %v3930_v57, 0.0  ;;  %v3872_v63 = vmul.f32 %v12337_v43, %v3742_v59  ;;  %v8778_v1 = vpop.f32.mrb[65].mxu1  ;;  %v3965_v57 = vadd.s32 72, %v12335_v25 }
 0x672   : > { %v4413_v4 = vpack.c.bf16 %v4373_v62, %v3929_v58  ;;  %v3745_v5 = vpop.f32.mrb[66].mxu1  ;;  %v10627_v1 = vld [vmem:[#allocation14 + $0x20] sm:$0xff]  }
 0x673   : > { %v3873_v17 = vmul.f32 %v12337_v43, %v3745_v5  ;;  %v8779_v11 = vpop.f32.mrb[67].mxu1  ;;  %v3905_v40 = vadd.f32 %v12341_v26, %v3872_v63 }
 0x674   : > { %v4428_v13 = vshrl.u32 %v4413_v4, 16  ;;  %v4431_v19 = vshll.u32 %v4413_v4, 16 }
 0x675   : > { %v3906_v14 = vadd.f32 %v12341_v26, %v3873_v17  ;;  %v3931_v9 = vmax.f32 %v3905_v40, 0.0  ;;  %v4049_v40 = vand.u32 15, %v3965_v57 }
 0x676   : > { %v4430_v18 = vrot.slane %v4428_v13, 7 }
 0x677   : > { %v3932_v23 = vmax.f32 %v3906_v14, 0.0  ;;  %vm4303_vm13 = vcmp.lt.s32.totalorder %v4049_v40, 13 }
 0x678   : > { %v4433_v29 = vor.u32 %v4431_v19, %v4430_v18  ;;  %v3750_v2 = vpop.f32.mrb[68].mxu1 }
 0x679   : > { %v4375_v61 = vsel %vm4297_vm8, %v3932_v23, 0.0  ;;  %v3874_v27 = vmul.f32 %v12337_v43, %v3750_v2  ;;  %v8782_v24 = vpop.f32.mrb[69].mxu1  ;;  %v10628_v23 = vld [vmem:[#allocation14 + $0x28] sm:$0xff]  }
 0x67a   : > { %v12354_v28 = vsel %vm4544_vm9, %v4433_v29, 0  ;;  %v4414_v6 = vpack.c.bf16 %v4375_v61, %v3931_v9  ;;  %v3753_v60 = vpop.f32.mrb[70].mxu1 }
 0x67b   : > { %4547 = vst [vmem:[#allocation3 + $0x8] sm:$0xff] %v12354_v28  ;;  %v3875_v32 = vmul.f32 %v12337_v43, %v3753_v60  ;;  %v8783_v34 = vpop.f32.mrb[71].mxu1  ;;  %8841 = vmatmul.mubr.bf16.vlgmr.msra.gmra.mrb[60].mxu0 %v12354_v28  ;;  %v3907_v38 = vadd.f32 %v12341_v26, %v3874_v27  ;;  %v10629_v60 = vld [vmem:[#allocation14 + $0x30] sm:$0xff]  }
 0x67c   : > { %v4435_v8 = vshrl.u32 %v4414_v6, 16  ;;  %8893 = vmatpush3.bf16.msra.mxu0 %v10623_v35  ;;  %8844 = vmatprep.mubr.msk.bf16.mxu0 %vm10992_vm0, %v10991_v0  ;;  %v4438_v47 = vshll.u32 %v4414_v6, 16  ;;  %v3967_v35 = vadd.s32 88, %v12335_v25 }
 0x67d   : > { %v3908_v55 = vadd.f32 %v12341_v26, %v3875_v32  ;;  %8894 = vmatprep.subr.bf16.mxu0 %v10991_v0  ;;  %v3933_v49 = vmax.f32 %v3907_v38, 0.0 }
 0x67e   : > { %v4437_v45 = vrot.slane %v4435_v8, 7 }
 0x67f   : > { %v3934_v48 = vmax.f32 %v3908_v55, 0.0  ;;  %v4063_v55 = vand.u32 15, %v3967_v35 }
 0x680   : > { %v4440_v31 = vor.u32 %v4438_v47, %v4437_v45  ;;  %v3758_v42 = vpop.f32.mrb[72].mxu1  ;;  %8895 = vmatpush3.bf16.msra.mxu0 %v10624_v41 }
 0x681   : > { %v4377_v21 = vsel %vm4299_vm10, %v3934_v48, 0.0  ;;  %v3876_v50 = vmul.f32 %v12337_v43, %v3758_v42  ;;  %v8786_v53 = vpop.f32.mrb[73].mxu1  ;;  %8896 = vmatprep.subr.bf16.mxu0 %v10991_v0  ;;  %vm4305_vm14 = vcmp.lt.s32.totalorder %v4063_v55, 13 }
 0x682   : > { %v12368_v10 = vsel %vm4426_vm11, %v4430_v18, %v4440_v31  ;;  %v4415_v12 = vpack.c.bf16 %v4377_v21, %v3933_v49  ;;  %v3761_v15 = vpop.f32.mrb[74].mxu1  ;;  %v10630_v31 = vld [vmem:[#allocation14 + $0x38] sm:$0xff]   ;;  %v3969_v21 = vadd.s32 104, %v12335_v25 }
 0x683   : > { %4548 = vst [vmem:[#allocation3 + $0x10] sm:$0xff] %v12368_v10  ;;  %v3877_v3 = vmul.f32 %v12337_v43, %v3761_v15  ;;  %v8787_v33 = vpop.f32.mrb[75].mxu1  ;;  %8845 = vmatmul.mubr.bf16.gmra.mrb[64].mxu0 %v12368_v10  ;;  %v3909_v44 = vadd.f32 %v12341_v26, %v3876_v50 }
 0x684   : > { %v4443_v39 = vshrl.u32 %v4415_v12, 16  ;;  %8848 = vmatprep.mubr.msk.bf16.mxu0 %vm10992_vm0, %v10991_v0  ;;  %8897 = vmatpush3.bf16.msra.mxu0 %v10625_v36  ;;  %v4446_v56 = vshll.u32 %v4415_v12, 16 }
 0x685   : > { %v3910_v52 = vadd.f32 %v12341_v26, %v3877_v3  ;;  %8898 = vmatprep.subr.bf16.mxu0 %v10991_v0  ;;  %v3935_v62 = vmax.f32 %v3909_v44, 0.0 }
 0x686   : > { %v4445_v54 = vrot.slane %v4443_v39, 7 }
 0x687   : > { %v3936_v58 = vmax.f32 %v3910_v52, 0.0  ;;  %v4077_v52 = vand.u32 15, %v3969_v21 }
 0x688   : > { %v4448_v59 = vor.u32 %v4446_v56, %v4445_v54  ;;  %v3766_v63 = vpop.f32.mrb[76].mxu1  ;;  %8899 = vmatpush3.bf16.msra.mxu0 %v10626_v46 }
 0x689   : > { %v4379_v4 = vsel %vm4301_vm12, %v3936_v58, 0.0  ;;  %v3878_v5 = vmul.f32 %v12337_v43, %v3766_v63  ;;  %v8790_v7 = vpop.f32.mrb[77].mxu1  ;;  %8900 = vmatprep.subr.bf16.mxu0 %v10991_v0  ;;  %vm4307_vm15 = vcmp.lt.s32.totalorder %v4077_v52, 13 }
 0x68a   : > { %v12382_v17 = vsel %vm4426_vm11, %v4437_v45, %v4448_v59  ;;  %v4416_v11 = vpack.c.bf16 %v4379_v4, %v3935_v62  ;;  %v3769_v13 = vpop.f32.mrb[78].mxu1 }
 0x68b   : > { %4549 = vst [vmem:[#allocation3 + $0x18] sm:$0xff] %v12382_v17  ;;  %v3879_v14 = vmul.f32 %v12337_v43, %v3769_v13  ;;  %v8791_v18 = vpop.f32.mrb[79].mxu1  ;;  %8849 = vmatmul.mubr.bf16.gmra.mrb[68].mxu0 %v12382_v17  ;;  %v3911_v22 = vadd.f32 %v12341_v26, %v3878_v5 }
 0x68c   : > { %v4451_v19 = vshrl.u32 %v4416_v11, 16  ;;  %8852 = vmatprep.mubr.msk.bf16.mxu0 %vm10992_vm0, %v10991_v0  ;;  %8901 = vmatpush3.bf16.msra.mxu0 %v10627_v1  ;;  %v4454_v2 = vshll.u32 %v4416_v11, 16  ;;  %v3971_v1 = vadd.s32 120, %v12335_v25 }
 0x68d   : > { %v3912_v29 = vadd.f32 %v12341_v26, %v3879_v14  ;;  %8902 = vmatprep.subr.bf16.mxu0 %v10991_v0  ;;  %v3937_v24 = vmax.f32 %v3911_v22, 0.0 }
 0x68e   : > { %v4453_v9 = vrot.slane %v4451_v19, 7 }
 0x68f   : > { %v3938_v61 = vmax.f32 %v3912_v29, 0.0 }
 0x690   : > { %v4456_v27 = vor.u32 %v4454_v2, %v4453_v9  ;;  %v3774_v6 = vpop.f32.mrb[80].mxu1  ;;  %8903 = vmatpush3.bf16.msra.mxu0 %v10628_v23  ;;  %v4091_v23 = vand.u32 15, %v3971_v1 }
 0x691   : > { %v4381_v30 = vsel %vm4303_vm13, %v3938_v61, 0.0  ;;  %v3880_v32 = vmul.f32 %v12337_v43, %v3774_v6  ;;  %v8794_v34 = vpop.f32.mrb[81].mxu1  ;;  %8904 = vmatprep.subr.bf16.mxu0 %v10991_v0  ;;  %v3973_v6 = vadd.s32 136, %v12335_v25 }
 0x692   : > { %v12396_v8 = vsel %vm4426_vm11, %v4445_v54, %v4456_v27  ;;  %v4417_v38 = vpack.c.bf16 %v4381_v30, %v3937_v24  ;;  %v3777_v41 = vpop.f32.mrb[82].mxu1  ;;  %vm4309_vm1 = vcmp.lt.s32.totalorder %v4091_v23, 13 }
 0x693   : > { %4550 = vst [vmem:[#allocation3 + $0x20] sm:$0xff] %v12396_v8  ;;  %v3881_v45 = vmul.f32 %v12337_v43, %v3777_v41  ;;  %v8795_v47 = vpop.f32.mrb[83].mxu1  ;;  %8853 = vmatmul.mubr.bf16.gmra.mrb[72].mxu0 %v12396_v8  ;;  %v3913_v48 = vadd.f32 %v12341_v26, %v3880_v32 }
 0x694   : > { %v4459_v20 = vshrl.u32 %v4417_v38, 16  ;;  %8856 = vmatprep.mubr.msk.bf16.mxu0 %vm10992_vm0, %v10991_v0  ;;  %8905 = vmatpush3.bf16.msra.mxu0 %v10629_v60  ;;  %v4462_v36 = vshll.u32 %v4417_v38, 16 }
 0x695   : > { %v3914_v49 = vadd.f32 %v12341_v26, %v3881_v45  ;;  %8906 = vmatprep.subr.bf16.mxu0 %v10991_v0  ;;  %v3939_v12 = vmax.f32 %v3913_v48, 0.0  ;;  %v4105_v48 = vand.u32 15, %v3973_v6 }
 0x696   : > { %v4461_v42 = vrot.slane %v4459_v20, 7 }
 0x697   : > { %v3940_v50 = vmax.f32 %v3914_v49, 0.0  ;;  %vm4311_vm3 = vcmp.lt.s32.totalorder %v4105_v48, 13 }
 0x698   : > { %v4464_v53 = vor.u32 %v4462_v36, %v4461_v42  ;;  %v3782_v15 = vpop.f32.mrb[84].mxu1  ;;  %8907 = vmatpush3.bf16.msra.mxu0 %v10630_v31 }
 0x699   : > { %v4383_v16 = vsel %vm4305_vm14, %v3940_v50, 0.0  ;;  %v3882_v3 = vmul.f32 %v12337_v43, %v3782_v15  ;;  %v8798_v33 = vpop.f32.mrb[85].mxu1  ;;  %8960 = vmatprep.subr.bf16.mxu0 %v10991_v0 }
 0x69a   : > { %v12410_v39 = vsel %vm4426_vm11, %v4453_v9, %v4464_v53  ;;  %v4418_v44 = vpack.c.bf16 %v4383_v16, %v3939_v12  ;;  %v3785_v46 = vpop.f32.mrb[86].mxu1  ;;  %v3975_v12 = vadd.s32 152, %v12335_v25 }
 0x69b   : > { %4551 = vst [vmem:[#allocation3 + $0x28] sm:$0xff] %v12410_v39  ;;  %v3883_v54 = vmul.f32 %v12337_v43, %v3785_v46  ;;  %v8799_v56 = vpop.f32.mrb[87].mxu1  ;;  %8857 = vmatmul.mubr.bf16.gmra.mrb[76].mxu0 %v12410_v39  ;;  %v3915_v58 = vadd.f32 %v12341_v26, %v3882_v3 }
 0x69c   : > { %v4467_v57 = vshrl.u32 %v4418_v44, 16  ;;  %8860 = vmatprep.mubr.msk.bf16.mxu0 %vm10992_vm0, %v10991_v0  ;;  %v4470_v63 = vshll.u32 %v4418_v44, 16 }
 0x69d   : > { %v3916_v59 = vadd.f32 %v12341_v26, %v3883_v54  ;;  %v3941_v7 = vmax.f32 %v3915_v58, 0.0  ;;  %v4119_v58 = vand.u32 15, %v3975_v12 }
 0x69e   : > { %v4469_v62 = vrot.slane %v4467_v57, 7 }
 0x69f   : > { %v3942_v4 = vmax.f32 %v3916_v59, 0.0  ;;  %vm4313_vm6 = vcmp.lt.s32.totalorder %v4119_v58, 13 }
 0x6a0   : > { %v4472_v5 = vor.u32 %v4470_v63, %v4469_v62  ;;  %v3790_v11 = vpop.f32.mrb[88].mxu1 }
 0x6a1   : > { %v4385_v13 = vsel %vm4307_vm15, %v3942_v4, 0.0  ;;  %v3884_v40 = vmul.f32 %v12337_v43, %v3790_v11  ;;  %v8802_v14 = vpop.f32.mrb[89].mxu1  ;;  %v3977_v11 = vadd.s32 168, %v12335_v25 }
 0x6a2   : > { %v12422_v18 = vsel %vm4426_vm11, %v4461_v42, %v4472_v5  ;;  %v4419_v19 = vpack.c.bf16 %v4385_v13, %v3941_v7  ;;  %v3793_v22 = vpop.f32.mrb[90].mxu1 }
 0x6a3   : > { %4552 = vst [vmem:[#allocation3 + $0x30] sm:$0xff] %v12422_v18  ;;  %v3885_v29 = vmul.f32 %v12337_v43, %v3793_v22  ;;  %v8803_v9 = vpop.f32.mrb[91].mxu1  ;;  %8861 = vmatmul.mubr.bf16.gmra.mrb[80].mxu0 %v12422_v18  ;;  %v3917_v35 = vadd.f32 %v12341_v26, %v3884_v40 }
 0x6a4   : > { %v4475_v2 = vshrl.u32 %v4419_v19, 16  ;;  %8864 = vmatprep.mubr.msk.bf16.mxu0 %vm10992_vm0, %v10991_v0  ;;  %v4478_v24 = vshll.u32 %v4419_v19, 16 }
 0x6a5   : > { %v3918_v61 = vadd.f32 %v12341_v26, %v3885_v29  ;;  %v3943_v32 = vmax.f32 %v3917_v35, 0.0 }
 0x6a6   : > { %v4477_v27 = vrot.slane %v4475_v2, 7 }
 0x6a7   : > { %v3944_v60 = vmax.f32 %v3918_v61, 0.0  ;;  %v4133_v61 = vand.u32 15, %v3977_v11 }
 0x6a8   : > { %v4480_v30 = vor.u32 %v4478_v24, %v4477_v27  ;;  %v3798_v34 = vpop.f32.mrb[92].mxu1 }
 0x6a9   : > { %v4387_v38 = vsel %vm4309_vm1, %v3944_v60, 0.0  ;;  %v3886_v41 = vmul.f32 %v12337_v43, %v3798_v34  ;;  %v8806_v55 = vpop.f32.mrb[93].mxu1  ;;  %vm4315_vm7 = vcmp.lt.s32.totalorder %v4133_v61, 13 }
 0x6aa   : > { %v12434_v45 = vsel %vm4426_vm11, %v4469_v62, %v4480_v30  ;;  %v4420_v47 = vpack.c.bf16 %v4387_v38, %v3943_v32  ;;  %v3801_v20 = vpop.f32.mrb[94].mxu1  ;;  %v3979_v38 = vadd.s32 184, %v12335_v25 }
 0x6ab   : > { %v3887_v31 = vmul.f32 %v12337_v43, %v3801_v20  ;;  %v8807_v49 = vpop.f32.mrb[95].mxu1  ;;  %8865 = vmatmul.mubr.bf16.gmra.mrb[84].mxu0 %v12434_v45  ;;  %v3919_v36 = vadd.f32 %v12341_v26, %v3886_v41 }
 0x6ac   : > { %v4483_v42 = vshrl.u32 %v4420_v47, 16  ;;  %8868 = vmatprep.mubr.msk.bf16.mxu0 %vm10992_vm0, %v10991_v0  ;;  %v4486_v53 = vshll.u32 %v4420_v47, 16 }
 0x6ad   : > { %v3920_v21 = vadd.f32 %v12341_v26, %v3887_v31  ;;  %v3945_v3 = vmax.f32 %v3919_v36, 0.0 }
 0x6ae   : > { %v4485_v50 = vrot.slane %v4483_v42, 7 }
 0x6af   : > { %v3946_v15 = vmax.f32 %v3920_v21, 0.0 }
 0x6b0   : > { %v4488_v16 = vor.u32 %v4486_v53, %v4485_v50  ;;  %v3806_v33 = vpop.f32.mrb[96].mxu1 }
 0x6b1   : > { %v4389_v44 = vsel %vm4311_vm3, %v3946_v15, 0.0  ;;  %v3888_v46 = vmul.f32 %v12337_v43, %v3806_v33  ;;  %v8810_v52 = vpop.f32.mrb[97].mxu1 }
 0x6b2   : > { %v12445_v54 = vsel %vm4426_vm11, %v4477_v27, %v4488_v16  ;;  %v4421_v56 = vpack.c.bf16 %v4389_v44, %v3945_v3  ;;  %v3809_v57 = vpop.f32.mrb[98].mxu1 }
 0x6b3   : > { %v3889_v59 = vmul.f32 %v12337_v43, %v3809_v57  ;;  %v8811_v62 = vpop.f32.mrb[99].mxu1  ;;  %8869 = vmatmul.mubr.bf16.gmra.mrb[88].mxu0 %v12445_v54  ;;  %v3921_v1 = vadd.f32 %v12341_v26, %v3888_v46  ;;  %v3981_v46 = vadd.s32 200, %v12335_v25 }
 0x6b4   : > { %v4491_v63 = vshrl.u32 %v4421_v56, 16  ;;  %8872 = vmatprep.mubr.msk.bf16.mxu0 %vm10992_vm0, %v10991_v0  ;;  %v4494_v7 = vshll.u32 %v4421_v56, 16 }
 0x6b5   : > { %v3922_v4 = vadd.f32 %v12341_v26, %v3889_v59  ;;  %v3947_v14 = vmax.f32 %v3921_v1, 0.0 }
 0x6b6   : > { %v4493_v5 = vrot.slane %v4491_v63, 7 }
 0x6b7   : > { %v3948_v13 = vmax.f32 %v3922_v4, 0.0 }
 0x6b8   : > { %v4496_v40 = vor.u32 %v4494_v7, %v4493_v5  ;;  %v3814_v19 = vpop.f32.mrb[100].mxu1  ;;  %v4161_v7 = vand.u32 15, %v3981_v46 }
 0x6b9   : > { %v4391_v22 = vsel %vm4313_vm6, %v3948_v13, 0.0  ;;  %v3890_v23 = vmul.f32 %v12337_v43, %v3814_v19  ;;  %v8814_v29 = vpop.f32.mrb[101].mxu1 }
 0x6ba   : > { %v12456_v9 = vsel %vm4426_vm11, %v4485_v50, %v4496_v40  ;;  %v4422_v2 = vpack.c.bf16 %v4391_v22, %v3947_v14  ;;  %v3817_v35 = vpop.f32.mrb[102].mxu1  ;;  %v4147_v50 = vand.u32 15, %v3979_v38  ;;  %vm4319_vm9 = vcmp.lt.s32.totalorder %v4161_v7, 13  ;;  %v10633_v38 = vld [vmem:[#allocation14 + $0x190] sm:$0xff]  }
 0x6bb   : > { %v3891_v27 = vmul.f32 %v12337_v43, %v3817_v35  ;;  %v8815_v24 = vpop.f32.mrb[103].mxu1  ;;  %8873 = vmatmul.mubr.bf16.gmra.mrb[92].mxu0 %v12456_v9  ;;  %v3923_v60 = vadd.f32 %v12341_v26, %v3890_v23 }
 0x6bc   : > { %v4499_v6 = vshrl.u32 %v4422_v2, 16  ;;  %8876 = vmatprep.mubr.msk.bf16.mxu0 %vm10992_vm0, %v10991_v0  ;;  %v4502_v34 = vshll.u32 %v4422_v2, 16  ;;  %vm4317_vm8 = vcmp.lt.s32.totalorder %v4147_v50, 13  ;;  %v10644_v50 = vld [vmem:[#allocation14 + $0x68] sm:$0xff]  }
 0x6bd   : > { %v3924_v30 = vadd.f32 %v12341_v26, %v3891_v27  ;;  %v3949_v47 = vmax.f32 %v3923_v60, 0.0 }
 0x6be   : > { %v4501_v32 = vrot.slane %v4499_v6, 7 }
 0x6bf   : > { %v3950_v41 = vmax.f32 %v3924_v30, 0.0 }
 0x6c0   : > { %v4504_v55 = vor.u32 %v4502_v34, %v4501_v32  ;;  %v3822_v20 = vpop.f32.mrb[104].mxu1  ;;  %v10632_v34 = vld [vmem:[#allocation14 + $0x188] sm:$0xff]  }
 0x6c1   : > { %v4393_v48 = vsel %vm4315_vm7, %v3950_v41, 0.0  ;;  %v3892_v31 = vmul.f32 %v12337_v43, %v3822_v20  ;;  %v8818_v49 = vpop.f32.mrb[105].mxu1  ;;  %v10635_v41 = vld [vmem:[#allocation14 + $0x1a0] sm:$0xff]   ;;  %v10638_v20 = vld [vmem:[#allocation14 + $0x1b8] sm:$0xff]  }
 0x6c2   : > { %v12467_v42 = vsel %vm4426_vm11, %v4493_v5, %v4504_v55  ;;  %v4423_v36 = vpack.c.bf16 %v4393_v48, %v3949_v47  ;;  %v3825_v21 = vpop.f32.mrb[106].mxu1  ;;  %v10636_v55 = vld [vmem:[#allocation14 + $0x1a8] sm:$0xff]   ;;  %v10637_v47 = vld [vmem:[#allocation14 + $0x1b0] sm:$0xff]   ;;  %v10639_v48 = vld [vmem:[#allocation14 + $0x40] sm:$0xff]  }
 0x6c3   : > { %v3893_v53 = vmul.f32 %v12337_v43, %v3825_v21  ;;  %v8819_v12 = vpop.f32.mrb[107].mxu1  ;;  %8877 = vmatmul.mubr.bf16.gmra.mrb[96].mxu0 %v12467_v42  ;;  %v3925_v16 = vadd.f32 %v12341_v26, %v3892_v31  ;;  %v10640_v31 = vld [vmem:[#allocation14 + $0x48] sm:$0xff]   ;;  %v10641_v49 = vld [vmem:[#allocation14 + $0x50] sm:$0xff]   ;;  %v10643_v21 = vld [vmem:[#allocation14 + $0x60] sm:$0xff]  }
 0x6c4   : > { %v4507_v15 = vshrl.u32 %v4423_v36, 16  ;;  %8880 = vmatprep.mubr.msk.bf16.mxu0 %vm10992_vm0, %v10991_v0  ;;  %v4510_v44 = vshll.u32 %v4423_v36, 16  ;;  %v10642_v36 = vld [vmem:[#allocation14 + $0x58] sm:$0xff]  }
 0x6c5   : > { %v3926_v3 = vadd.f32 %v12341_v26, %v3893_v53  ;;  %v3951_v57 = vmax.f32 %v3925_v16, 0.0  ;;  %v10645_v53 = vld [vmem:[#allocation14 + $0x70] sm:$0xff]   ;;  %v10646_v12 = vld [vmem:[#allocation14 + $0x78] sm:$0xff]   ;;  %v12592_v16 = vrot.slane %v10993_v51, 1 }
 0x6c6   : > { %v4509_v33 = vrot.slane %v4507_v15, 7  ;;  %v4576_v15 = vld [vmem:[#allocation3 + $0x70] sm:$0x7f] }
 0x6c7   : > { %v3952_v52 = vmax.f32 %v3926_v3, 0.0  ;;  %v5234_v3 = vshll.u32 %v12354_v28, 16 }
 0x6c8   : > { %v4512_v56 = vor.u32 %v4510_v44, %v4509_v33  ;;  %v3830_v58 = vpop.f32.mrb[108].mxu1  ;;  %v10647_v44 = vld [vmem:[#allocation14 + $0x100] sm:$0xff]  }
 0x6c9   : > { %v4395_v59 = vsel %vm4317_vm8, %v3952_v52, 0.0  ;;  %v3894_v62 = vmul.f32 %v12337_v43, %v3830_v58  ;;  %v8822_v63 = vpop.f32.mrb[109].mxu1  ;;  %v5242_v52 = vshll.u32 %v12368_v10, 16 }
 0x6ca   : > { %v12478_v1 = vsel %vm4426_vm11, %v4501_v32, %v4512_v56  ;;  %v4424_v4 = vpack.c.bf16 %v4395_v59, %v3951_v57  ;;  %v3833_v5 = vpop.f32.mrb[110].mxu1  ;;  %v10631_v32 = vld [vmem:[#allocation14 + $0x180] sm:$0xff]   ;;  %v5238_v56 = vshrl.u32 %v12354_v28, 16  ;;  %v10649_v59 = vld [vmem:[#allocation14 + $0x110] sm:$0xff]   ;;  %v5250_v63 = vshll.u32 %v12382_v17, 16 }
 0x6cb   : > { %v3895_v11 = vmul.f32 %v12337_v43, %v3833_v5  ;;  %v8823_v13 = vpop.f32.mrb[111].mxu1  ;;  %8881 = vmatmul.mubr.bf16.gmra.mrb[100].mxu0 %v12478_v1  ;;  %v3927_v40 = vadd.f32 %v12341_v26, %v3894_v62  ;;  %v5244_v57 = vrot.slane %v5242_v52, 1 }
 0x6cc   : > { %v4515_v25 = vshrl.u32 %v4424_v4, 16  ;;  %8884 = vmatprep.mubr.msk.bf16.mxu0 %vm10992_vm0, %v10991_v0  ;;  %v4518_v22 = vshll.u32 %v4424_v4, 16  ;;  %v10650_v4 = vld [vmem:[#allocation14 + $0x118] sm:$0xff]   ;;  %v5252_v5 = vrot.slane %v5250_v63, 1 }
 0x6cd   : > { %v3928_v14 = vadd.f32 %v12341_v26, %v3895_v11  ;;  %v3953_v2 = vmax.f32 %v3927_v40, 0.0  ;;  %v10651_v11 = vld [vmem:[#allocation14 + $0x120] sm:$0xff]   ;;  %v10652_v40 = vld [vmem:[#allocation14 + $0x128] sm:$0xff]  }
 0x6ce   : > { %v4517_v19 = vrot.slane %v4515_v25, 7  ;;  %v5258_v25 = vshll.u32 %v12396_v8, 16 }
 0x6cf   : > { %v3954_v23 = vmax.f32 %v3928_v14, 0.0 }
 0x6d0   : > { %v4520_v29 = vor.u32 %v4518_v22, %v4517_v19  ;;  %v5260_v14 = vrot.slane %v5258_v25, 1  ;;  %v10653_v22 = vld [vmem:[#allocation14 + $0x130] sm:$0xff]   ;;  %v10658_v25 = vld [vmem:[#allocation14 + $0x1d8] sm:$0xff]  }
 0x6d1   : > { %v4397_v35 = vsel %vm4319_vm9, %v3954_v23, 0.0 }
 0x6d2   : > { %v12487_v43 = vsel %vm4426_vm11, %v4509_v33, %v4520_v29  ;;  %v4425_v61 = vpack.c.bf16 %v4397_v35, %v3953_v2  ;;  %v5236_v33 = vrot.slane %v5234_v3, 1  ;;  %v5266_v29 = vshll.u32 %v12410_v39, 16  ;;  %v10654_v2 = vld [vmem:[#allocation14 + $0x138] sm:$0xff]  }
 0x6d3   : > { %8885 = vmatmul.mubr.bf16.gmra.mrb[104].mxu0 %v12487_v43 }
 0x6d4   : > { %v4523_v27 = vshrl.u32 %v4425_v61, 16  ;;  %8888 = vmatprep.mubr.msk.bf16.mxu0 %vm10992_vm0, %v10991_v0  ;;  %v4526_v6 = vshll.u32 %v4425_v61, 16  ;;  %v5237_v46 = vsel %vm967_vm2, %v12592_v16, %v5236_v33  ;;  %v5240_v58 = vor.u32 %v5238_v56, %v5236_v33 }
 0x6d5   : > { %v5268_v35 = vrot.slane %v5266_v29, 1  ;;  %v5314_v33 = vshll.u32 %v12478_v1, 16  ;;  %v5322_v56 = vshll.u32 %v12487_v43, 16 }
 0x6d6   : > { %v4525_v24 = vrot.slane %v4523_v27, 7  ;;  %v12606_v62 = vsel %vm967_vm2, %v5240_v58, %v5244_v57 }
 0x6d7   : > { %v5324_v58 = vrot.slane %v5322_v56, 1 }
 0x6d8   : > { %v4528_v26 = vor.u32 %v4526_v6, %v4525_v24  ;;  %v5274_v24 = vshll.u32 %v12422_v18, 16  ;;  %v5270_v6 = vshrl.u32 %v12410_v39, 16 }
 0x6da   : > { %v4529_v60 = vsel %vm4426_vm11, %v4517_v19, %v4528_v26  ;;  %v5276_v26 = vrot.slane %v5274_v24, 1  ;;  %v10665_v24 = vld [vmem:[#allocation14 + $0x90] sm:$0xff]  }
 0x6db   : > { %v12495_v30 = vsel %vm11851_vm4, %v4529_v60, 0  ;;  %v5272_v60 = vor.u32 %v5270_v6, %v5268_v35  ;;  %v10666_v6 = vld [vmem:[#allocation14 + $0x98] sm:$0xff]  }
 0x6dc   : > { %8889 = vmatmul.mubr.bf16.gmra.mrb[108].mxu0 %v12495_v30 }
 0x6dd   : > { %8908 = vmatprep.mubr.msk.bf16.mxu0 %vm10992_vm0, %v10991_v0 }
 0x6e4   : > { %8909 = vmatmul.mubr.bf16.vlgmr.msra.gmra.mrb[60].mxu0 %v10993_v51  ;;  %v10648_v51 = vld [vmem:[#allocation14 + $0x108] sm:$0xff]  }
 0x6e5   : > { %8961 = vmatpush3.bf16.msra.mxu0 %v10631_v32  ;;  %8912 = vmatprep.mubr.msk.bf16.mxu0 %vm10992_vm0, %v10991_v0  ;;  %v5282_v32 = vshll.u32 %v12434_v45, 16 }
 0x6e6   : > { %8962 = vmatprep.subr.bf16.mxu0 %v10991_v0 }
 0x6e9   : > { %8963 = vmatpush3.bf16.msra.mxu0 %v10632_v34  ;;  %v5278_v34 = vshrl.u32 %v12422_v18, 16 }
 0x6ea   : > { %8964 = vmatprep.subr.bf16.mxu0 %v10991_v0 }
 0x6ec   : > { %8913 = vmatmul.mubr.bf16.gmra.mrb[64].mxu0 %v12354_v28  ;;  %v5246_v28 = vshrl.u32 %v12368_v10, 16 }
 0x6ed   : > { %8916 = vmatprep.mubr.msk.bf16.mxu0 %vm10992_vm0, %v10991_v0  ;;  %8965 = vmatpush3.bf16.msra.mxu0 %v10633_v38  ;;  %v5284_v38 = vrot.slane %v5282_v32, 1 }
 0x6ee   : > { %8966 = vmatprep.subr.bf16.mxu0 %v10991_v0  ;;  %v5248_v7 = vor.u32 %v5246_v28, %v5244_v57  ;;  %v5318_v57 = vshrl.u32 %v12478_v1, 16 }
 0x6f0   : > { %v12616_v13 = vsel %vm967_vm2, %v5248_v7, %v5252_v5  ;;  %v10656_v7 = vld [vmem:[#allocation14 + $0x1c8] sm:$0xff]  }
 0x6f1   : > { %8967 = vmatpush3.bf16.msra.mxu0 %v10634_v37  ;;  %v5280_v37 = vor.u32 %v5278_v34, %v5276_v26  ;;  %v10693_v34 = vld [vmem:[#allocation3 + $0x8] sm:$0xff] }
 0x6f2   : > { %8968 = vmatprep.subr.bf16.mxu0 %v10991_v0 }
 0x6f4   : > { %8917 = vmatmul.mubr.bf16.gmra.mrb[68].mxu0 %v12368_v10 }
 0x6f5   : > { %8920 = vmatprep.mubr.msk.bf16.mxu0 %vm10992_vm0, %v10991_v0  ;;  %8969 = vmatpush3.bf16.msra.mxu0 %v10635_v41  ;;  %v12652_v41 = vsel %vm967_vm2, %v5280_v37, %v5284_v38  ;;  %v10671_v37 = vld [vmem:[#allocation14 + $0x140] sm:$0xff]  }
 0x6f6   : > { %8970 = vmatprep.subr.bf16.mxu0 %v10991_v0 }
 0x6f9   : > { %8971 = vmatpush3.bf16.msra.mxu0 %v10636_v55  ;;  %v5286_v55 = vshrl.u32 %v12434_v45, 16 }
 0x6fa   : > { %8972 = vmatprep.subr.bf16.mxu0 %v10991_v0 }
 0x6fc   : > { %8921 = vmatmul.mubr.bf16.gmra.mrb[72].mxu0 %v12382_v17 }
 0x6fd   : > { %8924 = vmatprep.mubr.msk.bf16.mxu0 %vm10992_vm0, %v10991_v0  ;;  %8973 = vmatpush3.bf16.msra.mxu0 %v10637_v47 }
 0x6fe   : > { %8974 = vmatprep.subr.bf16.mxu0 %v10991_v0 }
 0x701   : > { %8975 = vmatpush3.bf16.msra.mxu0 %v10638_v20  ;;  %v5288_v20 = vor.u32 %v5286_v55, %v5284_v38  ;;  %v6061_v38 = vrot.slane %v10693_v34, 1  ;;  %v10694_v55 = vld [vmem:[#allocation3 + $0x10] sm:$0xff] }
 0x702   : > { %9028 = vmatprep.subr.bf16.mxu0 %v10991_v0 }
 0x704   : > { %8925 = vmatmul.mubr.bf16.gmra.mrb[76].mxu0 %v12396_v8 }
 0x705   : > { %8928 = vmatprep.mubr.msk.bf16.mxu0 %vm10992_vm0, %v10991_v0 }
 0x70c   : > { %8929 = vmatmul.mubr.bf16.gmra.mrb[80].mxu0 %v12410_v39 }
 0x70d   : > { %8932 = vmatprep.mubr.msk.bf16.mxu0 %vm10992_vm0, %v10991_v0 }
 0x714   : > { %8933 = vmatmul.mubr.bf16.gmra.mrb[84].mxu0 %v12422_v18 }
 0x715   : > { %8936 = vmatprep.mubr.msk.bf16.mxu0 %vm10992_vm0, %v10991_v0 }
 0x71c   : > { %8937 = vmatmul.mubr.bf16.gmra.mrb[88].mxu0 %v12434_v45 }
 0x71d   : > { %8940 = vmatprep.mubr.msk.bf16.mxu0 %vm10992_vm0, %v10991_v0 }
 0x724   : > { %8941 = vmatmul.mubr.bf16.gmra.mrb[92].mxu0 %v12445_v54 }
 0x725   : > { %8944 = vmatprep.mubr.msk.bf16.mxu0 %vm10992_vm0, %v10991_v0 }
 0x72c   : > { %8945 = vmatmul.mubr.bf16.gmra.mrb[96].mxu0 %v12456_v9 }
 0x72d   : > { %8948 = vmatprep.mubr.msk.bf16.mxu0 %vm10992_vm0, %v10991_v0 }
 0x734   : > { %8949 = vmatmul.mubr.bf16.gmra.mrb[100].mxu0 %v12467_v42 }
 0x735   : > { %8952 = vmatprep.mubr.msk.bf16.mxu0 %vm10992_vm0, %v10991_v0 }
 0x73c   : > { %8953 = vmatmul.mubr.bf16.gmra.mrb[104].mxu0 %v12478_v1 }
 0x73d   : > { %8956 = vmatprep.mubr.msk.bf16.mxu0 %vm10992_vm0, %v10991_v0 }
 0x744   : > { %8957 = vmatmul.mubr.bf16.gmra.mrb[108].mxu0 %v12487_v43 }
 0x745   : > { %8976 = vmatprep.mubr.msk.bf16.mxu0 %vm10992_vm0, %v10991_v0 }
 0x74c   : > { %8977 = vmatmul.mubr.bf16.vlgmr.msra.gmra.mrb[60].mxu0 %v12368_v10  ;;  %v5254_v10 = vshrl.u32 %v12382_v17, 16 }
 0x74d   : > { %9029 = vmatpush3.bf16.msra.mxu0 %v10639_v48  ;;  %8980 = vmatprep.mubr.msk.bf16.mxu0 %vm10992_vm0, %v10991_v0 }
 0x74e   : > { %9030 = vmatprep.subr.bf16.mxu0 %v10991_v0  ;;  %v5256_v19 = vor.u32 %v5254_v10, %v5252_v5  ;;  %v10655_v5 = vld [vmem:[#allocation14 + $0x1c0] sm:$0xff]   ;;  %v10661_v10 = vld [vmem:[#allocation14 + $0x1f0] sm:$0xff]  }
 0x750   : > { %v12626_v23 = vsel %vm967_vm2, %v5256_v19, %v5260_v14  ;;  %v5571_v19 = vshll.u32 %v12495_v30, 16 }
 0x751   : > { %9031 = vmatpush3.bf16.msra.mxu0 %v10640_v31  ;;  %v5294_v31 = vshrl.u32 %v12445_v54, 16 }
 0x752   : > { %9032 = vmatprep.subr.bf16.mxu0 %v10991_v0 }
 0x754   : > { %8981 = vmatmul.mubr.bf16.gmra.mrb[64].mxu0 %v12382_v17  ;;  %v5262_v17 = vshrl.u32 %v12396_v8, 16 }
 0x755   : > { %8984 = vmatprep.mubr.msk.bf16.mxu0 %vm10992_vm0, %v10991_v0  ;;  %9033 = vmatpush3.bf16.msra.mxu0 %v10641_v49 }
 0x756   : > { %9034 = vmatprep.subr.bf16.mxu0 %v10991_v0  ;;  %v5264_v61 = vor.u32 %v5262_v17, %v5260_v14  ;;  %v10662_v14 = vld [vmem:[#allocation14 + $0x1f8] sm:$0xff]  }
 0x758   : > { %v12636_v27 = vsel %vm967_vm2, %v5264_v61, %v5268_v35  ;;  %v10663_v35 = vld [vmem:[#allocation14 + $0x80] sm:$0xff]   ;;  %v10664_v61 = vld [vmem:[#allocation14 + $0x88] sm:$0xff]  }
 0x759   : > { %9035 = vmatpush3.bf16.msra.mxu0 %v10642_v36 }
 0x75a   : > { %9036 = vmatprep.subr.bf16.mxu0 %v10991_v0 }
 0x75c   : > { %8985 = vmatmul.mubr.bf16.gmra.mrb[68].mxu0 %v12396_v8  ;;  %v12644_v8 = vsel %vm967_vm2, %v5272_v60, %v5276_v26  ;;  %v10668_v26 = vld [vmem:[#allocation14 + $0xa8] sm:$0xff]   ;;  %v10670_v60 = vld [vmem:[#allocation14 + $0xb8] sm:$0xff]  }
 0x75d   : > { %8988 = vmatprep.mubr.msk.bf16.mxu0 %vm10992_vm0, %v10991_v0  ;;  %9037 = vmatpush3.bf16.msra.mxu0 %v10643_v21 }
 0x75e   : > { %9038 = vmatprep.subr.bf16.mxu0 %v10991_v0 }
 0x761   : > { %9039 = vmatpush3.bf16.msra.mxu0 %v10644_v50  ;;  %v5306_v50 = vshll.u32 %v12467_v42, 16 }
 0x762   : > { %9040 = vmatprep.subr.bf16.mxu0 %v10991_v0 }
 0x764   : > { %8989 = vmatmul.mubr.bf16.gmra.mrb[72].mxu0 %v12410_v39  ;;  %v5290_v39 = vshll.u32 %v12445_v54, 16 }
 0x765   : > { %8992 = vmatprep.mubr.msk.bf16.mxu0 %vm10992_vm0, %v10991_v0  ;;  %9041 = vmatpush3.bf16.msra.mxu0 %v10645_v53  ;;  %v5302_v53 = vshrl.u32 %v12456_v9, 16 }
 0x766   : > { %9042 = vmatprep.subr.bf16.mxu0 %v10991_v0  ;;  %v5292_v47 = vrot.slane %v5290_v39, 1  ;;  %v10672_v39 = vld [vmem:[#allocation14 + $0x148] sm:$0xff]  }
 0x768   : > { %v12660_v48 = vsel %vm967_vm2, %v5288_v20, %v5292_v47  ;;  %v5296_v36 = vor.u32 %v5294_v31, %v5292_v47  ;;  %v10673_v47 = vld [vmem:[#allocation14 + $0x150] sm:$0xff]  }
 0x769   : > { %9043 = vmatpush3.bf16.msra.mxu0 %v10646_v12  ;;  %v5308_v12 = vrot.slane %v5306_v50, 1  ;;  %v10696_v50 = vld [vmem:[#allocation3 + $0x20] sm:$0xff] }
 0x76a   : > { %9096 = vmatprep.subr.bf16.mxu0 %v10991_v0 }
 0x76c   : > { %8993 = vmatmul.mubr.bf16.gmra.mrb[76].mxu0 %v12422_v18  ;;  %v5298_v18 = vshll.u32 %v12456_v9, 16 }
 0x76d   : > { %8996 = vmatprep.mubr.msk.bf16.mxu0 %vm10992_vm0, %v10991_v0 }
 0x76e   : > { %v5300_v49 = vrot.slane %v5298_v18, 1  ;;  %v10695_v18 = vld [vmem:[#allocation3 + $0x18] sm:$0xff] }
 0x76f   : > { %v6065_v31 = vrot.slane %v10695_v18, 1 }
 0x770   : > { %v12668_v21 = vsel %vm967_vm2, %v5296_v36, %v5300_v49 }
 0x774   : > { %8997 = vmatmul.mubr.bf16.gmra.mrb[80].mxu0 %v12434_v45 }
 0x775   : > { %9000 = vmatprep.mubr.msk.bf16.mxu0 %vm10992_vm0, %v10991_v0 }
 0x77c   : > { %9001 = vmatmul.mubr.bf16.gmra.mrb[84].mxu0 %v12445_v54 }
 0x77d   : > { %9004 = vmatprep.mubr.msk.bf16.mxu0 %vm10992_vm0, %v10991_v0 }
 0x784   : > { %9005 = vmatmul.mubr.bf16.gmra.mrb[88].mxu0 %v12456_v9 }
 0x785   : > { %9008 = vmatprep.mubr.msk.bf16.mxu0 %vm10992_vm0, %v10991_v0 }
 0x78c   : > { %9009 = vmatmul.mubr.bf16.gmra.mrb[92].mxu0 %v12467_v42 }
 0x78d   : > { %9012 = vmatprep.mubr.msk.bf16.mxu0 %vm10992_vm0, %v10991_v0 }
 0x794   : > { %9013 = vmatmul.mubr.bf16.gmra.mrb[96].mxu0 %v12478_v1 }
 0x795   : > { %9016 = vmatprep.mubr.msk.bf16.mxu0 %vm10992_vm0, %v10991_v0 }
 0x79c   : > { %9017 = vmatmul.mubr.bf16.gmra.mrb[100].mxu0 %v12487_v43 }
 0x79d   : > { %9020 = vmatprep.mubr.msk.bf16.mxu0 %vm10992_vm0, %v10991_v0 }
 0x7a4   : > { %9021 = vmatmul.mubr.bf16.gmra.mrb[104].mxu0 %v12495_v30 }
 0x7a5   : > { %9024 = vmatprep.mubr.msk.bf16.mxu0 %vm10992_vm0, %v10991_v0 }
 0x7ac   : > { %9025 = vmatmul.mubr.bf16.gmra.mrb[108].mxu0 %v4576_v15  ;;  %v5304_v15 = vor.u32 %v5302_v53, %v5300_v49  ;;  %v10675_v49 = vld [vmem:[#allocation14 + $0x160] sm:$0xff]   ;;  %v6067_v53 = vrot.slane %v10696_v50, 1 }
 0x7ad   : > { %9044 = vmatprep.mubr.msk.bf16.mxu0 %vm10992_vm0, %v10991_v0 }
 0x7ae   : > { %v12676_v3 = vsel %vm967_vm2, %v5304_v15, %v5308_v12  ;;  %v12817_v15 = vsel %vm3147_vm5, %v6065_v31, %v6067_v53 }
 0x7b4   : > { %9045 = vmatmul.mubr.bf16.vlgmr.msra.gmra.mrb[60].mxu0 %v5237_v46  ;;  %v5316_v46 = vrot.slane %v5314_v33, 1  ;;  %v10697_v33 = vld [vmem:[#allocation3 + $0x28] sm:$0xff] }
 0x7b5   : > { %9097 = vmatpush3.bf16.msra.mxu0 %v10647_v44  ;;  %9048 = vmatprep.mubr.msk.bf16.mxu0 %vm10992_vm0, %v10991_v0  ;;  %v5310_v44 = vshrl.u32 %v12467_v42, 16 }
 0x7b6   : > { %9098 = vmatprep.subr.bf16.mxu0 %v10991_v0 }
 0x7b7   : > { %v5312_v52 = vor.u32 %v5310_v44, %v5308_v12  ;;  %v10677_v12 = vld [vmem:[#allocation14 + $0x170] sm:$0xff]   ;;  %v6069_v44 = vrot.slane %v10697_v33, 1 }
 0x7b9   : > { %9099 = vmatpush3.bf16.msra.mxu0 %v10648_v51  ;;  %v12684_v51 = vsel %vm967_vm2, %v5312_v52, %v5316_v46  ;;  %v10698_v52 = vld [vmem:[#allocation3 + $0x30] sm:$0xff] }
 0x7ba   : > { %9100 = vmatprep.subr.bf16.mxu0 %v10991_v0 }
 0x7bc   : > { %9049 = vmatmul.mubr.bf16.gmra.mrb[64].mxu0 %v12606_v62 }
 0x7bd   : > { %9052 = vmatprep.mubr.msk.bf16.mxu0 %vm10992_vm0, %v10991_v0  ;;  %9101 = vmatpush3.bf16.msra.mxu0 %v10649_v59  ;;  %v5320_v59 = vor.u32 %v5318_v57, %v5316_v46  ;;  %v12825_v46 = vsel %vm3147_vm5, %v6067_v53, %v6069_v44  ;;  %v6073_v57 = vrot.slane %v12434_v45, 1  ;;  %v6077_v45 = vrot.slane %v12456_v9, 1 }
 0x7be   : > { %9102 = vmatprep.subr.bf16.mxu0 %v10991_v0  ;;  %v6081_v9 = vrot.slane %v12478_v1, 1  ;;  %v10679_v1 = vld [vmem:[#allocation14 + $0x200] sm:$0xff]  }
 0x7bf   : > { %v12692_v63 = vsel %vm967_vm2, %v5320_v59, %v5324_v58  ;;  %v6075_v59 = vrot.slane %v12445_v54, 1  ;;  %v6079_v54 = vrot.slane %v12467_v42, 1  ;;  %v6083_v42 = vrot.slane %v12487_v43, 1 }
 0x7c1   : > { %9103 = vmatpush3.bf16.msra.mxu0 %v10650_v4  ;;  %v5326_v4 = vshrl.u32 %v12487_v43, 16  ;;  %v10680_v43 = vld [vmem:[#allocation14 + $0x208] sm:$0xff]  }
 0x7c2   : > { %9104 = vmatprep.subr.bf16.mxu0 %v10991_v0 }
 0x7c3   : > { %v5328_v28 = vor.u32 %v5326_v4, %v5324_v58  ;;  %v12852_v4 = vsel %vm3147_vm5, %v6075_v59, %v6077_v45 }
 0x7c4   : > { %9053 = vmatmul.mubr.bf16.gmra.mrb[68].mxu0 %v12616_v13 }
 0x7c5   : > { %9056 = vmatprep.mubr.msk.bf16.mxu0 %vm10992_vm0, %v10991_v0  ;;  %9105 = vmatpush3.bf16.msra.mxu0 %v10651_v11  ;;  %v10657_v11 = vld [vmem:[#allocation14 + $0x1d0] sm:$0xff]  }
 0x7c6   : > { %9106 = vmatprep.subr.bf16.mxu0 %v10991_v0 }
 0x7c9   : > { %9107 = vmatpush3.bf16.msra.mxu0 %v10652_v40  ;;  %v10660_v40 = vld [vmem:[#allocation14 + $0x1e8] sm:$0xff]  }
 0x7ca   : > { %9108 = vmatprep.subr.bf16.mxu0 %v10991_v0 }
 0x7cc   : > { %9057 = vmatmul.mubr.bf16.gmra.mrb[72].mxu0 %v12626_v23 }
 0x7cd   : > { %9060 = vmatprep.mubr.msk.bf16.mxu0 %vm10992_vm0, %v10991_v0  ;;  %9109 = vmatpush3.bf16.msra.mxu0 %v10653_v22  ;;  %v5573_v22 = vrot.slane %v5571_v19, 1  ;;  %v6327_v19 = vrot.slane %v12495_v30, 1 }
 0x7ce   : > { %9110 = vmatprep.subr.bf16.mxu0 %v10991_v0 }
 0x7cf   : > { %v5574_v29 = vsel %vm967_vm2, %v5328_v28, %v5573_v22 }
 0x7d1   : > { %9111 = vmatpush3.bf16.msra.mxu0 %v10654_v2  ;;  %v5575_v2 = vshrl.u32 %v12495_v30, 16  ;;  %v10699_v30 = vld [vmem:[#allocation3] sm:$0xff] }
 0x7d2   : > { %9164 = vmatprep.subr.bf16.mxu0 %v10991_v0 }
 0x7d3   : > { %v5577_v17 = vor.u32 %v5575_v2, %v5573_v22  ;;  %v6328_v22 = vsel %vm3147_vm5, %v6083_v42, %v6327_v19 }
 0x7d4   : > { %9061 = vmatmul.mubr.bf16.gmra.mrb[76].mxu0 %v12636_v27 }
 0x7d5   : > { %9064 = vmatprep.mubr.msk.bf16.mxu0 %vm10992_vm0, %v10991_v0 }
 0x7dc   : > { %9065 = vmatmul.mubr.bf16.gmra.mrb[80].mxu0 %v12644_v8 }
 0x7dd   : > { %9068 = vmatprep.mubr.msk.bf16.mxu0 %vm10992_vm0, %v10991_v0 }
 0x7e4   : > { %9069 = vmatmul.mubr.bf16.gmra.mrb[84].mxu0 %v12652_v41 }
 0x7e5   : > { %9072 = vmatprep.mubr.msk.bf16.mxu0 %vm10992_vm0, %v10991_v0 }
 0x7ec   : > { %9073 = vmatmul.mubr.bf16.gmra.mrb[88].mxu0 %v12660_v48 }
 0x7ed   : > { %9076 = vmatprep.mubr.msk.bf16.mxu0 %vm10992_vm0, %v10991_v0 }
 0x7f4   : > { %9077 = vmatmul.mubr.bf16.gmra.mrb[92].mxu0 %v12668_v21 }
 0x7f5   : > { %9080 = vmatprep.mubr.msk.bf16.mxu0 %vm10992_vm0, %v10991_v0 }
 0x7fc   : > { %9081 = vmatmul.mubr.bf16.gmra.mrb[96].mxu0 %v12676_v3 }
 0x7fd   : > { %9084 = vmatprep.mubr.msk.bf16.mxu0 %vm10992_vm0, %v10991_v0 }
 0x804   : > { %9085 = vmatmul.mubr.bf16.gmra.mrb[100].mxu0 %v12684_v51 }
 0x805   : > { %9088 = vmatprep.mubr.msk.bf16.mxu0 %vm10992_vm0, %v10991_v0 }
 0x80c   : > { %9089 = vmatmul.mubr.bf16.gmra.mrb[104].mxu0 %v12692_v63 }
 0x80d   : > { %9092 = vmatprep.mubr.msk.bf16.mxu0 %vm10992_vm0, %v10991_v0 }
 0x814   : > { %9093 = vmatmul.mubr.bf16.gmra.mrb[108].mxu0 %v5328_v28  ;;  %v12859_v28 = vsel %vm3147_vm5, %v6077_v45, %v6079_v54 }
 0x815   : > { %9112 = vmatprep.mubr.msk.bf16.mxu0 %vm10992_vm0, %v10991_v0 }
 0x81c   : > { %9113 = vmatmul.mubr.bf16.vlgmr.msra.gmra.mrb[60].mxu0 %v12606_v62  ;;  %v10659_v62 = vld [vmem:[#allocation14 + $0x1e0] sm:$0xff]  }
 0x81d   : > { %9165 = vmatpush3.bf16.msra.mxu0 %v10655_v5  ;;  %9116 = vmatprep.mubr.msk.bf16.mxu0 %vm10992_vm0, %v10991_v0  ;;  %v12866_v5 = vsel %vm3147_vm5, %v6079_v54, %v6081_v9 }
 0x81e   : > { %9166 = vmatprep.subr.bf16.mxu0 %v10991_v0 }
 0x821   : > { %9167 = vmatpush3.bf16.msra.mxu0 %v10656_v7  ;;  %v12873_v7 = vsel %vm3147_vm5, %v6081_v9, %v6083_v42 }
 0x822   : > { %9168 = vmatprep.subr.bf16.mxu0 %v10991_v0 }
 0x824   : > { %9117 = vmatmul.mubr.bf16.gmra.mrb[64].mxu0 %v12616_v13 }
 0x825   : > { %9120 = vmatprep.mubr.msk.bf16.mxu0 %vm10992_vm0, %v10991_v0  ;;  %9169 = vmatpush3.bf16.msra.mxu0 %v10657_v11  ;;  %v10681_v11 = vld [vmem:[#allocation14 + $0x210] sm:$0xff]  }
 0x826   : > { %9170 = vmatprep.subr.bf16.mxu0 %v10991_v0 }
 0x829   : > { %9171 = vmatpush3.bf16.msra.mxu0 %v10658_v25  ;;  %v10682_v25 = vld [vmem:[#allocation14 + $0x218] sm:$0xff]  }
 0x82a   : > { %9172 = vmatprep.subr.bf16.mxu0 %v10991_v0 }
 0x82c   : > { %9121 = vmatmul.mubr.bf16.gmra.mrb[68].mxu0 %v12626_v23 }
 0x82d   : > { %9124 = vmatprep.mubr.msk.bf16.mxu0 %vm10992_vm0, %v10991_v0  ;;  %9173 = vmatpush3.bf16.msra.mxu0 %v10659_v62  ;;  %v10683_v62 = vld [vmem:[#allocation14 + $0x220] sm:$0xff]  }
 0x82e   : > { %9174 = vmatprep.subr.bf16.mxu0 %v10991_v0 }
 0x831   : > { %9175 = vmatpush3.bf16.msra.mxu0 %v10660_v40  ;;  %v10684_v40 = vld [vmem:[#allocation14 + $0x228] sm:$0xff]  }
 0x832   : > { %9176 = vmatprep.subr.bf16.mxu0 %v10991_v0 }
 0x834   : > { %9125 = vmatmul.mubr.bf16.gmra.mrb[72].mxu0 %v12636_v27 }
 0x835   : > { %9128 = vmatprep.mubr.msk.bf16.mxu0 %vm10992_vm0, %v10991_v0  ;;  %9177 = vmatpush3.bf16.msra.mxu0 %v10661_v10  ;;  %v10685_v10 = vld [vmem:[#allocation14 + $0x230] sm:$0xff]  }
 0x836   : > { %9178 = vmatprep.subr.bf16.mxu0 %v10991_v0 }
 0x839   : > { %9179 = vmatpush3.bf16.msra.mxu0 %v10662_v14  ;;  %v10686_v14 = vld [vmem:[#allocation14 + $0x238] sm:$0xff]  }
 0x83a   : > { %9232 = vmatprep.subr.bf16.mxu0 %v10991_v0 }
 0x83c   : > { %9129 = vmatmul.mubr.bf16.gmra.mrb[76].mxu0 %v12644_v8 }
 0x83d   : > { %9132 = vmatprep.mubr.msk.bf16.mxu0 %vm10992_vm0, %v10991_v0 }
 0x844   : > { %9133 = vmatmul.mubr.bf16.gmra.mrb[80].mxu0 %v12652_v41 }
 0x845   : > { %9136 = vmatprep.mubr.msk.bf16.mxu0 %vm10992_vm0, %v10991_v0 }
 0x84c   : > { %9137 = vmatmul.mubr.bf16.gmra.mrb[84].mxu0 %v12660_v48 }
 0x84d   : > { %9140 = vmatprep.mubr.msk.bf16.mxu0 %vm10992_vm0, %v10991_v0 }
 0x854   : > { %9141 = vmatmul.mubr.bf16.gmra.mrb[88].mxu0 %v12668_v21 }
 0x855   : > { %9144 = vmatprep.mubr.msk.bf16.mxu0 %vm10992_vm0, %v10991_v0 }
 0x85c   : > { %9145 = vmatmul.mubr.bf16.gmra.mrb[92].mxu0 %v12676_v3 }
 0x85d   : > { %9148 = vmatprep.mubr.msk.bf16.mxu0 %vm10992_vm0, %v10991_v0 }
 0x864   : > { %9149 = vmatmul.mubr.bf16.gmra.mrb[96].mxu0 %v12684_v51 }
 0x865   : > { %9152 = vmatprep.mubr.msk.bf16.mxu0 %vm10992_vm0, %v10991_v0 }
 0x86c   : > { %9153 = vmatmul.mubr.bf16.gmra.mrb[100].mxu0 %v12692_v63 }
 0x86d   : > { %9156 = vmatprep.mubr.msk.bf16.mxu0 %vm10992_vm0, %v10991_v0 }
 0x874   : > { %9157 = vmatmul.mubr.bf16.gmra.mrb[104].mxu0 %v5574_v29 }
 0x875   : > { %9160 = vmatprep.mubr.msk.bf16.mxu0 %vm10992_vm0, %v10991_v0 }
 0x87c   : > { %9161 = vmatmul.mubr.bf16.gmra.mrb[108].mxu0 %v5577_v17 }
 0x87d   : > { %9180 = vmatprep.mubr.msk.bf16.mxu0 %vm10992_vm0, %v10991_v0 }
 0x884   : > { %9181 = vmatmul.mubr.bf16.vlgmr.msra.gmra.mrb[60].mxu0 %v12616_v13  ;;  %v10667_v13 = vld [vmem:[#allocation14 + $0xa0] sm:$0xff]  }
 0x885   : > { %9233 = vmatpush3.bf16.msra.mxu0 %v10663_v35  ;;  %9184 = vmatprep.mubr.msk.bf16.mxu0 %vm10992_vm0, %v10991_v0 }
 0x886   : > { %9234 = vmatprep.subr.bf16.mxu0 %v10991_v0 }
 0x889   : > { %9235 = vmatpush3.bf16.msra.mxu0 %v10664_v61  ;;  %v12963_v61 = vld [vmem:[#allocation17] ss:$0 sm:$0xff] }
 0x88a   : > { %9236 = vmatprep.subr.bf16.mxu0 %v10991_v0 }
 0x88c   : > { %9185 = vmatmul.mubr.bf16.gmra.mrb[64].mxu0 %v12626_v23  ;;  %v10669_v23 = vld [vmem:[#allocation14 + $0xb0] sm:$0xff]  }
 0x88d   : > { %9188 = vmatprep.mubr.msk.bf16.mxu0 %vm10992_vm0, %v10991_v0  ;;  %9237 = vmatpush3.bf16.msra.mxu0 %v10665_v24 }
 0x88e   : > { %9238 = vmatprep.subr.bf16.mxu0 %v10991_v0 }
 0x891   : > { %9239 = vmatpush3.bf16.msra.mxu0 %v10666_v6 }
 0x892   : > { %9240 = vmatprep.subr.bf16.mxu0 %v10991_v0 }
 0x894   : > { %9189 = vmatmul.mubr.bf16.gmra.mrb[68].mxu0 %v12636_v27  ;;  %v5812_v27 = vsel %vm967_vm2, %v5577_v17, %v12592_v16  ;;  %v12961_v17 = vld [vmem:[#allocation15] ss:$0 sm:$0xff] }
 0x895   : > { %9192 = vmatprep.mubr.msk.bf16.mxu0 %vm10992_vm0, %v10991_v0  ;;  %9241 = vmatpush3.bf16.msra.mxu0 %v10667_v13 }
 0x896   : > { %9242 = vmatprep.subr.bf16.mxu0 %v10991_v0 }
 0x899   : > { %9243 = vmatpush3.bf16.msra.mxu0 %v10668_v26 }
 0x89a   : > { %9244 = vmatprep.subr.bf16.mxu0 %v10991_v0 }
 0x89c   : > { %9193 = vmatmul.mubr.bf16.gmra.mrb[72].mxu0 %v12644_v8  ;;  %v6029_v8 = vld [vmem:[#allocation3] sm:$0xfe] }
 0x89d   : > { %9196 = vmatprep.mubr.msk.bf16.mxu0 %vm10992_vm0, %v10991_v0  ;;  %9245 = vmatpush3.bf16.msra.mxu0 %v10669_v23  ;;  %v6060_v32 = vrot.slane %v6029_v8, 1 }
 0x89e   : > { %9246 = vmatprep.subr.bf16.mxu0 %v10991_v0 }
 0x8a1   : > { %9247 = vmatpush3.bf16.msra.mxu0 %v10670_v60 }
 0x8a2   : > { %9300 = vmatprep.subr.bf16.mxu0 %v10991_v0 }
 0x8a4   : > { %9197 = vmatmul.mubr.bf16.gmra.mrb[76].mxu0 %v12652_v41  ;;  %v6062_v41 = vsel %vm3147_vm5, %v6060_v32, %v6061_v38 }
 0x8a5   : > { %9200 = vmatprep.mubr.msk.bf16.mxu0 %vm10992_vm0, %v10991_v0 }
 0x8ac   : > { %9201 = vmatmul.mubr.bf16.gmra.mrb[80].mxu0 %v12660_v48  ;;  %v10674_v48 = vld [vmem:[#allocation14 + $0x158] sm:$0xff]  }
 0x8ad   : > { %9204 = vmatprep.mubr.msk.bf16.mxu0 %vm10992_vm0, %v10991_v0 }
 0x8b4   : > { %9205 = vmatmul.mubr.bf16.gmra.mrb[84].mxu0 %v12668_v21  ;;  %v10676_v21 = vld [vmem:[#allocation14 + $0x168] sm:$0xff]  }
 0x8b5   : > { %9208 = vmatprep.mubr.msk.bf16.mxu0 %vm10992_vm0, %v10991_v0 }
 0x8bc   : > { %9209 = vmatmul.mubr.bf16.gmra.mrb[88].mxu0 %v12676_v3  ;;  %v10678_v3 = vld [vmem:[#allocation14 + $0x178] sm:$0xff]  }
 0x8bd   : > { %9212 = vmatprep.mubr.msk.bf16.mxu0 %vm10992_vm0, %v10991_v0 }
 0x8c4   : > { %9213 = vmatmul.mubr.bf16.gmra.mrb[92].mxu0 %v12684_v51  ;;  %v6071_v51 = vrot.slane %v10698_v52, 1 }
 0x8c5   : > { %9216 = vmatprep.mubr.msk.bf16.mxu0 %vm10992_vm0, %v10991_v0 }
 0x8c6   : > { %v12831_v56 = vsel %vm3147_vm5, %v6069_v44, %v6071_v51  ;;  %v12838_v58 = vsel %vm3147_vm5, %v6071_v51, %v6073_v57 }
 0x8cc   : > { %9217 = vmatmul.mubr.bf16.gmra.mrb[96].mxu0 %v12692_v63  ;;  %v12845_v63 = vsel %vm3147_vm5, %v6073_v57, %v6075_v59 }
 0x8cd   : > { %9220 = vmatprep.mubr.msk.bf16.mxu0 %vm10992_vm0, %v10991_v0 }
 0x8d4   : > { %9221 = vmatmul.mubr.bf16.gmra.mrb[100].mxu0 %v5574_v29  ;;  %v6560_v29 = vrot.slane %v10699_v30, 1 }
 0x8d5   : > { %9224 = vmatprep.mubr.msk.bf16.mxu0 %vm10992_vm0, %v10991_v0 }
 0x8d6   : > { %v6561_v2 = vsel %vm3147_vm5, %v6327_v19, %v6560_v29 }
 0x8dc   : > { %9225 = vmatmul.mubr.bf16.gmra.mrb[104].mxu0 %v5812_v27 }
 0x8dd   : > { %9228 = vmatprep.mubr.msk.bf16.mxu0 %vm10992_vm0, %v10991_v0 }
 0x8e4   : > { %9229 = vmatmul.mubr.bf16.gmra.mrb[108].mxu0 %v12592_v16  ;;  %v6063_v16 = vrot.slane %v10694_v55, 1 }
 0x8e5   : > { %9248 = vmatprep.mubr.msk.bf16.mxu0 %vm10992_vm0, %v10991_v0 }
 0x8e6   : > { %v12801_v20 = vsel %vm3147_vm5, %v6061_v38, %v6063_v16  ;;  %v12809_v36 = vsel %vm3147_vm5, %v6063_v16, %v6065_v31 }
 0x8ec   : > { %9249 = vmatmul.mubr.bf16.vlgmr.msra.gmra.mrb[60].mxu0 %v6062_v41 }
 0x8ed   : > { %9301 = vmatpush3.bf16.msra.mxu0 %v10671_v37  ;;  %9252 = vmatprep.mubr.msk.bf16.mxu0 %vm10992_vm0, %v10991_v0 }
 0x8ee   : > { %9302 = vmatprep.subr.bf16.mxu0 %v10991_v0 }
 0x8f1   : > { %9303 = vmatpush3.bf16.msra.mxu0 %v10672_v39 }
 0x8f2   : > { %9304 = vmatprep.subr.bf16.mxu0 %v10991_v0 }
 0x8f4   : > { %9253 = vmatmul.mubr.bf16.gmra.mrb[64].mxu0 %v12801_v20 }
 0x8f5   : > { %9256 = vmatprep.mubr.msk.bf16.mxu0 %vm10992_vm0, %v10991_v0  ;;  %9305 = vmatpush3.bf16.msra.mxu0 %v10673_v47 }
 0x8f6   : > { %9306 = vmatprep.subr.bf16.mxu0 %v10991_v0 }
 0x8f9   : > { %9307 = vmatpush3.bf16.msra.mxu0 %v10674_v48 }
 0x8fa   : > { %9308 = vmatprep.subr.bf16.mxu0 %v10991_v0 }
 0x8fc   : > { %9257 = vmatmul.mubr.bf16.gmra.mrb[68].mxu0 %v12809_v36 }
 0x8fd   : > { %9260 = vmatprep.mubr.msk.bf16.mxu0 %vm10992_vm0, %v10991_v0  ;;  %9309 = vmatpush3.bf16.msra.mxu0 %v10675_v49 }
 0x8fe   : > { %9310 = vmatprep.subr.bf16.mxu0 %v10991_v0 }
 0x901   : > { %9311 = vmatpush3.bf16.msra.mxu0 %v10676_v21 }
 0x902   : > { %9312 = vmatprep.subr.bf16.mxu0 %v10991_v0 }
 0x904   : > { %9261 = vmatmul.mubr.bf16.gmra.mrb[72].mxu0 %v12817_v15 }
 0x905   : > { %9264 = vmatprep.mubr.msk.bf16.mxu0 %vm10992_vm0, %v10991_v0  ;;  %9313 = vmatpush3.bf16.msra.mxu0 %v10677_v12 }
 0x906   : > { %9314 = vmatprep.subr.bf16.mxu0 %v10991_v0 }
 0x909   : > { %9315 = vmatpush3.bf16.msra.mxu0 %v10678_v3 }
 0x90a   : > { %9368 = vmatprep.subr.bf16.mxu0 %v10991_v0 }
 0x90c   : > { %9265 = vmatmul.mubr.bf16.gmra.mrb[76].mxu0 %v12825_v46 }
 0x90d   : > { %9268 = vmatprep.mubr.msk.bf16.mxu0 %vm10992_vm0, %v10991_v0 }
 0x914   : > { %9269 = vmatmul.mubr.bf16.gmra.mrb[80].mxu0 %v12831_v56 }
 0x915   : > { %9272 = vmatprep.mubr.msk.bf16.mxu0 %vm10992_vm0, %v10991_v0 }
 0x91c   : > { %9273 = vmatmul.mubr.bf16.gmra.mrb[84].mxu0 %v12838_v58 }
 0x91d   : > { %9276 = vmatprep.mubr.msk.bf16.mxu0 %vm10992_vm0, %v10991_v0 }
 0x924   : > { %9277 = vmatmul.mubr.bf16.gmra.mrb[88].mxu0 %v12845_v63 }
 0x925   : > { %9280 = vmatprep.mubr.msk.bf16.mxu0 %vm10992_vm0, %v10991_v0 }
 0x92c   : > { %9281 = vmatmul.mubr.bf16.gmra.mrb[92].mxu0 %v12852_v4 }
 0x92d   : > { %9284 = vmatprep.mubr.msk.bf16.mxu0 %vm10992_vm0, %v10991_v0 }
 0x934   : > { %9285 = vmatmul.mubr.bf16.gmra.mrb[96].mxu0 %v12859_v28 }
 0x935   : > { %9288 = vmatprep.mubr.msk.bf16.mxu0 %vm10992_vm0, %v10991_v0 }
 0x93c   : > { %9289 = vmatmul.mubr.bf16.gmra.mrb[100].mxu0 %v12866_v5 }
 0x93d   : > { %9292 = vmatprep.mubr.msk.bf16.mxu0 %vm10992_vm0, %v10991_v0 }
 0x944   : > { %9293 = vmatmul.mubr.bf16.gmra.mrb[104].mxu0 %v12873_v7 }
 0x945   : > { %9296 = vmatprep.mubr.msk.bf16.mxu0 %vm10992_vm0, %v10991_v0 }
 0x94c   : > { %9297 = vmatmul.mubr.bf16.gmra.mrb[108].mxu0 %v6083_v42 }
 0x94d   : > { %9316 = vmatprep.mubr.msk.bf16.mxu0 %vm10992_vm0, %v10991_v0 }
 0x954   : > { %9317 = vmatmul.mubr.bf16.vlgmr.msra.gmra.mrb[60].mxu0 %v12801_v20 }
 0x955   : > { %9369 = vmatpush3.bf16.msra.mxu0 %v10679_v1  ;;  %9320 = vmatprep.mubr.msk.bf16.mxu0 %vm10992_vm0, %v10991_v0 }
 0x956   : > { %9370 = vmatprep.subr.bf16.mxu0 %v10991_v0 }
 0x959   : > { %9371 = vmatpush3.bf16.msra.mxu0 %v10680_v43 }
 0x95a   : > { %9372 = vmatprep.subr.bf16.mxu0 %v10991_v0 }
 0x95c   : > { %9321 = vmatmul.mubr.bf16.gmra.mrb[64].mxu0 %v12809_v36 }
 0x95d   : > { %9324 = vmatprep.mubr.msk.bf16.mxu0 %vm10992_vm0, %v10991_v0  ;;  %9373 = vmatpush3.bf16.msra.mxu0 %v10681_v11 }
 0x95e   : > { %9374 = vmatprep.subr.bf16.mxu0 %v10991_v0 }
 0x961   : > { %9375 = vmatpush3.bf16.msra.mxu0 %v10682_v25 }
 0x962   : > { %9376 = vmatprep.subr.bf16.mxu0 %v10991_v0 }
 0x964   : > { %9325 = vmatmul.mubr.bf16.gmra.mrb[68].mxu0 %v12817_v15 }
 0x965   : > { %9328 = vmatprep.mubr.msk.bf16.mxu0 %vm10992_vm0, %v10991_v0  ;;  %9377 = vmatpush3.bf16.msra.mxu0 %v10683_v62 }
 0x966   : > { %9378 = vmatprep.subr.bf16.mxu0 %v10991_v0 }
 0x969   : > { %9379 = vmatpush3.bf16.msra.mxu0 %v10684_v40 }
 0x96a   : > { %9380 = vmatprep.subr.bf16.mxu0 %v10991_v0 }
 0x96c   : > { %9329 = vmatmul.mubr.bf16.gmra.mrb[72].mxu0 %v12825_v46 }
 0x96d   : > { %9332 = vmatprep.mubr.msk.bf16.mxu0 %vm10992_vm0, %v10991_v0  ;;  %9381 = vmatpush3.bf16.msra.mxu0 %v10685_v10 }
 0x96e   : > { %9382 = vmatprep.subr.bf16.mxu0 %v10991_v0 }
 0x971   : > { %9383 = vmatpush3.bf16.msra.mxu0 %v10686_v14 }
 0x974   : > { %9333 = vmatmul.mubr.bf16.gmra.mrb[76].mxu0 %v12831_v56 }
 0x975   : > { %9336 = vmatprep.mubr.msk.bf16.mxu0 %vm10992_vm0, %v10991_v0 }
 0x97c   : > { %9337 = vmatmul.mubr.bf16.gmra.mrb[80].mxu0 %v12838_v58 }
 0x97d   : > { %9340 = vmatprep.mubr.msk.bf16.mxu0 %vm10992_vm0, %v10991_v0 }
 0x984   : > { %9341 = vmatmul.mubr.bf16.gmra.mrb[84].mxu0 %v12845_v63 }
 0x985   : > { %9344 = vmatprep.mubr.msk.bf16.mxu0 %vm10992_vm0, %v10991_v0 }
 0x98c   : > { %9345 = vmatmul.mubr.bf16.gmra.mrb[88].mxu0 %v12852_v4 }
 0x98d   : > { %9348 = vmatprep.mubr.msk.bf16.mxu0 %vm10992_vm0, %v10991_v0 }
 0x994   : > { %9349 = vmatmul.mubr.bf16.gmra.mrb[92].mxu0 %v12859_v28 }
 0x995   : > { %9352 = vmatprep.mubr.msk.bf16.mxu0 %vm10992_vm0, %v10991_v0 }
 0x99c   : > { %9353 = vmatmul.mubr.bf16.gmra.mrb[96].mxu0 %v12866_v5 }
 0x99d   : > { %9356 = vmatprep.mubr.msk.bf16.mxu0 %vm10992_vm0, %v10991_v0 }
 0x9a4   : > { %9357 = vmatmul.mubr.bf16.gmra.mrb[100].mxu0 %v12873_v7 }
 0x9a5   : > { %9360 = vmatprep.mubr.msk.bf16.mxu0 %vm10992_vm0, %v10991_v0 }
 0x9ac   : > { %9361 = vmatmul.mubr.bf16.gmra.mrb[104].mxu0 %v6328_v22 }
 0x9ad   : > { %9364 = vmatprep.mubr.msk.bf16.mxu0 %vm10992_vm0, %v10991_v0 }
 0x9b4   : > { %9365 = vmatmul.mubr.bf16.gmra.mrb[108].mxu0 %v6327_v19 }
 0x9b5   : > { %9384 = vmatprep.mubr.msk.bf16.mxu0 %vm10992_vm0, %v10991_v0 }
 0x9bc   : > { %9385 = vmatmul.mubr.bf16.vlgmr.msra.gmra.mrb[60].mxu0 %v12809_v36 }
 0x9bd   : > { %9388 = vmatprep.mubr.msk.bf16.mxu0 %vm10992_vm0, %v10991_v0 }
 0x9c4   : > { %9389 = vmatmul.mubr.bf16.gmra.mrb[64].mxu0 %v12817_v15 }
 0x9c5   : > { %9392 = vmatprep.mubr.msk.bf16.mxu0 %vm10992_vm0, %v10991_v0 }
 0x9cc   : > { %9393 = vmatmul.mubr.bf16.gmra.mrb[68].mxu0 %v12825_v46 }
 0x9cd   : > { %9396 = vmatprep.mubr.msk.bf16.mxu0 %vm10992_vm0, %v10991_v0 }
 0x9d4   : > { %9397 = vmatmul.mubr.bf16.gmra.mrb[72].mxu0 %v12831_v56 }
 0x9d5   : > { %9400 = vmatprep.mubr.msk.bf16.mxu0 %vm10992_vm0, %v10991_v0 }
 0x9dc   : > { %9401 = vmatmul.mubr.bf16.gmra.mrb[76].mxu0 %v12838_v58 }
 0x9dd   : > { %9404 = vmatprep.mubr.msk.bf16.mxu0 %vm10992_vm0, %v10991_v0 }
 0x9e4   : > { %9405 = vmatmul.mubr.bf16.gmra.mrb[80].mxu0 %v12845_v63 }
 0x9e5   : > { %9408 = vmatprep.mubr.msk.bf16.mxu0 %vm10992_vm0, %v10991_v0 }
 0x9ec   : > { %9409 = vmatmul.mubr.bf16.gmra.mrb[84].mxu0 %v12852_v4 }
 0x9ed   : > { %9412 = vmatprep.mubr.msk.bf16.mxu0 %vm10992_vm0, %v10991_v0 }
 0x9f4   : > { %9413 = vmatmul.mubr.bf16.gmra.mrb[88].mxu0 %v12859_v28 }
 0x9f5   : > { %9416 = vmatprep.mubr.msk.bf16.mxu0 %vm10992_vm0, %v10991_v0 }
 0x9fc   : > { %9417 = vmatmul.mubr.bf16.gmra.mrb[92].mxu0 %v12866_v5 }
 0x9fd   : > { %9420 = vmatprep.mubr.msk.bf16.mxu0 %vm10992_vm0, %v10991_v0 }
 0xa04   : > { %9421 = vmatmul.mubr.bf16.gmra.mrb[96].mxu0 %v12873_v7 }
 0xa05   : > { %9424 = vmatprep.mubr.msk.bf16.mxu0 %vm10992_vm0, %v10991_v0 }
 0xa0c   : > { %9425 = vmatmul.mubr.bf16.gmra.mrb[100].mxu0 %v6328_v22 }
 0xa0d   : > { %9428 = vmatprep.mubr.msk.bf16.mxu0 %vm10992_vm0, %v10991_v0 }
 0xa14   : > { %9429 = vmatmul.mubr.bf16.gmra.mrb[104].mxu0 %v6561_v2 }
 0xa15   : > { %9432 = vmatprep.mubr.msk.bf16.mxu0 %vm10992_vm0, %v10991_v0 }
 0xa1c   : > { %9433 = vmatmul.mubr.bf16.gmra.mrb[108].mxu0 %v6560_v29 }
 0xa8f   : > { %v6646_v35 = vpop.f32.mrb[60].mxu0 }
 0xa90   : > { %v6782_v24 = vmul.f32 %v12961_v17, %v6646_v35  ;;  %v9386_v6 = vpop.f32.mrb[61].mxu0 }
 0xa91   : > { %v6649_v13 = vpop.f32.mrb[62].mxu0 }
 0xa92   : > { %v6815_v26 = vadd.f32 %v12963_v61, %v6782_v24  ;;  %v6783_v23 = vmul.f32 %v12961_v17, %v6649_v13  ;;  %v9387_v60 = vpop.f32.mrb[63].mxu0 }
 0xa94   : > { %v6816_v27 = vadd.f32 %v12963_v61, %v6783_v23  ;;  %v6841_v8 = vmax.f32 %v6815_v26, 0.0 }
 0xa96   : > { %v6842_v0 = vmax.f32 %v6816_v27, 0.0 }
 0xa97   : > { %v6654_v32 = vpop.f32.mrb[64].mxu0 }
 0xa98   : > { %v7454_v34 = vpack.c.bf16 %v6842_v0, %v6841_v8  ;;  %v6784_v38 = vmul.f32 %v12961_v17, %v6654_v32  ;;  %v9390_v37 = vpop.f32.mrb[65].mxu0 }
 0xa99   : > { %v6657_v41 = vpop.f32.mrb[66].mxu0 }
 0xa9a   : > { %7455 = vst [vmem:[%s12973_s11] sm:$0xff] %v7454_v34   ;;  %v6817_v39 = vadd.f32 %v12963_v61, %v6784_v38  ;;  %v6785_v55 = vmul.f32 %v12961_v17, %v6657_v41  ;;  %v9391_v16 = vpop.f32.mrb[67].mxu0 }
 0xa9c   : > { %v6818_v47 = vadd.f32 %v12963_v61, %v6785_v55  ;;  %v6843_v20 = vmax.f32 %v6817_v39, 0.0 }
 0xa9e   : > { %v6844_v48 = vmax.f32 %v6818_v47, 0.0 }
 0xa9f   : > { %v6662_v18 = vpop.f32.mrb[68].mxu0 }
 0xaa0   : > { %v7459_v31 = vpack.c.bf16 %v6844_v48, %v6843_v20  ;;  %v6786_v49 = vmul.f32 %v12961_v17, %v6662_v18  ;;  %v9394_v36 = vpop.f32.mrb[69].mxu0 }
 0xaa1   : > { %v6665_v21 = vpop.f32.mrb[70].mxu0 }
 0xaa2   : > { %7511 = vst [vmem:[%s12973_s11 + $0x8] sm:$0xff] %v7459_v31   ;;  %v6819_v50 = vadd.f32 %v12963_v61, %v6786_v49  ;;  %v6787_v53 = vmul.f32 %v12961_v17, %v6665_v21  ;;  %v9395_v12 = vpop.f32.mrb[71].mxu0 }
 0xaa4   : > { %v6820_v15 = vadd.f32 %v12963_v61, %v6787_v53  ;;  %v6845_v3 = vmax.f32 %v6819_v50, 0.0 }
 0xaa6   : > { %v6846_v33 = vmax.f32 %v6820_v15, 0.0 }
 0xaa7   : > { %v6670_v44 = vpop.f32.mrb[72].mxu0 }
 0xaa8   : > { %v7464_v46 = vpack.c.bf16 %v6846_v33, %v6845_v3  ;;  %v6788_v52 = vmul.f32 %v12961_v17, %v6670_v44  ;;  %v9398_v51 = vpop.f32.mrb[73].mxu0 }
 0xaa9   : > { %v6673_v56 = vpop.f32.mrb[74].mxu0 }
 0xaaa   : > { %7512 = vst [vmem:[%s12973_s11 + $0x10] sm:$0xff] %v7464_v46   ;;  %v6821_v57 = vadd.f32 %v12963_v61, %v6788_v52  ;;  %v6789_v58 = vmul.f32 %v12961_v17, %v6673_v56  ;;  %v9399_v59 = vpop.f32.mrb[75].mxu0 }
 0xaac   : > { %v6822_v63 = vadd.f32 %v12963_v61, %v6789_v58  ;;  %v6847_v45 = vmax.f32 %v6821_v57, 0.0 }
 0xaae   : > { %v6848_v4 = vmax.f32 %v6822_v63, 0.0 }
 0xaaf   : > { %v6678_v54 = vpop.f32.mrb[76].mxu0 }
 0xab0   : > { %v7469_v28 = vpack.c.bf16 %v6848_v4, %v6847_v45  ;;  %v6790_v9 = vmul.f32 %v12961_v17, %v6678_v54  ;;  %v9402_v5 = vpop.f32.mrb[77].mxu0 }
 0xab1   : > { %v6681_v42 = vpop.f32.mrb[78].mxu0 }
 0xab2   : > { %7513 = vst [vmem:[%s12973_s11 + $0x18] sm:$0xff] %v7469_v28   ;;  %v6823_v7 = vadd.f32 %v12963_v61, %v6790_v9  ;;  %v6791_v1 = vmul.f32 %v12961_v17, %v6681_v42  ;;  %v9403_v43 = vpop.f32.mrb[79].mxu0 }
 0xab4   : > { %v6824_v11 = vadd.f32 %v12963_v61, %v6791_v1  ;;  %v6849_v25 = vmax.f32 %v6823_v7, 0.0 }
 0xab6   : > { %v6850_v62 = vmax.f32 %v6824_v11, 0.0 }
 0xab7   : > { %v6686_v40 = vpop.f32.mrb[80].mxu0 }
 0xab8   : > { %v7474_v10 = vpack.c.bf16 %v6850_v62, %v6849_v25  ;;  %v6792_v14 = vmul.f32 %v12961_v17, %v6686_v40  ;;  %v9406_v19 = vpop.f32.mrb[81].mxu0 }
 0xab9   : > { %v6689_v22 = vpop.f32.mrb[82].mxu0 }
 0xaba   : > { %7514 = vst [vmem:[%s12973_s11 + $0x20] sm:$0xff] %v7474_v10   ;;  %v6825_v30 = vadd.f32 %v12963_v61, %v6792_v14  ;;  %v6793_v29 = vmul.f32 %v12961_v17, %v6689_v22  ;;  %v9407_v2 = vpop.f32.mrb[83].mxu0 }
 0xabc   : > { %v6826_v35 = vadd.f32 %v12963_v61, %v6793_v29  ;;  %v6851_v24 = vmax.f32 %v6825_v30, 0.0 }
 0xabe   : > { %v6852_v6 = vmax.f32 %v6826_v35, 0.0 }
 0xabf   : > { %v6694_v13 = vpop.f32.mrb[84].mxu0 }
 0xac0   : > { %v7479_v26 = vpack.c.bf16 %v6852_v6, %v6851_v24  ;;  %v6794_v23 = vmul.f32 %v12961_v17, %v6694_v13  ;;  %v9410_v60 = vpop.f32.mrb[85].mxu0 }
 0xac1   : > { %v6697_v27 = vpop.f32.mrb[86].mxu0 }
 0xac2   : > { %7515 = vst [vmem:[%s12973_s11 + $0x28] sm:$0xff] %v7479_v26   ;;  %v6827_v8 = vadd.f32 %v12963_v61, %v6794_v23  ;;  %v6795_v0 = vmul.f32 %v12961_v17, %v6697_v27  ;;  %v9411_v32 = vpop.f32.mrb[87].mxu0 }
 0xac4   : > { %v6828_v34 = vadd.f32 %v12963_v61, %v6795_v0  ;;  %v6853_v38 = vmax.f32 %v6827_v8, 0.0 }
 0xac6   : > { %v6854_v37 = vmax.f32 %v6828_v34, 0.0 }
 0xac7   : > { %v6702_v41 = vpop.f32.mrb[88].mxu0 }
 0xac8   : > { %v7484_v39 = vpack.c.bf16 %v6854_v37, %v6853_v38  ;;  %v6796_v55 = vmul.f32 %v12961_v17, %v6702_v41  ;;  %v9414_v16 = vpop.f32.mrb[89].mxu0 }
 0xac9   : > { %v6705_v47 = vpop.f32.mrb[90].mxu0 }
 0xaca   : > { %7516 = vst [vmem:[%s12973_s11 + $0x30] sm:$0xff] %v7484_v39   ;;  %v6829_v20 = vadd.f32 %v12963_v61, %v6796_v55  ;;  %v6797_v48 = vmul.f32 %v12961_v17, %v6705_v47  ;;  %v9415_v18 = vpop.f32.mrb[91].mxu0 }
 0xacc   : > { %v6830_v31 = vadd.f32 %v12963_v61, %v6797_v48  ;;  %v6855_v49 = vmax.f32 %v6829_v20, 0.0 }
 0xace   : > { %v6856_v36 = vmax.f32 %v6830_v31, 0.0 }
 0xacf   : > { %v6710_v21 = vpop.f32.mrb[92].mxu0 }
 0xad0   : > { %v7489_v50 = vpack.c.bf16 %v6856_v36, %v6855_v49  ;;  %v6798_v53 = vmul.f32 %v12961_v17, %v6710_v21  ;;  %v9418_v12 = vpop.f32.mrb[93].mxu0 }
 0xad1   : > { %v6713_v15 = vpop.f32.mrb[94].mxu0 }
 0xad2   : > { %7517 = vst [vmem:[%s12973_s11 + $0x38] sm:$0xff] %v7489_v50   ;;  %v6831_v3 = vadd.f32 %v12963_v61, %v6798_v53  ;;  %v6799_v33 = vmul.f32 %v12961_v17, %v6713_v15  ;;  %v9419_v44 = vpop.f32.mrb[95].mxu0 }
 0xad4   : > { %v6832_v46 = vadd.f32 %v12963_v61, %v6799_v33  ;;  %v6857_v52 = vmax.f32 %v6831_v3, 0.0 }
 0xad6   : > { %v6858_v51 = vmax.f32 %v6832_v46, 0.0 }
 0xad7   : > { %v6718_v56 = vpop.f32.mrb[96].mxu0 }
 0xad8   : > { %v7494_v57 = vpack.c.bf16 %v6858_v51, %v6857_v52  ;;  %v6800_v58 = vmul.f32 %v12961_v17, %v6718_v56  ;;  %v9422_v59 = vpop.f32.mrb[97].mxu0 }
 0xad9   : > { %v6721_v63 = vpop.f32.mrb[98].mxu0 }
 0xada   : > { %7518 = vst [vmem:[%s12973_s11 + $0x40] sm:$0xff] %v7494_v57   ;;  %v6833_v45 = vadd.f32 %v12963_v61, %v6800_v58  ;;  %v6801_v4 = vmul.f32 %v12961_v17, %v6721_v63  ;;  %v9423_v54 = vpop.f32.mrb[99].mxu0 }
 0xadc   : > { %v6834_v28 = vadd.f32 %v12963_v61, %v6801_v4  ;;  %v6859_v9 = vmax.f32 %v6833_v45, 0.0 }
 0xade   : > { %v6860_v5 = vmax.f32 %v6834_v28, 0.0 }
 0xadf   : > { %v6726_v42 = vpop.f32.mrb[100].mxu0 }
 0xae0   : > { %v7499_v7 = vpack.c.bf16 %v6860_v5, %v6859_v9  ;;  %v6802_v1 = vmul.f32 %v12961_v17, %v6726_v42  ;;  %v9426_v43 = vpop.f32.mrb[101].mxu0 }
 0xae1   : > { %v6729_v11 = vpop.f32.mrb[102].mxu0 }
 0xae2   : > { %7519 = vst [vmem:[%s12973_s11 + $0x48] sm:$0xff] %v7499_v7   ;;  %v6835_v25 = vadd.f32 %v12963_v61, %v6802_v1  ;;  %v6803_v62 = vmul.f32 %v12961_v17, %v6729_v11  ;;  %v9427_v40 = vpop.f32.mrb[103].mxu0 }
 0xae4   : > { %v6836_v10 = vadd.f32 %v12963_v61, %v6803_v62  ;;  %v6861_v14 = vmax.f32 %v6835_v25, 0.0 }
 0xae6   : > { %v6862_v19 = vmax.f32 %v6836_v10, 0.0 }
 0xae7   : > { %v6734_v22 = vpop.f32.mrb[104].mxu0 }
 0xae8   : > { %v7504_v30 = vpack.c.bf16 %v6862_v19, %v6861_v14  ;;  %v6804_v29 = vmul.f32 %v12961_v17, %v6734_v22  ;;  %v9430_v2 = vpop.f32.mrb[105].mxu0 }
 0xae9   : > { %v6737_v35 = vpop.f32.mrb[106].mxu0 }
 0xaea   : > { %7520 = vst [vmem:[%s12973_s11 + $0x50] sm:$0xff] %v7504_v30   ;;  %v6837_v24 = vadd.f32 %v12963_v61, %v6804_v29  ;;  %v6805_v6 = vmul.f32 %v12961_v17, %v6737_v35  ;;  %v9431_v13 = vpop.f32.mrb[107].mxu0 }
 0xaec   : > { %v6838_v26 = vadd.f32 %v12963_v61, %v6805_v6  ;;  %v6863_v23 = vmax.f32 %v6837_v24, 0.0 }
 0xaee   : > { %v6864_v60 = vmax.f32 %v6838_v26, 0.0 }
 0xaef   : > { %v6742_v27 = vpop.f32.mrb[108].mxu0 }
 0xaf0   : > { %v7509_v8 = vpack.c.bf16 %v6864_v60, %v6863_v23  ;;  %v6806_v0 = vmul.f32 %v12961_v17, %v6742_v27  ;;  %v9434_v32 = vpop.f32.mrb[109].mxu0 }
 0xaf1   : > { %v6745_v34 = vpop.f32.mrb[110].mxu0 }
 0xaf2   : > { %7521 = vst [vmem:[%s12973_s11 + $0x58] sm:$0xff] %v7509_v8   ;;  %v6839_v38 = vadd.f32 %v12963_v61, %v6806_v0  ;;  %v6807_v37 = vmul.f32 %v12961_v17, %v6745_v34  ;;  %v9435_v41 = vpop.f32.mrb[111].mxu0 }
 0xaf4   : > { %v6865_v39 = vmax.f32 %v6839_v38, 0.0  ;;  %v6840_v55 = vadd.f32 %v12963_v61, %v6807_v37 }
 0xaf6   : > { %v7449_v16 = vpack.c.bf16 %v6865_v39, %v6865_v39  ;;  %v6866_v47 = vmax.f32 %v6840_v55, 0.0 }
 0xaf8   : > { %6995 = vst [vmem:[%s12973_s11 + $0x60] sm:$0xf] %v7449_v16  ;;  %v7450_v20 = vpack.c.bf16 %v6866_v47, %v6866_v47 }
 0xafa   : > { %6996 = vst [vmem:[%s12973_s11 + $0x64] sm:$0x7] %v7450_v20 }
 0xafb PF: > { %s25_s13 = sadd.s32 1, %s10978_s13  }
 0xafc   : > { %p22_p11 = scmp.ge.s32.totalorder %s25_s13, 4  }
 0xafe   :  { %24 = sbr.rel (!%p22_p11) target bundleno = 5 (0x5), region = 146 }
 0xb05   :  { %7018 = vsyncpa [#allocation5], 1 }
 0xb06   :  { %7020 = vsyncpa [#allocation5 + $0x1], 1 }
 0xb07   :  { %7021 = vsyncpa [#allocation7], 1 }
 0xb08   :  { %7022 = vsyncpa [#allocation10], 1 }
 0xb09   :  { %7023 = vsyncpa [#allocation13], 1 }
 0xb0a   :  { %7024 = vsyncpa [#allocation16], 1 }

</bundles_post_ra>
